<compile_context>
chip_gen: v5e
topology: v5e:2x2
jax: 0.10.0
libtpu: 0.0.40
codegen_flags: <defaults>
</compile_context>

<pallas_src>
import jax
import jax.numpy as jnp
from jax import lax
from jax.experimental import pallas as pl
from jax.experimental.pallas import tpu as pltpu


# ----------------------------------------------------------------------------
# Plain-JAX glue: knn + neighbor gathers (data-dependent, no clean Pallas win)
# ----------------------------------------------------------------------------

def knn_idx(pts, k):
    """pts: (B, n, 3) -> idx (B, n, k) of k nearest neighbors (self included)."""
    d2 = jnp.sum(pts * pts, axis=-1)                       # (B, n)
    inner = jnp.einsum("bid,bjd->bij", pts, pts)           # (B, n, n)
    neg_dist = 2.0 * inner - d2[:, :, None] - d2[:, None, :]
    _, idx = lax.top_k(neg_dist, k)                        # (B, n, k)
    return idx


def _gather_neighbors(feat, idx):
    """feat: (B, m, C), idx: (B, n, k) with values < n <= m -> (B, n, k, C)."""
    return jax.vmap(lambda f, i: f[i])(feat, idx)


def local_maxpool(feat, idx):
    return jnp.max(_gather_neighbors(feat, idx), axis=2)   # (B, n, C)


def local_cov(pts, idx):
    nbr = _gather_neighbors(pts, idx)                      # (B, n, k, 3)
    x0 = nbr[:, :, 0, :]
    x1 = nbr[:, :, 1, :]
    cov = (x0[..., :, None] * x1[..., None, :]).reshape(
        pts.shape[0], pts.shape[1], 9)
    return jnp.concatenate([pts, cov], axis=-1)            # (B, n, 12)


# ----------------------------------------------------------------------------
# Pallas kernels (all the matmul work of the encoder)
# ----------------------------------------------------------------------------

def _mlp1_kernel(x_ref, w1_ref, b1_ref, w2_ref, b2_ref, w3_ref, b3_ref, o_ref):
    """mlp1: Conv1d(12,64,1)+ReLU -> Conv1d(64,64,1)+ReLU -> Conv1d(64,64,1)+ReLU."""
    f32 = jnp.float32
    h = jnp.maximum(jnp.dot(x_ref[...], w1_ref[...], preferred_element_type=f32)
                    + b1_ref[...], 0.0)
    h = jnp.maximum(jnp.dot(h, w2_ref[...], preferred_element_type=f32)
                    + b2_ref[...], 0.0)
    o_ref[...] = jnp.maximum(jnp.dot(h, w3_ref[...], preferred_element_type=f32)
                             + b3_ref[...], 0.0)


def _graph1_kernel(x_ref, wl1_ref, bl1_ref, wc1_ref, bc1_ref, o_ref):
    """linear1(64,64) (no act) -> ReLU(conv1(64,128))."""
    f32 = jnp.float32
    h = jnp.dot(x_ref[...], wl1_ref[...], preferred_element_type=f32) + bl1_ref[...]
    o_ref[...] = jnp.maximum(
        jnp.dot(h, wc1_ref[...], preferred_element_type=f32) + bc1_ref[...], 0.0)


def _graph2_kernel(x_ref, wl2_ref, bl2_ref, wc2_ref, bc2_ref,
                   wm1_ref, bm1_ref, wm2_ref, bm2_ref,
                   o_ref, acc_ref):
    """linear2(128,128) -> conv2(128,1024) -> global max over points
       -> mlp2: ReLU(1024->512) -> 512.  Grid = (B, n_tiles).

    Input rows beyond the true point count are edge-replicated valid rows
    (done in the wrapper), so no validity mask is needed here.
    """
    f32 = jnp.float32
    t = pl.program_id(1)

    @pl.when(t == 0)
    def _():
        acc_ref[...] = jnp.full(acc_ref.shape, -jnp.inf, f32)

    x = x_ref[0]                                                    # (tile, 128)
    h = jnp.dot(x, wl2_ref[...], preferred_element_type=f32) + bl2_ref[...]
    z = jnp.dot(h, wc2_ref[...], preferred_element_type=f32) + bc2_ref[...]  # (tile, 1024)

    acc_ref[...] = jnp.maximum(acc_ref[...], jnp.max(z, axis=0, keepdims=True))

    @pl.when(t == pl.num_programs(1) - 1)
    def _():
        pooled = acc_ref[...]                                       # (8, 1024), rows identical
        g = jnp.maximum(jnp.dot(pooled, wm1_ref[...], preferred_element_type=f32)
                        + bm1_ref[...], 0.0)
        feat = jnp.dot(g, wm2_ref[...], preferred_element_type=f32) + bm2_ref[...]
        o_ref[...] = feat[None]                                     # (1, 8, 512)


# ----------------------------------------------------------------------------
# pallas_call wrappers
# ----------------------------------------------------------------------------

def _rowwise_call(kernel, x, weights, out_width, tile):
    """Run a per-point fused MLP kernel over (M, C) rows with row tiles of `tile`."""
    M, C = x.shape
    assert M % tile == 0
    return pl.pallas_call(
        kernel,
        out_shape=jax.ShapeDtypeStruct((M, out_width), jnp.float32),
        grid_spec=pltpu.PrefetchScalarGridSpec(
            num_scalar_prefetch=0,
            grid=(M // tile,),
            in_specs=[pl.BlockSpec((tile, C), lambda i: (i, 0))]
                     + [pl.BlockSpec(w.shape, lambda i: (0, 0)) for w in weights],
            out_specs=pl.BlockSpec((tile, out_width), lambda i: (i, 0)),
        ),
        compiler_params=pltpu.CompilerParams(
            dimension_semantics=("parallel",)),
    )(x, *weights)


def foldnet_encoder_forward(pts, params, *, k, num_features, tile=512):
    """pts: (B, n, 3) f32 -> features (B, num_features) f32."""
    B, n, _ = pts.shape
    assert tile % 8 == 0
    pts = pts.astype(jnp.float32)
    p = params

    idx = knn_idx(pts, k)
    cov = local_cov(pts, idx)                                       # (B, n, 12)

    n_pad = pl.cdiv(n, tile) * tile

    def pad_points(a, mode="constant"):
        return jnp.pad(a, ((0, 0), (0, n_pad - n), (0, 0)), mode=mode)

    # ---- mlp1 (fused 3x (1x1 conv + ReLU)) ----  (padded rows sliced off by gathers)
    f1 = _rowwise_call(
        _mlp1_kernel,
        pad_points(cov).reshape(B * n_pad, 12),
        (p["w11"], p["b11"], p["w12"], p["b12"], p["w13"], p["b13"]),
        64, tile).reshape(B, n_pad, 64)

    # ---- graph layer, first half ----
    g1 = local_maxpool(f1, idx)                                     # (B, n, 64); idx < n
    f2 = _rowwise_call(
        _graph1_kernel,
        pad_points(g1).reshape(B * n_pad, 64),
        (p["w_l1"], p["b_l1"], p["w_c1"], p["b_c1"]),
        128, tile).reshape(B, n_pad, 128)

    # ---- graph layer second half + global max-pool + mlp2, all fused ----
    # Edge-replicate padding: duplicated valid rows cannot change the global max,
    # so the kernel needs no per-step validity mask.
    g2 = pad_points(local_maxpool(f2, idx), mode="edge")            # (B, n_pad, 128)
    weights3 = (p["w_l2"], p["b_l2"], p["w_c2"], p["b_c2"],
                p["w_m1"], p["b_m1"], p["w_m2"], p["b_m2"])
    feat8 = pl.pallas_call(
        _graph2_kernel,
        out_shape=jax.ShapeDtypeStruct((B, 8, 512), jnp.float32),
        grid_spec=pltpu.PrefetchScalarGridSpec(
            num_scalar_prefetch=0,
            grid=(B, n_pad // tile),
            in_specs=[pl.BlockSpec((1, tile, 128), lambda b, t: (b, t, 0))]
                     + [pl.BlockSpec(w.shape, lambda b, t: (0, 0)) for w in weights3],
            out_specs=pl.BlockSpec((1, 8, 512), lambda b, t: (b, 0, 0)),
            scratch_shapes=[pltpu.VMEM((8, 1024), jnp.float32)],
        ),
        compiler_params=pltpu.CompilerParams(
            dimension_semantics=("parallel", "arbitrary")),
    )(g2, *weights3)

    features = feat8[:, 0, :]                                       # (B, 512)
    if num_features != 512:
        # TODO(synk): `self.flatten` is undefined in the source module; implemented as
        # reshape (B,1,512)->(B,512) followed by the bias-free embedding Linear.
        features = features @ p["w_emb"]
    return features


# ----------------------------------------------------------------------------
# Parameter init (nn.Linear / Conv1d(kernel=1) default: uniform +-1/sqrt(fan_in))
# ----------------------------------------------------------------------------

def init_params(key, num_features):
    def linear(kk, fan_in, fan_out, bias=True):
        kw, kb = jax.random.split(kk)
        bound = 1.0 / jnp.sqrt(float(fan_in))
        w = jax.random.uniform(kw, (fan_in, fan_out), jnp.float32, -bound, bound)
        if not bias:
            return w
        b = jax.random.uniform(kb, (1, fan_out), jnp.float32, -bound, bound)
        return w, b

    ks = jax.random.split(key, 10)
    p = {}
    p["w11"], p["b11"] = linear(ks[0], 12, 64)       # mlp1[0]
    p["w12"], p["b12"] = linear(ks[1], 64, 64)       # mlp1[2]
    p["w13"], p["b13"] = linear(ks[2], 64, 64)       # mlp1[4]
    p["w_l1"], p["b_l1"] = linear(ks[3], 64, 64)     # linear1
    p["w_c1"], p["b_c1"] = linear(ks[4], 64, 128)    # conv1
    p["w_l2"], p["b_l2"] = linear(ks[5], 128, 128)   # linear2
    p["w_c2"], p["b_c2"] = linear(ks[6], 128, 1024)  # conv2
    p["w_m1"], p["b_m1"] = linear(ks[7], 1024, 512)  # mlp2[0]
    p["w_m2"], p["b_m2"] = linear(ks[8], 512, 512)   # mlp2[2]
    if num_features != 512:
        p["w_emb"] = linear(ks[9], 512, num_features, bias=False)   # embedding
    return p


# ----------------------------------------------------------------------------
# Pure-JAX reference (mirrors the PyTorch forward)
# ----------------------------------------------------------------------------

def reference_forward(pts, params, *, k, num_features):
    p = params
    pts = pts.astype(jnp.float32)
    idx = knn_idx(pts, k)
    x = local_cov(pts, idx)                                # (B, n, 12)
    x = jax.nn.relu(x @ p["w11"] + p["b11"])
    x = jax.nn.relu(x @ p["w12"] + p["b12"])
    x = jax.nn.relu(x @ p["w13"] + p["b13"])
    x = local_maxpool(x, idx)
    x = x @ p["w_l1"] + p["b_l1"]
    x = jax.nn.relu(x @ p["w_c1"] + p["b_c1"])
    x = local_maxpool(x, idx)
    x = x @ p["w_l2"] + p["b_l2"]
    x = x @ p["w_c2"] + p["b_c2"]                          # (B, n, 1024)
    x = jnp.max(x, axis=1)                                 # (B, 1024)  global max pool
    x = jax.nn.relu(x @ p["w_m1"] + p["b_m1"])
    feat = x @ p["w_m2"] + p["b_m2"]                       # (B, 512)
    if num_features != 512:
        feat = feat @ p["w_emb"]
    return feat


if __name__ == "__main__":
    jax.config.update("jax_default_matmul_precision", "float32")

    key = jax.random.PRNGKey(0)
    kp, kx = jax.random.split(key)

    # small shapes (module default is n=2048, k=16); n=400 exercises the padding path
    B, n, k, num_features = 2, 400, 16, 512
    pts = jax.random.normal(kx, (B, n, 3), jnp.float32)

    params = init_params(kp, num_features)

    out = foldnet_encoder_forward(pts, params, k=k, num_features=num_features, tile=512)
    out = jax.block_until_ready(out)
    assert out.shape == (B, 512), out.shape

    ref = jax.block_until_ready(
        reference_forward(pts, params, k=k, num_features=num_features))
    max_err = float(jnp.max(jnp.abs(out - ref)))
    assert jnp.allclose(out, ref, rtol=5e-4, atol=5e-4), max_err

    print("KERNEL_OK")
</pallas_src>

<mosaic_0001>
module attributes {stable_mosaic.version = 11 : i64} {
  func.func @_mlp1_kernel(%arg0: i32, %arg1: memref<512x12xf32, #tpu.memory_space<vmem>>, %arg2: memref<12x64xf32, #tpu.memory_space<vmem>>, %arg3: memref<1x64xf32, #tpu.memory_space<vmem>>, %arg4: memref<64x64xf32, #tpu.memory_space<vmem>>, %arg5: memref<1x64xf32, #tpu.memory_space<vmem>>, %arg6: memref<64x64xf32, #tpu.memory_space<vmem>>, %arg7: memref<1x64xf32, #tpu.memory_space<vmem>>, %arg8: memref<512x64xf32, #tpu.memory_space<vmem>>) attributes {dimension_semantics = [#tpu.dimension_semantics<parallel>], iteration_bounds = array<i64: 2>, scalar_prefetch = 0 : i64, scratch_operands = 0 : i64, tpu.core_type = #tpu.core_type<tc>, window_params = [{transform_indices = @transform_0, window_bounds = array<i64: 512, 12>}, {pipeline_mode = #tpu.pipeline_mode<synchronous>, transform_indices = @transform_1, window_bounds = array<i64: 12, 64>}, {pipeline_mode = #tpu.pipeline_mode<synchronous>, transform_indices = @transform_2, window_bounds = array<i64: 1, 64>}, {pipeline_mode = #tpu.pipeline_mode<synchronous>, transform_indices = @transform_3, window_bounds = array<i64: 64, 64>}, {pipeline_mode = #tpu.pipeline_mode<synchronous>, transform_indices = @transform_4, window_bounds = array<i64: 1, 64>}, {pipeline_mode = #tpu.pipeline_mode<synchronous>, transform_indices = @transform_5, window_bounds = array<i64: 64, 64>}, {pipeline_mode = #tpu.pipeline_mode<synchronous>, transform_indices = @transform_6, window_bounds = array<i64: 1, 64>}, {transform_indices = @transform_7, window_bounds = array<i64: 512, 64>}]} {
    %c0 = arith.constant 0 : index
    %c0_0 = arith.constant 0 : index
    %0 = vector.load %arg1[%c0, %c0_0] : memref<512x12xf32, #tpu.memory_space<vmem>>, vector<512x12xf32>
    %c0_1 = arith.constant 0 : index
    %c0_2 = arith.constant 0 : index
    %1 = vector.load %arg2[%c0_1, %c0_2] : memref<12x64xf32, #tpu.memory_space<vmem>>, vector<12x64xf32>
    %cst = arith.constant dense<0.000000e+00> : vector<512x64xf32>
    %2 = tpu.matmul %0, %1, %cst {dimension_numbers = #tpu.dot_dimension_numbers<[1], [0], [0], [1], [0, 0, 1, 1], [], []>, precision = #tpu.contract_precision<fp32>} : vector<512x12xf32>, vector<12x64xf32>, vector<512x64xf32> -> vector<512x64xf32>
    %c0_3 = arith.constant 0 : index
    %c0_4 = arith.constant 0 : index
    %3 = vector.load %arg3[%c0_3, %c0_4] : memref<1x64xf32, #tpu.memory_space<vmem>>, vector<1x64xf32>
    %4 = vector.broadcast %3 : vector<1x64xf32> to vector<512x64xf32>
    %5 = arith.addf %2, %4 : vector<512x64xf32>
    %cst_5 = arith.constant 0.000000e+00 : f32
    %6 = vector.broadcast %cst_5 : f32 to vector<512x64xf32>
    %7 = arith.maximumf %5, %6 : vector<512x64xf32>
    %c0_6 = arith.constant 0 : index
    %c0_7 = arith.constant 0 : index
    %8 = vector.load %arg4[%c0_6, %c0_7] : memref<64x64xf32, #tpu.memory_space<vmem>>, vector<64x64xf32>
    %cst_8 = arith.constant dense<0.000000e+00> : vector<512x64xf32>
    %9 = tpu.matmul %7, %8, %cst_8 {dimension_numbers = #tpu.dot_dimension_numbers<[1], [0], [0], [1], [0, 0, 1, 1], [], []>, precision = #tpu.contract_precision<fp32>} : vector<512x64xf32>, vector<64x64xf32>, vector<512x64xf32> -> vector<512x64xf32>
    %c0_9 = arith.constant 0 : index
    %c0_10 = arith.constant 0 : index
    %10 = vector.load %arg5[%c0_9, %c0_10] : memref<1x64xf32, #tpu.memory_space<vmem>>, vector<1x64xf32>
    %11 = vector.broadcast %10 : vector<1x64xf32> to vector<512x64xf32>
    %12 = arith.addf %9, %11 : vector<512x64xf32>
    %cst_11 = arith.constant 0.000000e+00 : f32
    %13 = vector.broadcast %cst_11 : f32 to vector<512x64xf32>
    %14 = arith.maximumf %12, %13 : vector<512x64xf32>
    %c0_12 = arith.constant 0 : index
    %c0_13 = arith.constant 0 : index
    %15 = vector.load %arg6[%c0_12, %c0_13] : memref<64x64xf32, #tpu.memory_space<vmem>>, vector<64x64xf32>
    %cst_14 = arith.constant dense<0.000000e+00> : vector<512x64xf32>
    %16 = tpu.matmul %14, %15, %cst_14 {dimension_numbers = #tpu.dot_dimension_numbers<[1], [0], [0], [1], [0, 0, 1, 1], [], []>, precision = #tpu.contract_precision<fp32>} : vector<512x64xf32>, vector<64x64xf32>, vector<512x64xf32> -> vector<512x64xf32>
    %c0_15 = arith.constant 0 : index
    %c0_16 = arith.constant 0 : index
    %17 = vector.load %arg7[%c0_15, %c0_16] : memref<1x64xf32, #tpu.memory_space<vmem>>, vector<1x64xf32>
    %18 = vector.broadcast %17 : vector<1x64xf32> to vector<512x64xf32>
    %19 = arith.addf %16, %18 : vector<512x64xf32>
    %cst_17 = arith.constant 0.000000e+00 : f32
    %20 = vector.broadcast %cst_17 : f32 to vector<512x64xf32>
    %21 = arith.maximumf %19, %20 : vector<512x64xf32>
    %c0_18 = arith.constant 0 : index
    %c0_19 = arith.constant 0 : index
    %22 = vector.load %arg8[%c0_18, %c0_19] : memref<512x64xf32, #tpu.memory_space<vmem>>, vector<512x64xf32>
    tpu.vector_store %arg8[%c0_18, %c0_19], %21 {strides = array<i32>} : memref<512x64xf32, #tpu.memory_space<vmem>>, vector<512x64xf32>,
    return
  }
  func.func @transform_0(%arg0: i32) -> (i32, i32) {
    %c0_i32 = arith.constant 0 : i32
    %c0_i32_0 = arith.constant 0 : i32
    return %arg0, %c0_i32 : i32, i32
  }
  func.func @transform_1(%arg0: i32) -> (i32, i32) {
    %c0_i32 = arith.constant 0 : i32
    %c0_i32_0 = arith.constant 0 : i32
    %c0_i32_1 = arith.constant 0 : i32
    return %c0_i32, %c0_i32_0 : i32, i32
  }
  func.func @transform_2(%arg0: i32) -> (i32, i32) {
    %c0_i32 = arith.constant 0 : i32
    %c0_i32_0 = arith.constant 0 : i32
    %c0_i32_1 = arith.constant 0 : i32
    return %c0_i32, %c0_i32_0 : i32, i32
  }
  func.func @transform_3(%arg0: i32) -> (i32, i32) {
    %c0_i32 = arith.constant 0 : i32
    %c0_i32_0 = arith.constant 0 : i32
    %c0_i32_1 = arith.constant 0 : i32
    return %c0_i32, %c0_i32_0 : i32, i32
  }
  func.func @transform_4(%arg0: i32) -> (i32, i32) {
    %c0_i32 = arith.constant 0 : i32
    %c0_i32_0 = arith.constant 0 : i32
    %c0_i32_1 = arith.constant 0 : i32
    return %c0_i32, %c0_i32_0 : i32, i32
  }
  func.func @transform_5(%arg0: i32) -> (i32, i32) {
    %c0_i32 = arith.constant 0 : i32
    %c0_i32_0 = arith.constant 0 : i32
    %c0_i32_1 = arith.constant 0 : i32
    return %c0_i32, %c0_i32_0 : i32, i32
  }
  func.func @transform_6(%arg0: i32) -> (i32, i32) {
    %c0_i32 = arith.constant 0 : i32
    %c0_i32_0 = arith.constant 0 : i32
    %c0_i32_1 = arith.constant 0 : i32
    return %c0_i32, %c0_i32_0 : i32, i32
  }
  func.func @transform_7(%arg0: i32) -> (i32, i32) {
    %c0_i32 = arith.constant 0 : i32
    %c0_i32_0 = arith.constant 0 : i32
    return %arg0, %c0_i32 : i32, i32
  }
}

</mosaic_0001>

<bundles_post_ra>
// kernel: tpu_custom_call.1
= control target key start
LH: loop header
LB: loop body
LE: loop exit
PB: predicated region body
PF: predicated region fallthrough
CT: control target
= control target key end

     0   :  { %s7840_s24 = smov 0   ;;  %s12403_s0 = inlined_call_operand.vmem [shape: f32[1024,12], index: 0, kind: input, shape index: {}]   ;;  %s12404_s1 = inlined_call_operand.vmem [shape: f32[12,64], index: 1, kind: input, shape index: {}]   ;;  %s12405_s2 = inlined_call_operand.vmem [shape: f32[1,64], index: 2, kind: input, shape index: {}]   ;;  %s12406_s3 = inlined_call_operand.vmem [shape: f32[64,64], index: 3, kind: input, shape index: {}]   ;;  %s12407_s4 = inlined_call_operand.vmem [shape: f32[1,64], index: 4, kind: input, shape index: {}]   ;;  %s12408_s5 = inlined_call_operand.vmem [shape: f32[64,64], index: 5, kind: input, shape index: {}]   ;;  %s12409_s6 = inlined_call_operand.vmem [shape: f32[1,64], index: 6, kind: input, shape index: {}]   ;;  %s12410_s7 = inlined_call_operand.vmem [shape: f32[1024,64], index: 7, kind: output, shape index: {}]  }
   0x1 LB: > { %s7762_s25 = sadd.s32 4294967295, %s7798_s24   ;;  %p7766_p0 = scmp.ge.s32.totalorder %s7798_s24, 1  ;;  %s7798_s24 = sphi %s7840_s24, %s17_s24  }
   0x2   : > { %p238_p1 = scmp.lt.s32.totalorder %s7798_s24, 3 }
   0x4   : > { %p239_p2 = pnand %p7766_p0, %p238_p1 }
   0x6   : > { %242 = sbr.rel (%p239_p2) target bundleno = 2608 (0xa30), region = 48 }
   0xb   : > { %v347_v0 = vld [vmem:[%s12404_s1 + $0x8] sm:$0xf]  ;;  %vm545_vm0 = vcmask 1043456   ;;  %v346_v1 = vld [vmem:[%s12404_s1] sm:$0xff]  ;;  %s7767_s30 = sshll.u32 %s7762_s25, 6  ;;  %vm352_vm1 = vcmask 97280  }
   0xc   : > { %v547_v2 = vsel %vm545_vm0, %v347_v0, 0  ;;  %v7854_v3 = vand.u32 4294901760, %v346_v1  ;;  %p271_p3 = scmp.lt.s32.totalorder %s7767_s30, 127  ;;  %vm2737_vm2 = vcmask 523264  }
   0xd   : > { %v563_v4 = vand.u32 4294901760, %v547_v2 }
   0xe   : > { %v1101_v5 = vsub.f32 %v346_v1, %v7854_v3  ;;  %s14173_s30 = smov (!%p271_p3, %s7767_s30), 127 }
   0xf   : > { %v1095_v6 = vsub.f32 %v547_v2, %v563_v4  ;;  %564 = vmatpush.msra.mxu0 %v563_v4  ;;  %7773 = vmatpush.msra.mxu2 %v563_v4  ;;  %s7768_s8 = sshll.u32 %s14173_s30, 3 }
  0x10   : > { %v1102_v7 = vand.u32 4294901760, %v1101_v5  ;;  %s7865_s11 = scalar_lea.vmem %s12403_s0, %s7768_s8  ;;  %s11835_s18 = scalar_lea.vmem %s12410_s7, %s7768_s8 }
  0x11   : > { %v1096_v8 = vand.u32 4294901760, %v1095_v6  ;;  %566 = vmatpush.msra.mxu0 %v7854_v3  ;;  %7774 = vmatpush.msra.mxu2 %v7854_v3  ;;  %v282_v10 = vld [vmem:[%s7865_s11] sm:$0xff]  ;;  %v283_v12 = vld [vmem:[%s7865_s11 + $0x8] sm:$0xff]  ;;  %v284_v18 = vld [vmem:[%s7865_s11 + $0x10] sm:$0xff] }
  0x12   : > { %v1103_v9 = vsub.f32 %v1101_v5, %v1102_v7  ;;  %v314_v11 = vld [vmem:[%s7865_s11 + $0x100] sm:$0xff]  ;;  %v354_v14 = vsel %vm352_vm1, %v282_v10, 0  ;;  %v357_v16 = vsel %vm352_vm1, %v283_v12, 0  ;;  %v315_v17 = vld [vmem:[%s7865_s11 + $0x108] sm:$0xff]  ;;  %v316_v19 = vld [vmem:[%s7865_s11 + $0x110] sm:$0xff]  ;;  %v360_v26 = vsel %vm352_vm1, %v284_v18, 0 }
  0x13   : > { %1379 = vmatpush.msrb.mxu2 %v1095_v6  ;;  %v1097_v13 = vsub.f32 %v1095_v6, %v1096_v8  ;;  %v450_v15 = vsel %vm352_vm1, %v314_v11, 0  ;;  %2124 = vmatpush.msrb.mxu0 %v1096_v8  ;;  %v7878_v21 = vand.u32 4294901760, %v354_v14  ;;  %v7882_v23 = vand.u32 4294901760, %v357_v16  ;;  %v285_v41 = vld [vmem:[%s7865_s11 + $0x18] sm:$0xff]  ;;  %v286_v57 = vld [vmem:[%s7865_s11 + $0x20] sm:$0xff]  ;;  %v319_v8 = vld [vmem:[%s7865_s11 + $0x128] sm:$0xff] }
  0x14   : > { %v1104_v20 = vand.u32 4294901760, %v1103_v9  ;;  %v7880_v22 = vand.u32 4294901760, %v450_v15  ;;  %v453_v25 = vsel %vm352_vm1, %v315_v17, 0  ;;  %v456_v27 = vsel %vm352_vm1, %v316_v19, 0  ;;  %v317_v42 = vld [vmem:[%s7865_s11 + $0x118] sm:$0xff]  ;;  %v318_v58 = vld [vmem:[%s7865_s11 + $0x120] sm:$0xff] }
  0x15   : > { %1382 = vmatpush.msrb.mxu2 %v1101_v5  ;;  %v1098_v24 = vand.u32 4294901760, %v1097_v13  ;;  %2128 = vmatpush.msrb.mxu0 %v1102_v7  ;;  %v7888_v28 = vsub.f32 %v354_v14, %v7878_v21  ;;  %v7893_v30 = vand.u32 4294901760, %v453_v25  ;;  %v7896_v31 = vsub.f32 %v357_v16, %v7882_v23  ;;  %v287_v7 = vld [vmem:[%s7865_s11 + $0x28] sm:$0xff] }
  0x16   : > { %13026 = vst [vmem:[#allocation2_spill] sm:$0xff] %v7880_v22  ;;  %v7891_v29 = vsub.f32 %v450_v15, %v7880_v22  ;;  %v7903_v35 = vand.u32 4294901760, %v360_v26  ;;  %v7905_v36 = vand.u32 4294901760, %v456_v27  ;;  %v363_v46 = vsel %vm352_vm1, %v285_v41, 0 }
  0x17   : > { %13028 = vst [vmem:[#allocation4_spill] sm:$0xff] %v7893_v30  ;;  %1099 = vmatpush.msra.mxu1 %v1098_v24  ;;  %7775 = vmatpush.msra.mxu3 %v1098_v24  ;;  %v12432_v32 = vand.u32 4294901760, %v7888_v28  ;;  %v7901_v34 = vsub.f32 %v453_v25, %v7893_v30  ;;  %v12431_v39 = vand.u32 4294901760, %v7896_v31  ;;  %v459_v50 = vsel %vm352_vm1, %v317_v42, 0  ;;  %v288_v24 = vld [vmem:[%s7865_s11 + $0x30] sm:$0xff] }
  0x18   : > { %13027 = vst [vmem:[#allocation3_spill] sm:$0xff] %v7891_v29  ;;  %v12419_v33 = vand.u32 4294901760, %v7891_v29  ;;  %v7920_v45 = vsub.f32 %v360_v26, %v7903_v35  ;;  %v7932_v49 = vsub.f32 %v456_v27, %v7905_v36  ;;  %v7935_v51 = vand.u32 4294901760, %v363_v46  ;;  %v320_v25 = vld [vmem:[%s7865_s11 + $0x130] sm:$0xff] }
  0x19   : > { %13029 = vst [vmem:[#allocation5_spill] sm:$0xff] %v7901_v34  ;;  %1105 = vmatpush.msra.mxu1 %v1104_v20  ;;  %7776 = vmatpush.msra.mxu3 %v1104_v20  ;;  %v570_v37 = vsub.f32 %v7888_v28, %v12432_v32  ;;  %v12418_v40 = vand.u32 4294901760, %v7901_v34  ;;  %v578_v47 = vsub.f32 %v7896_v31, %v12431_v39  ;;  %v7937_v52 = vand.u32 4294901760, %v459_v50 }
  0x1a   : > { %13030 = vst [vmem:[#allocation6_spill] sm:$0xff] %v7905_v36  ;;  %1107 = vmatmul.f32.vlgmr.msra.gmra.mxu1 %v7878_v21  ;;  %1235 = vmatmul.f32.vlgmr.msra.gmra.mxu3 %v7880_v22  ;;  %v826_v38 = vsub.f32 %v7891_v29, %v12419_v33  ;;  %v12430_v55 = vand.u32 4294901760, %v7920_v45  ;;  %v12416_v56 = vand.u32 4294901760, %v7932_v49  ;;  %v7946_v59 = vsub.f32 %v363_v46, %v7935_v51 }
  0x1b   : > { %1719 = vmatpush.msrb.mxu3 %v563_v4  ;;  %2401 = vmatpush.msrb.mxu1 %v563_v4  ;;  %v571_v43 = vand.u32 4294901760, %v570_v37  ;;  %v834_v48 = vsub.f32 %v7901_v34, %v12418_v40  ;;  %13031 = vst [vmem:[#allocation7_spill] sm:$0xff] %v7932_v49  ;;  %v579_v53 = vand.u32 4294901760, %v578_v47  ;;  %v7949_v60 = vsub.f32 %v459_v50, %v7937_v52  ;;  %v325_v40 = vld [vmem:[%s7865_s11 + $0x158] sm:$0xff] }
  0x1c   : > { %v827_v44 = vand.u32 4294901760, %v826_v38  ;;  %13032 = vst [vmem:[#allocation8_spill] sm:$0xff] %v7937_v52  ;;  %v586_v61 = vsub.f32 %v7920_v45, %v12430_v55  ;;  %v842_v62 = vsub.f32 %v7932_v49, %v12416_v56  ;;  %v366_v63 = vsel %vm352_vm1, %v286_v57, 0  ;;  %v327_v55 = vld [vmem:[%s7865_s11 + $0x168] sm:$0xff] }
  0x1d   : > { %1721 = vmatpush.msrb.mxu3 %v7854_v3  ;;  %2403 = vmatpush.msrb.mxu1 %v7854_v3  ;;  %v835_v54 = vand.u32 4294901760, %v834_v48  ;;  %13033 = vst [vmem:[#allocation9_spill] sm:$0xff] %v7949_v60  ;;  %v462_v0 = vsel %vm352_vm1, %v318_v58, 0  ;;  %v12428_v1 = vand.u32 4294901760, %v7946_v59  ;;  %v12415_v2 = vand.u32 4294901760, %v7949_v60 }
  0x1e   : > { %572 = vmatmul.f32.vlgmr.msra.gmra.mxu0 %v571_v43  ;;  %828 = vmatmul.f32.vlgmr.msra.gmra.mxu2 %v827_v44  ;;  %v587_v3 = vand.u32 4294901760, %v586_v61  ;;  %v843_v4 = vand.u32 4294901760, %v842_v62  ;;  %v7963_v5 = vand.u32 4294901760, %v366_v63  ;;  %v7965_v6 = vand.u32 4294901760, %v462_v0 }
  0x1f   : > { %v594_v9 = vsub.f32 %v7946_v59, %v12428_v1  ;;  %v850_v10 = vsub.f32 %v7949_v60, %v12415_v2  ;;  %v369_v13 = vsel %vm352_vm1, %v287_v7, 0  ;;  %v465_v14 = vsel %vm352_vm1, %v319_v8, 0 }
  0x20   : > { %13034 = vst [vmem:[#allocation10_spill] sm:$0xff] %v7965_v6  ;;  %v7976_v11 = vsub.f32 %v366_v63, %v7963_v5  ;;  %v7979_v12 = vsub.f32 %v462_v0, %v7965_v6  ;;  %v7983_v16 = vand.u32 4294901760, %v369_v13  ;;  %v7989_v20 = vand.u32 4294901760, %v465_v14 }
  0x21   : > { %v595_v15 = vand.u32 4294901760, %v594_v9  ;;  %v851_v17 = vand.u32 4294901760, %v850_v10  ;;  %v372_v41 = vsel %vm352_vm1, %v288_v24, 0  ;;  %v468_v42 = vsel %vm352_vm1, %v320_v25, 0 }
  0x22   : > { %1111 = vmatmul.f32.gmra.mxu1 %v7882_v23  ;;  %1239 = vmatmul.f32.gmra.mxu3 %v7893_v30  ;;  %13035 = vst [vmem:[#allocation11_spill] sm:$0xff] %v7979_v12  ;;  %v12426_v18 = vand.u32 4294901760, %v7976_v11  ;;  %v12414_v19 = vand.u32 4294901760, %v7979_v12  ;;  %v7994_v26 = vsub.f32 %v369_v13, %v7983_v16  ;;  %v8003_v38 = vsub.f32 %v465_v14, %v7989_v20  ;;  %v290_v13 = vld [vmem:[%s7865_s11 + $0x40] sm:$0xff] }
  0x23   : > { %13036 = vst [vmem:[#allocation12_spill] sm:$0xff] %v7989_v20  ;;  %v8008_v44 = vand.u32 4294901760, %v372_v41  ;;  %v8013_v50 = vand.u32 4294901760, %v468_v42  ;;  %v322_v14 = vld [vmem:[%s7865_s11 + $0x140] sm:$0xff]  ;;  %v489_v32 = vsel %vm352_vm1, %v327_v55, 0 }
  0x24   : > { %v602_v27 = vsub.f32 %v7976_v11, %v12426_v18  ;;  %v858_v37 = vsub.f32 %v7979_v12, %v12414_v19  ;;  %13037 = vst [vmem:[#allocation13_spill] sm:$0xff] %v8003_v38  ;;  %v12425_v43 = vand.u32 4294901760, %v7994_v26  ;;  %v12413_v48 = vand.u32 4294901760, %v8003_v38  ;;  %v334_v30 = vld [vmem:[%s7865_s11 + $0x1a0] sm:$0xff] }
  0x25   : > { %13038 = vst [vmem:[#allocation14_spill] sm:$0xff] %v8013_v50  ;;  %v8021_v58 = vsub.f32 %v372_v41, %v8008_v44  ;;  %v8027_v62 = vsub.f32 %v468_v42, %v8013_v50 }
  0x26   : > { %580 = vmatmul.f32.gmra.mxu0 %v579_v53  ;;  %836 = vmatmul.f32.gmra.mxu2 %v835_v54  ;;  %v603_v46 = vand.u32 4294901760, %v602_v27  ;;  %v859_v47 = vand.u32 4294901760, %v858_v37  ;;  %v289_v53 = vld [vmem:[%s7865_s11 + $0x38] sm:$0xff]  ;;  %v610_v57 = vsub.f32 %v7994_v26, %v12425_v43  ;;  %v866_v61 = vsub.f32 %v8003_v38, %v12413_v48 }
  0x27   : > { %v321_v54 = vld [vmem:[%s7865_s11 + $0x138] sm:$0xff]  ;;  %13039 = vst [vmem:[#allocation15_spill] sm:$0xff] %v8027_v62  ;;  %v375_v63 = vsel %vm352_vm1, %v289_v53, 0  ;;  %v12412_v8 = vand.u32 4294901760, %v8027_v62  ;;  %v378_v27 = vsel %vm352_vm1, %v290_v13, 0  ;;  %v474_v37 = vsel %vm352_vm1, %v322_v14, 0 }
  0x28   : > { %v471_v0 = vsel %vm352_vm1, %v321_v54, 0  ;;  %v867_v7 = vand.u32 4294901760, %v866_v61  ;;  %v8035_v9 = vand.u32 4294901760, %v375_v63  ;;  %v8055_v42 = vand.u32 4294901760, %v378_v27  ;;  %v323_v61 = vld [vmem:[%s7865_s11 + $0x148] sm:$0xff]  ;;  %v333_v38 = vld [vmem:[%s7865_s11 + $0x198] sm:$0xff] }
  0x29   : > { %v8037_v10 = vand.u32 4294901760, %v471_v0  ;;  %v8061_v54 = vand.u32 4294901760, %v474_v37  ;;  %v477_v14 = vsel %vm352_vm1, %v323_v61, 0 }
  0x2a   : > { %1115 = vmatmul.f32.gmra.mxu1 %v7903_v35  ;;  %1243 = vmatmul.f32.gmra.mxu3 %v7905_v36  ;;  %v8048_v24 = vsub.f32 %v375_v63, %v8035_v9  ;;  %v8066_v63 = vsub.f32 %v378_v27, %v8055_v42 }
  0x2b   : > { %13040 = vst [vmem:[#allocation16_spill] sm:$0xff] %v8037_v10  ;;  %v8051_v25 = vsub.f32 %v471_v0, %v8037_v10 }
  0x2c   : > { %13042 = vst [vmem:[#allocation18_spill] sm:$0xff] %v8061_v54 }
  0x2d   : > { %13041 = vst [vmem:[#allocation17_spill] sm:$0xff] %v8051_v25  ;;  %v12411_v53 = vand.u32 4294901760, %v8051_v25 }
  0x2e   : > { %588 = vmatmul.f32.gmra.mxu0 %v587_v3  ;;  %844 = vmatmul.f32.gmra.mxu2 %v843_v4  ;;  %v611_v3 = vand.u32 4294901760, %v610_v57  ;;  %v12424_v4 = vand.u32 4294901760, %v8021_v58  ;;  %v291_v57 = vld [vmem:[%s7865_s11 + $0x48] sm:$0xff] }
  0x2f   : > { %v381_v13 = vsel %vm352_vm1, %v291_v57, 0 }
  0x32   : > { %1119 = vmatmul.f32.gmra.mxu1 %v7935_v51  ;;  %1247 = vmatmul.f32.gmra.mxu3 %v7937_v52  ;;  %v507_v52 = vsel %vm352_vm1, %v333_v38, 0  ;;  %v302_v38 = vld [vmem:[%s7865_s11 + $0xa0] sm:$0xff] }
  0x33   : > { %v414_v29 = vsel %vm352_vm1, %v302_v38, 0 }
  0x36   : > { %596 = vmatmul.f32.gmra.mxu0 %v595_v15  ;;  %852 = vmatmul.f32.gmra.mxu2 %v851_v17  ;;  %v618_v15 = vsub.f32 %v8021_v58, %v12424_v4  ;;  %v874_v17 = vsub.f32 %v8027_v62, %v12412_v8  ;;  %v324_v8 = vld [vmem:[%s7865_s11 + $0x150] sm:$0xff]  ;;  %v326_v4 = vld [vmem:[%s7865_s11 + $0x160] sm:$0xff] }
  0x37   : > { %v480_v19 = vsel %vm352_vm1, %v324_v8, 0 }
  0x38   : > { %v619_v41 = vand.u32 4294901760, %v618_v15  ;;  %v12420_v15 = vand.u32 4294901760, %v8066_v63 }
  0x3a   : > { %1123 = vmatmul.f32.gmra.mxu1 %v7963_v5  ;;  %1251 = vmatmul.f32.gmra.mxu3 %v7965_v6  ;;  %v634_v57 = vsub.f32 %v8066_v63, %v12420_v15  ;;  %v483_v15 = vsel %vm352_vm1, %v325_v40, 0 }
  0x3c   : > { %v635_v2 = vand.u32 4294901760, %v634_v57 }
  0x3e   : > { %604 = vmatmul.f32.gmra.mxu0 %v603_v46  ;;  %860 = vmatmul.f32.gmra.mxu2 %v859_v47  ;;  %v875_v46 = vand.u32 4294901760, %v874_v17  ;;  %v12421_v47 = vand.u32 4294901760, %v8048_v24  ;;  %v8080_v17 = vand.u32 4294901760, %v381_v13 }
  0x40   : > { %v626_v0 = vsub.f32 %v8048_v24, %v12421_v47  ;;  %v8093_v61 = vsub.f32 %v381_v13, %v8080_v17 }
  0x42   : > { %1127 = vmatmul.f32.gmra.mxu1 %v7983_v16  ;;  %1255 = vmatmul.f32.gmra.mxu3 %v7989_v20  ;;  %v627_v27 = vand.u32 4294901760, %v626_v0  ;;  %v12422_v56 = vand.u32 4294901760, %v8093_v61 }
  0x44   : > { %v642_v8 = vsub.f32 %v8093_v61, %v12422_v56 }
  0x46   : > { %612 = vmatmul.f32.gmra.mxu0 %v611_v3  ;;  %868 = vmatmul.f32.gmra.mxu2 %v867_v7  ;;  %v882_v3 = vsub.f32 %v8051_v25, %v12411_v53  ;;  %v8075_v7 = vsub.f32 %v474_v37, %v8061_v54  ;;  %v8085_v53 = vand.u32 4294901760, %v477_v14  ;;  %v292_v37 = vld [vmem:[%s7865_s11 + $0x50] sm:$0xff]  ;;  %v643_v47 = vand.u32 4294901760, %v642_v8 }
  0x47   : > { %v384_v48 = vsel %vm352_vm1, %v292_v37, 0 }
  0x48   : > { %13043 = vst [vmem:[#allocation19_spill] sm:$0xff] %v8075_v7 }
  0x49   : > { %13044 = vst [vmem:[#allocation20_spill] sm:$0xff] %v8085_v53 }
  0x4a   : > { %1131 = vmatmul.f32.gmra.mxu1 %v8008_v44  ;;  %1259 = vmatmul.f32.gmra.mxu3 %v8013_v50 }
  0x4e   : > { %620 = vmatmul.f32.gmra.mxu0 %v619_v41  ;;  %876 = vmatmul.f32.gmra.mxu2 %v875_v46  ;;  %v883_v41 = vand.u32 4294901760, %v882_v3  ;;  %v12417_v46 = vand.u32 4294901760, %v8075_v7  ;;  %v8099_v3 = vsub.f32 %v477_v14, %v8085_v53  ;;  %v293_v14 = vld [vmem:[%s7865_s11 + $0x58] sm:$0xff] }
  0x4f   : > { %v387_v33 = vsel %vm352_vm1, %v293_v14, 0 }
  0x50   : > { %v890_v0 = vsub.f32 %v8075_v7, %v12417_v46  ;;  %13045 = vst [vmem:[#allocation21_spill] sm:$0xff] %v8099_v3  ;;  %v8109_v46 = vand.u32 4294901760, %v480_v19  ;;  %v8127_v56 = vand.u32 4294901760, %v387_v33 }
  0x52   : > { %1135 = vmatmul.f32.gmra.mxu1 %v8035_v9  ;;  %1263 = vmatmul.f32.gmra.mxu3 %v8037_v10  ;;  %v891_v13 = vand.u32 4294901760, %v890_v0  ;;  %13046 = vst [vmem:[#allocation22_spill] sm:$0xff] %v8109_v46  ;;  %v8123_v0 = vsub.f32 %v480_v19, %v8109_v46  ;;  %v294_v19 = vld [vmem:[%s7865_s11 + $0x60] sm:$0xff]  ;;  %v8138_v14 = vsub.f32 %v387_v33, %v8127_v56  ;;  %v486_v33 = vsel %vm352_vm1, %v326_v4, 0 }
  0x53   : > { %v390_v43 = vsel %vm352_vm1, %v294_v19, 0 }
  0x54   : > { %13047 = vst [vmem:[#allocation23_spill] sm:$0xff] %v8123_v0  ;;  %v12435_v18 = vand.u32 4294901760, %v8138_v14 }
  0x56   : > { %628 = vmatmul.f32.gmra.mxu0 %v627_v27  ;;  %884 = vmatmul.f32.gmra.mxu2 %v883_v41  ;;  %v12423_v27 = vand.u32 4294901760, %v8099_v3  ;;  %v8107_v41 = vand.u32 4294901760, %v384_v48  ;;  %v658_v4 = vsub.f32 %v8138_v14, %v12435_v18 }
  0x58   : > { %v898_v37 = vsub.f32 %v8099_v3, %v12423_v27  ;;  %v8120_v57 = vsub.f32 %v384_v48, %v8107_v41  ;;  %v12429_v48 = vand.u32 4294901760, %v8123_v0  ;;  %v8133_v27 = vand.u32 4294901760, %v483_v15 }
  0x5a   : > { %1139 = vmatmul.f32.gmra.mxu1 %v8055_v42  ;;  %1267 = vmatmul.f32.gmra.mxu3 %v8061_v54  ;;  %13048 = vst [vmem:[#allocation24_spill] sm:$0xff] %v8133_v27  ;;  %v906_v8 = vsub.f32 %v8123_v0, %v12429_v48  ;;  %v8157_v48 = vand.u32 4294901760, %v486_v33 }
  0x5c   : > { %13050 = vst [vmem:[#allocation26_spill] sm:$0xff] %v8157_v48 }
  0x5e   : > { %636 = vmatmul.f32.gmra.mxu0 %v635_v2  ;;  %892 = vmatmul.f32.gmra.mxu2 %v891_v13  ;;  %v899_v2 = vand.u32 4294901760, %v898_v37  ;;  %v12427_v13 = vand.u32 4294901760, %v8120_v57  ;;  %v8147_v37 = vsub.f32 %v483_v15, %v8133_v27  ;;  %v295_v15 = vld [vmem:[%s7865_s11 + $0x68] sm:$0xff] }
  0x5f   : > { %v393_v39 = vsel %vm352_vm1, %v295_v15, 0 }
  0x60   : > { %v650_v40 = vsub.f32 %v8120_v57, %v12427_v13  ;;  %13049 = vst [vmem:[#allocation25_spill] sm:$0xff] %v8147_v37  ;;  %v907_v13 = vand.u32 4294901760, %v906_v8  ;;  %v12436_v1 = vand.u32 4294901760, %v8147_v37  ;;  %v8171_v8 = vsub.f32 %v486_v33, %v8157_v48  ;;  %v296_v33 = vld [vmem:[%s7865_s11 + $0x70] sm:$0xff] }
  0x62   : > { %1143 = vmatmul.f32.gmra.mxu1 %v8080_v17  ;;  %1271 = vmatmul.f32.gmra.mxu3 %v8085_v53  ;;  %13051 = vst [vmem:[#allocation27_spill] sm:$0xff] %v8171_v8 }
  0x66   : > { %644 = vmatmul.f32.gmra.mxu0 %v643_v47  ;;  %900 = vmatmul.f32.gmra.mxu2 %v899_v2  ;;  %v8152_v47 = vand.u32 4294901760, %v390_v43  ;;  %v651_v2 = vand.u32 4294901760, %v650_v40  ;;  %v914_v40 = vsub.f32 %v8147_v37, %v12436_v1  ;;  %v8181_v1 = vand.u32 4294901760, %v489_v32  ;;  %v328_v37 = vld [vmem:[%s7865_s11 + $0x170] sm:$0xff] }
  0x67   : > { %v492_v0 = vsel %vm352_vm1, %v328_v37, 0 }
  0x68   : > { %v8165_v19 = vsub.f32 %v390_v43, %v8152_v47  ;;  %v915_v43 = vand.u32 4294901760, %v914_v40  ;;  %13052 = vst [vmem:[#allocation28_spill] sm:$0xff] %v8181_v1  ;;  %v8195_v40 = vsub.f32 %v489_v32, %v8181_v1  ;;  %v297_v32 = vld [vmem:[%s7865_s11 + $0x78] sm:$0xff] }
  0x6a   : > { %1147 = vmatmul.f32.gmra.mxu1 %v8107_v41  ;;  %1275 = vmatmul.f32.gmra.mxu3 %v8109_v46  ;;  %v659_v46 = vand.u32 4294901760, %v658_v4  ;;  %v12445_v18 = vand.u32 4294901760, %v8165_v19  ;;  %13053 = vst [vmem:[#allocation29_spill] sm:$0xff] %v8195_v40 }
  0x6c   : > { %v666_v55 = vsub.f32 %v8165_v19, %v12445_v18 }
  0x6e   : > { %652 = vmatmul.f32.gmra.mxu0 %v651_v2  ;;  %908 = vmatmul.f32.gmra.mxu2 %v907_v13  ;;  %v12446_v13 = vand.u32 4294901760, %v8171_v8  ;;  %v8179_v2 = vand.u32 4294901760, %v393_v39  ;;  %v667_v53 = vand.u32 4294901760, %v666_v55 }
  0x70   : > { %v922_v15 = vsub.f32 %v8171_v8, %v12446_v13  ;;  %v8192_v4 = vsub.f32 %v393_v39, %v8179_v2  ;;  %v12456_v39 = vand.u32 4294901760, %v8195_v40  ;;  %v8205_v13 = vand.u32 4294901760, %v492_v0  ;;  %v329_v8 = vld [vmem:[%s7865_s11 + $0x178] sm:$0xff] }
  0x72   : > { %1151 = vmatmul.f32.gmra.mxu1 %v8127_v56  ;;  %1279 = vmatmul.f32.gmra.mxu3 %v8133_v27  ;;  %v396_v27 = vsel %vm352_vm1, %v296_v33, 0  ;;  %13054 = vst [vmem:[#allocation30_spill] sm:$0xff] %v8205_v13  ;;  %v930_v55 = vsub.f32 %v8195_v40, %v12456_v39  ;;  %v330_v40 = vld [vmem:[%s7865_s11 + $0x180] sm:$0xff] }
  0x73   : > { %v8199_v18 = vand.u32 4294901760, %v396_v27  ;;  %v498_v7 = vsel %vm352_vm1, %v330_v40, 0 }
  0x75   : > { %v8210_v33 = vsub.f32 %v396_v27, %v8199_v18  ;;  %v495_v27 = vsel %vm352_vm1, %v329_v8, 0 }
  0x76   : > { %660 = vmatmul.f32.gmra.mxu0 %v659_v46  ;;  %916 = vmatmul.f32.gmra.mxu2 %v915_v43  ;;  %v923_v46 = vand.u32 4294901760, %v922_v15  ;;  %v12453_v43 = vand.u32 4294901760, %v8192_v4  ;;  %v8219_v15 = vsub.f32 %v492_v0, %v8205_v13  ;;  %v8229_v39 = vand.u32 4294901760, %v495_v27  ;;  %v298_v0 = vld [vmem:[%s7865_s11 + $0x80] sm:$0xff] }
  0x77   : > { %v12465_v3 = vand.u32 4294901760, %v8210_v33 }
  0x78   : > { %v674_v37 = vsub.f32 %v8192_v4, %v12453_v43  ;;  %13055 = vst [vmem:[#allocation31_spill] sm:$0xff] %v8219_v15  ;;  %v931_v43 = vand.u32 4294901760, %v930_v55  ;;  %v12466_v54 = vand.u32 4294901760, %v8219_v15  ;;  %v8243_v55 = vsub.f32 %v495_v27, %v8229_v39  ;;  %v299_v27 = vld [vmem:[%s7865_s11 + $0x88] sm:$0xff] }
  0x79   : > { %13056 = vst [vmem:[#allocation32_spill] sm:$0xff] %v8229_v39  ;;  %v682_v8 = vsub.f32 %v8210_v33, %v12465_v3 }
  0x7a   : > { %1155 = vmatmul.f32.gmra.mxu1 %v8152_v47  ;;  %1283 = vmatmul.f32.gmra.mxu3 %v8157_v48  ;;  %v399_v48 = vsel %vm352_vm1, %v297_v32, 0  ;;  %13057 = vst [vmem:[#allocation33_spill] sm:$0xff] %v8243_v55 }
  0x7b   : > { %v683_v10 = vand.u32 4294901760, %v682_v8 }
  0x7e   : > { %668 = vmatmul.f32.gmra.mxu0 %v667_v53  ;;  %924 = vmatmul.f32.gmra.mxu2 %v923_v46  ;;  %v8224_v53 = vand.u32 4294901760, %v399_v48  ;;  %v675_v46 = vand.u32 4294901760, %v674_v37  ;;  %v938_v37 = vsub.f32 %v8219_v15, %v12466_v54  ;;  %v8253_v54 = vand.u32 4294901760, %v498_v7  ;;  %v331_v15 = vld [vmem:[%s7865_s11 + $0x188] sm:$0xff] }
  0x7f   : > { %v501_v25 = vsel %vm352_vm1, %v331_v15, 0 }
  0x80   : > { %v8237_v32 = vsub.f32 %v399_v48, %v8224_v53  ;;  %v939_v48 = vand.u32 4294901760, %v938_v37  ;;  %13058 = vst [vmem:[#allocation34_spill] sm:$0xff] %v8253_v54  ;;  %v8267_v37 = vsub.f32 %v498_v7, %v8253_v54  ;;  %v300_v7 = vld [vmem:[%s7865_s11 + $0x90] sm:$0xff] }
  0x82   : > { %1159 = vmatmul.f32.gmra.mxu1 %v8179_v2  ;;  %1287 = vmatmul.f32.gmra.mxu3 %v8181_v1  ;;  %v402_v1 = vsel %vm352_vm1, %v298_v0, 0  ;;  %v12475_v3 = vand.u32 4294901760, %v8237_v32  ;;  %13059 = vst [vmem:[#allocation35_spill] sm:$0xff] %v8267_v37 }
  0x84   : > { %v690_v40 = vsub.f32 %v8237_v32, %v12475_v3 }
  0x86   : > { %676 = vmatmul.f32.gmra.mxu0 %v675_v46  ;;  %932 = vmatmul.f32.gmra.mxu2 %v931_v43  ;;  %v12476_v43 = vand.u32 4294901760, %v8243_v55  ;;  %v8251_v46 = vand.u32 4294901760, %v402_v1  ;;  %v691_v50 = vand.u32 4294901760, %v690_v40 }
  0x88   : > { %v946_v0 = vsub.f32 %v8243_v55, %v12476_v43  ;;  %v8264_v8 = vsub.f32 %v402_v1, %v8251_v46  ;;  %v12486_v1 = vand.u32 4294901760, %v8267_v37  ;;  %v8277_v43 = vand.u32 4294901760, %v501_v25  ;;  %v332_v55 = vld [vmem:[%s7865_s11 + $0x190] sm:$0xff] }
  0x8a   : > { %1163 = vmatmul.f32.gmra.mxu1 %v8199_v18  ;;  %1291 = vmatmul.f32.gmra.mxu3 %v8205_v13  ;;  %v405_v13 = vsel %vm352_vm1, %v299_v27, 0  ;;  %13060 = vst [vmem:[#allocation36_spill] sm:$0xff] %v8277_v43  ;;  %v954_v40 = vsub.f32 %v8267_v37, %v12486_v1 }
  0x8b   : > { %v8271_v3 = vand.u32 4294901760, %v405_v13 }
  0x8c   : > { %v955_v20 = vand.u32 4294901760, %v954_v40 }
  0x8d   : > { %v8282_v27 = vsub.f32 %v405_v13, %v8271_v3 }
  0x8e   : > { %684 = vmatmul.f32.gmra.mxu0 %v683_v10  ;;  %940 = vmatmul.f32.gmra.mxu2 %v939_v48  ;;  %v947_v10 = vand.u32 4294901760, %v946_v0  ;;  %v12483_v48 = vand.u32 4294901760, %v8264_v8  ;;  %v8291_v0 = vsub.f32 %v501_v25, %v8277_v43 }
  0x8f   : > { %v12497_v13 = vand.u32 4294901760, %v8282_v27 }
  0x90   : > { %v698_v15 = vsub.f32 %v8264_v8, %v12483_v48  ;;  %13061 = vst [vmem:[#allocation37_spill] sm:$0xff] %v8291_v0  ;;  %v12506_v1 = vand.u32 4294901760, %v8291_v0 }
  0x92   : > { %1167 = vmatmul.f32.gmra.mxu1 %v8224_v53  ;;  %1295 = vmatmul.f32.gmra.mxu3 %v8229_v39  ;;  %v408_v39 = vsel %vm352_vm1, %v300_v7, 0  ;;  %v699_v48 = vand.u32 4294901760, %v698_v15  ;;  %v301_v7 = vld [vmem:[%s7865_s11 + $0x98] sm:$0xff]  ;;  %v8318_v15 = vld [vmem:[%s12405_s2] ss:$0 sm:$0xff]  ;;  %v962_v40 = vsub.f32 %v8291_v0, %v12506_v1 }
  0x96   : > { %692 = vmatmul.f32.gmra.mxu0 %v691_v50  ;;  %948 = vmatmul.f32.gmra.mxu2 %v947_v10  ;;  %v504_v50 = vsel %vm352_vm1, %v332_v55, 0  ;;  %v8298_v10 = vand.u32 4294901760, %v408_v39  ;;  %v706_v55 = vsub.f32 %v8282_v27, %v12497_v13  ;;  %v411_v13 = vsel %vm352_vm1, %v301_v7, 0 }
  0x97   : > { %v8294_v62 = vpop.f32.mrf.mxu1  ;;  %v8303_v25 = vand.u32 4294901760, %v504_v50  ;;  %v8337_v7 = vand.u32 4294901760, %v507_v52 }
  0x98   : > { %13062 = vst [vmem:[#allocation38_spill] sm:$0xff] %v8298_v10  ;;  %v8313_v12 = vsub.f32 %v408_v39, %v8298_v10  ;;  %v707_v36 = vand.u32 4294901760, %v706_v55 }
  0x99   : > { %13063 = vst [vmem:[#allocation39_spill] sm:$0xff] %v8303_v25 }
  0x9a   : > { %1171 = vmatmul.f32.gmra.mxu1 %v8251_v46  ;;  %1299 = vmatmul.f32.gmra.mxu3 %v8253_v54  ;;  %13064 = vst [vmem:[#allocation40_spill] sm:$0xff] %v8313_v12  ;;  %v8324_v54 = vsub.f32 %v504_v50, %v8303_v25  ;;  %v963_v50 = vand.u32 4294901760, %v962_v40 }
  0x9b   : > { %v8305_v37 = vpop.f32.mrf.mxu0  ;;  %13068 = vst [vmem:[#allocation44_spill] sm:$0xff] %v8337_v7 }
  0x9c   : > { %13065 = vst [vmem:[#allocation41_spill] sm:$0xff] %v8324_v54  ;;  %v12520_v1 = vand.u32 4294901760, %v8324_v54 }
  0x9d   : > { %v1236_v6 = vpop.f32.mrf.mxu3 }
  0x9e   : > { %700 = vmatmul.f32.gmra.mxu0 %v699_v48  ;;  %956 = vmatmul.f32.gmra.mxu2 %v955_v20  ;;  %v12519_v48 = vand.u32 4294901760, %v8313_v12  ;;  %v8331_v20 = vand.u32 4294901760, %v411_v13  ;;  %v970_v40 = vsub.f32 %v8324_v54, %v12520_v1 }
  0x9f   : > { %v8327_v39 = vpop.f32.mrf.mxu1 }
  0xa0   : > { %13066 = vst [vmem:[#allocation42_spill] sm:$0xff] %v8327_v39  ;;  %v714_v34 = vsub.f32 %v8313_v12, %v12519_v48 }
  0xa1   : > { %v829_v60 = vpop.f32.mrf.mxu2  ;;  %13067 = vst [vmem:[#allocation43_spill] sm:$0xff] %v8331_v20 }
  0xa2   : > { %v830_v49 = vadd.f32 %v8318_v15, %v829_v60  ;;  %1175 = vmatmul.f32.gmra.mxu1 %v8271_v3  ;;  %1303 = vmatmul.f32.gmra.mxu3 %v8277_v43  ;;  %v8347_v60 = vsub.f32 %v411_v13, %v8331_v20  ;;  %v8355_v43 = vsub.f32 %v507_v52, %v8337_v7  ;;  %v510_v13 = vsel %vm352_vm1, %v334_v30, 0  ;;  %v303_v30 = vld [vmem:[%s7865_s11 + $0xa8] sm:$0xff] }
  0xa3   : > { %v8339_v0 = vpop.f32.mrf.mxu0  ;;  %v971_v52 = vand.u32 4294901760, %v970_v40  ;;  %v8368_v38 = vand.u32 4294901760, %v510_v13 }
  0xa4   : > { %13069 = vst [vmem:[#allocation45_spill] sm:$0xff] %v8339_v0  ;;  %v8349_v22 = vadd.f32 %v1236_v6, %v830_v49  ;;  %v715_v49 = vand.u32 4294901760, %v714_v34  ;;  %v8362_v6 = vand.u32 4294901760, %v414_v29  ;;  %v12530_v1 = vand.u32 4294901760, %v8355_v43 }
  0xa5   : > { %v1240_v55 = vpop.f32.mrf.mxu3  ;;  %13070 = vst [vmem:[#allocation46_spill] sm:$0xff] %v8347_v60 }
  0xa6   : > { %13071 = vst [vmem:[#allocation47_spill] sm:$0xff] %v8349_v22  ;;  %708 = vmatmul.f32.gmra.mxu0 %v707_v36  ;;  %964 = vmatmul.f32.gmra.mxu2 %v963_v50  ;;  %v12529_v36 = vand.u32 4294901760, %v8347_v60  ;;  %v335_v22 = vld [vmem:[%s7865_s11 + $0x1a8] sm:$0xff]  ;;  %v978_v40 = vsub.f32 %v8355_v43, %v12530_v1 }
  0xa7   : > { %13072 = vst [vmem:[#allocation48_spill] sm:$0xff] %v8355_v43  ;;  %v8358_v39 = vpop.f32.mrf.mxu1 }
  0xa8   : > { %13073 = vst [vmem:[#allocation49_spill] sm:$0xff] %v8358_v39  ;;  %v722_v39 = vsub.f32 %v8347_v60, %v12529_v36 }
  0xa9   : > { %v837_v48 = vpop.f32.mrf.mxu2  ;;  %13074 = vst [vmem:[#allocation50_spill] sm:$0xff] %v8362_v6 }
  0xaa   : > { %v838_v50 = vadd.f32 %v8318_v15, %v837_v48  ;;  %1179 = vmatmul.f32.gmra.mxu1 %v8298_v10  ;;  %1307 = vmatmul.f32.gmra.mxu3 %v8303_v25  ;;  %13075 = vst [vmem:[#allocation51_spill] sm:$0xff] %v8368_v38  ;;  %v8378_v48 = vsub.f32 %v414_v29, %v8362_v6  ;;  %v513_v29 = vsel %vm352_vm1, %v335_v22, 0  ;;  %v304_v22 = vld [vmem:[%s7865_s11 + $0xb0] sm:$0xff] }
  0xab   : > { %v8370_v54 = vpop.f32.mrf.mxu0  ;;  %v8386_v25 = vsub.f32 %v510_v13, %v8368_v38  ;;  %v979_v13 = vand.u32 4294901760, %v978_v40 }
  0xac   : > { %13076 = vst [vmem:[#allocation52_spill] sm:$0xff] %v8370_v54  ;;  %v8380_v10 = vadd.f32 %v1240_v55, %v838_v50  ;;  %v417_v54 = vsel %vm352_vm1, %v303_v30, 0  ;;  %v723_v55 = vand.u32 4294901760, %v722_v39  ;;  %v8399_v30 = vand.u32 4294901760, %v513_v29 }
  0xad   : > { %v1244_v34 = vpop.f32.mrf.mxu3  ;;  %13077 = vst [vmem:[#allocation53_spill] sm:$0xff] %v8378_v48  ;;  %v8393_v50 = vand.u32 4294901760, %v417_v54  ;;  %v12540_v1 = vand.u32 4294901760, %v8386_v25 }
  0xae   : > { %13078 = vst [vmem:[#allocation54_spill] sm:$0xff] %v8380_v10  ;;  %716 = vmatmul.f32.gmra.mxu0 %v715_v49  ;;  %972 = vmatmul.f32.gmra.mxu2 %v971_v52  ;;  %v12539_v49 = vand.u32 4294901760, %v8378_v48  ;;  %v336_v10 = vld [vmem:[%s7865_s11 + $0x1b0] sm:$0xff] }
  0xaf   : > { %13079 = vst [vmem:[#allocation55_spill] sm:$0xff] %v8386_v25  ;;  %v8389_v12 = vpop.f32.mrf.mxu1  ;;  %v986_v40 = vsub.f32 %v8386_v25, %v12540_v1 }
  0xb0   : > { %13080 = vst [vmem:[#allocation56_spill] sm:$0xff] %v8389_v12  ;;  %v730_v12 = vsub.f32 %v8378_v48, %v12539_v49 }
  0xb1   : > { %v845_v36 = vpop.f32.mrf.mxu2  ;;  %13081 = vst [vmem:[#allocation57_spill] sm:$0xff] %v8393_v50 }
  0xb2   : > { %v846_v52 = vadd.f32 %v8318_v15, %v845_v36  ;;  %1183 = vmatmul.f32.gmra.mxu1 %v8331_v20  ;;  %1311 = vmatmul.f32.gmra.mxu3 %v8337_v7  ;;  %13082 = vst [vmem:[#allocation58_spill] sm:$0xff] %v8399_v30  ;;  %v8409_v36 = vsub.f32 %v417_v54, %v8393_v50  ;;  %v516_v54 = vsel %vm352_vm1, %v336_v10, 0  ;;  %v305_v10 = vld [vmem:[%s7865_s11 + $0xb8] sm:$0xff] }
  0xb3   : > { %v8401_v43 = vpop.f32.mrf.mxu0  ;;  %v8417_v7 = vsub.f32 %v513_v29, %v8399_v30  ;;  %v987_v29 = vand.u32 4294901760, %v986_v40 }
  0xb4   : > { %13083 = vst [vmem:[#allocation59_spill] sm:$0xff] %v8401_v43  ;;  %v8411_v20 = vadd.f32 %v1244_v34, %v846_v52  ;;  %v420_v43 = vsel %vm352_vm1, %v304_v22, 0  ;;  %v731_v34 = vand.u32 4294901760, %v730_v12  ;;  %v8430_v22 = vand.u32 4294901760, %v516_v54 }
  0xb5   : > { %v1248_v39 = vpop.f32.mrf.mxu3  ;;  %13084 = vst [vmem:[#allocation60_spill] sm:$0xff] %v8409_v36  ;;  %v8424_v52 = vand.u32 4294901760, %v420_v43  ;;  %v12550_v1 = vand.u32 4294901760, %v8417_v7 }
  0xb6   : > { %13085 = vst [vmem:[#allocation61_spill] sm:$0xff] %v8411_v20  ;;  %724 = vmatmul.f32.gmra.mxu0 %v723_v55  ;;  %980 = vmatmul.f32.gmra.mxu2 %v979_v13  ;;  %v12549_v55 = vand.u32 4294901760, %v8409_v36  ;;  %v337_v20 = vld [vmem:[%s7865_s11 + $0x1b8] sm:$0xff] }
  0xb7   : > { %13086 = vst [vmem:[#allocation62_spill] sm:$0xff] %v8417_v7  ;;  %v8420_v60 = vpop.f32.mrf.mxu1  ;;  %v994_v40 = vsub.f32 %v8417_v7, %v12550_v1 }
  0xb8   : > { %13087 = vst [vmem:[#allocation63_spill] sm:$0xff] %v8420_v60  ;;  %v738_v60 = vsub.f32 %v8409_v36, %v12549_v55 }
  0xb9   : > { %v853_v49 = vpop.f32.mrf.mxu2  ;;  %13088 = vst [vmem:[#allocation64_spill] sm:$0xff] %v8424_v52 }
  0xba   : > { %v854_v13 = vadd.f32 %v8318_v15, %v853_v49  ;;  %1187 = vmatmul.f32.gmra.mxu1 %v8362_v6  ;;  %1315 = vmatmul.f32.gmra.mxu3 %v8368_v38  ;;  %13089 = vst [vmem:[#allocation65_spill] sm:$0xff] %v8430_v22  ;;  %v8440_v49 = vsub.f32 %v420_v43, %v8424_v52  ;;  %v519_v43 = vsel %vm352_vm1, %v337_v20, 0  ;;  %v306_v20 = vld [vmem:[%s7865_s11 + $0xc0] sm:$0xff] }
  0xbb   : > { %v8432_v25 = vpop.f32.mrf.mxu0  ;;  %v8448_v38 = vsub.f32 %v516_v54, %v8430_v22  ;;  %v995_v54 = vand.u32 4294901760, %v994_v40 }
  0xbc   : > { %13090 = vst [vmem:[#allocation66_spill] sm:$0xff] %v8432_v25  ;;  %v8442_v6 = vadd.f32 %v1248_v39, %v854_v13  ;;  %v423_v25 = vsel %vm352_vm1, %v305_v10, 0  ;;  %v739_v39 = vand.u32 4294901760, %v738_v60  ;;  %v8461_v10 = vand.u32 4294901760, %v519_v43 }
  0xbd   : > { %v1252_v12 = vpop.f32.mrf.mxu3  ;;  %13091 = vst [vmem:[#allocation67_spill] sm:$0xff] %v8440_v49  ;;  %v8455_v13 = vand.u32 4294901760, %v423_v25  ;;  %v12560_v1 = vand.u32 4294901760, %v8448_v38 }
  0xbe   : > { %13092 = vst [vmem:[#allocation68_spill] sm:$0xff] %v8442_v6  ;;  %732 = vmatmul.f32.gmra.mxu0 %v731_v34  ;;  %988 = vmatmul.f32.gmra.mxu2 %v987_v29  ;;  %v12559_v34 = vand.u32 4294901760, %v8440_v49  ;;  %v338_v6 = vld [vmem:[%s7865_s11 + $0x1c0] sm:$0xff] }
  0xbf   : > { %13093 = vst [vmem:[#allocation69_spill] sm:$0xff] %v8448_v38  ;;  %v8451_v48 = vpop.f32.mrf.mxu1  ;;  %v1002_v40 = vsub.f32 %v8448_v38, %v12560_v1 }
  0xc0   : > { %13094 = vst [vmem:[#allocation70_spill] sm:$0xff] %v8451_v48  ;;  %v746_v48 = vsub.f32 %v8440_v49, %v12559_v34 }
  0xc1   : > { %v861_v55 = vpop.f32.mrf.mxu2  ;;  %13095 = vst [vmem:[#allocation71_spill] sm:$0xff] %v8455_v13 }
  0xc2   : > { %v862_v29 = vadd.f32 %v8318_v15, %v861_v55  ;;  %1191 = vmatmul.f32.gmra.mxu1 %v8393_v50  ;;  %1319 = vmatmul.f32.gmra.mxu3 %v8399_v30  ;;  %13096 = vst [vmem:[#allocation72_spill] sm:$0xff] %v8461_v10  ;;  %v8471_v55 = vsub.f32 %v423_v25, %v8455_v13  ;;  %v522_v25 = vsel %vm352_vm1, %v338_v6, 0  ;;  %v307_v6 = vld [vmem:[%s7865_s11 + $0xc8] sm:$0xff] }
  0xc3   : > { %v8463_v7 = vpop.f32.mrf.mxu0  ;;  %v8479_v30 = vsub.f32 %v519_v43, %v8461_v10  ;;  %v1003_v43 = vand.u32 4294901760, %v1002_v40 }
  0xc4   : > { %13097 = vst [vmem:[#allocation73_spill] sm:$0xff] %v8463_v7  ;;  %v8473_v50 = vadd.f32 %v1252_v12, %v862_v29  ;;  %v426_v7 = vsel %vm352_vm1, %v306_v20, 0  ;;  %v747_v12 = vand.u32 4294901760, %v746_v48  ;;  %v8492_v20 = vand.u32 4294901760, %v522_v25 }
  0xc5   : > { %v1256_v60 = vpop.f32.mrf.mxu3  ;;  %13098 = vst [vmem:[#allocation74_spill] sm:$0xff] %v8471_v55  ;;  %v8486_v29 = vand.u32 4294901760, %v426_v7  ;;  %v12570_v1 = vand.u32 4294901760, %v8479_v30 }
  0xc6   : > { %13099 = vst [vmem:[#allocation75_spill] sm:$0xff] %v8473_v50  ;;  %740 = vmatmul.f32.gmra.mxu0 %v739_v39  ;;  %996 = vmatmul.f32.gmra.mxu2 %v995_v54  ;;  %v12569_v39 = vand.u32 4294901760, %v8471_v55  ;;  %v339_v50 = vld [vmem:[%s7865_s11 + $0x1c8] sm:$0xff] }
  0xc7   : > { %13100 = vst [vmem:[#allocation76_spill] sm:$0xff] %v8479_v30  ;;  %v8482_v36 = vpop.f32.mrf.mxu1  ;;  %v1010_v40 = vsub.f32 %v8479_v30, %v12570_v1 }
  0xc8   : > { %13101 = vst [vmem:[#allocation77_spill] sm:$0xff] %v8482_v36  ;;  %v754_v36 = vsub.f32 %v8471_v55, %v12569_v39 }
  0xc9   : > { %v869_v34 = vpop.f32.mrf.mxu2  ;;  %13102 = vst [vmem:[#allocation78_spill] sm:$0xff] %v8486_v29 }
  0xca   : > { %v870_v54 = vadd.f32 %v8318_v15, %v869_v34  ;;  %1195 = vmatmul.f32.gmra.mxu1 %v8424_v52  ;;  %1323 = vmatmul.f32.gmra.mxu3 %v8430_v22  ;;  %13103 = vst [vmem:[#allocation79_spill] sm:$0xff] %v8492_v20  ;;  %v8502_v34 = vsub.f32 %v426_v7, %v8486_v29  ;;  %v525_v7 = vsel %vm352_vm1, %v339_v50, 0  ;;  %v308_v50 = vld [vmem:[%s7865_s11 + $0xd0] sm:$0xff] }
  0xcb   : > { %v8494_v38 = vpop.f32.mrf.mxu0  ;;  %v8510_v22 = vsub.f32 %v522_v25, %v8492_v20  ;;  %v1011_v25 = vand.u32 4294901760, %v1010_v40 }
  0xcc   : > { %13104 = vst [vmem:[#allocation80_spill] sm:$0xff] %v8494_v38  ;;  %v8504_v52 = vadd.f32 %v1256_v60, %v870_v54  ;;  %v429_v38 = vsel %vm352_vm1, %v307_v6, 0  ;;  %v755_v60 = vand.u32 4294901760, %v754_v36  ;;  %v8523_v6 = vand.u32 4294901760, %v525_v7 }
  0xcd   : > { %v1260_v48 = vpop.f32.mrf.mxu3  ;;  %13105 = vst [vmem:[#allocation81_spill] sm:$0xff] %v8502_v34  ;;  %v8517_v54 = vand.u32 4294901760, %v429_v38  ;;  %v12580_v1 = vand.u32 4294901760, %v8510_v22 }
  0xce   : > { %13106 = vst [vmem:[#allocation82_spill] sm:$0xff] %v8504_v52  ;;  %748 = vmatmul.f32.gmra.mxu0 %v747_v12  ;;  %1004 = vmatmul.f32.gmra.mxu2 %v1003_v43  ;;  %v12579_v12 = vand.u32 4294901760, %v8502_v34  ;;  %v340_v52 = vld [vmem:[%s7865_s11 + $0x1d0] sm:$0xff] }
  0xcf   : > { %13107 = vst [vmem:[#allocation83_spill] sm:$0xff] %v8510_v22  ;;  %v8513_v49 = vpop.f32.mrf.mxu1  ;;  %v1018_v40 = vsub.f32 %v8510_v22, %v12580_v1 }
  0xd0   : > { %13108 = vst [vmem:[#allocation84_spill] sm:$0xff] %v8513_v49  ;;  %v762_v49 = vsub.f32 %v8502_v34, %v12579_v12 }
  0xd1   : > { %v877_v39 = vpop.f32.mrf.mxu2  ;;  %13109 = vst [vmem:[#allocation85_spill] sm:$0xff] %v8523_v6 }
  0xd2   : > { %v878_v43 = vadd.f32 %v8318_v15, %v877_v39  ;;  %1199 = vmatmul.f32.gmra.mxu1 %v8455_v13  ;;  %1327 = vmatmul.f32.gmra.mxu3 %v8461_v10  ;;  %v8533_v39 = vsub.f32 %v429_v38, %v8517_v54  ;;  %v8541_v10 = vsub.f32 %v525_v7, %v8523_v6  ;;  %v528_v38 = vsel %vm352_vm1, %v340_v52, 0  ;;  %v309_v52 = vld [vmem:[%s7865_s11 + $0xd8] sm:$0xff] }
  0xd3   : > { %v8525_v30 = vpop.f32.mrf.mxu0  ;;  %v1019_v7 = vand.u32 4294901760, %v1018_v40 }
  0xd4   : > { %13110 = vst [vmem:[#allocation86_spill] sm:$0xff] %v8525_v30  ;;  %v8535_v13 = vadd.f32 %v1260_v48, %v878_v43  ;;  %v432_v30 = vsel %vm352_vm1, %v308_v50, 0  ;;  %v763_v48 = vand.u32 4294901760, %v762_v49  ;;  %v12590_v1 = vand.u32 4294901760, %v8541_v10 }
  0xd5   : > { %v1264_v36 = vpop.f32.mrf.mxu3  ;;  %13111 = vst [vmem:[#allocation87_spill] sm:$0xff] %v8533_v39  ;;  %v8548_v43 = vand.u32 4294901760, %v432_v30  ;;  %v8554_v50 = vand.u32 4294901760, %v528_v38 }
  0xd6   : > { %13112 = vst [vmem:[#allocation88_spill] sm:$0xff] %v8535_v13  ;;  %756 = vmatmul.f32.gmra.mxu0 %v755_v60  ;;  %1012 = vmatmul.f32.gmra.mxu2 %v1011_v25  ;;  %v12587_v60 = vand.u32 4294901760, %v8533_v39  ;;  %v341_v13 = vld [vmem:[%s7865_s11 + $0x1d8] sm:$0xff]  ;;  %v1026_v40 = vsub.f32 %v8541_v10, %v12590_v1 }
  0xd7   : > { %13113 = vst [vmem:[#allocation89_spill] sm:$0xff] %v8541_v10  ;;  %v8544_v55 = vpop.f32.mrf.mxu1  ;;  %v310_v10 = vld [vmem:[%s7865_s11 + $0xe0] sm:$0xff] }
  0xd8   : > { %13114 = vst [vmem:[#allocation90_spill] sm:$0xff] %v8544_v55  ;;  %v770_v55 = vsub.f32 %v8533_v39, %v12587_v60  ;;  %v531_v60 = vsel %vm352_vm1, %v341_v13, 0  ;;  %v1027_v1 = vand.u32 4294901760, %v1026_v40 }
  0xd9   : > { %v885_v12 = vpop.f32.mrf.mxu2  ;;  %13115 = vst [vmem:[#allocation91_spill] sm:$0xff] %v8548_v43 }
  0xda   : > { %v886_v25 = vadd.f32 %v8318_v15, %v885_v12  ;;  %1203 = vmatmul.f32.gmra.mxu1 %v8486_v29  ;;  %1331 = vmatmul.f32.gmra.mxu3 %v8492_v20  ;;  %13116 = vst [vmem:[#allocation92_spill] sm:$0xff] %v8554_v50  ;;  %v8564_v12 = vsub.f32 %v432_v30, %v8548_v43 }
  0xdb   : > { %v8556_v22 = vpop.f32.mrf.mxu0  ;;  %v8572_v20 = vsub.f32 %v528_v38, %v8554_v50  ;;  %v771_v38 = vand.u32 4294901760, %v770_v55 }
  0xdc   : > { %13117 = vst [vmem:[#allocation93_spill] sm:$0xff] %v8556_v22  ;;  %v8566_v29 = vadd.f32 %v1264_v36, %v886_v25  ;;  %v435_v22 = vsel %vm352_vm1, %v309_v52, 0  ;;  %v12597_v36 = vand.u32 4294901760, %v8564_v12  ;;  %v8581_v25 = vand.u32 4294901760, %v531_v60 }
  0xdd   : > { %v1268_v49 = vpop.f32.mrf.mxu3  ;;  %13118 = vst [vmem:[#allocation94_spill] sm:$0xff] %v8564_v12  ;;  %v12600_v52 = vand.u32 4294901760, %v8572_v20 }
  0xde   : > { %13119 = vst [vmem:[#allocation95_spill] sm:$0xff] %v8566_v29  ;;  %764 = vmatmul.f32.gmra.mxu0 %v763_v48  ;;  %1020 = vmatmul.f32.gmra.mxu2 %v1019_v7  ;;  %v8579_v48 = vand.u32 4294901760, %v435_v22  ;;  %v342_v29 = vld [vmem:[%s7865_s11 + $0x1e0] sm:$0xff]  ;;  %v778_v34 = vsub.f32 %v8564_v12, %v12597_v36  ;;  %v438_v36 = vsel %vm352_vm1, %v310_v10, 0 }
  0xdf   : > { %13120 = vst [vmem:[#allocation96_spill] sm:$0xff] %v8572_v20  ;;  %v8576_v39 = vpop.f32.mrf.mxu1  ;;  %v1034_v55 = vsub.f32 %v8572_v20, %v12600_v52  ;;  %v343_v20 = vld [vmem:[%s7865_s11 + $0x1e8] sm:$0xff] }
  0xe0   : > { %13121 = vst [vmem:[#allocation97_spill] sm:$0xff] %v8576_v39  ;;  %v8595_v0 = vsub.f32 %v435_v22, %v8579_v48  ;;  %v534_v22 = vsel %vm352_vm1, %v342_v29, 0  ;;  %v311_v29 = vld [vmem:[%s7865_s11 + $0xe8] sm:$0xff] }
  0xe1   : > { %v893_v30 = vpop.f32.mrf.mxu2  ;;  %13122 = vst [vmem:[#allocation98_spill] sm:$0xff] %v8579_v48  ;;  %v8616_v52 = vand.u32 4294901760, %v534_v22 }
  0xe2   : > { %13123 = vst [vmem:[#allocation99_spill] sm:$0xff] %v8581_v25  ;;  %v894_v7 = vadd.f32 %v8318_v15, %v893_v30  ;;  %1207 = vmatmul.f32.gmra.mxu1 %v8517_v54  ;;  %1335 = vmatmul.f32.gmra.mxu3 %v8523_v6  ;;  %v8598_v30 = vsub.f32 %v531_v60, %v8581_v25  ;;  %v12605_v60 = vand.u32 4294901760, %v8595_v0 }
  0xe3   : > { %v8587_v13 = vpop.f32.mrf.mxu0  ;;  %13125 = vst [vmem:[#allocation101_spill] sm:$0xff] %v8595_v0 }
  0xe4   : > { %13124 = vst [vmem:[#allocation100_spill] sm:$0xff] %v8587_v13  ;;  %v8600_v6 = vadd.f32 %v1268_v49, %v894_v7  ;;  %v779_v13 = vand.u32 4294901760, %v778_v34  ;;  %v1035_v7 = vand.u32 4294901760, %v1034_v55  ;;  %v786_v49 = vsub.f32 %v8595_v0, %v12605_v60 }
  0xe5   : > { %v1272_v39 = vpop.f32.mrf.mxu3  ;;  %13126 = vst [vmem:[#allocation102_spill] sm:$0xff] %v8598_v30  ;;  %v537_v60 = vsel %vm352_vm1, %v343_v20, 0 }
  0xe6   : > { %13127 = vst [vmem:[#allocation103_spill] sm:$0xff] %v8600_v6  ;;  %772 = vmatmul.f32.gmra.mxu0 %v771_v38  ;;  %1028 = vmatmul.f32.gmra.mxu2 %v1027_v1  ;;  %v8614_v38 = vand.u32 4294901760, %v438_v36 }
  0xe7   : > { %v8605_v40 = vpop.f32.mrf.mxu1  ;;  %13130 = vst [vmem:[#allocation106_spill] sm:$0xff] %v8616_v52 }
  0xe8   : > { %13128 = vst [vmem:[#allocation104_spill] sm:$0xff] %v8605_v40  ;;  %v8631_v55 = vsub.f32 %v438_v36, %v8614_v38 }
  0xe9   : > { %v901_v12 = vpop.f32.mrf.mxu2  ;;  %13129 = vst [vmem:[#allocation105_spill] sm:$0xff] %v8614_v38 }
  0xea   : > { %v902_v1 = vadd.f32 %v8318_v15, %v901_v12  ;;  %1211 = vmatmul.f32.gmra.mxu1 %v8548_v43  ;;  %1339 = vmatmul.f32.gmra.mxu3 %v8554_v50  ;;  %v13132_v12 = vand.u32 4294901760, %v8598_v30  ;;  %13134 = vst [vmem:[#allocation109_spill] sm:$0xff] %v8631_v55  ;;  %v8634_v50 = vsub.f32 %v534_v22, %v8616_v52 }
  0xeb   : > { %v8618_v10 = vpop.f32.mrf.mxu0 }
  0xec   : > { %13131 = vst [vmem:[#allocation107_spill] sm:$0xff] %v8618_v10  ;;  %v1042_v6 = vsub.f32 %v8598_v30, %v13132_v12  ;;  %v8628_v40 = vadd.f32 %v1272_v39, %v902_v1  ;;  %v441_v10 = vsel %vm352_vm1, %v311_v29, 0  ;;  %v787_v12 = vand.u32 4294901760, %v786_v49  ;;  %v312_v29 = vld [vmem:[%s7865_s11 + $0xf0] sm:$0xff] }
  0xed   : > { %v1276_v34 = vpop.f32.mrf.mxu3  ;;  %13135 = vst [vmem:[#allocation110_spill] sm:$0xff] %v8634_v50  ;;  %v8640_v39 = vand.u32 4294901760, %v441_v10  ;;  %v12614_v1 = vand.u32 4294901760, %v8631_v55  ;;  %v344_v30 = vld [vmem:[%s7865_s11 + $0x1f0] sm:$0xff] }
  0xee   : > { %13133 = vst [vmem:[#allocation108_spill] sm:$0xff] %v8628_v40  ;;  %780 = vmatmul.f32.gmra.mxu0 %v779_v13  ;;  %1036 = vmatmul.f32.gmra.mxu2 %v1035_v7  ;;  %v8642_v13 = vand.u32 4294901760, %v537_v60  ;;  %v1043_v22 = vand.u32 4294901760, %v1042_v6  ;;  %v12615_v7 = vand.u32 4294901760, %v8634_v50 }
  0xef   : > { %v8638_v0 = vpop.f32.mrf.mxu1  ;;  %13137 = vst [vmem:[#allocation112_spill] sm:$0xff] %v8640_v39  ;;  %v794_v6 = vsub.f32 %v8631_v55, %v12614_v1  ;;  %v345_v55 = vld [vmem:[%s7865_s11 + $0x1f8] sm:$0xff] }
  0xf0   : > { %13136 = vst [vmem:[#allocation111_spill] sm:$0xff] %v8638_v0  ;;  %v8656_v0 = vsub.f32 %v441_v10, %v8640_v39  ;;  %v540_v10 = vsel %vm352_vm1, %v344_v30, 0  ;;  %v313_v30 = vld [vmem:[%s7865_s11 + $0xf8] sm:$0xff] }
  0xf1   : > { %v909_v43 = vpop.f32.mrf.mxu2  ;;  %13138 = vst [vmem:[#allocation113_spill] sm:$0xff] %v8642_v13 }
  0xf2   : > { %v910_v36 = vadd.f32 %v8318_v15, %v909_v43  ;;  %1215 = vmatmul.f32.gmra.mxu1 %v8579_v48  ;;  %1343 = vmatmul.f32.gmra.mxu3 %v8581_v25  ;;  %v8659_v43 = vsub.f32 %v537_v60, %v8642_v13  ;;  %v1050_v25 = vsub.f32 %v8634_v50, %v12615_v7  ;;  %v795_v7 = vand.u32 4294901760, %v794_v6 }
  0xf3   : > { %v8649_v20 = vpop.f32.mrf.mxu0 }
  0xf4   : > { %13139 = vst [vmem:[#allocation114_spill] sm:$0xff] %v8649_v20  ;;  %v8653_v49 = vadd.f32 %v1276_v34, %v910_v36  ;;  %v444_v34 = vsel %vm352_vm1, %v312_v29, 0  ;;  %v1051_v50 = vand.u32 4294901760, %v1050_v25  ;;  %v8678_v29 = vand.u32 4294901760, %v540_v10 }
  0xf5   : > { %v1280_v40 = vpop.f32.mrf.mxu3  ;;  %13141 = vst [vmem:[#allocation116_spill] sm:$0xff] %v8659_v43 }
  0xf6   : > { %13140 = vst [vmem:[#allocation115_spill] sm:$0xff] %v8653_v49  ;;  %788 = vmatmul.f32.gmra.mxu0 %v787_v12  ;;  %1044 = vmatmul.f32.gmra.mxu2 %v1043_v22  ;;  %v8673_v49 = vand.u32 4294901760, %v444_v34  ;;  %v13145_v22 = vand.u32 4294901760, %v8656_v0  ;;  %v8696_v25 = vsub.f32 %v540_v10, %v8678_v29 }
  0xf7   : > { %v8668_v36 = vpop.f32.mrf.mxu1  ;;  %13143 = vst [vmem:[#allocation118_spill] sm:$0xff] %v8678_v29 }
  0xf8   : > { %13142 = vst [vmem:[#allocation117_spill] sm:$0xff] %v8668_v36  ;;  %v802_v48 = vsub.f32 %v8656_v0, %v13145_v22  ;;  %v8693_v6 = vsub.f32 %v444_v34, %v8673_v49  ;;  %v447_v22 = vsel %vm352_vm1, %v313_v30, 0 }
  0xf9   : > { %v917_v60 = vpop.f32.mrf.mxu2  ;;  %13148 = vst [vmem:[#allocation121_spill] sm:$0xff] %v8696_v25  ;;  %v8717_v30 = vand.u32 4294901760, %v447_v22 }
  0xfa   : > { %v918_v1 = vadd.f32 %v8318_v15, %v917_v60  ;;  %1219 = vmatmul.f32.gmra.mxu1 %v8614_v38  ;;  %1347 = vmatmul.f32.gmra.mxu3 %v8616_v52  ;;  %v13146_v60 = vand.u32 4294901760, %v8659_v43  ;;  %13147 = vst [vmem:[#allocation120_spill] sm:$0xff] %v8693_v6  ;;  %v543_v52 = vsel %vm352_vm1, %v345_v55, 0  ;;  %v803_v34 = vand.u32 4294901760, %v802_v48 }
  0xfb   : > { %v8680_v36 = vpop.f32.mrf.mxu0  ;;  %v8719_v48 = vand.u32 4294901760, %v543_v52 }
  0xfc   : > { %v8684_v20 = vadd.f32 %v1280_v40, %v918_v1  ;;  %v1058_v38 = vsub.f32 %v8659_v43, %v13146_v60  ;;  %v2732_v40 = vld [vmem:[%s12406_s3 + $0x38] sm:$0xff] }
  0xfd   : > { %v1284_v12 = vpop.f32.mrf.mxu3  ;;  %13152 = vst [vmem:[#allocation125_spill] sm:$0xff] %v8719_v48 }
  0xfe   : > { %13144 = vst [vmem:[#allocation119_spill] sm:$0xff] %v8684_v20  ;;  %796 = vmatmul.f32.gmra.mxu0 %v795_v7  ;;  %1052 = vmatmul.f32.gmra.mxu2 %v1051_v50  ;;  %v8705_v20 = vand.u32 4294901760, %v2732_v40  ;;  %v1059_v43 = vand.u32 4294901760, %v1058_v38 }
  0xff   : > { %v8701_v1 = vpop.f32.mrf.mxu1 }
 0x100   : > { %13149 = vst [vmem:[#allocation122_spill] sm:$0xff] %v8701_v1  ;;  %2939 = vmatpush.msra.mxu2 %v8705_v20  ;;  %v8710_v7 = vsub.f32 %v2732_v40, %v8705_v20  ;;  %4142 = vmatpush.msra.mxu1 %v8705_v20 }
 0x101   : > { %13150 = vst [vmem:[#allocation123_spill] sm:$0xff] %v8705_v20  ;;  %v925_v60 = vpop.f32.mrf.mxu2 }
 0x102   : > { %13151 = vst [vmem:[#allocation124_spill] sm:$0xff] %v8710_v7  ;;  %v926_v10 = vadd.f32 %v8318_v15, %v925_v60  ;;  %1223 = vmatmul.f32.gmra.mxu1 %v8640_v39  ;;  %1351 = vmatmul.f32.gmra.mxu3 %v8642_v13  ;;  %v12635_v50 = vand.u32 4294901760, %v8710_v7  ;;  %v13155_v60 = vand.u32 4294901760, %v8693_v6  ;;  %v13156_v13 = vand.u32 4294901760, %v8696_v25 }
 0x103   : > { %v8721_v38 = vpop.f32.mrf.mxu0  ;;  %3790 = vmatpush.msra.mxu0 %v8710_v7  ;;  %v8737_v39 = vsub.f32 %v447_v22, %v8717_v30 }
 0x104   : > { %13153 = vst [vmem:[#allocation126_spill] sm:$0xff] %v8721_v38  ;;  %v8725_v40 = vadd.f32 %v1284_v12, %v926_v10  ;;  %v810_v1 = vsub.f32 %v8693_v6, %v13155_v60  ;;  %v3478_v55 = vsub.f32 %v8710_v7, %v12635_v50  ;;  %v1066_v38 = vsub.f32 %v8696_v25, %v13156_v13 }
 0x105   : > { %v1288_v20 = vpop.f32.mrf.mxu3  ;;  %v8740_v12 = vsub.f32 %v543_v52, %v8719_v48  ;;  %v12638_v13 = vand.u32 4294901760, %v8737_v39 }
 0x106   : > { %13154 = vst [vmem:[#allocation127_spill] sm:$0xff] %v8725_v40  ;;  %804 = vmatmul.f32.gmra.mxu0 %v803_v34  ;;  %1060 = vmatmul.f32.gmra.mxu2 %v1059_v43  ;;  %v3479_v40 = vand.u32 4294901760, %v3478_v55  ;;  %v811_v6 = vand.u32 4294901760, %v810_v1  ;;  %v1067_v43 = vand.u32 4294901760, %v1066_v38 }
 0x107   : > { %13157 = vst [vmem:[#allocation128_spill] sm:$0xff] %v8740_v12  ;;  %v8742_v10 = vpop.f32.mrf.mxu1  ;;  %v12641_v22 = vand.u32 4294901760, %v8740_v12  ;;  %v818_v1 = vsub.f32 %v8737_v39, %v12638_v13 }
 0x108   : > { %3480 = vmatpush.msra.mxu3 %v3479_v40 }
 0x109   : > { %v933_v60 = vpop.f32.mrf.mxu2  ;;  %v1074_v55 = vsub.f32 %v8740_v12, %v12641_v22 }
 0x10a   : > { %v934_v50 = vadd.f32 %v8318_v15, %v933_v60  ;;  %1227 = vmatmul.f32.gmra.mxu1 %v8673_v49  ;;  %1355 = vmatmul.f32.gmra.mxu3 %v8678_v29 }
 0x10b   : > { %v8749_v34 = vpop.f32.mrf.mxu0 }
 0x10c   : > { %v8751_v52 = vadd.f32 %v1288_v20, %v934_v50  ;;  %v819_v20 = vand.u32 4294901760, %v818_v1 }
 0x10d   : > { %v1292_v25 = vpop.f32.mrf.mxu3 }
 0x10e   : > { %13158 = vst [vmem:[#allocation129_spill] sm:$0xff] %v8751_v52  ;;  %812 = vmatmul.f32.gmra.mxu0 %v811_v6  ;;  %1068 = vmatmul.f32.gmra.mxu2 %v1067_v43  ;;  %v1075_v6 = vand.u32 4294901760, %v1074_v55 }
 0x10f   : > { %v8759_v38 = vpop.f32.mrf.mxu1 }
 0x111   : > { %v941_v40 = vpop.f32.mrf.mxu2 }
 0x112   : > { %v942_v60 = vadd.f32 %v8318_v15, %v941_v40  ;;  %1231 = vmatmul.f32.gmra.mxu1 %v8717_v30  ;;  %1359 = vmatmul.f32.gmra.mxu3 %v8719_v48  ;;  %v13160_v40 = vand.u32 4294901760, %v7888_v28 }
 0x113   : > { %v8764_v50 = vpop.f32.mrf.mxu0 }
 0x114   : > { %v8766_v43 = vadd.f32 %v1292_v25, %v942_v60 }
 0x115   : > { %v1296_v13 = vpop.f32.mrf.mxu3 }
 0x116   : > { %13159 = vst [vmem:[#allocation130_spill] sm:$0xff] %v8766_v43  ;;  %820 = vmatmul.f32.gmra.mxu0 %v819_v20  ;;  %1076 = vmatmul.f32.gmra.mxu2 %v1075_v6 }
 0x117   : > { %v8768_v29 = vpop.f32.mrf.mxu1 }
 0x119   : > { %v949_v22 = vpop.f32.mrf.mxu2 }
 0x11a   : > { %v950_v12 = vadd.f32 %v8318_v15, %v949_v22  ;;  %1725 = vmatmul.f32.vlgmr.msrb.gmra.mxu3 %v13160_v40  ;;  %2405 = vmatmul.f32.vlgmr.msrb.gmra.mxu1 %v7878_v21  ;;  %v13162_v22 = vand.u32 4294901760, %v7896_v31 }
 0x11b   : > { %v8774_v48 = vpop.f32.mrf.mxu0 }
 0x11c   : > { %v8776_v1 = vadd.f32 %v1296_v13, %v950_v12 }
 0x11d   : > { %v1300_v55 = vpop.f32.mrf.mxu3 }
 0x11e   : > { %13161 = vst [vmem:[#allocation131_spill] sm:$0xff] %v8776_v1  ;;  %1385 = vmatmul.f32.vlgmr.msrb.gmra.mxu2 %v7888_v28  ;;  %2130 = vmatmul.f32.vlgmr.msrb.gmra.mxu0 %v7878_v21 }
 0x11f   : > { %v8780_v25 = vpop.f32.mrf.mxu1 }
 0x121   : > { %v957_v60 = vpop.f32.mrf.mxu2 }
 0x122   : > { %v958_v20 = vadd.f32 %v8318_v15, %v957_v60  ;;  %1731 = vmatmul.f32.gmra.mxu3 %v13162_v22  ;;  %2409 = vmatmul.f32.gmra.mxu1 %v7882_v23  ;;  %v13164_v60 = vand.u32 4294901760, %v7920_v45 }
 0x123   : > { %v8786_v6 = vpop.f32.mrf.mxu0 }
 0x124   : > { %v8788_v40 = vadd.f32 %v1300_v55, %v958_v20 }
 0x125   : > { %v1304_v12 = vpop.f32.mrf.mxu3 }
 0x126   : > { %13163 = vst [vmem:[#allocation132_spill] sm:$0xff] %v8788_v40  ;;  %1390 = vmatmul.f32.gmra.mxu2 %v7896_v31  ;;  %2134 = vmatmul.f32.gmra.mxu0 %v7882_v23 }
 0x127   : > { %v8792_v21 = vpop.f32.mrf.mxu1 }
 0x129   : > { %v965_v28 = vpop.f32.mrf.mxu2 }
 0x12a   : > { %v966_v13 = vadd.f32 %v8318_v15, %v965_v28  ;;  %1737 = vmatmul.f32.gmra.mxu3 %v13164_v60  ;;  %2413 = vmatmul.f32.gmra.mxu1 %v7903_v35  ;;  %v13166_v28 = vand.u32 4294901760, %v7946_v59 }
 0x12b   : > { %v8798_v22 = vpop.f32.mrf.mxu0 }
 0x12c   : > { %v8800_v1 = vadd.f32 %v1304_v12, %v966_v13 }
 0x12d   : > { %v1308_v55 = vpop.f32.mrf.mxu3 }
 0x12e   : > { %13165 = vst [vmem:[#allocation133_spill] sm:$0xff] %v8800_v1  ;;  %1395 = vmatmul.f32.gmra.mxu2 %v7920_v45  ;;  %2138 = vmatmul.f32.gmra.mxu0 %v7903_v35 }
 0x12f   : > { %v8804_v23 = vpop.f32.mrf.mxu1 }
 0x131   : > { %v973_v31 = vpop.f32.mrf.mxu2 }
 0x132   : > { %v974_v20 = vadd.f32 %v8318_v15, %v973_v31  ;;  %1743 = vmatmul.f32.gmra.mxu3 %v13166_v28  ;;  %2417 = vmatmul.f32.gmra.mxu1 %v7935_v51  ;;  %v13168_v31 = vand.u32 4294901760, %v7976_v11 }
 0x133   : > { %v8810_v60 = vpop.f32.mrf.mxu0 }
 0x134   : > { %v8812_v40 = vadd.f32 %v1308_v55, %v974_v20 }
 0x135   : > { %v1312_v12 = vpop.f32.mrf.mxu3 }
 0x136   : > { %13167 = vst [vmem:[#allocation134_spill] sm:$0xff] %v8812_v40  ;;  %1400 = vmatmul.f32.gmra.mxu2 %v7946_v59  ;;  %2142 = vmatmul.f32.gmra.mxu0 %v7935_v51  ;;  %v2731_v51 = vld [vmem:[%s12406_s3 + $0x30] sm:$0xff] }
 0x137   : > { %v8816_v35 = vpop.f32.mrf.mxu1  ;;  %v8833_v20 = vand.u32 4294901760, %v2731_v51 }
 0x139   : > { %v981_v45 = vpop.f32.mrf.mxu2  ;;  %13170 = vst [vmem:[#allocation136_spill] sm:$0xff] %v8833_v20  ;;  %2941 = vmatpush.msra.mxu2 %v8833_v20  ;;  %4144 = vmatpush.msra.mxu1 %v8833_v20 }
 0x13a   : > { %v982_v13 = vadd.f32 %v8318_v15, %v981_v45  ;;  %1749 = vmatmul.f32.gmra.mxu3 %v13168_v31  ;;  %2421 = vmatmul.f32.gmra.mxu1 %v7963_v5  ;;  %v8837_v31 = vsub.f32 %v2731_v51, %v8833_v20  ;;  %v13174_v20 = vand.u32 4294901760, %v8021_v58 }
 0x13b   : > { %v8822_v28 = vpop.f32.mrf.mxu0 }
 0x13c   : > { %v8824_v1 = vadd.f32 %v1312_v12, %v982_v13  ;;  %13171 = vst [vmem:[#allocation137_spill] sm:$0xff] %v8837_v31  ;;  %v12647_v13 = vand.u32 4294901760, %v8837_v31  ;;  %3793 = vmatpush.msra.mxu0 %v8837_v31 }
 0x13d   : > { %v1316_v55 = vpop.f32.mrf.mxu3 }
 0x13e   : > { %13169 = vst [vmem:[#allocation135_spill] sm:$0xff] %v8824_v1  ;;  %1405 = vmatmul.f32.gmra.mxu2 %v7976_v11  ;;  %2146 = vmatmul.f32.gmra.mxu0 %v7963_v5  ;;  %v13172_v5 = vand.u32 4294901760, %v7994_v26  ;;  %v3484_v51 = vsub.f32 %v8837_v31, %v12647_v13  ;;  %v13201_v31 = vld [vmem:[#allocation45_spill] sm:$0xff] }
 0x13f   : > { %v8831_v59 = vpop.f32.mrf.mxu1 }
 0x141   : > { %v989_v45 = vpop.f32.mrf.mxu2 }
 0x142   : > { %v990_v11 = vadd.f32 %v8318_v15, %v989_v45  ;;  %1755 = vmatmul.f32.gmra.mxu3 %v13172_v5  ;;  %2425 = vmatmul.f32.gmra.mxu1 %v7983_v16  ;;  %v3485_v5 = vand.u32 4294901760, %v3484_v51 }
 0x143   : > { %v8844_v12 = vpop.f32.mrf.mxu0 }
 0x144   : > { %v8848_v1 = vadd.f32 %v1316_v55, %v990_v11  ;;  %3486 = vmatpush.msra.mxu3 %v3485_v5 }
 0x145   : > { %v1320_v40 = vpop.f32.mrf.mxu3 }
 0x146   : > { %13173 = vst [vmem:[#allocation138_spill] sm:$0xff] %v8848_v1  ;;  %1410 = vmatmul.f32.gmra.mxu2 %v7994_v26  ;;  %2150 = vmatmul.f32.gmra.mxu0 %v7983_v16  ;;  %v8971_v1 = vld [vmem:[%s12405_s2] ss:$0 sm:$0xff] }
 0x147   : > { %v8855_v45 = vpop.f32.mrf.mxu1 }
 0x149   : > { %v997_v43 = vpop.f32.mrf.mxu2 }
 0x14a   : > { %v998_v52 = vadd.f32 %v8318_v15, %v997_v43  ;;  %1761 = vmatmul.f32.gmra.mxu3 %v13174_v20  ;;  %2429 = vmatmul.f32.gmra.mxu1 %v8008_v44  ;;  %v13176_v43 = vand.u32 4294901760, %v8048_v24 }
 0x14b   : > { %v8861_v55 = vpop.f32.mrf.mxu0 }
 0x14c   : > { %v8863_v11 = vadd.f32 %v1320_v40, %v998_v52 }
 0x14d   : > { %v1324_v13 = vpop.f32.mrf.mxu3 }
 0x14e   : > { %13175 = vst [vmem:[#allocation139_spill] sm:$0xff] %v8863_v11  ;;  %1415 = vmatmul.f32.gmra.mxu2 %v8021_v58  ;;  %2154 = vmatmul.f32.gmra.mxu0 %v8008_v44 }
 0x14f   : > { %v8867_v16 = vpop.f32.mrf.mxu1 }
 0x151   : > { %v1005_v26 = vpop.f32.mrf.mxu2 }
 0x152   : > { %v1006_v51 = vadd.f32 %v8318_v15, %v1005_v26  ;;  %1767 = vmatmul.f32.gmra.mxu3 %v13176_v43  ;;  %2433 = vmatmul.f32.gmra.mxu1 %v8035_v9  ;;  %v13178_v26 = vand.u32 4294901760, %v8066_v63 }
 0x153   : > { %v8873_v20 = vpop.f32.mrf.mxu0 }
 0x154   : > { %v8875_v5 = vadd.f32 %v1324_v13, %v1006_v51 }
 0x155   : > { %v1328_v52 = vpop.f32.mrf.mxu3 }
 0x156   : > { %13177 = vst [vmem:[#allocation140_spill] sm:$0xff] %v8875_v5  ;;  %1420 = vmatmul.f32.gmra.mxu2 %v8048_v24  ;;  %2158 = vmatmul.f32.gmra.mxu0 %v8035_v9 }
 0x157   : > { %v8879_v44 = vpop.f32.mrf.mxu1 }
 0x159   : > { %v1013_v58 = vpop.f32.mrf.mxu2 }
 0x15a   : > { %v1014_v40 = vadd.f32 %v8318_v15, %v1013_v58  ;;  %1773 = vmatmul.f32.gmra.mxu3 %v13178_v26  ;;  %2437 = vmatmul.f32.gmra.mxu1 %v8055_v42  ;;  %v13180_v58 = vand.u32 4294901760, %v8093_v61 }
 0x15b   : > { %v8885_v43 = vpop.f32.mrf.mxu0 }
 0x15c   : > { %v8887_v11 = vadd.f32 %v1328_v52, %v1014_v40 }
 0x15d   : > { %v1332_v13 = vpop.f32.mrf.mxu3 }
 0x15e   : > { %13179 = vst [vmem:[#allocation141_spill] sm:$0xff] %v8887_v11  ;;  %1425 = vmatmul.f32.gmra.mxu2 %v8066_v63  ;;  %2162 = vmatmul.f32.gmra.mxu0 %v8055_v42 }
 0x15f   : > { %v8891_v9 = vpop.f32.mrf.mxu1 }
 0x161   : > { %v1021_v24 = vpop.f32.mrf.mxu2 }
 0x162   : > { %v1022_v51 = vadd.f32 %v8318_v15, %v1021_v24  ;;  %1779 = vmatmul.f32.gmra.mxu3 %v13180_v58  ;;  %2441 = vmatmul.f32.gmra.mxu1 %v8080_v17  ;;  %v13182_v24 = vand.u32 4294901760, %v8120_v57 }
 0x163   : > { %v8897_v26 = vpop.f32.mrf.mxu0 }
 0x164   : > { %v8899_v5 = vadd.f32 %v1332_v13, %v1022_v51 }
 0x165   : > { %v1336_v52 = vpop.f32.mrf.mxu3 }
 0x166   : > { %13181 = vst [vmem:[#allocation142_spill] sm:$0xff] %v8899_v5  ;;  %1430 = vmatmul.f32.gmra.mxu2 %v8093_v61  ;;  %2166 = vmatmul.f32.gmra.mxu0 %v8080_v17 }
 0x167   : > { %v8903_v42 = vpop.f32.mrf.mxu1 }
 0x169   : > { %v1029_v63 = vpop.f32.mrf.mxu2 }
 0x16a   : > { %v1030_v40 = vadd.f32 %v8318_v15, %v1029_v63  ;;  %1785 = vmatmul.f32.gmra.mxu3 %v13182_v24  ;;  %2445 = vmatmul.f32.gmra.mxu1 %v8107_v41  ;;  %v13184_v63 = vand.u32 4294901760, %v8138_v14 }
 0x16b   : > { %v8909_v58 = vpop.f32.mrf.mxu0 }
 0x16c   : > { %v8911_v11 = vadd.f32 %v1336_v52, %v1030_v40 }
 0x16d   : > { %v1340_v13 = vpop.f32.mrf.mxu3 }
 0x16e   : > { %13183 = vst [vmem:[#allocation143_spill] sm:$0xff] %v8911_v11  ;;  %1435 = vmatmul.f32.gmra.mxu2 %v8120_v57  ;;  %2170 = vmatmul.f32.gmra.mxu0 %v8107_v41 }
 0x16f   : > { %v8915_v17 = vpop.f32.mrf.mxu1 }
 0x171   : > { %v1037_v61 = vpop.f32.mrf.mxu2 }
 0x172   : > { %v1038_v51 = vadd.f32 %v8318_v15, %v1037_v61  ;;  %1791 = vmatmul.f32.gmra.mxu3 %v13184_v63  ;;  %2449 = vmatmul.f32.gmra.mxu1 %v8127_v56  ;;  %v13186_v61 = vand.u32 4294901760, %v8165_v19 }
 0x173   : > { %v8921_v24 = vpop.f32.mrf.mxu0 }
 0x174   : > { %v8923_v5 = vadd.f32 %v1340_v13, %v1038_v51 }
 0x175   : > { %v1344_v52 = vpop.f32.mrf.mxu3 }
 0x176   : > { %13185 = vst [vmem:[#allocation144_spill] sm:$0xff] %v8923_v5  ;;  %1440 = vmatmul.f32.gmra.mxu2 %v8138_v14  ;;  %2174 = vmatmul.f32.gmra.mxu0 %v8127_v56  ;;  %v2730_v56 = vld [vmem:[%s12406_s3 + $0x28] sm:$0xff] }
 0x177   : > { %v8927_v41 = vpop.f32.mrf.mxu1  ;;  %v8944_v51 = vand.u32 4294901760, %v2730_v56 }
 0x179   : > { %v1045_v57 = vpop.f32.mrf.mxu2  ;;  %13188 = vst [vmem:[#allocation146_spill] sm:$0xff] %v8944_v51  ;;  %2943 = vmatpush.msra.mxu2 %v8944_v51  ;;  %4146 = vmatpush.msra.mxu1 %v8944_v51 }
 0x17a   : > { %v1046_v40 = vadd.f32 %v8318_v15, %v1045_v57  ;;  %1797 = vmatmul.f32.gmra.mxu3 %v13186_v61  ;;  %2453 = vmatmul.f32.gmra.mxu1 %v8152_v47  ;;  %v8948_v61 = vsub.f32 %v2730_v56, %v8944_v51 }
 0x17b   : > { %v8933_v63 = vpop.f32.mrf.mxu0 }
 0x17c   : > { %v8935_v11 = vadd.f32 %v1344_v52, %v1046_v40  ;;  %13189 = vst [vmem:[#allocation147_spill] sm:$0xff] %v8948_v61  ;;  %v12648_v40 = vand.u32 4294901760, %v8948_v61  ;;  %3796 = vmatpush.msra.mxu0 %v8948_v61 }
 0x17d   : > { %v1348_v13 = vpop.f32.mrf.mxu3 }
 0x17e   : > { %13187 = vst [vmem:[#allocation145_spill] sm:$0xff] %v8935_v11  ;;  %1445 = vmatmul.f32.gmra.mxu2 %v8165_v19  ;;  %2178 = vmatmul.f32.gmra.mxu0 %v8152_v47  ;;  %v13190_v47 = vand.u32 4294901760, %v8192_v4  ;;  %v3490_v56 = vsub.f32 %v8948_v61, %v12648_v40 }
 0x17f   : > { %v8942_v14 = vpop.f32.mrf.mxu1 }
 0x181   : > { %v1053_v57 = vpop.f32.mrf.mxu2 }
 0x182   : > { %v1054_v19 = vadd.f32 %v8318_v15, %v1053_v57  ;;  %1803 = vmatmul.f32.gmra.mxu3 %v13190_v47  ;;  %2457 = vmatmul.f32.gmra.mxu1 %v8179_v2  ;;  %v3491_v57 = vand.u32 4294901760, %v3490_v56 }
 0x183   : > { %v8955_v52 = vpop.f32.mrf.mxu0 }
 0x184   : > { %v8959_v11 = vadd.f32 %v1348_v13, %v1054_v19  ;;  %3492 = vmatpush.msra.mxu3 %v3491_v57  ;;  %v13192_v19 = vand.u32 4294901760, %v8210_v33 }
 0x185   : > { %v1352_v5 = vpop.f32.mrf.mxu3 }
 0x186   : > { %13191 = vst [vmem:[#allocation148_spill] sm:$0xff] %v8959_v11  ;;  %1450 = vmatmul.f32.gmra.mxu2 %v8192_v4  ;;  %2182 = vmatmul.f32.gmra.mxu0 %v8179_v2 }
 0x187   : > { %v8966_v15 = vpop.f32.mrf.mxu1 }
 0x189   : > { %v1061_v47 = vpop.f32.mrf.mxu2 }
 0x18a   : > { %v1062_v13 = vadd.f32 %v8971_v1, %v1061_v47  ;;  %1809 = vmatmul.f32.gmra.mxu3 %v13192_v19  ;;  %2461 = vmatmul.f32.gmra.mxu1 %v8199_v18  ;;  %v13195_v47 = vand.u32 4294901760, %v8237_v32 }
 0x18b   : > { %v8977_v4 = vpop.f32.mrf.mxu0 }
 0x18c   : > { %v8979_v2 = vadd.f32 %v1352_v5, %v1062_v13 }
 0x18d   : > { %v1356_v40 = vpop.f32.mrf.mxu3 }
 0x18e   : > { %13193 = vst [vmem:[#allocation149_spill] sm:$0xff] %v8979_v2  ;;  %1455 = vmatmul.f32.gmra.mxu2 %v8210_v33  ;;  %2186 = vmatmul.f32.gmra.mxu0 %v8199_v18  ;;  %v574_v2 = vadd.f32 %v8971_v1, %v8305_v37  ;;  %v582_v37 = vadd.f32 %v8971_v1, %v13201_v31 }
 0x18f   : > { %v8983_v56 = vpop.f32.mrf.mxu1 }
 0x190   : > { %13194 = vst [vmem:[#allocation150_spill] sm:$0xff] %v8983_v56  ;;  %v13206_v56 = vld [vmem:[#allocation38_spill] sm:$0xff] }
 0x191   : > { %v1069_v57 = vpop.f32.mrf.mxu2 }
 0x192   : > { %v1070_v11 = vadd.f32 %v8971_v1, %v1069_v57  ;;  %1815 = vmatmul.f32.gmra.mxu3 %v13195_v47  ;;  %2465 = vmatmul.f32.gmra.mxu1 %v8224_v53  ;;  %v13198_v57 = vand.u32 4294901760, %v8264_v8 }
 0x193   : > { %v8989_v19 = vpop.f32.mrf.mxu0 }
 0x194   : > { %13196 = vst [vmem:[#allocation151_spill] sm:$0xff] %v8989_v19  ;;  %v8991_v51 = vadd.f32 %v1356_v40, %v1070_v11  ;;  %v13237_v19 = vld [vmem:[#allocation71_spill] sm:$0xff] }
 0x195   : > { %v1360_v5 = vpop.f32.mrf.mxu3 }
 0x196   : > { %13197 = vst [vmem:[#allocation152_spill] sm:$0xff] %v8991_v51  ;;  %1460 = vmatmul.f32.gmra.mxu2 %v8237_v32  ;;  %2190 = vmatmul.f32.gmra.mxu0 %v8224_v53  ;;  %v1109_v32 = vadd.f32 %v8294_v62, %v574_v2 }
 0x197   : > { %v2406_v18 = vpop.f32.mrf.mxu1 }
 0x199   : > { %v1077_v33 = vpop.f32.mrf.mxu2 }
 0x19a   : > { %v1078_v13 = vadd.f32 %v8971_v1, %v1077_v33  ;;  %1821 = vmatmul.f32.gmra.mxu3 %v13198_v57  ;;  %2469 = vmatmul.f32.gmra.mxu1 %v8251_v46  ;;  %v13200_v57 = vand.u32 4294901760, %v8282_v27 }
 0x19b   : > { %v2131_v47 = vpop.f32.mrf.mxu0 }
 0x19c   : > { %v9001_v11 = vadd.f32 %v1360_v5, %v1078_v13 }
 0x19d   : > { %v1726_v40 = vpop.f32.mrf.mxu3 }
 0x19e   : > { %13199 = vst [vmem:[#allocation153_spill] sm:$0xff] %v9001_v11  ;;  %1465 = vmatmul.f32.gmra.mxu2 %v8264_v8  ;;  %2194 = vmatmul.f32.gmra.mxu0 %v8251_v46  ;;  %v13203_v8 = vld [vmem:[#allocation42_spill] sm:$0xff] }
 0x19f   : > { %v2410_v53 = vpop.f32.mrf.mxu1  ;;  %v1113_v2 = vadd.f32 %v13203_v8, %v582_v37 }
 0x1a1   : > { %v1386_v33 = vpop.f32.mrf.mxu2 }
 0x1a2   : > { %v1387_v51 = vadd.f32 %v1386_v33, %v1109_v32  ;;  %1827 = vmatmul.f32.gmra.mxu3 %v13200_v57  ;;  %2473 = vmatmul.f32.gmra.mxu1 %v8271_v3  ;;  %v13204_v57 = vld [vmem:[#allocation40_spill] sm:$0xff] }
 0x1a3   : > { %v2135_v61 = vpop.f32.mrf.mxu0  ;;  %v13205_v7 = vand.u32 4294901760, %v13204_v57 }
 0x1a4   : > { %v1727_v5 = vadd.f32 %v1726_v40, %v1387_v51  ;;  %v13207_v51 = vld [vmem:[#allocation52_spill] sm:$0xff] }
 0x1a5   : > { %v1732_v13 = vpop.f32.mrf.mxu3 }
 0x1a6   : > { %v2132_v11 = vadd.f32 %v2131_v47, %v1727_v5  ;;  %1470 = vmatmul.f32.gmra.mxu2 %v8282_v27  ;;  %2198 = vmatmul.f32.gmra.mxu0 %v8271_v3  ;;  %v590_v47 = vadd.f32 %v8971_v1, %v13207_v51 }
 0x1a7   : > { %v2414_v46 = vpop.f32.mrf.mxu1 }
 0x1a8   : > { %v9013_v62 = vadd.f32 %v2406_v18, %v2132_v11  ;;  %v13209_v11 = vld [vmem:[#allocation49_spill] sm:$0xff] }
 0x1a9   : > { %v1391_v32 = vpop.f32.mrf.mxu2  ;;  %v1117_v37 = vadd.f32 %v13209_v11, %v590_v47  ;;  %v13215_v47 = vld [vmem:[#allocation56_spill] sm:$0xff] }
 0x1aa   : > { %13202 = vst [vmem:[#allocation45_spill] sm:$0xff] %v9013_v62  ;;  %v1392_v33 = vadd.f32 %v1391_v32, %v1113_v2  ;;  %1833 = vmatmul.f32.gmra.mxu3 %v13205_v7  ;;  %2477 = vmatmul.f32.gmra.mxu1 %v13206_v56  ;;  %v13210_v2 = vld [vmem:[#allocation46_spill] sm:$0xff]  ;;  %v13212_v62 = vld [vmem:[#allocation43_spill] sm:$0xff] }
 0x1ab   : > { %v2139_v31 = vpop.f32.mrf.mxu0  ;;  %v13211_v32 = vand.u32 4294901760, %v13210_v2 }
 0x1ac   : > { %v1733_v40 = vadd.f32 %v1732_v13, %v1392_v33  ;;  %v13213_v13 = vld [vmem:[#allocation59_spill] sm:$0xff] }
 0x1ad   : > { %v1738_v27 = vpop.f32.mrf.mxu3 }
 0x1ae   : > { %v2136_v5 = vadd.f32 %v2135_v61, %v1733_v40  ;;  %1475 = vmatmul.f32.gmra.mxu2 %v13204_v57  ;;  %2202 = vmatmul.f32.gmra.mxu0 %v13206_v56  ;;  %v598_v61 = vadd.f32 %v8971_v1, %v13213_v13 }
 0x1af   : > { %v2418_v3 = vpop.f32.mrf.mxu1 }
 0x1b0   : > { %v9023_v18 = vadd.f32 %v2410_v53, %v2136_v5  ;;  %v1121_v5 = vadd.f32 %v13215_v47, %v598_v61  ;;  %v13221_v61 = vld [vmem:[#allocation63_spill] sm:$0xff] }
 0x1b1   : > { %v1396_v8 = vpop.f32.mrf.mxu2 }
 0x1b2   : > { %13208 = vst [vmem:[#allocation42_spill] sm:$0xff] %v9023_v18  ;;  %v1397_v7 = vadd.f32 %v1396_v8, %v1117_v37  ;;  %1839 = vmatmul.f32.gmra.mxu3 %v13211_v32  ;;  %2481 = vmatmul.f32.gmra.mxu1 %v13212_v62  ;;  %v13216_v8 = vld [vmem:[#allocation53_spill] sm:$0xff]  ;;  %v13218_v18 = vld [vmem:[#allocation50_spill] sm:$0xff] }
 0x1b3   : > { %v2143_v51 = vpop.f32.mrf.mxu0  ;;  %v13217_v32 = vand.u32 4294901760, %v13216_v8 }
 0x1b4   : > { %v1739_v33 = vadd.f32 %v1738_v27, %v1397_v7  ;;  %v13219_v27 = vld [vmem:[#allocation66_spill] sm:$0xff] }
 0x1b5   : > { %v1744_v57 = vpop.f32.mrf.mxu3 }
 0x1b6   : > { %v2140_v40 = vadd.f32 %v2139_v31, %v1739_v33  ;;  %1480 = vmatmul.f32.gmra.mxu2 %v13210_v2  ;;  %2206 = vmatmul.f32.gmra.mxu0 %v13212_v62  ;;  %v606_v31 = vadd.f32 %v8971_v1, %v13219_v27 }
 0x1b7   : > { %v2422_v56 = vpop.f32.mrf.mxu1 }
 0x1b8   : > { %v9033_v53 = vadd.f32 %v2414_v46, %v2140_v40  ;;  %v1125_v40 = vadd.f32 %v13221_v61, %v606_v31 }
 0x1b9   : > { %v1401_v11 = vpop.f32.mrf.mxu2 }
 0x1ba   : > { %13214 = vst [vmem:[#allocation40_spill] sm:$0xff] %v9033_v53  ;;  %v1402_v37 = vadd.f32 %v1401_v11, %v1121_v5  ;;  %1845 = vmatmul.f32.gmra.mxu3 %v13217_v32  ;;  %2485 = vmatmul.f32.gmra.mxu1 %v13218_v18  ;;  %v13222_v11 = vld [vmem:[#allocation60_spill] sm:$0xff]  ;;  %v13224_v53 = vld [vmem:[#allocation57_spill] sm:$0xff] }
 0x1bb   : > { %v2147_v13 = vpop.f32.mrf.mxu0  ;;  %v13223_v32 = vand.u32 4294901760, %v13222_v11 }
 0x1bc   : > { %v1745_v7 = vadd.f32 %v1744_v57, %v1402_v37 }
 0x1bd   : > { %v1750_v2 = vpop.f32.mrf.mxu3 }
 0x1be   : > { %v2144_v33 = vadd.f32 %v2143_v51, %v1745_v7  ;;  %1485 = vmatmul.f32.gmra.mxu2 %v13216_v8  ;;  %2210 = vmatmul.f32.gmra.mxu0 %v13218_v18  ;;  %v2729_v51 = vld [vmem:[%s12406_s3 + $0x20] sm:$0xff]  ;;  %v13226_v18 = vld [vmem:[#allocation73_spill] sm:$0xff] }
 0x1bf   : > { %v2426_v46 = vpop.f32.mrf.mxu1  ;;  %v9052_v37 = vand.u32 4294901760, %v2729_v51 }
 0x1c0   : > { %v9043_v62 = vadd.f32 %v2418_v3, %v2144_v33  ;;  %v614_v3 = vadd.f32 %v8971_v1, %v13226_v18 }
 0x1c1   : > { %v1406_v47 = vpop.f32.mrf.mxu2  ;;  %13225 = vst [vmem:[#allocation52_spill] sm:$0xff] %v9052_v37  ;;  %2945 = vmatpush.msra.mxu2 %v9052_v37  ;;  %v9058_v31 = vsub.f32 %v2729_v51, %v9052_v37  ;;  %4148 = vmatpush.msra.mxu1 %v9052_v37 }
 0x1c2   : > { %13220 = vst [vmem:[#allocation38_spill] sm:$0xff] %v9043_v62  ;;  %v1407_v5 = vadd.f32 %v1406_v47, %v1125_v40  ;;  %1851 = vmatmul.f32.gmra.mxu3 %v13223_v32  ;;  %2489 = vmatmul.f32.gmra.mxu1 %v13224_v53  ;;  %v13233_v62 = vld [vmem:[#allocation80_spill] sm:$0xff] }
 0x1c3   : > { %v2151_v57 = vpop.f32.mrf.mxu0  ;;  %13227 = vst [vmem:[#allocation49_spill] sm:$0xff] %v9058_v31  ;;  %v12654_v61 = vand.u32 4294901760, %v9058_v31  ;;  %3799 = vmatpush.msra.mxu0 %v9058_v31  ;;  %v622_v37 = vadd.f32 %v8971_v1, %v13233_v62 }
 0x1c4   : > { %v1751_v8 = vadd.f32 %v1750_v2, %v1407_v5  ;;  %v13229_v2 = vld [vmem:[#allocation70_spill] sm:$0xff] }
 0x1c5   : > { %v1756_v27 = vpop.f32.mrf.mxu3  ;;  %v1129_v47 = vadd.f32 %v13229_v2, %v614_v3  ;;  %v3496_v32 = vsub.f32 %v9058_v31, %v12654_v61  ;;  %v13235_v31 = vld [vmem:[#allocation74_spill] sm:$0xff] }
 0x1c6   : > { %v2148_v7 = vadd.f32 %v2147_v13, %v1751_v8  ;;  %1490 = vmatmul.f32.gmra.mxu2 %v13222_v11  ;;  %2214 = vmatmul.f32.gmra.mxu0 %v13224_v53  ;;  %v13230_v13 = vld [vmem:[#allocation67_spill] sm:$0xff]  ;;  %v13232_v11 = vld [vmem:[#allocation64_spill] sm:$0xff] }
 0x1c7   : > { %v2430_v33 = vpop.f32.mrf.mxu1  ;;  %v13231_v18 = vand.u32 4294901760, %v13230_v13  ;;  %v3497_v8 = vand.u32 4294901760, %v3496_v32  ;;  %v13236_v32 = vand.u32 4294901760, %v13235_v31 }
 0x1c8   : > { %v9065_v40 = vadd.f32 %v2422_v56, %v2148_v7 }
 0x1c9   : > { %v1411_v5 = vpop.f32.mrf.mxu2  ;;  %3498 = vmatpush.msra.mxu3 %v3497_v8 }
 0x1ca   : > { %13228 = vst [vmem:[#allocation46_spill] sm:$0xff] %v9065_v40  ;;  %v1412_v51 = vadd.f32 %v1411_v5, %v1129_v47  ;;  %1857 = vmatmul.f32.gmra.mxu3 %v13231_v18  ;;  %2493 = vmatmul.f32.gmra.mxu1 %v13232_v11  ;;  %v13234_v5 = vld [vmem:[#allocation77_spill] sm:$0xff] }
 0x1cb   : > { %v2155_v53 = vpop.f32.mrf.mxu0  ;;  %v1133_v18 = vadd.f32 %v13234_v5, %v622_v37  ;;  %v13240_v5 = vld [vmem:[#allocation81_spill] sm:$0xff] }
 0x1cc   : > { %v1757_v56 = vadd.f32 %v1756_v27, %v1412_v51  ;;  %v13238_v27 = vld [vmem:[#allocation86_spill] sm:$0xff] }
 0x1cd   : > { %v1762_v7 = vpop.f32.mrf.mxu3 }
 0x1ce   : > { %v2152_v3 = vadd.f32 %v2151_v57, %v1757_v56  ;;  %1495 = vmatmul.f32.gmra.mxu2 %v13230_v13  ;;  %2218 = vmatmul.f32.gmra.mxu0 %v13232_v11  ;;  %v630_v57 = vadd.f32 %v8971_v1, %v13238_v27 }
 0x1cf   : > { %v2434_v2 = vpop.f32.mrf.mxu1 }
 0x1d0   : > { %v9078_v47 = vadd.f32 %v2426_v46, %v2152_v3 }
 0x1d1   : > { %v1416_v61 = vpop.f32.mrf.mxu2 }
 0x1d2   : > { %v1417_v40 = vadd.f32 %v1416_v61, %v1133_v18  ;;  %1863 = vmatmul.f32.gmra.mxu3 %v13236_v32  ;;  %2497 = vmatmul.f32.gmra.mxu1 %v13237_v19  ;;  %v13239_v61 = vld [vmem:[#allocation84_spill] sm:$0xff]  ;;  %v13241_v18 = vand.u32 4294901760, %v13240_v5  ;;  %v13242_v32 = vld [vmem:[#allocation78_spill] sm:$0xff] }
 0x1d3   : > { %v2159_v62 = vpop.f32.mrf.mxu0  ;;  %v1137_v11 = vadd.f32 %v13239_v61, %v630_v57  ;;  %v13245_v57 = vld [vmem:[#allocation90_spill] sm:$0xff] }
 0x1d4   : > { %v1763_v51 = vadd.f32 %v1762_v7, %v1417_v40  ;;  %v13243_v40 = vld [vmem:[#allocation93_spill] sm:$0xff] }
 0x1d5   : > { %v1768_v13 = vpop.f32.mrf.mxu3 }
 0x1d6   : > { %v2156_v8 = vadd.f32 %v2155_v53, %v1763_v51  ;;  %1500 = vmatmul.f32.gmra.mxu2 %v13235_v31  ;;  %2222 = vmatmul.f32.gmra.mxu0 %v13237_v19  ;;  %v638_v53 = vadd.f32 %v8971_v1, %v13243_v40 }
 0x1d7   : > { %v2438_v46 = vpop.f32.mrf.mxu1 }
 0x1d8   : > { %v9088_v37 = vadd.f32 %v2430_v33, %v2156_v8  ;;  %v1141_v8 = vadd.f32 %v13245_v57, %v638_v53  ;;  %v13250_v53 = vld [vmem:[#allocation97_spill] sm:$0xff] }
 0x1d9   : > { %v1421_v56 = vpop.f32.mrf.mxu2 }
 0x1da   : > { %v1422_v3 = vadd.f32 %v1421_v56, %v1137_v11  ;;  %1869 = vmatmul.f32.gmra.mxu3 %v13241_v18  ;;  %2501 = vmatmul.f32.gmra.mxu1 %v13242_v32  ;;  %v13246_v56 = vld [vmem:[#allocation87_spill] sm:$0xff] }
 0x1db   : > { %v2163_v27 = vpop.f32.mrf.mxu0  ;;  %v13247_v18 = vand.u32 4294901760, %v13246_v56 }
 0x1dc   : > { %v1769_v7 = vadd.f32 %v1768_v13, %v1422_v3  ;;  %v13248_v13 = vld [vmem:[#allocation100_spill] sm:$0xff] }
 0x1dd   : > { %v1774_v31 = vpop.f32.mrf.mxu3 }
 0x1de   : > { %v2160_v51 = vadd.f32 %v2159_v62, %v1769_v7  ;;  %1505 = vmatmul.f32.gmra.mxu2 %v13240_v5  ;;  %2226 = vmatmul.f32.gmra.mxu0 %v13242_v32  ;;  %v646_v62 = vadd.f32 %v8971_v1, %v13248_v13 }
 0x1df   : > { %v2442_v19 = vpop.f32.mrf.mxu1 }
 0x1e0   : > { %v9098_v33 = vadd.f32 %v2434_v2, %v2160_v51  ;;  %v1145_v51 = vadd.f32 %v13250_v53, %v646_v62  ;;  %v13256_v62 = vld [vmem:[#allocation104_spill] sm:$0xff] }
 0x1e1   : > { %v1426_v61 = vpop.f32.mrf.mxu2 }
 0x1e2   : > { %13244 = vst [vmem:[#allocation43_spill] sm:$0xff] %v9098_v33  ;;  %v1427_v11 = vadd.f32 %v1426_v61, %v1141_v8  ;;  %1875 = vmatmul.f32.gmra.mxu3 %v13247_v18  ;;  %2505 = vmatmul.f32.gmra.mxu1 %v8517_v54  ;;  %v13251_v61 = vld [vmem:[#allocation94_spill] sm:$0xff]  ;;  %v13253_v33 = vld [vmem:[#allocation91_spill] sm:$0xff] }
 0x1e3   : > { %v2167_v40 = vpop.f32.mrf.mxu0  ;;  %v13252_v18 = vand.u32 4294901760, %v13251_v61 }
 0x1e4   : > { %v1775_v3 = vadd.f32 %v1774_v31, %v1427_v11  ;;  %v13254_v31 = vld [vmem:[#allocation107_spill] sm:$0xff] }
 0x1e5   : > { %v1780_v5 = vpop.f32.mrf.mxu3 }
 0x1e6   : > { %v2164_v7 = vadd.f32 %v2163_v27, %v1775_v3  ;;  %1510 = vmatmul.f32.gmra.mxu2 %v13246_v56  ;;  %2230 = vmatmul.f32.gmra.mxu0 %v8517_v54  ;;  %v654_v27 = vadd.f32 %v8971_v1, %v13254_v31 }
 0x1e7   : > { %v2446_v2 = vpop.f32.mrf.mxu1 }
 0x1e8   : > { %v9108_v32 = vadd.f32 %v2438_v46, %v2164_v7  ;;  %v1149_v7 = vadd.f32 %v13256_v62, %v654_v27  ;;  %v13261_v27 = vld [vmem:[#allocation111_spill] sm:$0xff] }
 0x1e9   : > { %v1431_v57 = vpop.f32.mrf.mxu2 }
 0x1ea   : > { %13249 = vst [vmem:[#allocation59_spill] sm:$0xff] %v9108_v32  ;;  %v1432_v8 = vadd.f32 %v1431_v57, %v1145_v51  ;;  %1881 = vmatmul.f32.gmra.mxu3 %v13252_v18  ;;  %2509 = vmatmul.f32.gmra.mxu1 %v13253_v33  ;;  %v13257_v57 = vld [vmem:[#allocation101_spill] sm:$0xff]  ;;  %v13259_v32 = vld [vmem:[#allocation98_spill] sm:$0xff] }
 0x1eb   : > { %v2171_v13 = vpop.f32.mrf.mxu0  ;;  %v13258_v18 = vand.u32 4294901760, %v13257_v57 }
 0x1ec   : > { %v1781_v11 = vadd.f32 %v1780_v5, %v1432_v8  ;;  %v13260_v5 = vld [vmem:[#allocation114_spill] sm:$0xff] }
 0x1ed   : > { %v1786_v56 = vpop.f32.mrf.mxu3 }
 0x1ee   : > { %v2168_v3 = vadd.f32 %v2167_v40, %v1781_v11  ;;  %1515 = vmatmul.f32.gmra.mxu2 %v13251_v61  ;;  %2234 = vmatmul.f32.gmra.mxu0 %v13253_v33  ;;  %v662_v40 = vadd.f32 %v8971_v1, %v13260_v5 }
 0x1ef   : > { %v2450_v54 = vpop.f32.mrf.mxu1 }
 0x1f0   : > { %v9118_v46 = vadd.f32 %v2442_v19, %v2168_v3  ;;  %v1153_v3 = vadd.f32 %v13261_v27, %v662_v40  ;;  %v13265_v40 = vld [vmem:[#allocation117_spill] sm:$0xff] }
 0x1f1   : > { %v1436_v53 = vpop.f32.mrf.mxu2 }
 0x1f2   : > { %13255 = vst [vmem:[#allocation56_spill] sm:$0xff] %v9118_v46  ;;  %v1437_v51 = vadd.f32 %v1436_v53, %v1149_v7  ;;  %1887 = vmatmul.f32.gmra.mxu3 %v13258_v18  ;;  %2513 = vmatmul.f32.gmra.mxu1 %v13259_v32  ;;  %v13262_v53 = vld [vmem:[#allocation109_spill] sm:$0xff] }
 0x1f3   : > { %v2175_v31 = vpop.f32.mrf.mxu0  ;;  %v13263_v18 = vand.u32 4294901760, %v13262_v53  ;;  %v13264_v46 = vld [vmem:[#allocation105_spill] sm:$0xff] }
 0x1f4   : > { %v1787_v8 = vadd.f32 %v1786_v56, %v1437_v51 }
 0x1f5   : > { %v1792_v61 = vpop.f32.mrf.mxu3 }
 0x1f6   : > { %v2172_v11 = vadd.f32 %v2171_v13, %v1787_v8  ;;  %1520 = vmatmul.f32.gmra.mxu2 %v13257_v57  ;;  %2238 = vmatmul.f32.gmra.mxu0 %v13259_v32  ;;  %v670_v13 = vadd.f32 %v8971_v1, %v8680_v36  ;;  %v2728_v36 = vld [vmem:[%s12406_s3 + $0x18] sm:$0xff] }
 0x1f7   : > { %v2454_v19 = vpop.f32.mrf.mxu1 }
 0x1f8   : > { %v9128_v33 = vadd.f32 %v2446_v2, %v2172_v11  ;;  %v1157_v8 = vadd.f32 %v13265_v40, %v670_v13 }
 0x1f9   : > { %v1441_v62 = vpop.f32.mrf.mxu2 }
 0x1fa   : > { %v1442_v7 = vadd.f32 %v1441_v62, %v1153_v3  ;;  %1893 = vmatmul.f32.gmra.mxu3 %v13263_v18  ;;  %2517 = vmatmul.f32.gmra.mxu1 %v13264_v46  ;;  %v13266_v3 = vand.u32 4294901760, %v8656_v0  ;;  %v13267_v62 = vld [vmem:[#allocation112_spill] sm:$0xff] }
 0x1fb   : > { %v2179_v5 = vpop.f32.mrf.mxu0 }
 0x1fc   : > { %v1793_v56 = vadd.f32 %v1792_v61, %v1442_v7  ;;  %v9147_v61 = vand.u32 4294901760, %v2728_v36 }
 0x1fd   : > { %v1798_v51 = vpop.f32.mrf.mxu3 }
 0x1fe   : > { %v2176_v57 = vadd.f32 %v2175_v31, %v1793_v56  ;;  %1525 = vmatmul.f32.gmra.mxu2 %v13262_v53  ;;  %2242 = vmatmul.f32.gmra.mxu0 %v13264_v46  ;;  %v13268_v46 = vld [vmem:[#allocation126_spill] sm:$0xff]  ;;  %v9153_v18 = vsub.f32 %v2728_v36, %v9147_v61 }
 0x1ff   : > { %v2458_v2 = vpop.f32.mrf.mxu1  ;;  %2947 = vmatpush.msra.mxu2 %v9147_v61  ;;  %4150 = vmatpush.msra.mxu1 %v9147_v61 }
 0x200   : > { %v9138_v32 = vadd.f32 %v2450_v54, %v2176_v57  ;;  %v678_v54 = vadd.f32 %v8971_v1, %v13268_v46  ;;  %v3501_v57 = vand.u32 4294901760, %v9153_v18  ;;  %3802 = vmatpush.msra.mxu0 %v9153_v18  ;;  %v686_v46 = vadd.f32 %v8971_v1, %v8749_v34 }
 0x201   : > { %v1446_v11 = vpop.f32.mrf.mxu2 }
 0x202   : > { %v1447_v27 = vadd.f32 %v1446_v11, %v1157_v8  ;;  %1899 = vmatmul.f32.gmra.mxu3 %v13266_v3  ;;  %2521 = vmatmul.f32.gmra.mxu1 %v13267_v62 }
 0x203   : > { %v2183_v31 = vpop.f32.mrf.mxu0 }
 0x204   : > { %v1799_v7 = vadd.f32 %v1798_v51, %v1447_v27  ;;  %v13269_v51 = vld [vmem:[#allocation122_spill] sm:$0xff]  ;;  %v3502_v27 = vsub.f32 %v9153_v18, %v3501_v57 }
 0x205   : > { %v1804_v53 = vpop.f32.mrf.mxu3  ;;  %v1161_v8 = vadd.f32 %v13269_v51, %v678_v54 }
 0x206   : > { %v2180_v13 = vadd.f32 %v2179_v5, %v1799_v7  ;;  %1530 = vmatmul.f32.gmra.mxu2 %v8656_v0  ;;  %2246 = vmatmul.f32.gmra.mxu0 %v13267_v62  ;;  %v13270_v5 = vld [vmem:[#allocation120_spill] sm:$0xff]  ;;  %v3503_v62 = vand.u32 4294901760, %v3502_v27  ;;  %v13272_v27 = vand.u32 4294901760, %v8737_v39 }
 0x207   : > { %v2462_v56 = vpop.f32.mrf.mxu1  ;;  %v13271_v36 = vand.u32 4294901760, %v13270_v5 }
 0x208   : > { %v9160_v40 = vadd.f32 %v2454_v19, %v2180_v13  ;;  %3504 = vmatpush.msra.mxu3 %v3503_v62 }
 0x209   : > { %v1451_v11 = vpop.f32.mrf.mxu2 }
 0x20a   : > { %v1452_v3 = vadd.f32 %v1451_v11, %v1161_v8  ;;  %1905 = vmatmul.f32.gmra.mxu3 %v13271_v36  ;;  %2525 = vmatmul.f32.gmra.mxu1 %v8673_v49  ;;  %v1165_v8 = vadd.f32 %v8742_v10, %v686_v46 }
 0x20b   : > { %v2187_v0 = vpop.f32.mrf.mxu0 }
 0x20c   : > { %v1805_v19 = vadd.f32 %v1804_v53, %v1452_v3 }
 0x20d   : > { %v1810_v7 = vpop.f32.mrf.mxu3 }
 0x20e   : > { %v2184_v54 = vadd.f32 %v2183_v31, %v1805_v19  ;;  %1535 = vmatmul.f32.gmra.mxu2 %v13270_v5  ;;  %2250 = vmatmul.f32.gmra.mxu0 %v8673_v49  ;;  %v694_v31 = vadd.f32 %v8971_v1, %v8764_v50  ;;  %v13273_v19 = vld [vmem:[#allocation3_spill] sm:$0xff] }
 0x20f   : > { %v2466_v13 = vpop.f32.mrf.mxu1 }
 0x210   : > { %v9173_v51 = vadd.f32 %v2458_v2, %v2184_v54  ;;  %v1169_v2 = vadd.f32 %v8759_v38, %v694_v31  ;;  %v13274_v54 = vand.u32 4294901760, %v13273_v19  ;;  %v13276_v31 = vld [vmem:[#allocation5_spill] sm:$0xff] }
 0x211   : > { %v1456_v11 = vpop.f32.mrf.mxu2 }
 0x212   : > { %v1457_v36 = vadd.f32 %v1456_v11, %v1165_v8  ;;  %1911 = vmatmul.f32.gmra.mxu3 %v13272_v27  ;;  %2529 = vmatmul.f32.gmra.mxu1 %v8717_v30  ;;  %v13275_v8 = vld [vmem:[#allocation2_spill] sm:$0xff] }
 0x213   : > { %v2191_v34 = vpop.f32.mrf.mxu0 }
 0x214   : > { %v1811_v53 = vadd.f32 %v1810_v7, %v1457_v36 }
 0x215   : > { %v1816_v3 = vpop.f32.mrf.mxu3 }
 0x216   : > { %v2188_v5 = vadd.f32 %v2187_v0, %v1811_v53  ;;  %1540 = vmatmul.f32.gmra.mxu2 %v8737_v39  ;;  %2254 = vmatmul.f32.gmra.mxu0 %v8717_v30  ;;  %v702_v0 = vadd.f32 %v8971_v1, %v8774_v48  ;;  %v13277_v53 = vand.u32 4294901760, %v13276_v31 }
 0x217   : > { %v2470_v49 = vpop.f32.mrf.mxu1 }
 0x218   : > { %v9183_v10 = vadd.f32 %v2462_v56, %v2188_v5  ;;  %v1173_v56 = vadd.f32 %v8768_v29, %v702_v0  ;;  %v13278_v5 = vld [vmem:[#allocation4_spill] sm:$0xff] }
 0x219   : > { %v1461_v62 = vpop.f32.mrf.mxu2 }
 0x21a   : > { %v1462_v46 = vadd.f32 %v1461_v62, %v1169_v2  ;;  %1917 = vmatmul.f32.gmra.mxu3 %v13274_v54  ;;  %2533 = vmatmul.f32.gmra.mxu1 %v13275_v8 }
 0x21b   : > { %v2195_v50 = vpop.f32.mrf.mxu0 }
 0x21c   : > { %v1817_v7 = vadd.f32 %v1816_v3, %v1462_v46 }
 0x21d   : > { %v1822_v39 = vpop.f32.mrf.mxu3 }
 0x21e   : > { %v2192_v11 = vadd.f32 %v2191_v34, %v1817_v7  ;;  %1545 = vmatmul.f32.gmra.mxu2 %v13273_v19  ;;  %2258 = vmatmul.f32.gmra.mxu0 %v13275_v8  ;;  %v710_v34 = vadd.f32 %v8971_v1, %v8786_v6  ;;  %v13279_v8 = vld [vmem:[#allocation7_spill] sm:$0xff]  ;;  %v13281_v7 = vld [vmem:[#allocation6_spill] sm:$0xff] }
 0x21f   : > { %v2474_v30 = vpop.f32.mrf.mxu1  ;;  %v13280_v0 = vand.u32 4294901760, %v13279_v8 }
 0x220   : > { %v9193_v38 = vadd.f32 %v2466_v13, %v2192_v11  ;;  %v1177_v46 = vadd.f32 %v8780_v25, %v710_v34  ;;  %v13284_v34 = vld [vmem:[#allocation8_spill] sm:$0xff] }
 0x221   : > { %v1466_v36 = vpop.f32.mrf.mxu2 }
 0x222   : > { %v1467_v27 = vadd.f32 %v1466_v36, %v1173_v56  ;;  %1923 = vmatmul.f32.gmra.mxu3 %v13277_v53  ;;  %2537 = vmatmul.f32.gmra.mxu1 %v13278_v5  ;;  %v13282_v53 = vld [vmem:[#allocation9_spill] sm:$0xff] }
 0x223   : > { %v2199_v48 = vpop.f32.mrf.mxu0 }
 0x224   : > { %v1823_v3 = vadd.f32 %v1822_v39, %v1467_v27 }
 0x225   : > { %v1828_v2 = vpop.f32.mrf.mxu3 }
 0x226   : > { %v2196_v62 = vadd.f32 %v2195_v50, %v1823_v3  ;;  %1550 = vmatmul.f32.gmra.mxu2 %v13276_v31  ;;  %2262 = vmatmul.f32.gmra.mxu0 %v13278_v5  ;;  %v718_v50 = vadd.f32 %v8971_v1, %v8798_v22  ;;  %v13283_v5 = vand.u32 4294901760, %v13282_v53 }
 0x227   : > { %v2478_v13 = vpop.f32.mrf.mxu1 }
 0x228   : > { %v9203_v29 = vadd.f32 %v2470_v49, %v2196_v62  ;;  %v1181_v36 = vadd.f32 %v8792_v21, %v718_v50 }
 0x229   : > { %v1471_v19 = vpop.f32.mrf.mxu2 }
 0x22a   : > { %v1472_v54 = vadd.f32 %v1471_v19, %v1177_v46  ;;  %1929 = vmatmul.f32.gmra.mxu3 %v13280_v0  ;;  %2541 = vmatmul.f32.gmra.mxu1 %v13281_v7 }
 0x22b   : > { %v2203_v6 = vpop.f32.mrf.mxu0 }
 0x22c   : > { %v1829_v39 = vadd.f32 %v1828_v2, %v1472_v54 }
 0x22d   : > { %v1834_v11 = vpop.f32.mrf.mxu3 }
 0x22e   : > { %v2200_v56 = vadd.f32 %v2199_v48, %v1829_v39  ;;  %1555 = vmatmul.f32.gmra.mxu2 %v13279_v8  ;;  %2266 = vmatmul.f32.gmra.mxu0 %v13281_v7  ;;  %v726_v48 = vadd.f32 %v8971_v1, %v8810_v60  ;;  %v13285_v8 = vld [vmem:[#allocation11_spill] sm:$0xff]  ;;  %v13287_v7 = vld [vmem:[#allocation10_spill] sm:$0xff] }
 0x22f   : > { %v2482_v49 = vpop.f32.mrf.mxu1  ;;  %v13286_v0 = vand.u32 4294901760, %v13285_v8 }
 0x230   : > { %v9213_v25 = vadd.f32 %v2474_v30, %v2200_v56  ;;  %v1185_v46 = vadd.f32 %v8804_v23, %v726_v48 }
 0x231   : > { %v1476_v27 = vpop.f32.mrf.mxu2 }
 0x232   : > { %v1477_v31 = vadd.f32 %v1476_v27, %v1181_v36  ;;  %1935 = vmatmul.f32.gmra.mxu3 %v13283_v5  ;;  %2545 = vmatmul.f32.gmra.mxu1 %v13284_v34  ;;  %v13290_v5 = vld [vmem:[#allocation12_spill] sm:$0xff] }
 0x233   : > { %v2207_v22 = vpop.f32.mrf.mxu0 }
 0x234   : > { %v1835_v3 = vadd.f32 %v1834_v11, %v1477_v31  ;;  %v13288_v31 = vld [vmem:[#allocation13_spill] sm:$0xff] }
 0x235   : > { %v1840_v2 = vpop.f32.mrf.mxu3 }
 0x236   : > { %v2204_v62 = vadd.f32 %v2203_v6, %v1835_v3  ;;  %1560 = vmatmul.f32.gmra.mxu2 %v13282_v53  ;;  %2270 = vmatmul.f32.gmra.mxu0 %v13284_v34  ;;  %v734_v6 = vadd.f32 %v8971_v1, %v8822_v28  ;;  %v13289_v53 = vand.u32 4294901760, %v13288_v31  ;;  %v2727_v28 = vld [vmem:[%s12406_s3 + $0x10] sm:$0xff] }
 0x237   : > { %v2486_v30 = vpop.f32.mrf.mxu1 }
 0x238   : > { %v9223_v21 = vadd.f32 %v2478_v13, %v2204_v62  ;;  %v1189_v56 = vadd.f32 %v8816_v35, %v734_v6  ;;  %v13293_v6 = vld [vmem:[#allocation14_spill] sm:$0xff] }
 0x239   : > { %v1481_v19 = vpop.f32.mrf.mxu2 }
 0x23a   : > { %v1482_v54 = vadd.f32 %v1481_v19, %v1185_v46  ;;  %1941 = vmatmul.f32.gmra.mxu3 %v13286_v0  ;;  %2549 = vmatmul.f32.gmra.mxu1 %v13287_v7 }
 0x23b   : > { %v2211_v60 = vpop.f32.mrf.mxu0 }
 0x23c   : > { %v1841_v50 = vadd.f32 %v1840_v2, %v1482_v54 }
 0x23d   : > { %v1846_v39 = vpop.f32.mrf.mxu3 }
 0x23e   : > { %v2208_v11 = vadd.f32 %v2207_v22, %v1841_v50  ;;  %1565 = vmatmul.f32.gmra.mxu2 %v13285_v8  ;;  %2274 = vmatmul.f32.gmra.mxu0 %v13287_v7  ;;  %v9242_v22 = vand.u32 4294901760, %v2727_v28  ;;  %v13291_v7 = vld [vmem:[#allocation15_spill] sm:$0xff] }
 0x23f   : > { %v2490_v13 = vpop.f32.mrf.mxu1 }
 0x240   : > { %v9233_v23 = vadd.f32 %v2482_v49, %v2208_v11  ;;  %v742_v49 = vadd.f32 %v8971_v1, %v8844_v12  ;;  %2949 = vmatpush.msra.mxu2 %v9242_v22  ;;  %v9248_v35 = vsub.f32 %v2727_v28, %v9242_v22  ;;  %4152 = vmatpush.msra.mxu1 %v9242_v22  ;;  %v13294_v28 = vld [vmem:[#allocation17_spill] sm:$0xff] }
 0x241   : > { %v1486_v36 = vpop.f32.mrf.mxu2  ;;  %v750_v11 = vadd.f32 %v8971_v1, %v8861_v55 }
 0x242   : > { %v1487_v27 = vadd.f32 %v1486_v36, %v1189_v56  ;;  %1947 = vmatmul.f32.gmra.mxu3 %v13289_v53  ;;  %2553 = vmatmul.f32.gmra.mxu1 %v13290_v5  ;;  %v3507_v46 = vand.u32 4294901760, %v9248_v35  ;;  %v1193_v19 = vadd.f32 %v8831_v59, %v742_v49  ;;  %v13295_v49 = vand.u32 4294901760, %v13294_v28 }
 0x243   : > { %v2215_v34 = vpop.f32.mrf.mxu0  ;;  %3805 = vmatpush.msra.mxu0 %v9248_v35 }
 0x244   : > { %v1847_v48 = vadd.f32 %v1846_v39, %v1487_v27  ;;  %v3508_v8 = vsub.f32 %v9248_v35, %v3507_v46 }
 0x245   : > { %v1852_v3 = vpop.f32.mrf.mxu3 }
 0x246   : > { %v2212_v2 = vadd.f32 %v2211_v60, %v1847_v48  ;;  %1570 = vmatmul.f32.gmra.mxu2 %v13288_v31  ;;  %2278 = vmatmul.f32.gmra.mxu0 %v13290_v5  ;;  %v13292_v60 = vand.u32 4294901760, %v13291_v7  ;;  %v3509_v39 = vand.u32 4294901760, %v3508_v8  ;;  %v1197_v31 = vadd.f32 %v8855_v45, %v750_v11  ;;  %v13296_v48 = vld [vmem:[#allocation16_spill] sm:$0xff] }
 0x247   : > { %v2494_v62 = vpop.f32.mrf.mxu1 }
 0x248   : > { %v9255_v12 = vadd.f32 %v2486_v30, %v2212_v2  ;;  %3510 = vmatpush.msra.mxu3 %v3509_v39 }
 0x249   : > { %v1491_v54 = vpop.f32.mrf.mxu2 }
 0x24a   : > { %v1492_v0 = vadd.f32 %v1491_v54, %v1193_v19  ;;  %1953 = vmatmul.f32.gmra.mxu3 %v13292_v60  ;;  %2557 = vmatmul.f32.gmra.mxu1 %v13293_v6 }
 0x24b   : > { %v2219_v50 = vpop.f32.mrf.mxu0 }
 0x24c   : > { %v1853_v30 = vadd.f32 %v1852_v3, %v1492_v0 }
 0x24d   : > { %v1858_v56 = vpop.f32.mrf.mxu3 }
 0x24e   : > { %v2216_v59 = vadd.f32 %v2215_v34, %v1853_v30  ;;  %1575 = vmatmul.f32.gmra.mxu2 %v13291_v7  ;;  %2282 = vmatmul.f32.gmra.mxu0 %v13293_v6  ;;  %v758_v34 = vadd.f32 %v8971_v1, %v8873_v20  ;;  %v13297_v7 = vld [vmem:[#allocation19_spill] sm:$0xff]  ;;  %v13299_v6 = vld [vmem:[#allocation18_spill] sm:$0xff] }
 0x24f   : > { %v2498_v36 = vpop.f32.mrf.mxu1  ;;  %v13298_v60 = vand.u32 4294901760, %v13297_v7 }
 0x250   : > { %v9268_v27 = vadd.f32 %v2490_v13, %v2216_v59  ;;  %v1201_v54 = vadd.f32 %v8867_v16, %v758_v34 }
 0x251   : > { %v1496_v53 = vpop.f32.mrf.mxu2 }
 0x252   : > { %v1497_v5 = vadd.f32 %v1496_v53, %v1197_v31  ;;  %1959 = vmatmul.f32.gmra.mxu3 %v13295_v49  ;;  %2561 = vmatmul.f32.gmra.mxu1 %v13296_v48  ;;  %v13300_v53 = vld [vmem:[#allocation21_spill] sm:$0xff]  ;;  %v774_v49 = vadd.f32 %v8971_v1, %v8897_v26 }
 0x253   : > { %v2223_v55 = vpop.f32.mrf.mxu0 }
 0x254   : > { %v1859_v3 = vadd.f32 %v1858_v56, %v1497_v5  ;;  %v13301_v5 = vand.u32 4294901760, %v13300_v53 }
 0x255   : > { %v1864_v2 = vpop.f32.mrf.mxu3 }
 0x256   : > { %v2220_v19 = vadd.f32 %v2219_v50, %v1859_v3  ;;  %1580 = vmatmul.f32.gmra.mxu2 %v13294_v28  ;;  %2286 = vmatmul.f32.gmra.mxu0 %v13296_v48  ;;  %v766_v50 = vadd.f32 %v8971_v1, %v8885_v43  ;;  %v13302_v28 = vld [vmem:[#allocation20_spill] sm:$0xff]  ;;  %v1209_v3 = vadd.f32 %v8891_v9, %v774_v49 }
 0x257   : > { %v2502_v13 = vpop.f32.mrf.mxu1 }
 0x258   : > { %v9278_v45 = vadd.f32 %v2494_v62, %v2220_v19  ;;  %v1205_v56 = vadd.f32 %v8879_v44, %v766_v50 }
 0x259   : > { %v1501_v8 = vpop.f32.mrf.mxu2 }
 0x25a   : > { %v1502_v0 = vadd.f32 %v1501_v8, %v1201_v54  ;;  %1965 = vmatmul.f32.gmra.mxu3 %v13298_v60  ;;  %2565 = vmatmul.f32.gmra.mxu1 %v13299_v6  ;;  %v13303_v54 = vld [vmem:[#allocation23_spill] sm:$0xff] }
 0x25b   : > { %v2227_v20 = vpop.f32.mrf.mxu0  ;;  %v13304_v8 = vand.u32 4294901760, %v13303_v54 }
 0x25c   : > { %v1865_v39 = vadd.f32 %v1864_v2, %v1502_v0  ;;  %v13305_v0 = vld [vmem:[#allocation22_spill] sm:$0xff] }
 0x25d   : > { %v1870_v11 = vpop.f32.mrf.mxu3 }
 0x25e   : > { %v2224_v30 = vadd.f32 %v2223_v55, %v1865_v39  ;;  %1585 = vmatmul.f32.gmra.mxu2 %v13297_v7  ;;  %2290 = vmatmul.f32.gmra.mxu0 %v13299_v6  ;;  %v782_v7 = vadd.f32 %v8971_v1, %v8909_v58 }
 0x25f   : > { %v2506_v62 = vpop.f32.mrf.mxu1 }
 0x260   : > { %v9288_v16 = vadd.f32 %v2498_v36, %v2224_v30  ;;  %v1213_v50 = vadd.f32 %v8903_v42, %v782_v7  ;;  %v13306_v30 = vld [vmem:[#allocation25_spill] sm:$0xff] }
 0x261   : > { %v1506_v59 = vpop.f32.mrf.mxu2 }
 0x262   : > { %v1507_v31 = vadd.f32 %v1506_v59, %v1205_v56  ;;  %1971 = vmatmul.f32.gmra.mxu3 %v13301_v5  ;;  %2569 = vmatmul.f32.gmra.mxu1 %v13302_v28  ;;  %v13307_v56 = vand.u32 4294901760, %v13306_v30  ;;  %v13308_v59 = vld [vmem:[#allocation24_spill] sm:$0xff] }
 0x263   : > { %v2231_v43 = vpop.f32.mrf.mxu0 }
 0x264   : > { %v1871_v48 = vadd.f32 %v1870_v11, %v1507_v31  ;;  %v790_v31 = vadd.f32 %v8971_v1, %v8921_v24 }
 0x265   : > { %v1876_v55 = vpop.f32.mrf.mxu3 }
 0x266   : > { %v2228_v34 = vadd.f32 %v2227_v20, %v1871_v48  ;;  %1590 = vmatmul.f32.gmra.mxu2 %v13300_v53  ;;  %2294 = vmatmul.f32.gmra.mxu0 %v13302_v28 }
 0x267   : > { %v2510_v36 = vpop.f32.mrf.mxu1 }
 0x268   : > { %v9298_v44 = vadd.f32 %v2502_v13, %v2228_v34 }
 0x269   : > { %v1511_v2 = vpop.f32.mrf.mxu2 }
 0x26a   : > { %v1512_v19 = vadd.f32 %v1511_v2, %v1209_v3  ;;  %1977 = vmatmul.f32.gmra.mxu3 %v13304_v8  ;;  %2573 = vmatmul.f32.gmra.mxu1 %v13305_v0  ;;  %v13311_v3 = vld [vmem:[#allocation26_spill] sm:$0xff]  ;;  %v798_v2 = vadd.f32 %v8971_v1, %v8933_v63  ;;  %v2726_v63 = vld [vmem:[%s12406_s3 + $0x8] sm:$0xff] }
 0x26b   : > { %v2235_v26 = vpop.f32.mrf.mxu0 }
 0x26c   : > { %v1877_v60 = vadd.f32 %v1876_v55, %v1512_v19  ;;  %v13309_v55 = vld [vmem:[#allocation27_spill] sm:$0xff] }
 0x26d   : > { %v1882_v6 = vpop.f32.mrf.mxu3  ;;  %v13310_v34 = vand.u32 4294901760, %v13309_v55 }
 0x26e   : > { %v2232_v20 = vadd.f32 %v2231_v43, %v1877_v60  ;;  %1595 = vmatmul.f32.gmra.mxu2 %v13303_v54  ;;  %2298 = vmatmul.f32.gmra.mxu0 %v13305_v0  ;;  %v1217_v43 = vadd.f32 %v8915_v17, %v790_v31  ;;  %v1221_v0 = vadd.f32 %v8927_v41, %v798_v2  ;;  %v13312_v60 = vld [vmem:[#allocation29_spill] sm:$0xff] }
 0x26f   : > { %v2514_v13 = vpop.f32.mrf.mxu1 }
 0x270   : > { %v9308_v9 = vadd.f32 %v2506_v62, %v2232_v20  ;;  %v13314_v20 = vld [vmem:[#allocation28_spill] sm:$0xff] }
 0x271   : > { %v1516_v39 = vpop.f32.mrf.mxu2 }
 0x272   : > { %v1517_v11 = vadd.f32 %v1516_v39, %v1213_v50  ;;  %1983 = vmatmul.f32.gmra.mxu3 %v13307_v56  ;;  %2577 = vmatmul.f32.gmra.mxu1 %v13308_v59  ;;  %v9337_v39 = vand.u32 4294901760, %v2726_v63 }
 0x273   : > { %v2239_v58 = vpop.f32.mrf.mxu0 }
 0x274   : > { %v1883_v53 = vadd.f32 %v1882_v6, %v1517_v11  ;;  %v13313_v6 = vand.u32 4294901760, %v13312_v60  ;;  %2951 = vmatpush.msra.mxu2 %v9337_v39  ;;  %v9343_v41 = vsub.f32 %v2726_v63, %v9337_v39  ;;  %4154 = vmatpush.msra.mxu1 %v9337_v39 }
 0x275   : > { %v1888_v5 = vpop.f32.mrf.mxu3 }
 0x276   : > { %v2236_v28 = vadd.f32 %v2235_v26, %v1883_v53  ;;  %1600 = vmatmul.f32.gmra.mxu2 %v13306_v30  ;;  %2302 = vmatmul.f32.gmra.mxu0 %v13308_v59 }
 0x277   : > { %v2518_v62 = vpop.f32.mrf.mxu1  ;;  %3808 = vmatpush.msra.mxu0 %v9343_v41 }
 0x278   : > { %v9318_v42 = vadd.f32 %v2510_v36, %v2236_v28 }
 0x279   : > { %v1521_v49 = vpop.f32.mrf.mxu2 }
 0x27a   : > { %v1522_v48 = vadd.f32 %v1521_v49, %v1217_v43  ;;  %1989 = vmatmul.f32.gmra.mxu3 %v13310_v34  ;;  %2581 = vmatmul.f32.gmra.mxu1 %v13311_v3  ;;  %v13315_v43 = vld [vmem:[#allocation31_spill] sm:$0xff] }
 0x27b   : > { %v2243_v24 = vpop.f32.mrf.mxu0  ;;  %v13316_v49 = vand.u32 4294901760, %v13315_v43 }
 0x27c   : > { %v1889_v19 = vadd.f32 %v1888_v5, %v1522_v48  ;;  %v13317_v48 = vld [vmem:[#allocation30_spill] sm:$0xff] }
 0x27d   : > { %v1894_v54 = vpop.f32.mrf.mxu3 }
 0x27e   : > { %v2240_v8 = vadd.f32 %v2239_v58, %v1889_v19  ;;  %1605 = vmatmul.f32.gmra.mxu2 %v13309_v55  ;;  %2306 = vmatmul.f32.gmra.mxu0 %v13311_v3  ;;  %v3513_v58 = vand.u32 4294901760, %v9343_v41  ;;  %v814_v3 = vadd.f32 %v8971_v1, %v8977_v4 }
 0x27f   : > { %v2522_v36 = vpop.f32.mrf.mxu1 }
 0x280   : > { %v9328_v17 = vadd.f32 %v2514_v13, %v2240_v8  ;;  %v806_v13 = vadd.f32 %v8971_v1, %v8955_v52  ;;  %v3514_v5 = vsub.f32 %v9343_v41, %v3513_v58  ;;  %v13366_v41 = vld [vmem:[#allocation95_spill] sm:$0xff] }
 0x281   : > { %v1526_v26 = vpop.f32.mrf.mxu2 }
 0x282   : > { %v1527_v7 = vadd.f32 %v1526_v26, %v1221_v0  ;;  %1995 = vmatmul.f32.gmra.mxu3 %v13313_v6  ;;  %2585 = vmatmul.f32.gmra.mxu1 %v13314_v20  ;;  %v1225_v31 = vadd.f32 %v8942_v14, %v806_v13  ;;  %v3515_v34 = vand.u32 4294901760, %v3514_v5  ;;  %v13318_v26 = vld [vmem:[#allocation33_spill] sm:$0xff]  ;;  %v13321_v6 = vld [vmem:[#allocation151_spill] sm:$0xff] }
 0x283   : > { %v2247_v50 = vpop.f32.mrf.mxu0 }
 0x284   : > { %v1895_v11 = vadd.f32 %v1894_v54, %v1527_v7  ;;  %3516 = vmatpush.msra.mxu3 %v3515_v34  ;;  %v1229_v54 = vadd.f32 %v8966_v15, %v814_v3  ;;  %v13319_v7 = vand.u32 4294901760, %v13318_v26  ;;  %v13326_v3 = vld [vmem:[#allocation47_spill] sm:$0xff] }
 0x285   : > { %v1900_v30 = vpop.f32.mrf.mxu3 }
 0x286   : > { %v2244_v56 = vadd.f32 %v2243_v24, %v1895_v11  ;;  %1610 = vmatmul.f32.gmra.mxu2 %v13312_v60  ;;  %2310 = vmatmul.f32.gmra.mxu0 %v13314_v20  ;;  %v13320_v60 = vld [vmem:[#allocation32_spill] sm:$0xff]  ;;  %v822_v20 = vadd.f32 %v8971_v1, %v13321_v6  ;;  %v13322_v11 = vld [vmem:[#allocation150_spill] sm:$0xff] }
 0x287   : > { %v2526_v59 = vpop.f32.mrf.mxu1  ;;  %v13330_v6 = vld [vmem:[#allocation54_spill] sm:$0xff] }
 0x288   : > { %v9350_v52 = vadd.f32 %v2518_v62, %v2244_v56 }
 0x289   : > { %v1531_v53 = vpop.f32.mrf.mxu2 }
 0x28a   : > { %v1532_v28 = vadd.f32 %v1531_v53, %v1225_v31  ;;  %2001 = vmatmul.f32.gmra.mxu3 %v13316_v49  ;;  %2589 = vmatmul.f32.gmra.mxu1 %v13317_v48  ;;  %v13323_v53 = vld [vmem:[#allocation35_spill] sm:$0xff] }
 0x28b   : > { %v2251_v55 = vpop.f32.mrf.mxu0  ;;  %v13324_v5 = vand.u32 4294901760, %v13323_v53 }
 0x28c   : > { %v1901_v62 = vadd.f32 %v1900_v30, %v1532_v28  ;;  %v1233_v30 = vadd.f32 %v13322_v11, %v822_v20  ;;  %v13325_v28 = vld [vmem:[#allocation34_spill] sm:$0xff] }
 0x28d   : > { %v1906_v24 = vpop.f32.mrf.mxu3 }
 0x28e   : > { %v2248_v14 = vadd.f32 %v2247_v50, %v1901_v62  ;;  %1615 = vmatmul.f32.gmra.mxu2 %v13315_v43  ;;  %2314 = vmatmul.f32.gmra.mxu0 %v13317_v48 }
 0x28f   : > { %v2530_v2 = vpop.f32.mrf.mxu1 }
 0x290   : > { %v9363_v19 = vadd.f32 %v2522_v36, %v2248_v14 }
 0x291   : > { %v1536_v8 = vpop.f32.mrf.mxu2 }
 0x292   : > { %v1537_v0 = vadd.f32 %v1536_v8, %v1229_v54  ;;  %2007 = vmatmul.f32.gmra.mxu3 %v13319_v7  ;;  %2593 = vmatmul.f32.gmra.mxu1 %v13320_v60  ;;  %v13329_v54 = vld [vmem:[#allocation36_spill] sm:$0xff] }
 0x293   : > { %v2255_v4 = vpop.f32.mrf.mxu0 }
 0x294   : > { %v1907_v63 = vadd.f32 %v1906_v24, %v1537_v0  ;;  %v13327_v24 = vld [vmem:[#allocation37_spill] sm:$0xff] }
 0x295   : > { %v1912_v50 = vpop.f32.mrf.mxu3  ;;  %v13328_v14 = vand.u32 4294901760, %v13327_v24 }
 0x296   : > { %v2252_v13 = vadd.f32 %v2251_v55, %v1907_v63  ;;  %1620 = vmatmul.f32.gmra.mxu2 %v13318_v26  ;;  %2318 = vmatmul.f32.gmra.mxu0 %v13320_v60  ;;  %v13331_v63 = vld [vmem:[#allocation41_spill] sm:$0xff] }
 0x297   : > { %v2534_v36 = vpop.f32.mrf.mxu1 }
 0x298   : > { %v9373_v15 = vadd.f32 %v2526_v59, %v2252_v13  ;;  %v13333_v13 = vld [vmem:[#allocation39_spill] sm:$0xff] }
 0x299   : > { %v1541_v56 = vpop.f32.mrf.mxu2 }
 0x29a   : > { %v1542_v31 = vadd.f32 %v1541_v56, %v1233_v30  ;;  %2013 = vmatmul.f32.gmra.mxu3 %v13324_v5  ;;  %2597 = vmatmul.f32.gmra.mxu1 %v13325_v28 }
 0x29b   : > { %v2259_v1 = vpop.f32.mrf.mxu0 }
 0x29c   : > { %v1913_v43 = vadd.f32 %v1912_v50, %v1542_v31  ;;  %v13332_v50 = vand.u32 4294901760, %v13331_v63 }
 0x29d   : > { %v1918_v49 = vpop.f32.mrf.mxu3 }
 0x29e   : > { %v2256_v48 = vadd.f32 %v2255_v4, %v1913_v43  ;;  %1625 = vmatmul.f32.gmra.mxu2 %v13323_v53  ;;  %2322 = vmatmul.f32.gmra.mxu0 %v13325_v28  ;;  %v13334_v28 = vld [vmem:[#allocation61_spill] sm:$0xff]  ;;  %v13335_v43 = vld [vmem:[#allocation48_spill] sm:$0xff] }
 0x29f   : > { %v2538_v55 = vpop.f32.mrf.mxu1 }
 0x2a0   : > { %v9381_v59 = vadd.f32 %v2530_v2, %v2256_v48  ;;  %v13337_v48 = vld [vmem:[#allocation44_spill] sm:$0xff] }
 0x2a1   : > { %v1546_v34 = vpop.f32.mrf.mxu2 }
 0x2a2   : > { %v1547_v62 = vadd.f32 %v1546_v34, %v13326_v3  ;;  %2019 = vmatmul.f32.gmra.mxu3 %v13328_v14  ;;  %2601 = vmatmul.f32.gmra.mxu1 %v13329_v54 }
 0x2a3   : > { %v2263_v8 = vpop.f32.mrf.mxu0 }
 0x2a4   : > { %v1919_v0 = vadd.f32 %v1918_v49, %v1547_v62  ;;  %v13336_v49 = vand.u32 4294901760, %v13335_v43 }
 0x2a5   : > { %v1924_v26 = vpop.f32.mrf.mxu3 }
 0x2a6   : > { %v2260_v7 = vadd.f32 %v2259_v1, %v1919_v0  ;;  %1630 = vmatmul.f32.gmra.mxu2 %v13327_v24  ;;  %2326 = vmatmul.f32.gmra.mxu0 %v13329_v54 }
 0x2a7   : > { %v2542_v60 = vpop.f32.mrf.mxu1 }
 0x2a8   : > { %v9389_v4 = vadd.f32 %v2534_v36, %v2260_v7 }
 0x2a9   : > { %v1551_v2 = vpop.f32.mrf.mxu2 }
 0x2aa   : > { %v1552_v20 = vadd.f32 %v1551_v2, %v13330_v6  ;;  %2025 = vmatmul.f32.gmra.mxu3 %v13332_v50  ;;  %2605 = vmatmul.f32.gmra.mxu1 %v13333_v13  ;;  %v13341_v2 = vld [vmem:[#allocation51_spill] sm:$0xff] }
 0x2ab   : > { %v2267_v11 = vpop.f32.mrf.mxu0 }
 0x2ac   : > { %v1925_v30 = vadd.f32 %v1924_v26, %v1552_v20  ;;  %v13339_v26 = vld [vmem:[#allocation55_spill] sm:$0xff] }
 0x2ad   : > { %v1930_v56 = vpop.f32.mrf.mxu3  ;;  %v13340_v7 = vand.u32 4294901760, %v13339_v26 }
 0x2ae   : > { %v2264_v31 = vadd.f32 %v2263_v8, %v1925_v30  ;;  %1635 = vmatmul.f32.gmra.mxu2 %v13331_v63  ;;  %2330 = vmatmul.f32.gmra.mxu0 %v13333_v13  ;;  %v13338_v8 = vld [vmem:[#allocation68_spill] sm:$0xff]  ;;  %v13342_v30 = vld [vmem:[#allocation75_spill] sm:$0xff] }
 0x2af   : > { %v2546_v53 = vpop.f32.mrf.mxu1 }
 0x2b0   : > { %v9397_v5 = vadd.f32 %v2538_v55, %v2264_v31  ;;  %v13343_v31 = vld [vmem:[#allocation62_spill] sm:$0xff] }
 0x2b1   : > { %v1556_v36 = vpop.f32.mrf.mxu2 }
 0x2b2   : > { %v1557_v1 = vadd.f32 %v1556_v36, %v13334_v28  ;;  %2031 = vmatmul.f32.gmra.mxu3 %v13336_v49  ;;  %2609 = vmatmul.f32.gmra.mxu1 %v13337_v48  ;;  %v13344_v36 = vand.u32 4294901760, %v13343_v31  ;;  %v13345_v28 = vld [vmem:[#allocation58_spill] sm:$0xff] }
 0x2b3   : > { %v2271_v34 = vpop.f32.mrf.mxu0 }
 0x2b4   : > { %v1931_v3 = vadd.f32 %v1930_v56, %v1557_v1  ;;  %v2725_v1 = vld [vmem:[%s12406_s3] sm:$0xff] }
 0x2b5   : > { %v1936_v62 = vpop.f32.mrf.mxu3  ;;  %v2952_v49 = vand.u32 4294901760, %v2725_v1 }
 0x2b6   : > { %v2268_v24 = vadd.f32 %v2267_v11, %v1931_v3  ;;  %1640 = vmatmul.f32.gmra.mxu2 %v13335_v43  ;;  %2334 = vmatmul.f32.gmra.mxu0 %v13337_v48 }
 0x2b7   : > { %v2550_v14 = vpop.f32.mrf.mxu1  ;;  %2953 = vmatpush.msra.mxu2 %v2952_v49  ;;  %v3518_v3 = vsub.f32 %v2725_v1, %v2952_v49  ;;  %4156 = vmatpush.msra.mxu1 %v2952_v49 }
 0x2b8   : > { %v9405_v54 = vadd.f32 %v2542_v60, %v2268_v24 }
 0x2b9   : > { %v1561_v55 = vpop.f32.mrf.mxu2  ;;  %v3519_v24 = vand.u32 4294901760, %v3518_v3  ;;  %3811 = vmatpush.msra.mxu0 %v3518_v3 }
 0x2ba   : > { %v1562_v0 = vadd.f32 %v1561_v55, %v13338_v8  ;;  %2037 = vmatmul.f32.gmra.mxu3 %v13340_v7  ;;  %2613 = vmatmul.f32.gmra.mxu1 %v13341_v2  ;;  %v13346_v55 = vld [vmem:[#allocation124_spill] sm:$0xff] }
 0x2bb   : > { %v2275_v6 = vpop.f32.mrf.mxu0  ;;  %v13347_v8 = vand.u32 4294901760, %v13346_v55  ;;  %v3520_v7 = vsub.f32 %v3518_v3, %v3519_v24 }
 0x2bc   : > { %v1937_v20 = vadd.f32 %v1936_v62, %v1562_v0 }
 0x2bd   : > { %v1942_v63 = vpop.f32.mrf.mxu3  ;;  %4553 = vmatpush.msrb.mxu2 %v13347_v8  ;;  %v13358_v8 = vld [vmem:[#allocation123_spill] sm:$0xff] }
 0x2be   : > { %v2272_v50 = vadd.f32 %v2271_v34, %v1937_v20  ;;  %1645 = vmatmul.f32.gmra.mxu2 %v13339_v26  ;;  %2338 = vmatmul.f32.gmra.mxu0 %v13341_v2  ;;  %v13348_v2 = vld [vmem:[#allocation137_spill] sm:$0xff] }
 0x2bf   : > { %v2554_v13 = vpop.f32.mrf.mxu1  ;;  %v13349_v20 = vand.u32 4294901760, %v13348_v2  ;;  %v13360_v2 = vld [vmem:[#allocation88_spill] sm:$0xff] }
 0x2c0   : > { %v9413_v11 = vadd.f32 %v2546_v53, %v2272_v50 }
 0x2c1   : > { %v1566_v60 = vpop.f32.mrf.mxu2  ;;  %4557 = vmatpush.msrb.mxu2 %v13349_v20  ;;  %v13361_v20 = vld [vmem:[#allocation76_spill] sm:$0xff] }
 0x2c2   : > { %v1567_v56 = vadd.f32 %v1566_v60, %v13342_v30  ;;  %2043 = vmatmul.f32.gmra.mxu3 %v13344_v36  ;;  %2617 = vmatmul.f32.gmra.mxu1 %v13345_v28  ;;  %v13353_v30 = vld [vmem:[#allocation65_spill] sm:$0xff]  ;;  %v13354_v36 = vld [vmem:[#allocation147_spill] sm:$0xff] }
 0x2c3   : > { %v2279_v43 = vpop.f32.mrf.mxu0 }
 0x2c4   : > { %v1943_v48 = vadd.f32 %v1942_v63, %v1567_v56  ;;  %v13350_v63 = vld [vmem:[#allocation82_spill] sm:$0xff] }
 0x2c5   : > { %v1948_v34 = vpop.f32.mrf.mxu3 }
 0x2c6   : > { %v2276_v53 = vadd.f32 %v2275_v6, %v1943_v48  ;;  %1650 = vmatmul.f32.gmra.mxu2 %v13343_v31  ;;  %2342 = vmatmul.f32.gmra.mxu0 %v13345_v28  ;;  %v13351_v6 = vld [vmem:[#allocation69_spill] sm:$0xff]  ;;  %v3521_v31 = vand.u32 4294901760, %v3520_v7  ;;  %v13355_v28 = vand.u32 4294901760, %v13354_v36  ;;  %v13367_v36 = vld [vmem:[#allocation83_spill] sm:$0xff] }
 0x2c7   : > { %v2558_v62 = vpop.f32.mrf.mxu1  ;;  %v13352_v60 = vand.u32 4294901760, %v13351_v6  ;;  %v13356_v48 = vld [vmem:[#allocation49_spill] sm:$0xff] }
 0x2c8   : > { %v9426_v0 = vadd.f32 %v2550_v14, %v2276_v53  ;;  %4561 = vmatpush.msrb.mxu2 %v13355_v28  ;;  %3522 = vmatpush.msra.mxu3 %v3521_v31  ;;  %v13357_v3 = vand.u32 4294901760, %v13356_v48  ;;  %v13368_v28 = vand.u32 4294901760, %v13367_v36 }
 0x2c9   : > { %v1571_v26 = vpop.f32.mrf.mxu2 }
 0x2ca   : > { %v1572_v50 = vadd.f32 %v1571_v26, %v13350_v63  ;;  %2049 = vmatmul.f32.gmra.mxu3 %v13352_v60  ;;  %2621 = vmatmul.f32.gmra.mxu1 %v13353_v30  ;;  %v13362_v63 = vand.u32 4294901760, %v13361_v20  ;;  %v13364_v60 = vld [vmem:[#allocation146_spill] sm:$0xff] }
 0x2cb   : > { %v2283_v56 = vpop.f32.mrf.mxu0  ;;  %4565 = vmatpush.msrb.mxu2 %v13357_v3  ;;  %4848 = vmatpush.msrb.mxu3 %v13358_v8  ;;  %v13370_v3 = vld [vmem:[#allocation103_spill] sm:$0xff]  ;;  %v13371_v8 = vld [vmem:[#allocation89_spill] sm:$0xff] }
 0x2cc   : > { %v1949_v1 = vadd.f32 %v1948_v34, %v1572_v50  ;;  %v13359_v34 = vld [vmem:[#allocation136_spill] sm:$0xff] }
 0x2cd   : > { %v1954_v14 = vpop.f32.mrf.mxu3  ;;  %4569 = vmatpush.msrb.mxu2 %v3501_v57  ;;  %4850 = vmatpush.msrb.mxu3 %v13359_v34  ;;  %v13363_v50 = vld [vmem:[#allocation72_spill] sm:$0xff]  ;;  %v13373_v34 = vld [vmem:[#allocation85_spill] sm:$0xff] }
 0x2ce   : > { %v2280_v53 = vadd.f32 %v2279_v43, %v1949_v1  ;;  %1655 = vmatmul.f32.gmra.mxu2 %v13351_v6  ;;  %2346 = vmatmul.f32.gmra.mxu0 %v13353_v30  ;;  %v13369_v1 = vld [vmem:[#allocation79_spill] sm:$0xff] }
 0x2cf   : > { %v2562_v55 = vpop.f32.mrf.mxu1  ;;  %4573 = vmatpush.msrb.mxu2 %v3507_v46  ;;  %4852 = vmatpush.msrb.mxu3 %v13364_v60  ;;  %v13375_v60 = vld [vmem:[#allocation96_spill] sm:$0xff] }
 0x2d0   : > { %v9443_v26 = vadd.f32 %v2554_v13, %v2280_v53  ;;  %v13365_v13 = vld [vmem:[#allocation52_spill] sm:$0xff] }
 0x2d1   : > { %v1576_v7 = vpop.f32.mrf.mxu2  ;;  %4577 = vmatpush.msrb.mxu2 %v3513_v58  ;;  %4854 = vmatpush.msrb.mxu3 %v13365_v13 }
 0x2d2   : > { %v1577_v43 = vadd.f32 %v1576_v7, %v13360_v2  ;;  %2055 = vmatmul.f32.gmra.mxu3 %v13362_v63  ;;  %2625 = vmatmul.f32.gmra.mxu1 %v13363_v50  ;;  %v13372_v7 = vand.u32 4294901760, %v13371_v8 }
 0x2d3   : > { %v2287_v6 = vpop.f32.mrf.mxu0  ;;  %4581 = vmatpush.msrb.mxu2 %v3519_v24  ;;  %4856 = vmatpush.msrb.mxu3 %v9147_v61 }
 0x2d4   : > { %v1955_v18 = vadd.f32 %v1954_v14, %v1577_v43 }
 0x2d5   : > { %v1960_v57 = vpop.f32.mrf.mxu3  ;;  %4858 = vmatpush.msrb.mxu3 %v9242_v22 }
 0x2d6   : > { %v2284_v35 = vadd.f32 %v2283_v56, %v1955_v18  ;;  %1660 = vmatmul.f32.gmra.mxu2 %v13361_v20  ;;  %2350 = vmatmul.f32.gmra.mxu0 %v13363_v50  ;;  %v13374_v50 = vld [vmem:[#allocation108_spill] sm:$0xff]  ;;  %v13376_v18 = vand.u32 4294901760, %v13375_v60 }
 0x2d7   : > { %v2566_v46 = vpop.f32.mrf.mxu1  ;;  %4860 = vmatpush.msrb.mxu3 %v9337_v39 }
 0x2d8   : > { %v9459_v30 = vadd.f32 %v2558_v62, %v2284_v35 }
 0x2d9   : > { %v1581_v31 = vpop.f32.mrf.mxu2  ;;  %4862 = vmatpush.msrb.mxu3 %v2952_v49 }
 0x2da   : > { %v1582_v58 = vadd.f32 %v1581_v31, %v13366_v41  ;;  %2061 = vmatmul.f32.gmra.mxu3 %v13368_v28  ;;  %2629 = vmatmul.f32.gmra.mxu1 %v13369_v1  ;;  %v13378_v28 = vld [vmem:[#allocation115_spill] sm:$0xff] }
 0x2db   : > { %v2291_v24 = vpop.f32.mrf.mxu0 }
 0x2dc   : > { %v1961_v56 = vadd.f32 %v1960_v57, %v1582_v58  ;;  %v13377_v57 = vld [vmem:[#allocation92_spill] sm:$0xff] }
 0x2dd   : > { %v1966_v14 = vpop.f32.mrf.mxu3 }
 0x2de   : > { %v2288_v48 = vadd.f32 %v2287_v6, %v1961_v56  ;;  %1665 = vmatmul.f32.gmra.mxu2 %v13367_v36  ;;  %2354 = vmatmul.f32.gmra.mxu0 %v13369_v1 }
 0x2df   : > { %v2570_v61 = vpop.f32.mrf.mxu1 }
 0x2e0   : > { %v9469_v22 = vadd.f32 %v2562_v55, %v2288_v48 }
 0x2e1   : > { %v1586_v62 = vpop.f32.mrf.mxu2 }
 0x2e2   : > { %v1587_v53 = vadd.f32 %v1586_v62, %v13370_v3  ;;  %2067 = vmatmul.f32.gmra.mxu3 %v13372_v7  ;;  %2633 = vmatmul.f32.gmra.mxu1 %v13373_v34 }
 0x2e3   : > { %v2295_v39 = vpop.f32.mrf.mxu0 }
 0x2e4   : > { %v1967_v2 = vadd.f32 %v1966_v14, %v1587_v53  ;;  %v13381_v14 = vld [vmem:[#allocation99_spill] sm:$0xff] }
 0x2e5   : > { %v1972_v43 = vpop.f32.mrf.mxu3 }
 0x2e6   : > { %v2292_v49 = vadd.f32 %v2291_v24, %v1967_v2  ;;  %1670 = vmatmul.f32.gmra.mxu2 %v13371_v8  ;;  %2358 = vmatmul.f32.gmra.mxu0 %v13373_v34  ;;  %v13379_v24 = vld [vmem:[#allocation102_spill] sm:$0xff]  ;;  %v13382_v34 = vld [vmem:[#allocation119_spill] sm:$0xff] }
 0x2e7   : > { %v2574_v20 = vpop.f32.mrf.mxu1  ;;  %v13380_v56 = vand.u32 4294901760, %v13379_v24  ;;  %v13383_v2 = vld [vmem:[#allocation110_spill] sm:$0xff] }
 0x2e8   : > { %v9477_v63 = vadd.f32 %v2566_v46, %v2292_v49  ;;  %v13385_v49 = vld [vmem:[#allocation106_spill] sm:$0xff] }
 0x2e9   : > { %v1591_v55 = vpop.f32.mrf.mxu2 }
 0x2ea   : > { %v1592_v6 = vadd.f32 %v1591_v55, %v13374_v50  ;;  %2073 = vmatmul.f32.gmra.mxu3 %v13376_v18  ;;  %2637 = vmatmul.f32.gmra.mxu1 %v13377_v57 }
 0x2eb   : > { %v2299_v13 = vpop.f32.mrf.mxu0 }
 0x2ec   : > { %v1973_v35 = vadd.f32 %v1972_v43, %v1592_v6  ;;  %v13384_v43 = vand.u32 4294901760, %v13383_v2 }
 0x2ed   : > { %v1978_v31 = vpop.f32.mrf.mxu3 }
 0x2ee   : > { %v2296_v41 = vadd.f32 %v2295_v39, %v1973_v35  ;;  %1675 = vmatmul.f32.gmra.mxu2 %v13375_v60  ;;  %2362 = vmatmul.f32.gmra.mxu0 %v13377_v57 }
 0x2ef   : > { %v2578_v58 = vpop.f32.mrf.mxu1 }
 0x2f0   : > { %v9485_v36 = vadd.f32 %v2570_v61, %v2296_v41 }
 0x2f1   : > { %v1596_v46 = vpop.f32.mrf.mxu2 }
 0x2f2   : > { %v1597_v1 = vadd.f32 %v1596_v46, %v13378_v28  ;;  %2079 = vmatmul.f32.gmra.mxu3 %v13380_v56  ;;  %2641 = vmatmul.f32.gmra.mxu1 %v13381_v14  ;;  %v13389_v46 = vld [vmem:[#allocation113_spill] sm:$0xff] }
 0x2f3   : > { %v2303_v48 = vpop.f32.mrf.mxu0 }
 0x2f4   : > { %v1979_v62 = vadd.f32 %v1978_v31, %v1597_v1  ;;  %v13387_v31 = vld [vmem:[#allocation116_spill] sm:$0xff] }
 0x2f5   : > { %v1984_v3 = vpop.f32.mrf.mxu3  ;;  %v13388_v41 = vand.u32 4294901760, %v13387_v31 }
 0x2f6   : > { %v2300_v53 = vadd.f32 %v2299_v13, %v1979_v62  ;;  %1680 = vmatmul.f32.gmra.mxu2 %v13379_v24  ;;  %2366 = vmatmul.f32.gmra.mxu0 %v13381_v14  ;;  %v13386_v13 = vld [vmem:[#allocation127_spill] sm:$0xff]  ;;  %v13390_v24 = vld [vmem:[#allocation45_spill] sm:$0xff] }
 0x2f7   : > { %v2582_v8 = vpop.f32.mrf.mxu1  ;;  %v2661_v56 = vmax.f32 %v13390_v24, 0.0 }
 0x2f8   : > { %v9493_v7 = vadd.f32 %v2574_v20, %v2300_v53 }
 0x2f9   : > { %v1601_v61 = vpop.f32.mrf.mxu2 }
 0x2fa   : > { %v1602_v39 = vadd.f32 %v1601_v61, %v13382_v34  ;;  %2085 = vmatmul.f32.gmra.mxu3 %v13384_v43  ;;  %2645 = vmatmul.f32.gmra.mxu1 %v13385_v49  ;;  %v13391_v61 = vld [vmem:[#allocation129_spill] sm:$0xff]  ;;  %v13394_v43 = vld [vmem:[#allocation118_spill] sm:$0xff] }
 0x2fb   : > { %v2307_v55 = vpop.f32.mrf.mxu0 }
 0x2fc   : > { %v1985_v50 = vadd.f32 %v1984_v3, %v1602_v39  ;;  %v2739_v3 = vsel %vm2737_vm2, %v2661_v56, 0  ;;  %v13392_v39 = vld [vmem:[#allocation121_spill] sm:$0xff]  ;;  %v13398_v56 = vld [vmem:[#allocation128_spill] sm:$0xff] }
 0x2fd   : > { %v1990_v6 = vpop.f32.mrf.mxu3 }
 0x2fe   : > { %v2304_v60 = vadd.f32 %v2303_v48, %v1985_v50  ;;  %1685 = vmatmul.f32.gmra.mxu2 %v13383_v2  ;;  %2370 = vmatmul.f32.gmra.mxu0 %v13385_v49  ;;  %v13393_v2 = vand.u32 4294901760, %v13392_v39  ;;  %v9517_v50 = vand.u32 4294901760, %v2739_v3 }
 0x2ff   : > { %v2586_v18 = vpop.f32.mrf.mxu1 }
 0x300   : > { %v9501_v57 = vadd.f32 %v2578_v58, %v2304_v60  ;;  %13395 = vst [vmem:[#allocation53_spill] sm:$0xff] %v9517_v50 }
 0x301   : > { %v1606_v20 = vpop.f32.mrf.mxu2 }
 0x302   : > { %v1607_v35 = vadd.f32 %v1606_v20, %v13386_v13  ;;  %2091 = vmatmul.f32.gmra.mxu3 %v13388_v41  ;;  %2649 = vmatmul.f32.gmra.mxu1 %v13389_v46 }
 0x303   : > { %v2311_v28 = vpop.f32.mrf.mxu0 }
 0x304   : > { %v1991_v1 = vadd.f32 %v1990_v6, %v1607_v35  ;;  %v13396_v6 = vld [vmem:[#allocation42_spill] sm:$0xff]  ;;  %v2955_v35 = vsub.f32 %v2739_v3, %v9517_v50 }
 0x305   : > { %v1996_v14 = vpop.f32.mrf.mxu3  ;;  %v2662_v60 = vmax.f32 %v13396_v6, 0.0 }
 0x306   : > { %v2308_v48 = vadd.f32 %v2307_v55, %v1991_v1  ;;  %1690 = vmatmul.f32.gmra.mxu2 %v13387_v31  ;;  %2374 = vmatmul.f32.gmra.mxu0 %v13389_v46  ;;  %v13397_v1 = vld [vmem:[#allocation130_spill] sm:$0xff] }
 0x307   : > { %v2590_v58 = vpop.f32.mrf.mxu1  ;;  %v2742_v46 = vsel %vm2737_vm2, %v2662_v60, 0 }
 0x308   : > { %v9510_v62 = vadd.f32 %v2582_v8, %v2308_v48  ;;  %v13400_v48 = vld [vmem:[#allocation125_spill] sm:$0xff] }
 0x309   : > { %v1611_v53 = vpop.f32.mrf.mxu2 }
 0x30a   : > { %v1612_v34 = vadd.f32 %v1611_v53, %v13391_v61  ;;  %2097 = vmatmul.f32.gmra.mxu3 %v13393_v2  ;;  %2653 = vmatmul.f32.gmra.mxu1 %v13394_v43  ;;  %v2956_v61 = vand.u32 4294901760, %v2955_v35 }
 0x30b   : > { %v2315_v49 = vpop.f32.mrf.mxu0 }
 0x30c   : > { %v1997_v55 = vadd.f32 %v1996_v14, %v1612_v34  ;;  %v13399_v14 = vand.u32 4294901760, %v13398_v56  ;;  %v9530_v34 = vand.u32 4294901760, %v2742_v46  ;;  %v2957_v6 = vsub.f32 %v2955_v35, %v2956_v61 }
 0x30d   : > { %v2002_v20 = vpop.f32.mrf.mxu3 }
 0x30e   : > { %v2312_v13 = vadd.f32 %v2311_v28, %v1997_v55  ;;  %1695 = vmatmul.f32.gmra.mxu2 %v13392_v39  ;;  %2378 = vmatmul.f32.gmra.mxu0 %v13394_v43  ;;  %13401 = vst [vmem:[#allocation50_spill] sm:$0xff] %v9530_v34  ;;  %v13402_v39 = vld [vmem:[#allocation40_spill] sm:$0xff]  ;;  %v2963_v60 = vsub.f32 %v2742_v46, %v9530_v34 }
 0x30f   : > { %v2594_v8 = vpop.f32.mrf.mxu1  ;;  %v2663_v2 = vmax.f32 %v13402_v39, 0.0 }
 0x310   : > { %v9523_v31 = vadd.f32 %v2586_v18, %v2312_v13 }
 0x311   : > { %v1616_v41 = vpop.f32.mrf.mxu2 }
 0x312   : > { %v1617_v24 = vadd.f32 %v1616_v41, %v13397_v1  ;;  %2103 = vmatmul.f32.gmra.mxu3 %v13399_v14  ;;  %2657 = vmatmul.f32.gmra.mxu1 %v13400_v48  ;;  %v13404_v41 = vld [vmem:[#allocation131_spill] sm:$0xff]  ;;  %v2958_v14 = vand.u32 4294901760, %v2957_v6 }
 0x313   : > { %v2319_v28 = vpop.f32.mrf.mxu0 }
 0x314   : > { %v2003_v53 = vadd.f32 %v2002_v20, %v1617_v24  ;;  %v2745_v20 = vsel %vm2737_vm2, %v2663_v2, 0 }
 0x315   : > { %v2008_v3 = vpop.f32.mrf.mxu3 }
 0x316   : > { %v2316_v18 = vadd.f32 %v2315_v49, %v2003_v53  ;;  %1700 = vmatmul.f32.gmra.mxu2 %v13398_v56  ;;  %2382 = vmatmul.f32.gmra.mxu0 %v13400_v48  ;;  %v2964_v56 = vand.u32 4294901760, %v2963_v60  ;;  %v9541_v53 = vand.u32 4294901760, %v2745_v20  ;;  %v13406_v48 = vld [vmem:[#allocation38_spill] sm:$0xff] }
 0x317   : > { %v2598_v43 = vpop.f32.mrf.mxu1 }
 0x318   : > { %v9535_v55 = vadd.f32 %v2590_v58, %v2316_v18  ;;  %13405 = vst [vmem:[#allocation63_spill] sm:$0xff] %v9541_v53  ;;  %v2664_v58 = vmax.f32 %v13406_v48, 0.0  ;;  %v2965_v2 = vsub.f32 %v2963_v60, %v2964_v56 }
 0x319   : > { %v1621_v13 = vpop.f32.mrf.mxu2 }
 0x31a   : > { %13403 = vst [vmem:[#allocation66_spill] sm:$0xff] %v9535_v55  ;;  %v1622_v1 = vadd.f32 %v1621_v13, %v13404_v41  ;;  %3524 = vmatmul.f32.vlgmr.msra.gmra.mxu3 %v9517_v50  ;;  %4160 = vmatmul.f32.vlgmr.msra.gmra.mxu1 %v2956_v61  ;;  %v2971_v13 = vsub.f32 %v2745_v20, %v9541_v53  ;;  %v2748_v61 = vsel %vm2737_vm2, %v2664_v58, 0  ;;  %v2966_v50 = vand.u32 4294901760, %v2965_v2 }
 0x31b   : > { %v2323_v24 = vpop.f32.mrf.mxu0 }
 0x31c   : > { %v2009_v49 = vadd.f32 %v2008_v3, %v1622_v1  ;;  %v13408_v3 = vld [vmem:[#allocation132_spill] sm:$0xff] }
 0x31d   : > { %v2014_v39 = vpop.f32.mrf.mxu3 }
 0x31e   : > { %v2320_v18 = vadd.f32 %v2319_v28, %v2009_v49  ;;  %2959 = vmatmul.f32.vlgmr.msra.gmra.mxu2 %v2958_v14  ;;  %3814 = vmatmul.f32.vlgmr.msra.gmra.mxu0 %v2955_v35  ;;  %v2972_v28 = vand.u32 4294901760, %v2971_v13  ;;  %v9550_v49 = vand.u32 4294901760, %v2748_v61  ;;  %v13410_v35 = vld [vmem:[#allocation46_spill] sm:$0xff] }
 0x31f   : > { %v2602_v46 = vpop.f32.mrf.mxu1 }
 0x320   : > { %v9544_v55 = vadd.f32 %v2594_v8, %v2320_v18  ;;  %13409 = vst [vmem:[#allocation57_spill] sm:$0xff] %v9550_v49  ;;  %v2665_v8 = vmax.f32 %v13410_v35, 0.0  ;;  %v2973_v58 = vsub.f32 %v2971_v13, %v2972_v28 }
 0x321   : > { %v1626_v41 = vpop.f32.mrf.mxu2 }
 0x322   : > { %13407 = vst [vmem:[#allocation60_spill] sm:$0xff] %v9544_v55  ;;  %v1627_v6 = vadd.f32 %v1626_v41, %v13408_v3  ;;  %3528 = vmatmul.f32.gmra.mxu3 %v9530_v34  ;;  %4166 = vmatmul.f32.gmra.mxu1 %v2964_v56  ;;  %v2979_v41 = vsub.f32 %v2748_v61, %v9550_v49  ;;  %v2751_v56 = vsel %vm2737_vm2, %v2665_v8, 0  ;;  %v2974_v34 = vand.u32 4294901760, %v2973_v58 }
 0x323   : > { %v2327_v1 = vpop.f32.mrf.mxu0 }
 0x324   : > { %v2015_v48 = vadd.f32 %v2014_v39, %v1627_v6  ;;  %v13411_v39 = vld [vmem:[#allocation133_spill] sm:$0xff] }
 0x325   : > { %v2020_v14 = vpop.f32.mrf.mxu3 }
 0x326   : > { %v2324_v18 = vadd.f32 %v2323_v24, %v2015_v48  ;;  %2967 = vmatmul.f32.gmra.mxu2 %v2966_v50  ;;  %3819 = vmatmul.f32.gmra.mxu0 %v2963_v60  ;;  %v2980_v24 = vand.u32 4294901760, %v2979_v41  ;;  %v9559_v50 = vand.u32 4294901760, %v2751_v56 }
 0x327   : > { %v2606_v20 = vpop.f32.mrf.mxu1 }
 0x328   : > { %v9553_v55 = vadd.f32 %v2598_v43, %v2324_v18  ;;  %13412 = vst [vmem:[#allocation73_spill] sm:$0xff] %v9559_v50  ;;  %v2666_v43 = vmax.f32 %v9078_v47, 0.0  ;;  %v2981_v8 = vsub.f32 %v2979_v41, %v2980_v24 }
 0x329   : > { %v1631_v3 = vpop.f32.mrf.mxu2 }
 0x32a   : > { %v1632_v2 = vadd.f32 %v1631_v3, %v13411_v39  ;;  %3532 = vmatmul.f32.gmra.mxu3 %v9541_v53  ;;  %4172 = vmatmul.f32.gmra.mxu1 %v2972_v28  ;;  %v2987_v3 = vsub.f32 %v2751_v56, %v9559_v50  ;;  %v2754_v28 = vsel %vm2737_vm2, %v2666_v43, 0  ;;  %v2982_v53 = vand.u32 4294901760, %v2981_v8 }
 0x32b   : > { %v2331_v6 = vpop.f32.mrf.mxu0 }
 0x32c   : > { %v2021_v35 = vadd.f32 %v2020_v14, %v1632_v2  ;;  %v13413_v14 = vld [vmem:[#allocation134_spill] sm:$0xff] }
 0x32d   : > { %v2026_v60 = vpop.f32.mrf.mxu3 }
 0x32e   : > { %v2328_v48 = vadd.f32 %v2327_v1, %v2021_v35  ;;  %2975 = vmatmul.f32.gmra.mxu2 %v2974_v34  ;;  %3824 = vmatmul.f32.gmra.mxu0 %v2971_v13  ;;  %v2988_v1 = vand.u32 4294901760, %v2987_v3  ;;  %v9568_v34 = vand.u32 4294901760, %v2754_v28 }
 0x32f   : > { %v2610_v61 = vpop.f32.mrf.mxu1 }
 0x330   : > { %v9562_v18 = vadd.f32 %v2602_v46, %v2328_v48  ;;  %13414 = vst [vmem:[#allocation70_spill] sm:$0xff] %v9568_v34  ;;  %v2667_v46 = vmax.f32 %v9088_v37, 0.0  ;;  %v2989_v43 = vsub.f32 %v2987_v3, %v2988_v1 }
 0x331   : > { %v1636_v39 = vpop.f32.mrf.mxu2 }
 0x332   : > { %v1637_v58 = vadd.f32 %v1636_v39, %v13413_v14  ;;  %3536 = vmatmul.f32.gmra.mxu3 %v9550_v49  ;;  %4178 = vmatmul.f32.gmra.mxu1 %v2980_v24  ;;  %v2995_v39 = vsub.f32 %v2754_v28, %v9568_v34  ;;  %v2757_v24 = vsel %vm2737_vm2, %v2667_v46, 0  ;;  %v2990_v49 = vand.u32 4294901760, %v2989_v43 }
 0x333   : > { %v2335_v2 = vpop.f32.mrf.mxu0 }
 0x334   : > { %v2027_v47 = vadd.f32 %v2026_v60, %v1637_v58  ;;  %v13416_v60 = vld [vmem:[#allocation135_spill] sm:$0xff] }
 0x335   : > { %v2032_v13 = vpop.f32.mrf.mxu3 }
 0x336   : > { %v2332_v35 = vadd.f32 %v2331_v6, %v2027_v47  ;;  %2983 = vmatmul.f32.gmra.mxu2 %v2982_v53  ;;  %3829 = vmatmul.f32.gmra.mxu0 %v2979_v41  ;;  %v2996_v6 = vand.u32 4294901760, %v2995_v39  ;;  %v9577_v53 = vand.u32 4294901760, %v2757_v24  ;;  %v13418_v41 = vld [vmem:[#allocation43_spill] sm:$0xff] }
 0x337   : > { %v2614_v56 = vpop.f32.mrf.mxu1 }
 0x338   : > { %v9571_v48 = vadd.f32 %v2606_v20, %v2332_v35  ;;  %13417 = vst [vmem:[#allocation64_spill] sm:$0xff] %v9577_v53  ;;  %v2668_v20 = vmax.f32 %v13418_v41, 0.0  ;;  %v2997_v46 = vsub.f32 %v2995_v39, %v2996_v6 }
 0x339   : > { %v1641_v14 = vpop.f32.mrf.mxu2 }
 0x33a   : > { %13415 = vst [vmem:[#allocation67_spill] sm:$0xff] %v9571_v48  ;;  %v1642_v8 = vadd.f32 %v1641_v14, %v13416_v60  ;;  %3540 = vmatmul.f32.gmra.mxu3 %v9559_v50  ;;  %4184 = vmatmul.f32.gmra.mxu1 %v2988_v1  ;;  %v3003_v14 = vsub.f32 %v2757_v24, %v9577_v53  ;;  %v2760_v1 = vsel %vm2737_vm2, %v2668_v20, 0  ;;  %v2998_v50 = vand.u32 4294901760, %v2997_v46 }
 0x33b   : > { %v2339_v58 = vpop.f32.mrf.mxu0 }
 0x33c   : > { %v2033_v37 = vadd.f32 %v2032_v13, %v1642_v8  ;;  %v13420_v13 = vld [vmem:[#allocation138_spill] sm:$0xff] }
 0x33d   : > { %v2038_v47 = vpop.f32.mrf.mxu3 }
 0x33e   : > { %v2336_v35 = vadd.f32 %v2335_v2, %v2033_v37  ;;  %2991 = vmatmul.f32.gmra.mxu2 %v2990_v49  ;;  %3834 = vmatmul.f32.gmra.mxu0 %v2987_v3  ;;  %v3004_v2 = vand.u32 4294901760, %v3003_v14  ;;  %v9586_v49 = vand.u32 4294901760, %v2760_v1  ;;  %v13422_v3 = vld [vmem:[#allocation59_spill] sm:$0xff] }
 0x33f   : > { %v2618_v28 = vpop.f32.mrf.mxu1 }
 0x340   : > { %v9580_v48 = vadd.f32 %v2610_v61, %v2336_v35  ;;  %13421 = vst [vmem:[#allocation77_spill] sm:$0xff] %v9586_v49  ;;  %v2669_v61 = vmax.f32 %v13422_v3, 0.0  ;;  %v3005_v20 = vsub.f32 %v3003_v14, %v3004_v2 }
 0x341   : > { %v1646_v60 = vpop.f32.mrf.mxu2 }
 0x342   : > { %13419 = vst [vmem:[#allocation80_spill] sm:$0xff] %v9580_v48  ;;  %v1647_v43 = vadd.f32 %v1646_v60, %v13420_v13  ;;  %3544 = vmatmul.f32.gmra.mxu3 %v9568_v34  ;;  %4190 = vmatmul.f32.gmra.mxu1 %v2996_v6  ;;  %v3011_v60 = vsub.f32 %v2760_v1, %v9586_v49  ;;  %v2763_v6 = vsel %vm2737_vm2, %v2669_v61, 0  ;;  %v3006_v34 = vand.u32 4294901760, %v3005_v20 }
 0x343   : > { %v2343_v8 = vpop.f32.mrf.mxu0 }
 0x344   : > { %v2039_v41 = vadd.f32 %v2038_v47, %v1647_v43  ;;  %v13424_v47 = vld [vmem:[#allocation139_spill] sm:$0xff] }
 0x345   : > { %v2044_v37 = vpop.f32.mrf.mxu3 }
 0x346   : > { %v2340_v35 = vadd.f32 %v2339_v58, %v2039_v41  ;;  %2999 = vmatmul.f32.gmra.mxu2 %v2998_v50  ;;  %3839 = vmatmul.f32.gmra.mxu0 %v2995_v39  ;;  %v3012_v58 = vand.u32 4294901760, %v3011_v60  ;;  %v9595_v50 = vand.u32 4294901760, %v2763_v6  ;;  %v13426_v39 = vld [vmem:[#allocation56_spill] sm:$0xff] }
 0x347   : > { %v2622_v24 = vpop.f32.mrf.mxu1 }
 0x348   : > { %v9589_v48 = vadd.f32 %v2614_v56, %v2340_v35  ;;  %13425 = vst [vmem:[#allocation71_spill] sm:$0xff] %v9595_v50  ;;  %v2670_v56 = vmax.f32 %v13426_v39, 0.0  ;;  %v3013_v61 = vsub.f32 %v3011_v60, %v3012_v58 }
 0x349   : > { %v1651_v13 = vpop.f32.mrf.mxu2 }
 0x34a   : > { %13423 = vst [vmem:[#allocation74_spill] sm:$0xff] %v9589_v48  ;;  %v1652_v46 = vadd.f32 %v1651_v13, %v13424_v47  ;;  %3548 = vmatmul.f32.gmra.mxu3 %v9577_v53  ;;  %4196 = vmatmul.f32.gmra.mxu1 %v3004_v2  ;;  %v3019_v13 = vsub.f32 %v2763_v6, %v9595_v50  ;;  %v2766_v2 = vsel %vm2737_vm2, %v2670_v56, 0  ;;  %v3014_v53 = vand.u32 4294901760, %v3013_v61 }
 0x34b   : > { %v2347_v43 = vpop.f32.mrf.mxu0 }
 0x34c   : > { %v2045_v3 = vadd.f32 %v2044_v37, %v1652_v46  ;;  %v13427_v37 = vld [vmem:[#allocation140_spill] sm:$0xff] }
 0x34d   : > { %v2050_v41 = vpop.f32.mrf.mxu3 }
 0x34e   : > { %v2344_v35 = vadd.f32 %v2343_v8, %v2045_v3  ;;  %3007 = vmatmul.f32.gmra.mxu2 %v3006_v34  ;;  %3844 = vmatmul.f32.gmra.mxu0 %v3003_v14  ;;  %v3020_v8 = vand.u32 4294901760, %v3019_v13  ;;  %v9604_v34 = vand.u32 4294901760, %v2766_v2 }
 0x34f   : > { %v2626_v1 = vpop.f32.mrf.mxu1 }
 0x350   : > { %v9598_v48 = vadd.f32 %v2618_v28, %v2344_v35  ;;  %13428 = vst [vmem:[#allocation86_spill] sm:$0xff] %v9604_v34  ;;  %v2671_v28 = vmax.f32 %v9128_v33, 0.0  ;;  %v3021_v56 = vsub.f32 %v3019_v13, %v3020_v8 }
 0x351   : > { %v1656_v47 = vpop.f32.mrf.mxu2 }
 0x352   : > { %v1657_v20 = vadd.f32 %v1656_v47, %v13427_v37  ;;  %3552 = vmatmul.f32.gmra.mxu3 %v9586_v49  ;;  %4202 = vmatmul.f32.gmra.mxu1 %v3012_v58  ;;  %v3027_v47 = vsub.f32 %v2766_v2, %v9604_v34  ;;  %v2769_v58 = vsel %vm2737_vm2, %v2671_v28, 0  ;;  %v3022_v49 = vand.u32 4294901760, %v3021_v56 }
 0x353   : > { %v2351_v46 = vpop.f32.mrf.mxu0 }
 0x354   : > { %v2051_v39 = vadd.f32 %v2050_v41, %v1657_v20  ;;  %v13429_v41 = vld [vmem:[#allocation141_spill] sm:$0xff] }
 0x355   : > { %v2056_v14 = vpop.f32.mrf.mxu3 }
 0x356   : > { %v2348_v3 = vadd.f32 %v2347_v43, %v2051_v39  ;;  %3015 = vmatmul.f32.gmra.mxu2 %v3014_v53  ;;  %3849 = vmatmul.f32.gmra.mxu0 %v3011_v60  ;;  %v3028_v43 = vand.u32 4294901760, %v3027_v47  ;;  %v9613_v53 = vand.u32 4294901760, %v2769_v58 }
 0x357   : > { %v2630_v6 = vpop.f32.mrf.mxu1 }
 0x358   : > { %v9607_v35 = vadd.f32 %v2622_v24, %v2348_v3  ;;  %13430 = vst [vmem:[#allocation84_spill] sm:$0xff] %v9613_v53  ;;  %v2672_v24 = vmax.f32 %v9138_v32, 0.0  ;;  %v3029_v28 = vsub.f32 %v3027_v47, %v3028_v43 }
 0x359   : > { %v1661_v37 = vpop.f32.mrf.mxu2 }
 0x35a   : > { %v1662_v61 = vadd.f32 %v1661_v37, %v13429_v41  ;;  %3556 = vmatmul.f32.gmra.mxu3 %v9595_v50  ;;  %4208 = vmatmul.f32.gmra.mxu1 %v3020_v8  ;;  %v3035_v37 = vsub.f32 %v2769_v58, %v9613_v53  ;;  %v2772_v8 = vsel %vm2737_vm2, %v2672_v24, 0  ;;  %v3030_v50 = vand.u32 4294901760, %v3029_v28 }
 0x35b   : > { %v2355_v20 = vpop.f32.mrf.mxu0 }
 0x35c   : > { %v2057_v33 = vadd.f32 %v2056_v14, %v1662_v61  ;;  %v13431_v14 = vld [vmem:[#allocation142_spill] sm:$0xff] }
 0x35d   : > { %v2062_v60 = vpop.f32.mrf.mxu3 }
 0x35e   : > { %v2352_v39 = vadd.f32 %v2351_v46, %v2057_v33  ;;  %3023 = vmatmul.f32.gmra.mxu2 %v3022_v49  ;;  %3854 = vmatmul.f32.gmra.mxu0 %v3019_v13  ;;  %v3036_v46 = vand.u32 4294901760, %v3035_v37  ;;  %v9622_v49 = vand.u32 4294901760, %v2772_v8 }
 0x35f   : > { %v2634_v2 = vpop.f32.mrf.mxu1 }
 0x360   : > { %v9616_v3 = vadd.f32 %v2626_v1, %v2352_v39  ;;  %13432 = vst [vmem:[#allocation81_spill] sm:$0xff] %v9622_v49  ;;  %v2673_v1 = vmax.f32 %v9160_v40, 0.0  ;;  %v3037_v24 = vsub.f32 %v3035_v37, %v3036_v46 }
 0x361   : > { %v1666_v41 = vpop.f32.mrf.mxu2 }
 0x362   : > { %v1667_v56 = vadd.f32 %v1666_v41, %v13431_v14  ;;  %3560 = vmatmul.f32.gmra.mxu3 %v9604_v34  ;;  %4214 = vmatmul.f32.gmra.mxu1 %v3028_v43  ;;  %v3043_v41 = vsub.f32 %v2772_v8, %v9622_v49  ;;  %v2775_v43 = vsel %vm2737_vm2, %v2673_v1, 0  ;;  %v3038_v34 = vand.u32 4294901760, %v3037_v24 }
 0x363   : > { %v2359_v61 = vpop.f32.mrf.mxu0 }
 0x364   : > { %v2063_v32 = vadd.f32 %v2062_v60, %v1667_v56  ;;  %v13433_v60 = vld [vmem:[#allocation143_spill] sm:$0xff] }
 0x365   : > { %v2068_v13 = vpop.f32.mrf.mxu3 }
 0x366   : > { %v2356_v33 = vadd.f32 %v2355_v20, %v2063_v32  ;;  %3031 = vmatmul.f32.gmra.mxu2 %v3030_v50  ;;  %3859 = vmatmul.f32.gmra.mxu0 %v3027_v47  ;;  %v3044_v20 = vand.u32 4294901760, %v3043_v41  ;;  %v9631_v50 = vand.u32 4294901760, %v2775_v43 }
 0x367   : > { %v2638_v58 = vpop.f32.mrf.mxu1 }
 0x368   : > { %v9625_v39 = vadd.f32 %v2630_v6, %v2356_v33  ;;  %13434 = vst [vmem:[#allocation78_spill] sm:$0xff] %v9631_v50  ;;  %v2674_v6 = vmax.f32 %v9173_v51, 0.0  ;;  %v3045_v1 = vsub.f32 %v3043_v41, %v3044_v20 }
 0x369   : > { %v1671_v14 = vpop.f32.mrf.mxu2 }
 0x36a   : > { %v1672_v28 = vadd.f32 %v1671_v14, %v13433_v60  ;;  %3564 = vmatmul.f32.gmra.mxu3 %v9613_v53  ;;  %4220 = vmatmul.f32.gmra.mxu1 %v3036_v46  ;;  %v3051_v14 = vsub.f32 %v2775_v43, %v9631_v50  ;;  %v2778_v46 = vsel %vm2737_vm2, %v2674_v6, 0  ;;  %v3046_v53 = vand.u32 4294901760, %v3045_v1 }
 0x36b   : > { %v2363_v56 = vpop.f32.mrf.mxu0 }
 0x36c   : > { %v2069_v40 = vadd.f32 %v2068_v13, %v1672_v28  ;;  %v13435_v13 = vld [vmem:[#allocation144_spill] sm:$0xff] }
 0x36d   : > { %v2074_v47 = vpop.f32.mrf.mxu3 }
 0x36e   : > { %v2360_v32 = vadd.f32 %v2359_v61, %v2069_v40  ;;  %3039 = vmatmul.f32.gmra.mxu2 %v3038_v34  ;;  %3864 = vmatmul.f32.gmra.mxu0 %v3035_v37  ;;  %v3052_v61 = vand.u32 4294901760, %v3051_v14  ;;  %v9640_v34 = vand.u32 4294901760, %v2778_v46 }
 0x36f   : > { %v2642_v8 = vpop.f32.mrf.mxu1 }
 0x370   : > { %v9634_v33 = vadd.f32 %v2634_v2, %v2360_v32  ;;  %13436 = vst [vmem:[#allocation93_spill] sm:$0xff] %v9640_v34  ;;  %v2675_v2 = vmax.f32 %v9183_v10, 0.0  ;;  %v3053_v6 = vsub.f32 %v3051_v14, %v3052_v61 }
 0x371   : > { %v1676_v60 = vpop.f32.mrf.mxu2 }
 0x372   : > { %v1677_v24 = vadd.f32 %v1676_v60, %v13435_v13  ;;  %3568 = vmatmul.f32.gmra.mxu3 %v9622_v49  ;;  %4226 = vmatmul.f32.gmra.mxu1 %v3044_v20  ;;  %v3059_v60 = vsub.f32 %v2778_v46, %v9640_v34  ;;  %v2781_v20 = vsel %vm2737_vm2, %v2675_v2, 0  ;;  %v3054_v49 = vand.u32 4294901760, %v3053_v6 }
 0x373   : > { %v2367_v28 = vpop.f32.mrf.mxu0 }
 0x374   : > { %v2075_v51 = vadd.f32 %v2074_v47, %v1677_v24  ;;  %v13437_v47 = vld [vmem:[#allocation145_spill] sm:$0xff] }
 0x375   : > { %v2080_v37 = vpop.f32.mrf.mxu3 }
 0x376   : > { %v2364_v40 = vadd.f32 %v2363_v56, %v2075_v51  ;;  %3047 = vmatmul.f32.gmra.mxu2 %v3046_v53  ;;  %3869 = vmatmul.f32.gmra.mxu0 %v3043_v41  ;;  %v3060_v56 = vand.u32 4294901760, %v3059_v60  ;;  %v9649_v53 = vand.u32 4294901760, %v2781_v20 }
 0x377   : > { %v2646_v43 = vpop.f32.mrf.mxu1 }
 0x378   : > { %v9643_v32 = vadd.f32 %v2638_v58, %v2364_v40  ;;  %13438 = vst [vmem:[#allocation90_spill] sm:$0xff] %v9649_v53  ;;  %v2676_v58 = vmax.f32 %v9193_v38, 0.0  ;;  %v3061_v2 = vsub.f32 %v3059_v60, %v3060_v56 }
 0x379   : > { %v1681_v13 = vpop.f32.mrf.mxu2 }
 0x37a   : > { %v1682_v1 = vadd.f32 %v1681_v13, %v13437_v47  ;;  %3572 = vmatmul.f32.gmra.mxu3 %v9631_v50  ;;  %4232 = vmatmul.f32.gmra.mxu1 %v3052_v61  ;;  %v3067_v13 = vsub.f32 %v2781_v20, %v9649_v53  ;;  %v2784_v61 = vsel %vm2737_vm2, %v2676_v58, 0  ;;  %v3062_v50 = vand.u32 4294901760, %v3061_v2 }
 0x37b   : > { %v2371_v24 = vpop.f32.mrf.mxu0 }
 0x37c   : > { %v2081_v10 = vadd.f32 %v2080_v37, %v1682_v1  ;;  %v13439_v37 = vld [vmem:[#allocation148_spill] sm:$0xff] }
 0x37d   : > { %v2086_v41 = vpop.f32.mrf.mxu3 }
 0x37e   : > { %v2368_v51 = vadd.f32 %v2367_v28, %v2081_v10  ;;  %3055 = vmatmul.f32.gmra.mxu2 %v3054_v49  ;;  %3874 = vmatmul.f32.gmra.mxu0 %v3051_v14  ;;  %v3068_v28 = vand.u32 4294901760, %v3067_v13  ;;  %v9658_v49 = vand.u32 4294901760, %v2784_v61 }
 0x37f   : > { %v2650_v46 = vpop.f32.mrf.mxu1 }
 0x380   : > { %v9652_v40 = vadd.f32 %v2642_v8, %v2368_v51  ;;  %13440 = vst [vmem:[#allocation87_spill] sm:$0xff] %v9658_v49  ;;  %v2677_v8 = vmax.f32 %v9203_v29, 0.0  ;;  %v3069_v58 = vsub.f32 %v3067_v13, %v3068_v28 }
 0x381   : > { %v1686_v47 = vpop.f32.mrf.mxu2 }
 0x382   : > { %v1687_v6 = vadd.f32 %v1686_v47, %v13439_v37  ;;  %3576 = vmatmul.f32.gmra.mxu3 %v9640_v34  ;;  %4238 = vmatmul.f32.gmra.mxu1 %v3060_v56  ;;  %v3075_v47 = vsub.f32 %v2784_v61, %v9658_v49  ;;  %v2787_v56 = vsel %vm2737_vm2, %v2677_v8, 0  ;;  %v3070_v34 = vand.u32 4294901760, %v3069_v58 }
 0x383   : > { %v2375_v1 = vpop.f32.mrf.mxu0 }
 0x384   : > { %v2087_v38 = vadd.f32 %v2086_v41, %v1687_v6  ;;  %v13441_v41 = vld [vmem:[#allocation149_spill] sm:$0xff] }
 0x385   : > { %v2092_v14 = vpop.f32.mrf.mxu3 }
 0x386   : > { %v2372_v10 = vadd.f32 %v2371_v24, %v2087_v38  ;;  %3063 = vmatmul.f32.gmra.mxu2 %v3062_v50  ;;  %3879 = vmatmul.f32.gmra.mxu0 %v3059_v60  ;;  %v3076_v24 = vand.u32 4294901760, %v3075_v47  ;;  %v9667_v50 = vand.u32 4294901760, %v2787_v56 }
 0x387   : > { %v2654_v20 = vpop.f32.mrf.mxu1 }
 0x388   : > { %v9661_v51 = vadd.f32 %v2646_v43, %v2372_v10  ;;  %13442 = vst [vmem:[#allocation100_spill] sm:$0xff] %v9667_v50  ;;  %v2678_v43 = vmax.f32 %v9213_v25, 0.0  ;;  %v3077_v8 = vsub.f32 %v3075_v47, %v3076_v24 }
 0x389   : > { %v1691_v37 = vpop.f32.mrf.mxu2 }
 0x38a   : > { %v1692_v2 = vadd.f32 %v1691_v37, %v13441_v41  ;;  %3580 = vmatmul.f32.gmra.mxu3 %v9649_v53  ;;  %4244 = vmatmul.f32.gmra.mxu1 %v3068_v28  ;;  %v3083_v37 = vsub.f32 %v2787_v56, %v9667_v50  ;;  %v2790_v28 = vsel %vm2737_vm2, %v2678_v43, 0  ;;  %v3078_v53 = vand.u32 4294901760, %v3077_v8 }
 0x38b   : > { %v2379_v6 = vpop.f32.mrf.mxu0 }
 0x38c   : > { %v2093_v29 = vadd.f32 %v2092_v14, %v1692_v2  ;;  %v13443_v14 = vld [vmem:[#allocation152_spill] sm:$0xff] }
 0x38d   : > { %v2098_v60 = vpop.f32.mrf.mxu3 }
 0x38e   : > { %v2376_v38 = vadd.f32 %v2375_v1, %v2093_v29  ;;  %3071 = vmatmul.f32.gmra.mxu2 %v3070_v34  ;;  %3884 = vmatmul.f32.gmra.mxu0 %v3067_v13  ;;  %v3084_v1 = vand.u32 4294901760, %v3083_v37  ;;  %v9676_v34 = vand.u32 4294901760, %v2790_v28  ;;  %v2679_v13 = vmax.f32 %v9223_v21, 0.0 }
 0x38f   : > { %v2658_v61 = vpop.f32.mrf.mxu1 }
 0x390   : > { %v9670_v10 = vadd.f32 %v2650_v46, %v2376_v38  ;;  %13444 = vst [vmem:[#allocation97_spill] sm:$0xff] %v9676_v34  ;;  %v5191_v46 = vld [vmem:[%s12408_s5 + $0x38] sm:$0xff]  ;;  %v3085_v8 = vsub.f32 %v3083_v37, %v3084_v1 }
 0x391   : > { %v1696_v41 = vpop.f32.mrf.mxu2  ;;  %v9682_v29 = vand.u32 4294901760, %v5191_v46 }
 0x392   : > { %v1697_v58 = vadd.f32 %v1696_v41, %v13443_v14  ;;  %3584 = vmatmul.f32.gmra.mxu3 %v9658_v49  ;;  %4250 = vmatmul.f32.gmra.mxu1 %v3076_v24  ;;  %v3091_v41 = vsub.f32 %v2790_v28, %v9676_v34  ;;  %v2793_v14 = vsel %vm2737_vm2, %v2679_v13, 0  ;;  %v2680_v13 = vmax.f32 %v9233_v23, 0.0 }
 0x393   : > { %v2383_v2 = vpop.f32.mrf.mxu0  ;;  %13445 = vst [vmem:[#allocation94_spill] sm:$0xff] %v9682_v29  ;;  %5397 = vmatpush.msrb.mxu0 %v9682_v29  ;;  %v9686_v24 = vsub.f32 %v5191_v46, %v9682_v29  ;;  %6600 = vmatpush.msra.mxu3 %v9682_v29  ;;  %v3086_v46 = vand.u32 4294901760, %v3085_v8 }
 0x394   : > { %v2099_v25 = vadd.f32 %v2098_v60, %v1697_v58  ;;  %v3092_v28 = vand.u32 4294901760, %v3091_v41  ;;  %v2796_v23 = vsel %vm2737_vm2, %v2680_v13, 0 }
 0x395   : > { %v2104_v56 = vpop.f32.mrf.mxu3  ;;  %6248 = vmatpush.msra.mxu2 %v9686_v24 }
 0x396   : > { %v2380_v43 = vadd.f32 %v2379_v6, %v2099_v25  ;;  %3079 = vmatmul.f32.gmra.mxu2 %v3078_v53  ;;  %3889 = vmatmul.f32.gmra.mxu0 %v3075_v47  ;;  %v12689_v6 = vand.u32 4294901760, %v9686_v24  ;;  %v13447_v53 = vld [vmem:[#allocation153_spill] sm:$0xff] }
 0x397   : > { %v4161_v38 = vpop.f32.mrf.mxu1 }
 0x398   : > { %v9689_v60 = vadd.f32 %v2654_v20, %v2380_v43  ;;  %v5936_v20 = vsub.f32 %v9686_v24, %v12689_v6  ;;  %v9700_v43 = vand.u32 4294901760, %v2793_v14  ;;  %v9714_v6 = vand.u32 4294901760, %v2796_v23 }
 0x399   : > { %v1701_v21 = vpop.f32.mrf.mxu2 }
 0x39a   : > { %13446 = vst [vmem:[#allocation91_spill] sm:$0xff] %v9689_v60  ;;  %v1702_v47 = vadd.f32 %v1701_v21, %v13447_v53  ;;  %3588 = vmatmul.f32.gmra.mxu3 %v9667_v50  ;;  %4256 = vmatmul.f32.gmra.mxu1 %v3084_v1  ;;  %v5937_v29 = vand.u32 4294901760, %v5936_v20  ;;  %v9706_v1 = vld [vmem:[%s12407_s4] ss:$0 sm:$0xff]  ;;  %v3099_v8 = vsub.f32 %v2793_v14, %v9700_v43 }
 0x39b   : > { %v3815_v58 = vpop.f32.mrf.mxu0  ;;  %13448 = vst [vmem:[#allocation107_spill] sm:$0xff] %v9700_v43  ;;  %v3107_v13 = vsub.f32 %v2796_v23, %v9714_v6 }
 0x39c   : > { %v2105_v25 = vadd.f32 %v2104_v56, %v1702_v47  ;;  %5938 = vmatpush.msrb.mxu1 %v5937_v29  ;;  %v3093_v56 = vsub.f32 %v3091_v41, %v3092_v28  ;;  %13449 = vst [vmem:[#allocation104_spill] sm:$0xff] %v9714_v6 }
 0x39d   : > { %v3525_v49 = vpop.f32.mrf.mxu3 }
 0x39e   : > { %v2384_v60 = vadd.f32 %v2383_v2, %v2105_v25  ;;  %3087 = vmatmul.f32.gmra.mxu2 %v3086_v46  ;;  %3894 = vmatmul.f32.gmra.mxu0 %v3083_v37  ;;  %v3094_v25 = vand.u32 4294901760, %v3093_v56  ;;  %v3100_v46 = vand.u32 4294901760, %v3099_v8 }
 0x39f   : > { %v4167_v21 = vpop.f32.mrf.mxu1 }
 0x3a0   : > { %v9708_v53 = vadd.f32 %v2658_v61, %v2384_v60  ;;  %v2681_v61 = vmax.f32 %v9255_v12, 0.0  ;;  %v3101_v50 = vsub.f32 %v3099_v8, %v3100_v46 }
 0x3a1   : > { %v2960_v47 = vpop.f32.mrf.mxu2 }
 0x3a2   : > { %v2961_v20 = vadd.f32 %v9706_v1, %v2960_v47  ;;  %3592 = vmatmul.f32.gmra.mxu3 %v9676_v34  ;;  %4262 = vmatmul.f32.gmra.mxu1 %v3092_v28  ;;  %v2799_v28 = vsel %vm2737_vm2, %v2681_v61, 0 }
 0x3a3   : > { %v3820_v37 = vpop.f32.mrf.mxu0 }
 0x3a4   : > { %v3526_v2 = vadd.f32 %v3525_v49, %v2961_v20  ;;  %v3102_v20 = vand.u32 4294901760, %v3101_v50 }
 0x3a5   : > { %v3529_v29 = vpop.f32.mrf.mxu3 }
 0x3a6   : > { %3095 = vmatmul.f32.gmra.mxu2 %v3094_v25  ;;  %3899 = vmatmul.f32.gmra.mxu0 %v3091_v41  ;;  %v3816_v60 = vadd.f32 %v3815_v58, %v3526_v2  ;;  %v3108_v25 = vand.u32 4294901760, %v3107_v13  ;;  %v9723_v41 = vand.u32 4294901760, %v2799_v28  ;;  %v2682_v58 = vmax.f32 %v9268_v27, 0.0 }
 0x3a7   : > { %v4173_v14 = vpop.f32.mrf.mxu1 }
 0x3a8   : > { %v9718_v47 = vadd.f32 %v4161_v38, %v3816_v60  ;;  %13450 = vst [vmem:[#allocation101_spill] sm:$0xff] %v9723_v41  ;;  %v3109_v60 = vsub.f32 %v3107_v13, %v3108_v25  ;;  %v3115_v61 = vsub.f32 %v2799_v28, %v9723_v41 }
 0x3a9   : > { %v2968_v34 = vpop.f32.mrf.mxu2 }
 0x3aa   : > { %v2969_v49 = vadd.f32 %v9706_v1, %v2968_v34  ;;  %3596 = vmatmul.f32.gmra.mxu3 %v9700_v43  ;;  %4268 = vmatmul.f32.gmra.mxu1 %v3100_v46  ;;  %v2802_v46 = vsel %vm2737_vm2, %v2682_v58, 0 }
 0x3ab   : > { %v3825_v56 = vpop.f32.mrf.mxu0 }
 0x3ac   : > { %v3530_v12 = vadd.f32 %v3529_v29, %v2969_v49  ;;  %v3110_v49 = vand.u32 4294901760, %v3109_v60 }
 0x3ad   : > { %v3533_v2 = vpop.f32.mrf.mxu3 }
 0x3ae   : > { %3103 = vmatmul.f32.gmra.mxu2 %v3102_v20  ;;  %3904 = vmatmul.f32.gmra.mxu0 %v3099_v8  ;;  %v3821_v38 = vadd.f32 %v3820_v37, %v3530_v12  ;;  %v3116_v20 = vand.u32 4294901760, %v3115_v61  ;;  %v9732_v8 = vand.u32 4294901760, %v2802_v46  ;;  %v2683_v37 = vmax.f32 %v9278_v45, 0.0 }
 0x3af   : > { %v4179_v23 = vpop.f32.mrf.mxu1 }
 0x3b0   : > { %v9727_v34 = vadd.f32 %v4167_v21, %v3821_v38  ;;  %13451 = vst [vmem:[#allocation98_spill] sm:$0xff] %v9732_v8  ;;  %v3117_v38 = vsub.f32 %v3115_v61, %v3116_v20  ;;  %v3123_v58 = vsub.f32 %v2802_v46, %v9732_v8 }
 0x3b1   : > { %v2976_v43 = vpop.f32.mrf.mxu2 }
 0x3b2   : > { %v2977_v50 = vadd.f32 %v9706_v1, %v2976_v43  ;;  %3600 = vmatmul.f32.gmra.mxu3 %v9714_v6  ;;  %4274 = vmatmul.f32.gmra.mxu1 %v3108_v25  ;;  %v2805_v25 = vsel %vm2737_vm2, %v2683_v37, 0 }
 0x3b3   : > { %v3830_v29 = vpop.f32.mrf.mxu0 }
 0x3b4   : > { %v3534_v27 = vadd.f32 %v3533_v2, %v2977_v50  ;;  %v3118_v50 = vand.u32 4294901760, %v3117_v38 }
 0x3b5   : > { %v3537_v12 = vpop.f32.mrf.mxu3 }
 0x3b6   : > { %3111 = vmatmul.f32.gmra.mxu2 %v3110_v49  ;;  %3909 = vmatmul.f32.gmra.mxu0 %v3107_v13  ;;  %v3826_v21 = vadd.f32 %v3825_v56, %v3534_v27  ;;  %v3124_v49 = vand.u32 4294901760, %v3123_v58  ;;  %v9741_v13 = vand.u32 4294901760, %v2805_v25  ;;  %v2684_v56 = vmax.f32 %v9288_v16, 0.0 }
 0x3b7   : > { %v4185_v28 = vpop.f32.mrf.mxu1 }
 0x3b8   : > { %v9736_v43 = vadd.f32 %v4173_v14, %v3826_v21  ;;  %13452 = vst [vmem:[#allocation114_spill] sm:$0xff] %v9741_v13  ;;  %v3125_v21 = vsub.f32 %v3123_v58, %v3124_v49  ;;  %v3131_v37 = vsub.f32 %v2805_v25, %v9741_v13 }
 0x3b9   : > { %v2984_v6 = vpop.f32.mrf.mxu2 }
 0x3ba   : > { %v2985_v2 = vadd.f32 %v9706_v1, %v2984_v6  ;;  %3604 = vmatmul.f32.gmra.mxu3 %v9723_v41  ;;  %4280 = vmatmul.f32.gmra.mxu1 %v3116_v20  ;;  %v2808_v20 = vsel %vm2737_vm2, %v2684_v56, 0 }
 0x3bb   : > { %v3835_v60 = vpop.f32.mrf.mxu0 }
 0x3bc   : > { %v3538_v45 = vadd.f32 %v3537_v12, %v2985_v2  ;;  %v3126_v2 = vand.u32 4294901760, %v3125_v21 }
 0x3bd   : > { %v3541_v27 = vpop.f32.mrf.mxu3 }
 0x3be   : > { %3119 = vmatmul.f32.gmra.mxu2 %v3118_v50  ;;  %3914 = vmatmul.f32.gmra.mxu0 %v3115_v61  ;;  %v3831_v14 = vadd.f32 %v3830_v29, %v3538_v45  ;;  %v3132_v50 = vand.u32 4294901760, %v3131_v37  ;;  %v9750_v61 = vand.u32 4294901760, %v2808_v20  ;;  %v2685_v29 = vmax.f32 %v9298_v44, 0.0 }
 0x3bf   : > { %v4191_v46 = vpop.f32.mrf.mxu1 }
 0x3c0   : > { %v9745_v6 = vadd.f32 %v4179_v23, %v3831_v14  ;;  %13453 = vst [vmem:[#allocation111_spill] sm:$0xff] %v9750_v61  ;;  %v3133_v14 = vsub.f32 %v3131_v37, %v3132_v50  ;;  %v3139_v56 = vsub.f32 %v2808_v20, %v9750_v61 }
 0x3c1   : > { %v2992_v41 = vpop.f32.mrf.mxu2 }
 0x3c2   : > { %v2993_v12 = vadd.f32 %v9706_v1, %v2992_v41  ;;  %3608 = vmatmul.f32.gmra.mxu3 %v9732_v8  ;;  %4286 = vmatmul.f32.gmra.mxu1 %v3124_v49  ;;  %v2811_v49 = vsel %vm2737_vm2, %v2685_v29, 0 }
 0x3c3   : > { %v3840_v38 = vpop.f32.mrf.mxu0 }
 0x3c4   : > { %v3542_v16 = vadd.f32 %v3541_v27, %v2993_v12  ;;  %v3134_v12 = vand.u32 4294901760, %v3133_v14 }
 0x3c5   : > { %v3545_v45 = vpop.f32.mrf.mxu3 }
 0x3c6   : > { %3127 = vmatmul.f32.gmra.mxu2 %v3126_v2  ;;  %3919 = vmatmul.f32.gmra.mxu0 %v3123_v58  ;;  %v3836_v23 = vadd.f32 %v3835_v60, %v3542_v16  ;;  %v3140_v2 = vand.u32 4294901760, %v3139_v56  ;;  %v9759_v58 = vand.u32 4294901760, %v2811_v49  ;;  %v2686_v60 = vmax.f32 %v9308_v9, 0.0 }
 0x3c7   : > { %v4197_v25 = vpop.f32.mrf.mxu1 }
 0x3c8   : > { %v9754_v41 = vadd.f32 %v4185_v28, %v3836_v23  ;;  %13455 = vst [vmem:[#allocation105_spill] sm:$0xff] %v9759_v58  ;;  %v3141_v23 = vsub.f32 %v3139_v56, %v3140_v2  ;;  %v3147_v29 = vsub.f32 %v2811_v49, %v9759_v58 }
 0x3c9   : > { %v3000_v8 = vpop.f32.mrf.mxu2 }
 0x3ca   : > { %13454 = vst [vmem:[#allocation109_spill] sm:$0xff] %v9754_v41  ;;  %v3001_v27 = vadd.f32 %v9706_v1, %v3000_v8  ;;  %3612 = vmatmul.f32.gmra.mxu3 %v9741_v13  ;;  %4292 = vmatmul.f32.gmra.mxu1 %v3132_v50  ;;  %v2814_v50 = vsel %vm2737_vm2, %v2686_v60, 0 }
 0x3cb   : > { %v3845_v21 = vpop.f32.mrf.mxu0 }
 0x3cc   : > { %v3546_v44 = vadd.f32 %v3545_v45, %v3001_v27  ;;  %v3142_v27 = vand.u32 4294901760, %v3141_v23 }
 0x3cd   : > { %v3549_v16 = vpop.f32.mrf.mxu3 }
 0x3ce   : > { %3135 = vmatmul.f32.gmra.mxu2 %v3134_v12  ;;  %3924 = vmatmul.f32.gmra.mxu0 %v3131_v37  ;;  %v3841_v28 = vadd.f32 %v3840_v38, %v3546_v44  ;;  %v3148_v12 = vand.u32 4294901760, %v3147_v29  ;;  %v9768_v37 = vand.u32 4294901760, %v2814_v50  ;;  %v5190_v38 = vld [vmem:[%s12408_s5 + $0x30] sm:$0xff] }
 0x3cf   : > { %v4203_v20 = vpop.f32.mrf.mxu1  ;;  %v9774_v44 = vand.u32 4294901760, %v5190_v38 }
 0x3d0   : > { %v9763_v8 = vadd.f32 %v4191_v46, %v3841_v28  ;;  %v2687_v46 = vmax.f32 %v9318_v42, 0.0  ;;  %v3155_v28 = vsub.f32 %v2814_v50, %v9768_v37 }
 0x3d1   : > { %v3008_v13 = vpop.f32.mrf.mxu2  ;;  %5399 = vmatpush.msrb.mxu0 %v9774_v44  ;;  %6602 = vmatpush.msra.mxu3 %v9774_v44 }
 0x3d2   : > { %13456 = vst [vmem:[#allocation117_spill] sm:$0xff] %v9763_v8  ;;  %v3009_v45 = vadd.f32 %v9706_v1, %v3008_v13  ;;  %3616 = vmatmul.f32.gmra.mxu3 %v9750_v61  ;;  %4298 = vmatmul.f32.gmra.mxu1 %v3140_v2  ;;  %v9778_v2 = vsub.f32 %v5190_v38, %v9774_v44  ;;  %v3156_v38 = vand.u32 4294901760, %v3155_v28 }
 0x3d3   : > { %v3850_v14 = vpop.f32.mrf.mxu0 }
 0x3d4   : > { %v3550_v9 = vadd.f32 %v3549_v16, %v3009_v45  ;;  %v3149_v16 = vsub.f32 %v3147_v29, %v3148_v12  ;;  %v2817_v45 = vsel %vm2737_vm2, %v2687_v46, 0  ;;  %6251 = vmatpush.msra.mxu2 %v9778_v2  ;;  %v2688_v46 = vmax.f32 %v9328_v17, 0.0 }
 0x3d5   : > { %v3553_v49 = vpop.f32.mrf.mxu3 }
 0x3d6   : > { %3143 = vmatmul.f32.gmra.mxu2 %v3142_v27  ;;  %3929 = vmatmul.f32.gmra.mxu0 %v3139_v56  ;;  %v3846_v13 = vadd.f32 %v3845_v21, %v3550_v9  ;;  %v12708_v27 = vand.u32 4294901760, %v9778_v2 }
 0x3d7   : > { %v4209_v60 = vpop.f32.mrf.mxu1 }
 0x3d8   : > { %v9782_v23 = vadd.f32 %v4197_v25, %v3846_v13  ;;  %v5942_v9 = vsub.f32 %v9778_v2, %v12708_v27  ;;  %v3150_v25 = vand.u32 4294901760, %v3149_v16  ;;  %v9792_v13 = vand.u32 4294901760, %v2817_v45 }
 0x3d9   : > { %v3016_v42 = vpop.f32.mrf.mxu2 }
 0x3da   : > { %13457 = vst [vmem:[#allocation112_spill] sm:$0xff] %v9782_v23  ;;  %v3017_v56 = vadd.f32 %v9706_v1, %v3016_v42  ;;  %3620 = vmatmul.f32.gmra.mxu3 %v9759_v58  ;;  %4304 = vmatmul.f32.gmra.mxu1 %v3148_v12  ;;  %v5943_v23 = vand.u32 4294901760, %v5942_v9  ;;  %v3157_v12 = vsub.f32 %v3155_v28, %v3156_v38 }
 0x3db   : > { %v3855_v21 = vpop.f32.mrf.mxu0  ;;  %13458 = vst [vmem:[#allocation126_spill] sm:$0xff] %v9792_v13  ;;  %v3163_v58 = vsub.f32 %v2817_v45, %v9792_v13 }
 0x3dc   : > { %v3554_v50 = vadd.f32 %v3553_v49, %v3017_v56  ;;  %5944 = vmatpush.msrb.mxu1 %v5943_v23  ;;  %v2820_v49 = vsel %vm2737_vm2, %v2688_v46, 0  ;;  %v3158_v9 = vand.u32 4294901760, %v3157_v12  ;;  %v2689_v23 = vmax.f32 %v9350_v52, 0.0 }
 0x3dd   : > { %v3557_v61 = vpop.f32.mrf.mxu3 }
 0x3de   : > { %3151 = vmatmul.f32.gmra.mxu2 %v3150_v25  ;;  %3934 = vmatmul.f32.gmra.mxu0 %v3147_v29  ;;  %v3851_v42 = vadd.f32 %v3850_v14, %v3554_v50  ;;  %v3164_v29 = vand.u32 4294901760, %v3163_v58  ;;  %v9801_v14 = vand.u32 4294901760, %v2820_v49 }
 0x3df   : > { %v4215_v8 = vpop.f32.mrf.mxu1 }
 0x3e0   : > { %v9796_v41 = vadd.f32 %v4203_v20, %v3851_v42  ;;  %13459 = vst [vmem:[#allocation122_spill] sm:$0xff] %v9801_v14  ;;  %v3165_v25 = vsub.f32 %v3163_v58, %v3164_v29  ;;  %v3171_v46 = vsub.f32 %v2820_v49, %v9801_v14 }
 0x3e1   : > { %v3024_v27 = vpop.f32.mrf.mxu2 }
 0x3e2   : > { %v3025_v16 = vadd.f32 %v9706_v1, %v3024_v27  ;;  %3624 = vmatmul.f32.gmra.mxu3 %v9768_v37  ;;  %4310 = vmatmul.f32.gmra.mxu1 %v3156_v38  ;;  %v2823_v38 = vsel %vm2737_vm2, %v2689_v23, 0 }
 0x3e3   : > { %v3860_v17 = vpop.f32.mrf.mxu0 }
 0x3e4   : > { %v3558_v56 = vadd.f32 %v3557_v61, %v3025_v16  ;;  %v3166_v16 = vand.u32 4294901760, %v3165_v25 }
 0x3e5   : > { %v3561_v50 = vpop.f32.mrf.mxu3 }
 0x3e6   : > { %3159 = vmatmul.f32.gmra.mxu2 %v3158_v9  ;;  %3939 = vmatmul.f32.gmra.mxu0 %v3155_v28  ;;  %v3856_v20 = vadd.f32 %v3855_v21, %v3558_v56  ;;  %v3172_v9 = vand.u32 4294901760, %v3171_v46  ;;  %v9810_v28 = vand.u32 4294901760, %v2823_v38  ;;  %v2690_v21 = vmax.f32 %v9363_v19, 0.0 }
 0x3e7   : > { %v4221_v45 = vpop.f32.mrf.mxu1 }
 0x3e8   : > { %v9805_v27 = vadd.f32 %v4209_v60, %v3856_v20  ;;  %13460 = vst [vmem:[#allocation120_spill] sm:$0xff] %v9810_v28  ;;  %v3173_v20 = vsub.f32 %v3171_v46, %v3172_v9  ;;  %v3179_v23 = vsub.f32 %v2823_v38, %v9810_v28 }
 0x3e9   : > { %v3032_v42 = vpop.f32.mrf.mxu2 }
 0x3ea   : > { %v3033_v61 = vadd.f32 %v9706_v1, %v3032_v42  ;;  %3628 = vmatmul.f32.gmra.mxu3 %v9792_v13  ;;  %4316 = vmatmul.f32.gmra.mxu1 %v3164_v29  ;;  %v2826_v29 = vsel %vm2737_vm2, %v2690_v21, 0 }
 0x3eb   : > { %v3865_v12 = vpop.f32.mrf.mxu0 }
 0x3ec   : > { %v3562_v52 = vadd.f32 %v3561_v50, %v3033_v61  ;;  %v3174_v61 = vand.u32 4294901760, %v3173_v20 }
 0x3ed   : > { %v3565_v56 = vpop.f32.mrf.mxu3 }
 0x3ee   : > { %3167 = vmatmul.f32.gmra.mxu2 %v3166_v16  ;;  %3944 = vmatmul.f32.gmra.mxu0 %v3163_v58  ;;  %v3861_v60 = vadd.f32 %v3860_v17, %v3562_v52  ;;  %v3180_v16 = vand.u32 4294901760, %v3179_v23  ;;  %v9819_v58 = vand.u32 4294901760, %v2826_v29  ;;  %v2691_v17 = vmax.f32 %v9373_v15, 0.0 }
 0x3ef   : > { %v4227_v49 = vpop.f32.mrf.mxu1 }
 0x3f0   : > { %v9814_v42 = vadd.f32 %v4215_v8, %v3861_v60  ;;  %13461 = vst [vmem:[#allocation3_spill] sm:$0xff] %v9819_v58  ;;  %v3181_v60 = vsub.f32 %v3179_v23, %v3180_v16  ;;  %v3187_v21 = vsub.f32 %v2826_v29, %v9819_v58 }
 0x3f1   : > { %v3040_v13 = vpop.f32.mrf.mxu2 }
 0x3f2   : > { %v3041_v50 = vadd.f32 %v9706_v1, %v3040_v13  ;;  %3632 = vmatmul.f32.gmra.mxu3 %v9801_v14  ;;  %4322 = vmatmul.f32.gmra.mxu1 %v3172_v9  ;;  %v2829_v9 = vsel %vm2737_vm2, %v2691_v17, 0 }
 0x3f3   : > { %v3870_v25 = vpop.f32.mrf.mxu0 }
 0x3f4   : > { %v3566_v19 = vadd.f32 %v3565_v56, %v3041_v50  ;;  %v3182_v50 = vand.u32 4294901760, %v3181_v60 }
 0x3f5   : > { %v3569_v52 = vpop.f32.mrf.mxu3 }
 0x3f6   : > { %3175 = vmatmul.f32.gmra.mxu2 %v3174_v61  ;;  %3949 = vmatmul.f32.gmra.mxu0 %v3171_v46  ;;  %v3866_v8 = vadd.f32 %v3865_v12, %v3566_v19  ;;  %v3188_v61 = vand.u32 4294901760, %v3187_v21  ;;  %v9828_v46 = vand.u32 4294901760, %v2829_v9  ;;  %v2692_v12 = vmax.f32 %v9381_v59, 0.0 }
 0x3f7   : > { %v4233_v38 = vpop.f32.mrf.mxu1 }
 0x3f8   : > { %v9823_v13 = vadd.f32 %v4221_v45, %v3866_v8  ;;  %13462 = vst [vmem:[#allocation2_spill] sm:$0xff] %v9828_v46  ;;  %v3189_v8 = vsub.f32 %v3187_v21, %v3188_v61  ;;  %v3195_v17 = vsub.f32 %v2829_v9, %v9828_v46 }
 0x3f9   : > { %v3048_v14 = vpop.f32.mrf.mxu2 }
 0x3fa   : > { %v3049_v56 = vadd.f32 %v9706_v1, %v3048_v14  ;;  %3636 = vmatmul.f32.gmra.mxu3 %v9810_v28  ;;  %4328 = vmatmul.f32.gmra.mxu1 %v3180_v16  ;;  %v2832_v16 = vsel %vm2737_vm2, %v2692_v12, 0 }
 0x3fb   : > { %v3875_v20 = vpop.f32.mrf.mxu0 }
 0x3fc   : > { %v3570_v15 = vadd.f32 %v3569_v52, %v3049_v56  ;;  %v3190_v56 = vand.u32 4294901760, %v3189_v8 }
 0x3fd   : > { %v3573_v19 = vpop.f32.mrf.mxu3 }
 0x3fe   : > { %3183 = vmatmul.f32.gmra.mxu2 %v3182_v50  ;;  %3954 = vmatmul.f32.gmra.mxu0 %v3179_v23  ;;  %v3871_v45 = vadd.f32 %v3870_v25, %v3570_v15  ;;  %v3196_v50 = vand.u32 4294901760, %v3195_v17  ;;  %v9837_v23 = vand.u32 4294901760, %v2832_v16  ;;  %v2693_v25 = vmax.f32 %v9389_v4, 0.0 }
 0x3ff   : > { %v4239_v29 = vpop.f32.mrf.mxu1 }
 0x400   : > { %v9832_v14 = vadd.f32 %v4227_v49, %v3871_v45  ;;  %13463 = vst [vmem:[#allocation5_spill] sm:$0xff] %v9837_v23  ;;  %v3197_v45 = vsub.f32 %v3195_v17, %v3196_v50  ;;  %v3203_v12 = vsub.f32 %v2832_v16, %v9837_v23 }
 0x401   : > { %v3056_v28 = vpop.f32.mrf.mxu2 }
 0x402   : > { %v3057_v52 = vadd.f32 %v9706_v1, %v3056_v28  ;;  %3640 = vmatmul.f32.gmra.mxu3 %v9819_v58  ;;  %4334 = vmatmul.f32.gmra.mxu1 %v3188_v61  ;;  %v2835_v61 = vsel %vm2737_vm2, %v2693_v25, 0 }
 0x403   : > { %v3880_v60 = vpop.f32.mrf.mxu0 }
 0x404   : > { %v3574_v59 = vadd.f32 %v3573_v19, %v3057_v52  ;;  %v3198_v52 = vand.u32 4294901760, %v3197_v45 }
 0x405   : > { %v3577_v15 = vpop.f32.mrf.mxu3 }
 0x406   : > { %3191 = vmatmul.f32.gmra.mxu2 %v3190_v56  ;;  %3959 = vmatmul.f32.gmra.mxu0 %v3187_v21  ;;  %v3876_v49 = vadd.f32 %v3875_v20, %v3574_v59  ;;  %v3204_v56 = vand.u32 4294901760, %v3203_v12  ;;  %v9846_v21 = vand.u32 4294901760, %v2835_v61  ;;  %v2694_v20 = vmax.f32 %v9397_v5, 0.0 }
 0x407   : > { %v4245_v9 = vpop.f32.mrf.mxu1 }
 0x408   : > { %v9841_v28 = vadd.f32 %v4233_v38, %v3876_v49  ;;  %13465 = vst [vmem:[#allocation7_spill] sm:$0xff] %v9846_v21  ;;  %v3205_v49 = vsub.f32 %v3203_v12, %v3204_v56  ;;  %v3211_v25 = vsub.f32 %v2835_v61, %v9846_v21 }
 0x409   : > { %v3064_v58 = vpop.f32.mrf.mxu2 }
 0x40a   : > { %13464 = vst [vmem:[#allocation4_spill] sm:$0xff] %v9841_v28  ;;  %v3065_v19 = vadd.f32 %v9706_v1, %v3064_v58  ;;  %3644 = vmatmul.f32.gmra.mxu3 %v9828_v46  ;;  %4340 = vmatmul.f32.gmra.mxu1 %v3196_v50  ;;  %v2838_v50 = vsel %vm2737_vm2, %v2694_v20, 0 }
 0x40b   : > { %v3885_v8 = vpop.f32.mrf.mxu0 }
 0x40c   : > { %v3578_v4 = vadd.f32 %v3577_v15, %v3065_v19  ;;  %v3206_v19 = vand.u32 4294901760, %v3205_v49 }
 0x40d   : > { %v3581_v59 = vpop.f32.mrf.mxu3 }
 0x40e   : > { %3199 = vmatmul.f32.gmra.mxu2 %v3198_v52  ;;  %3964 = vmatmul.f32.gmra.mxu0 %v3195_v17  ;;  %v3881_v38 = vadd.f32 %v3880_v60, %v3578_v4  ;;  %v3212_v52 = vand.u32 4294901760, %v3211_v25  ;;  %v9855_v17 = vand.u32 4294901760, %v2838_v50  ;;  %v5189_v60 = vld [vmem:[%s12408_s5 + $0x28] sm:$0xff] }
 0x40f   : > { %v4251_v16 = vpop.f32.mrf.mxu1  ;;  %v9861_v4 = vand.u32 4294901760, %v5189_v60 }
 0x410   : > { %v9850_v58 = vadd.f32 %v4239_v29, %v3881_v38  ;;  %v2695_v29 = vmax.f32 %v9405_v54, 0.0  ;;  %v3219_v38 = vsub.f32 %v2838_v50, %v9855_v17 }
 0x411   : > { %v3072_v46 = vpop.f32.mrf.mxu2  ;;  %5401 = vmatpush.msrb.mxu0 %v9861_v4  ;;  %6604 = vmatpush.msra.mxu3 %v9861_v4 }
 0x412   : > { %13466 = vst [vmem:[#allocation6_spill] sm:$0xff] %v9850_v58  ;;  %v3073_v15 = vadd.f32 %v9706_v1, %v3072_v46  ;;  %3648 = vmatmul.f32.gmra.mxu3 %v9837_v23  ;;  %4346 = vmatmul.f32.gmra.mxu1 %v3204_v56  ;;  %v9865_v56 = vsub.f32 %v5189_v60, %v9861_v4  ;;  %v3220_v60 = vand.u32 4294901760, %v3219_v38 }
 0x413   : > { %v3890_v45 = vpop.f32.mrf.mxu0 }
 0x414   : > { %v3582_v5 = vadd.f32 %v3581_v59, %v3073_v15  ;;  %v3213_v59 = vsub.f32 %v3211_v25, %v3212_v52  ;;  %v2841_v15 = vsel %vm2737_vm2, %v2695_v29, 0  ;;  %6254 = vmatpush.msra.mxu2 %v9865_v56  ;;  %v2696_v29 = vmax.f32 %v9413_v11, 0.0 }
 0x415   : > { %v3585_v61 = vpop.f32.mrf.mxu3 }
 0x416   : > { %3207 = vmatmul.f32.gmra.mxu2 %v3206_v19  ;;  %3969 = vmatmul.f32.gmra.mxu0 %v3203_v12  ;;  %v3886_v46 = vadd.f32 %v3885_v8, %v3582_v5  ;;  %v12723_v19 = vand.u32 4294901760, %v9865_v56 }
 0x417   : > { %v4257_v20 = vpop.f32.mrf.mxu1 }
 0x418   : > { %v9869_v49 = vadd.f32 %v4245_v9, %v3886_v46  ;;  %v5948_v5 = vsub.f32 %v9865_v56, %v12723_v19  ;;  %v3214_v9 = vand.u32 4294901760, %v3213_v59  ;;  %v9879_v46 = vand.u32 4294901760, %v2841_v15 }
 0x419   : > { %v3080_v54 = vpop.f32.mrf.mxu2 }
 0x41a   : > { %13467 = vst [vmem:[#allocation9_spill] sm:$0xff] %v9869_v49  ;;  %v3081_v12 = vadd.f32 %v9706_v1, %v3080_v54  ;;  %3652 = vmatmul.f32.gmra.mxu3 %v9846_v21  ;;  %4352 = vmatmul.f32.gmra.mxu1 %v3212_v52  ;;  %v5949_v49 = vand.u32 4294901760, %v5948_v5  ;;  %v3221_v52 = vsub.f32 %v3219_v38, %v3220_v60 }
 0x41b   : > { %v3895_v8 = vpop.f32.mrf.mxu0  ;;  %13468 = vst [vmem:[#allocation8_spill] sm:$0xff] %v9879_v46  ;;  %v3227_v21 = vsub.f32 %v2841_v15, %v9879_v46 }
 0x41c   : > { %v3586_v50 = vadd.f32 %v3585_v61, %v3081_v12  ;;  %5950 = vmatpush.msrb.mxu1 %v5949_v49  ;;  %v2844_v61 = vsel %vm2737_vm2, %v2696_v29, 0  ;;  %v3222_v5 = vand.u32 4294901760, %v3221_v52  ;;  %v2697_v49 = vmax.f32 %v9426_v0, 0.0 }
 0x41d   : > { %v3589_v23 = vpop.f32.mrf.mxu3 }
 0x41e   : > { %3215 = vmatmul.f32.gmra.mxu2 %v3214_v9  ;;  %3974 = vmatmul.f32.gmra.mxu0 %v3211_v25  ;;  %v3891_v54 = vadd.f32 %v3890_v45, %v3586_v50  ;;  %v3228_v25 = vand.u32 4294901760, %v3227_v21  ;;  %v9888_v45 = vand.u32 4294901760, %v2844_v61 }
 0x41f   : > { %v4263_v58 = vpop.f32.mrf.mxu1 }
 0x420   : > { %v9883_v28 = vadd.f32 %v4251_v16, %v3891_v54  ;;  %13469 = vst [vmem:[#allocation11_spill] sm:$0xff] %v9888_v45  ;;  %v3229_v9 = vsub.f32 %v3227_v21, %v3228_v25  ;;  %v3235_v29 = vsub.f32 %v2844_v61, %v9888_v45 }
 0x421   : > { %v3088_v19 = vpop.f32.mrf.mxu2 }
 0x422   : > { %v3089_v59 = vadd.f32 %v9706_v1, %v3088_v19  ;;  %3656 = vmatmul.f32.gmra.mxu3 %v9855_v17  ;;  %4358 = vmatmul.f32.gmra.mxu1 %v3220_v60  ;;  %v2847_v60 = vsel %vm2737_vm2, %v2697_v49, 0 }
 0x423   : > { %v3900_v11 = vpop.f32.mrf.mxu0 }
 0x424   : > { %v3590_v12 = vadd.f32 %v3589_v23, %v3089_v59  ;;  %v3230_v59 = vand.u32 4294901760, %v3229_v9 }
 0x425   : > { %v3593_v50 = vpop.f32.mrf.mxu3 }
 0x426   : > { %3223 = vmatmul.f32.gmra.mxu2 %v3222_v5  ;;  %3979 = vmatmul.f32.gmra.mxu0 %v3219_v38  ;;  %v3896_v16 = vadd.f32 %v3895_v8, %v3590_v12  ;;  %v3236_v5 = vand.u32 4294901760, %v3235_v29  ;;  %v9897_v38 = vand.u32 4294901760, %v2847_v60  ;;  %v2698_v8 = vmax.f32 %v9443_v26, 0.0 }
 0x427   : > { %v4269_v15 = vpop.f32.mrf.mxu1 }
 0x428   : > { %v9892_v19 = vadd.f32 %v4257_v20, %v3896_v16  ;;  %13470 = vst [vmem:[#allocation10_spill] sm:$0xff] %v9897_v38  ;;  %v3237_v16 = vsub.f32 %v3235_v29, %v3236_v5  ;;  %v3243_v49 = vsub.f32 %v2847_v60, %v9897_v38 }
 0x429   : > { %v3096_v54 = vpop.f32.mrf.mxu2 }
 0x42a   : > { %v3097_v23 = vadd.f32 %v9706_v1, %v3096_v54  ;;  %3660 = vmatmul.f32.gmra.mxu3 %v9879_v46  ;;  %4364 = vmatmul.f32.gmra.mxu1 %v3228_v25  ;;  %v2850_v25 = vsel %vm2737_vm2, %v2698_v8, 0 }
 0x42b   : > { %v3905_v52 = vpop.f32.mrf.mxu0 }
 0x42c   : > { %v3594_v0 = vadd.f32 %v3593_v50, %v3097_v23  ;;  %v3238_v23 = vand.u32 4294901760, %v3237_v16 }
 0x42d   : > { %v3597_v12 = vpop.f32.mrf.mxu3 }
 0x42e   : > { %3231 = vmatmul.f32.gmra.mxu2 %v3230_v59  ;;  %3984 = vmatmul.f32.gmra.mxu0 %v3227_v21  ;;  %v3901_v20 = vadd.f32 %v3900_v11, %v3594_v0  ;;  %v3244_v59 = vand.u32 4294901760, %v3243_v49  ;;  %v9906_v21 = vand.u32 4294901760, %v2850_v25  ;;  %v2699_v11 = vmax.f32 %v9459_v30, 0.0 }
 0x42f   : > { %v4275_v61 = vpop.f32.mrf.mxu1 }
 0x430   : > { %v9901_v54 = vadd.f32 %v4263_v58, %v3901_v20  ;;  %13471 = vst [vmem:[#allocation13_spill] sm:$0xff] %v9906_v21  ;;  %v3245_v20 = vsub.f32 %v3243_v49, %v3244_v59  ;;  %v3251_v8 = vsub.f32 %v2850_v25, %v9906_v21 }
 0x431   : > { %v3104_v46 = vpop.f32.mrf.mxu2 }
 0x432   : > { %v3105_v50 = vadd.f32 %v9706_v1, %v3104_v46  ;;  %3664 = vmatmul.f32.gmra.mxu3 %v9888_v45  ;;  %4370 = vmatmul.f32.gmra.mxu1 %v3236_v5  ;;  %v2853_v5 = vsel %vm2737_vm2, %v2699_v11, 0 }
 0x433   : > { %v3910_v9 = vpop.f32.mrf.mxu0 }
 0x434   : > { %v3598_v26 = vadd.f32 %v3597_v12, %v3105_v50  ;;  %v3246_v50 = vand.u32 4294901760, %v3245_v20 }
 0x435   : > { %v3601_v0 = vpop.f32.mrf.mxu3 }
 0x436   : > { %3239 = vmatmul.f32.gmra.mxu2 %v3238_v23  ;;  %3989 = vmatmul.f32.gmra.mxu0 %v3235_v29  ;;  %v3906_v58 = vadd.f32 %v3905_v52, %v3598_v26  ;;  %v3252_v23 = vand.u32 4294901760, %v3251_v8  ;;  %v9915_v29 = vand.u32 4294901760, %v2853_v5  ;;  %v2700_v52 = vmax.f32 %v9469_v22, 0.0 }
 0x437   : > { %v4281_v60 = vpop.f32.mrf.mxu1 }
 0x438   : > { %v9910_v46 = vadd.f32 %v4269_v15, %v3906_v58  ;;  %13472 = vst [vmem:[#allocation12_spill] sm:$0xff] %v9915_v29  ;;  %v3253_v58 = vsub.f32 %v3251_v8, %v3252_v23  ;;  %v3259_v11 = vsub.f32 %v2853_v5, %v9915_v29 }
 0x439   : > { %v3112_v45 = vpop.f32.mrf.mxu2 }
 0x43a   : > { %v3113_v12 = vadd.f32 %v9706_v1, %v3112_v45  ;;  %3668 = vmatmul.f32.gmra.mxu3 %v9897_v38  ;;  %4376 = vmatmul.f32.gmra.mxu1 %v3244_v59  ;;  %v2856_v59 = vsel %vm2737_vm2, %v2700_v52, 0 }
 0x43b   : > { %v3915_v16 = vpop.f32.mrf.mxu0 }
 0x43c   : > { %v3602_v30 = vadd.f32 %v3601_v0, %v3113_v12  ;;  %v3254_v12 = vand.u32 4294901760, %v3253_v58 }
 0x43d   : > { %v3605_v26 = vpop.f32.mrf.mxu3 }
 0x43e   : > { %3247 = vmatmul.f32.gmra.mxu2 %v3246_v50  ;;  %3994 = vmatmul.f32.gmra.mxu0 %v3243_v49  ;;  %v3911_v15 = vadd.f32 %v3910_v9, %v3602_v30  ;;  %v3260_v50 = vand.u32 4294901760, %v3259_v11  ;;  %v9924_v49 = vand.u32 4294901760, %v2856_v59  ;;  %v2701_v9 = vmax.f32 %v9477_v63, 0.0 }
 0x43f   : > { %v4287_v25 = vpop.f32.mrf.mxu1 }
 0x440   : > { %v9919_v45 = vadd.f32 %v4275_v61, %v3911_v15  ;;  %13473 = vst [vmem:[#allocation15_spill] sm:$0xff] %v9924_v49  ;;  %v3261_v15 = vsub.f32 %v3259_v11, %v3260_v50  ;;  %v3267_v52 = vsub.f32 %v2856_v59, %v9924_v49 }
 0x441   : > { %v3120_v38 = vpop.f32.mrf.mxu2 }
 0x442   : > { %v3121_v0 = vadd.f32 %v9706_v1, %v3120_v38  ;;  %3672 = vmatmul.f32.gmra.mxu3 %v9906_v21  ;;  %4382 = vmatmul.f32.gmra.mxu1 %v3252_v23  ;;  %v2859_v23 = vsel %vm2737_vm2, %v2701_v9, 0 }
 0x443   : > { %v3920_v20 = vpop.f32.mrf.mxu0 }
 0x444   : > { %v3606_v22 = vadd.f32 %v3605_v26, %v3121_v0  ;;  %v3262_v0 = vand.u32 4294901760, %v3261_v15 }
 0x445   : > { %v3609_v30 = vpop.f32.mrf.mxu3 }
 0x446   : > { %3255 = vmatmul.f32.gmra.mxu2 %v3254_v12  ;;  %3999 = vmatmul.f32.gmra.mxu0 %v3251_v8  ;;  %v3916_v61 = vadd.f32 %v3915_v16, %v3606_v22  ;;  %v3268_v12 = vand.u32 4294901760, %v3267_v52  ;;  %v9933_v8 = vand.u32 4294901760, %v2859_v23  ;;  %v2702_v16 = vmax.f32 %v9485_v36, 0.0 }
 0x447   : > { %v4293_v5 = vpop.f32.mrf.mxu1 }
 0x448   : > { %v9928_v38 = vadd.f32 %v4281_v60, %v3916_v61  ;;  %13475 = vst [vmem:[#allocation17_spill] sm:$0xff] %v9933_v8  ;;  %v3269_v61 = vsub.f32 %v3267_v52, %v3268_v12  ;;  %v3275_v9 = vsub.f32 %v2859_v23, %v9933_v8 }
 0x449   : > { %v3128_v21 = vpop.f32.mrf.mxu2 }
 0x44a   : > { %13474 = vst [vmem:[#allocation14_spill] sm:$0xff] %v9928_v38  ;;  %v3129_v26 = vadd.f32 %v9706_v1, %v3128_v21  ;;  %3676 = vmatmul.f32.gmra.mxu3 %v9915_v29  ;;  %4388 = vmatmul.f32.gmra.mxu1 %v3260_v50  ;;  %v2862_v50 = vsel %vm2737_vm2, %v2702_v16, 0 }
 0x44b   : > { %v3925_v58 = vpop.f32.mrf.mxu0 }
 0x44c   : > { %v3610_v63 = vadd.f32 %v3609_v30, %v3129_v26  ;;  %v3270_v26 = vand.u32 4294901760, %v3269_v61 }
 0x44d   : > { %v3613_v22 = vpop.f32.mrf.mxu3 }
 0x44e   : > { %3263 = vmatmul.f32.gmra.mxu2 %v3262_v0  ;;  %4004 = vmatmul.f32.gmra.mxu0 %v3259_v11  ;;  %v3921_v60 = vadd.f32 %v3920_v20, %v3610_v63  ;;  %v3276_v0 = vand.u32 4294901760, %v3275_v9  ;;  %v9942_v11 = vand.u32 4294901760, %v2862_v50  ;;  %v5188_v20 = vld [vmem:[%s12408_s5 + $0x20] sm:$0xff] }
 0x44f   : > { %v4299_v59 = vpop.f32.mrf.mxu1  ;;  %v9948_v63 = vand.u32 4294901760, %v5188_v20 }
 0x450   : > { %v9937_v21 = vadd.f32 %v4287_v25, %v3921_v60  ;;  %13477 = vst [vmem:[#allocation19_spill] sm:$0xff] %v9942_v11  ;;  %v2703_v25 = vmax.f32 %v9493_v7, 0.0  ;;  %v3283_v60 = vsub.f32 %v2862_v50, %v9942_v11 }
 0x451   : > { %v3136_v29 = vpop.f32.mrf.mxu2  ;;  %5403 = vmatpush.msrb.mxu0 %v9948_v63  ;;  %6606 = vmatpush.msra.mxu3 %v9948_v63 }
 0x452   : > { %13476 = vst [vmem:[#allocation16_spill] sm:$0xff] %v9937_v21  ;;  %v3137_v30 = vadd.f32 %v9706_v1, %v3136_v29  ;;  %3680 = vmatmul.f32.gmra.mxu3 %v9924_v49  ;;  %4394 = vmatmul.f32.gmra.mxu1 %v3268_v12  ;;  %v9952_v12 = vsub.f32 %v5188_v20, %v9948_v63  ;;  %v3284_v20 = vand.u32 4294901760, %v3283_v60 }
 0x453   : > { %v3930_v15 = vpop.f32.mrf.mxu0 }
 0x454   : > { %v3614_v36 = vadd.f32 %v3613_v22, %v3137_v30  ;;  %v3277_v22 = vsub.f32 %v3275_v9, %v3276_v0  ;;  %v2865_v30 = vsel %vm2737_vm2, %v2703_v25, 0  ;;  %6257 = vmatpush.msra.mxu2 %v9952_v12  ;;  %v2704_v25 = vmax.f32 %v9501_v57, 0.0 }
 0x455   : > { %v3617_v23 = vpop.f32.mrf.mxu3 }
 0x456   : > { %3271 = vmatmul.f32.gmra.mxu2 %v3270_v26  ;;  %4009 = vmatmul.f32.gmra.mxu0 %v3267_v52  ;;  %v3926_v29 = vadd.f32 %v3925_v58, %v3614_v36  ;;  %v12738_v26 = vand.u32 4294901760, %v9952_v12 }
 0x457   : > { %v4305_v16 = vpop.f32.mrf.mxu1 }
 0x458   : > { %v9956_v61 = vadd.f32 %v4293_v5, %v3926_v29  ;;  %v5954_v36 = vsub.f32 %v9952_v12, %v12738_v26  ;;  %v3278_v5 = vand.u32 4294901760, %v3277_v22  ;;  %v9966_v29 = vand.u32 4294901760, %v2865_v30 }
 0x459   : > { %v3144_v7 = vpop.f32.mrf.mxu2 }
 0x45a   : > { %13478 = vst [vmem:[#allocation18_spill] sm:$0xff] %v9956_v61  ;;  %v3145_v52 = vadd.f32 %v9706_v1, %v3144_v7  ;;  %3684 = vmatmul.f32.gmra.mxu3 %v9933_v8  ;;  %4400 = vmatmul.f32.gmra.mxu1 %v3276_v0  ;;  %v5955_v61 = vand.u32 4294901760, %v5954_v36  ;;  %v3285_v0 = vsub.f32 %v3283_v60, %v3284_v20 }
 0x45b   : > { %v3935_v58 = vpop.f32.mrf.mxu0  ;;  %13479 = vst [vmem:[#allocation21_spill] sm:$0xff] %v9966_v29  ;;  %v3291_v8 = vsub.f32 %v2865_v30, %v9966_v29 }
 0x45c   : > { %v3618_v50 = vadd.f32 %v3617_v23, %v3145_v52  ;;  %5956 = vmatpush.msrb.mxu1 %v5955_v61  ;;  %v2868_v23 = vsel %vm2737_vm2, %v2704_v25, 0  ;;  %v3286_v36 = vand.u32 4294901760, %v3285_v0  ;;  %v2705_v61 = vmax.f32 %v9510_v62, 0.0 }
 0x45d   : > { %v3621_v49 = vpop.f32.mrf.mxu3 }
 0x45e   : > { %3279 = vmatmul.f32.gmra.mxu2 %v3278_v5  ;;  %4014 = vmatmul.f32.gmra.mxu0 %v3275_v9  ;;  %v3931_v7 = vadd.f32 %v3930_v15, %v3618_v50  ;;  %v3292_v9 = vand.u32 4294901760, %v3291_v8  ;;  %v9975_v15 = vand.u32 4294901760, %v2868_v23 }
 0x45f   : > { %v4311_v21 = vpop.f32.mrf.mxu1 }
 0x460   : > { %v9970_v38 = vadd.f32 %v4299_v59, %v3931_v7  ;;  %13480 = vst [vmem:[#allocation20_spill] sm:$0xff] %v9975_v15  ;;  %v3293_v5 = vsub.f32 %v3291_v8, %v3292_v9  ;;  %v3299_v25 = vsub.f32 %v2868_v23, %v9975_v15 }
 0x461   : > { %v3152_v26 = vpop.f32.mrf.mxu2 }
 0x462   : > { %v3153_v22 = vadd.f32 %v9706_v1, %v3152_v26  ;;  %3688 = vmatmul.f32.gmra.mxu3 %v9942_v11  ;;  %4406 = vmatmul.f32.gmra.mxu1 %v3284_v20  ;;  %v2871_v20 = vsel %vm2737_vm2, %v2705_v61, 0  ;;  %v3294_v7 = vand.u32 4294901760, %v3293_v5  ;;  %v3300_v0 = vand.u32 4294901760, %v3299_v25 }
 0x463   : > { %v3940_v57 = vpop.f32.mrf.mxu0  ;;  %v9989_v23 = vand.u32 4294901760, %v2871_v20 }
 0x464   : > { %v3622_v52 = vadd.f32 %v3621_v49, %v3153_v22  ;;  %v9985_v49 = vld [vmem:[%s12407_s4] ss:$0 sm:$0xff]  ;;  %v3301_v61 = vsub.f32 %v3299_v25, %v3300_v0 }
 0x465   : > { %v3625_v50 = vpop.f32.mrf.mxu3  ;;  %13481 = vst [vmem:[#allocation23_spill] sm:$0xff] %v9989_v23 }
 0x466   : > { %3287 = vmatmul.f32.gmra.mxu2 %v3286_v36  ;;  %4019 = vmatmul.f32.gmra.mxu0 %v3283_v60  ;;  %v3936_v59 = vadd.f32 %v3935_v58, %v3622_v52 }
 0x467   : > { %v4317_v30 = vpop.f32.mrf.mxu1 }
 0x468   : > { %v9979_v1 = vadd.f32 %v4305_v16, %v3936_v59  ;;  %v2706_v16 = vmax.f32 %v9523_v31, 0.0  ;;  %v3307_v59 = vsub.f32 %v2871_v20, %v9989_v23 }
 0x469   : > { %v3160_v26 = vpop.f32.mrf.mxu2 }
 0x46a   : > { %v3161_v62 = vadd.f32 %v9985_v49, %v3160_v26  ;;  %3692 = vmatmul.f32.gmra.mxu3 %v9966_v29  ;;  %4412 = vmatmul.f32.gmra.mxu1 %v3292_v9  ;;  %v2874_v9 = vsel %vm2737_vm2, %v2706_v16, 0 }
 0x46b   : > { %v3945_v60 = vpop.f32.mrf.mxu0 }
 0x46c   : > { %v3626_v58 = vadd.f32 %v3625_v50, %v3161_v62  ;;  %v3302_v62 = vand.u32 4294901760, %v3301_v61 }
 0x46d   : > { %v3629_v22 = vpop.f32.mrf.mxu3 }
 0x46e   : > { %3295 = vmatmul.f32.gmra.mxu2 %v3294_v7  ;;  %4024 = vmatmul.f32.gmra.mxu0 %v3291_v8  ;;  %v3941_v52 = vadd.f32 %v3940_v57, %v3626_v58  ;;  %v3308_v7 = vand.u32 4294901760, %v3307_v59  ;;  %v9998_v8 = vand.u32 4294901760, %v2874_v9  ;;  %v13484_v57 = vld [vmem:[#allocation66_spill] sm:$0xff] }
 0x46f   : > { %v4323_v36 = vpop.f32.mrf.mxu1  ;;  %v2707_v58 = vmax.f32 %v13484_v57, 0.0 }
 0x470   : > { %v9993_v26 = vadd.f32 %v4311_v21, %v3941_v52  ;;  %13483 = vst [vmem:[#allocation25_spill] sm:$0xff] %v9998_v8  ;;  %v3309_v52 = vsub.f32 %v3307_v59, %v3308_v7  ;;  %v3315_v16 = vsub.f32 %v2874_v9, %v9998_v8 }
 0x471   : > { %v3168_v29 = vpop.f32.mrf.mxu2 }
 0x472   : > { %13482 = vst [vmem:[#allocation22_spill] sm:$0xff] %v9993_v26  ;;  %v3169_v50 = vadd.f32 %v9985_v49, %v3168_v29  ;;  %3696 = vmatmul.f32.gmra.mxu3 %v9975_v15  ;;  %4418 = vmatmul.f32.gmra.mxu1 %v3300_v0  ;;  %v2877_v0 = vsel %vm2737_vm2, %v2707_v58, 0  ;;  %v3310_v57 = vand.u32 4294901760, %v3309_v52 }
 0x473   : > { %v3950_v5 = vpop.f32.mrf.mxu0 }
 0x474   : > { %v3630_v31 = vadd.f32 %v3629_v22, %v3169_v50 }
 0x475   : > { %v3633_v11 = vpop.f32.mrf.mxu3 }
 0x476   : > { %3303 = vmatmul.f32.gmra.mxu2 %v3302_v62  ;;  %4029 = vmatmul.f32.gmra.mxu0 %v3299_v25  ;;  %v3946_v21 = vadd.f32 %v3945_v60, %v3630_v31  ;;  %v3316_v62 = vand.u32 4294901760, %v3315_v16  ;;  %v10007_v25 = vand.u32 4294901760, %v2877_v0  ;;  %v13487_v60 = vld [vmem:[#allocation60_spill] sm:$0xff] }
 0x477   : > { %v4329_v20 = vpop.f32.mrf.mxu1  ;;  %v2708_v31 = vmax.f32 %v13487_v60, 0.0 }
 0x478   : > { %v10002_v29 = vadd.f32 %v4317_v30, %v3946_v21  ;;  %13486 = vst [vmem:[#allocation27_spill] sm:$0xff] %v10007_v25  ;;  %v3317_v21 = vsub.f32 %v3315_v16, %v3316_v62  ;;  %v3323_v58 = vsub.f32 %v2877_v0, %v10007_v25 }
 0x479   : > { %v3176_v15 = vpop.f32.mrf.mxu2 }
 0x47a   : > { %13485 = vst [vmem:[#allocation24_spill] sm:$0xff] %v10002_v29  ;;  %v3177_v22 = vadd.f32 %v9985_v49, %v3176_v15  ;;  %3700 = vmatmul.f32.gmra.mxu3 %v9989_v23  ;;  %4424 = vmatmul.f32.gmra.mxu1 %v3308_v7  ;;  %v2880_v7 = vsel %vm2737_vm2, %v2708_v31, 0  ;;  %v3318_v60 = vand.u32 4294901760, %v3317_v21 }
 0x47b   : > { %v3955_v61 = vpop.f32.mrf.mxu0 }
 0x47c   : > { %v3634_v50 = vadd.f32 %v3633_v11, %v3177_v22 }
 0x47d   : > { %v3637_v26 = vpop.f32.mrf.mxu3 }
 0x47e   : > { %3311 = vmatmul.f32.gmra.mxu2 %v3310_v57  ;;  %4034 = vmatmul.f32.gmra.mxu0 %v3307_v59  ;;  %v3951_v30 = vadd.f32 %v3950_v5, %v3634_v50  ;;  %v3324_v57 = vand.u32 4294901760, %v3323_v58  ;;  %v10016_v59 = vand.u32 4294901760, %v2880_v7  ;;  %v2709_v5 = vmax.f32 %v9553_v55, 0.0 }
 0x47f   : > { %v4335_v9 = vpop.f32.mrf.mxu1 }
 0x480   : > { %v10011_v15 = vadd.f32 %v4323_v36, %v3951_v30  ;;  %13489 = vst [vmem:[#allocation29_spill] sm:$0xff] %v10016_v59  ;;  %v3325_v30 = vsub.f32 %v3323_v58, %v3324_v57  ;;  %v3331_v31 = vsub.f32 %v2880_v7, %v10016_v59 }
 0x481   : > { %v3184_v23 = vpop.f32.mrf.mxu2 }
 0x482   : > { %13488 = vst [vmem:[#allocation26_spill] sm:$0xff] %v10011_v15  ;;  %v3185_v11 = vadd.f32 %v9985_v49, %v3184_v23  ;;  %3704 = vmatmul.f32.gmra.mxu3 %v9998_v8  ;;  %4430 = vmatmul.f32.gmra.mxu1 %v3316_v62  ;;  %v2883_v62 = vsel %vm2737_vm2, %v2709_v5, 0 }
 0x483   : > { %v3960_v52 = vpop.f32.mrf.mxu0 }
 0x484   : > { %v3638_v22 = vadd.f32 %v3637_v26, %v3185_v11  ;;  %v3326_v11 = vand.u32 4294901760, %v3325_v30 }
 0x485   : > { %v3641_v50 = vpop.f32.mrf.mxu3 }
 0x486   : > { %3319 = vmatmul.f32.gmra.mxu2 %v3318_v60  ;;  %4039 = vmatmul.f32.gmra.mxu0 %v3315_v16  ;;  %v3956_v36 = vadd.f32 %v3955_v61, %v3638_v22  ;;  %v3332_v60 = vand.u32 4294901760, %v3331_v31  ;;  %v10025_v16 = vand.u32 4294901760, %v2883_v62  ;;  %v2710_v61 = vmax.f32 %v9562_v18, 0.0 }
 0x487   : > { %v4341_v0 = vpop.f32.mrf.mxu1 }
 0x488   : > { %v10020_v23 = vadd.f32 %v4329_v20, %v3956_v36  ;;  %13491 = vst [vmem:[#allocation31_spill] sm:$0xff] %v10025_v16  ;;  %v3333_v36 = vsub.f32 %v3331_v31, %v3332_v60  ;;  %v3339_v5 = vsub.f32 %v2883_v62, %v10025_v16 }
 0x489   : > { %v3192_v8 = vpop.f32.mrf.mxu2 }
 0x48a   : > { %13490 = vst [vmem:[#allocation28_spill] sm:$0xff] %v10020_v23  ;;  %v3193_v26 = vadd.f32 %v9985_v49, %v3192_v8  ;;  %3708 = vmatmul.f32.gmra.mxu3 %v10007_v25  ;;  %4436 = vmatmul.f32.gmra.mxu1 %v3324_v57  ;;  %v2886_v57 = vsel %vm2737_vm2, %v2710_v61, 0 }
 0x48b   : > { %v3965_v21 = vpop.f32.mrf.mxu0 }
 0x48c   : > { %v3642_v55 = vadd.f32 %v3641_v50, %v3193_v26  ;;  %v3334_v26 = vand.u32 4294901760, %v3333_v36 }
 0x48d   : > { %v3645_v22 = vpop.f32.mrf.mxu3 }
 0x48e   : > { %3327 = vmatmul.f32.gmra.mxu2 %v3326_v11  ;;  %4044 = vmatmul.f32.gmra.mxu0 %v3323_v58  ;;  %v3961_v20 = vadd.f32 %v3960_v52, %v3642_v55  ;;  %v3340_v11 = vand.u32 4294901760, %v3339_v5  ;;  %v10034_v58 = vand.u32 4294901760, %v2886_v57  ;;  %v5187_v52 = vld [vmem:[%s12408_s5 + $0x18] sm:$0xff] }
 0x48f   : > { %v4347_v7 = vpop.f32.mrf.mxu1 }
 0x490   : > { %v10029_v8 = vadd.f32 %v4335_v9, %v3961_v20  ;;  %13493 = vst [vmem:[#allocation33_spill] sm:$0xff] %v10034_v58  ;;  %v13494_v9 = vld [vmem:[#allocation67_spill] sm:$0xff]  ;;  %v10040_v20 = vand.u32 4294901760, %v5187_v52  ;;  %v3341_v61 = vsub.f32 %v3339_v5, %v3340_v11 }
 0x491   : > { %v3200_v25 = vpop.f32.mrf.mxu2  ;;  %v2711_v62 = vmax.f32 %v13494_v9, 0.0 }
 0x492   : > { %13492 = vst [vmem:[#allocation30_spill] sm:$0xff] %v10029_v8  ;;  %v3201_v50 = vadd.f32 %v9985_v49, %v3200_v25  ;;  %3712 = vmatmul.f32.gmra.mxu3 %v10016_v59  ;;  %4442 = vmatmul.f32.gmra.mxu1 %v3332_v60  ;;  %v10044_v60 = vsub.f32 %v5187_v52, %v10040_v20 }
 0x493   : > { %v3970_v30 = vpop.f32.mrf.mxu0  ;;  %5405 = vmatpush.msrb.mxu0 %v10040_v20  ;;  %6608 = vmatpush.msra.mxu3 %v10040_v20  ;;  %v2889_v59 = vsel %vm2737_vm2, %v2711_v62, 0  ;;  %v13497_v62 = vld [vmem:[#allocation80_spill] sm:$0xff] }
 0x494   : > { %v3646_v18 = vadd.f32 %v3645_v22, %v3201_v50  ;;  %v3347_v22 = vsub.f32 %v2886_v57, %v10034_v58  ;;  %6260 = vmatpush.msra.mxu2 %v10044_v60 }
 0x495   : > { %v3649_v55 = vpop.f32.mrf.mxu3 }
 0x496   : > { %3335 = vmatmul.f32.gmra.mxu2 %v3334_v26  ;;  %4049 = vmatmul.f32.gmra.mxu0 %v3331_v31  ;;  %v3966_v25 = vadd.f32 %v3965_v21, %v3646_v18  ;;  %v12755_v26 = vand.u32 4294901760, %v10044_v60  ;;  %v3342_v18 = vand.u32 4294901760, %v3341_v61  ;;  %v3348_v52 = vand.u32 4294901760, %v3347_v22 }
 0x497   : > { %v4353_v50 = vpop.f32.mrf.mxu1 }
 0x498   : > { %v10048_v36 = vadd.f32 %v4341_v0, %v3966_v25  ;;  %v5960_v57 = vsub.f32 %v10044_v60, %v12755_v26  ;;  %v10058_v25 = vand.u32 4294901760, %v2889_v59 }
 0x499   : > { %v3208_v9 = vpop.f32.mrf.mxu2 }
 0x49a   : > { %13495 = vst [vmem:[#allocation32_spill] sm:$0xff] %v10048_v36  ;;  %v3209_v31 = vadd.f32 %v9985_v49, %v3208_v9  ;;  %3716 = vmatmul.f32.gmra.mxu3 %v10025_v16  ;;  %4448 = vmatmul.f32.gmra.mxu1 %v3340_v11  ;;  %v2712_v36 = vmax.f32 %v13497_v62, 0.0  ;;  %v5961_v23 = vand.u32 4294901760, %v5960_v57  ;;  %v3349_v16 = vsub.f32 %v3347_v22, %v3348_v52 }
 0x49b   : > { %v3975_v21 = vpop.f32.mrf.mxu0  ;;  %13496 = vst [vmem:[#allocation151_spill] sm:$0xff] %v10058_v25  ;;  %v3355_v11 = vsub.f32 %v2889_v59, %v10058_v25 }
 0x49c   : > { %v3650_v0 = vadd.f32 %v3649_v55, %v3209_v31  ;;  %5962 = vmatpush.msrb.mxu1 %v5961_v23  ;;  %v2892_v55 = vsel %vm2737_vm2, %v2712_v36, 0  ;;  %v13498_v23 = vld [vmem:[#allocation74_spill] sm:$0xff] }
 0x49d   : > { %v3653_v8 = vpop.f32.mrf.mxu3 }
 0x49e   : > { %3343 = vmatmul.f32.gmra.mxu2 %v3342_v18  ;;  %4054 = vmatmul.f32.gmra.mxu0 %v3339_v5  ;;  %v3971_v9 = vadd.f32 %v3970_v30, %v3650_v0  ;;  %v3350_v18 = vand.u32 4294901760, %v3349_v16  ;;  %v3356_v5 = vand.u32 4294901760, %v3355_v11  ;;  %v10067_v30 = vand.u32 4294901760, %v2892_v55 }
 0x49f   : > { %v4359_v31 = vpop.f32.mrf.mxu1  ;;  %v2713_v0 = vmax.f32 %v13498_v23, 0.0 }
 0x4a0   : > { %v10062_v15 = vadd.f32 %v4347_v7, %v3971_v9  ;;  %v3357_v9 = vsub.f32 %v3355_v11, %v3356_v5  ;;  %v3363_v36 = vsub.f32 %v2892_v55, %v10067_v30 }
 0x4a1   : > { %v3216_v29 = vpop.f32.mrf.mxu2 }
 0x4a2   : > { %v3217_v61 = vadd.f32 %v9985_v49, %v3216_v29  ;;  %3720 = vmatmul.f32.gmra.mxu3 %v10034_v58  ;;  %4454 = vmatmul.f32.gmra.mxu1 %v3348_v52  ;;  %v2895_v52 = vsel %vm2737_vm2, %v2713_v0, 0  ;;  %v3358_v23 = vand.u32 4294901760, %v3357_v9  ;;  %v3364_v58 = vand.u32 4294901760, %v3363_v36 }
 0x4a3   : > { %v3980_v62 = vpop.f32.mrf.mxu0 }
 0x4a4   : > { %v3654_v57 = vadd.f32 %v3653_v8, %v3217_v61 }
 0x4a5   : > { %v3657_v59 = vpop.f32.mrf.mxu3 }
 0x4a6   : > { %3351 = vmatmul.f32.gmra.mxu2 %v3350_v18  ;;  %4059 = vmatmul.f32.gmra.mxu0 %v3347_v22  ;;  %v3976_v7 = vadd.f32 %v3975_v21, %v3654_v57  ;;  %v10076_v18 = vand.u32 4294901760, %v2895_v52  ;;  %v2714_v22 = vmax.f32 %v9598_v48, 0.0  ;;  %v3365_v57 = vsub.f32 %v3363_v36, %v3364_v58 }
 0x4a7   : > { %v4365_v21 = vpop.f32.mrf.mxu1 }
 0x4a8   : > { %v10071_v29 = vadd.f32 %v4353_v50, %v3976_v7  ;;  %13499 = vst [vmem:[#allocation150_spill] sm:$0xff] %v10076_v18  ;;  %v3371_v0 = vsub.f32 %v2895_v52, %v10076_v18  ;;  %v3366_v48 = vand.u32 4294901760, %v3365_v57 }
 0x4a9   : > { %v3224_v26 = vpop.f32.mrf.mxu2 }
 0x4aa   : > { %v3225_v8 = vadd.f32 %v9985_v49, %v3224_v26  ;;  %3724 = vmatmul.f32.gmra.mxu3 %v10058_v25  ;;  %4460 = vmatmul.f32.gmra.mxu1 %v3356_v5  ;;  %v2898_v5 = vsel %vm2737_vm2, %v2714_v22, 0 }
 0x4ab   : > { %v3985_v16 = vpop.f32.mrf.mxu0  ;;  %v10085_v25 = vand.u32 4294901760, %v2898_v5 }
 0x4ac   : > { %v3658_v61 = vadd.f32 %v3657_v59, %v3225_v8  ;;  %v3372_v8 = vand.u32 4294901760, %v3371_v0 }
 0x4ad   : > { %v3661_v55 = vpop.f32.mrf.mxu3  ;;  %v3379_v22 = vsub.f32 %v2898_v5, %v10085_v25 }
 0x4ae   : > { %3359 = vmatmul.f32.gmra.mxu2 %v3358_v23  ;;  %4064 = vmatmul.f32.gmra.mxu0 %v3355_v11  ;;  %v3981_v50 = vadd.f32 %v3980_v62, %v3658_v61  ;;  %v2715_v11 = vmax.f32 %v9607_v35, 0.0  ;;  %v3373_v23 = vsub.f32 %v3371_v0, %v3372_v8 }
 0x4af   : > { %v4371_v52 = vpop.f32.mrf.mxu1 }
 0x4b0   : > { %v10080_v26 = vadd.f32 %v4359_v31, %v3981_v50  ;;  %v3374_v57 = vand.u32 4294901760, %v3373_v23 }
 0x4b1   : > { %v3232_v7 = vpop.f32.mrf.mxu2 }
 0x4b2   : > { %v3233_v59 = vadd.f32 %v9985_v49, %v3232_v7  ;;  %3728 = vmatmul.f32.gmra.mxu3 %v10067_v30  ;;  %4466 = vmatmul.f32.gmra.mxu1 %v3364_v58  ;;  %v2901_v58 = vsel %vm2737_vm2, %v2715_v11, 0 }
 0x4b3   : > { %v3990_v62 = vpop.f32.mrf.mxu0 }
 0x4b4   : > { %v3662_v9 = vadd.f32 %v3661_v55, %v3233_v59  ;;  %v3380_v59 = vand.u32 4294901760, %v3379_v22 }
 0x4b5   : > { %v3665_v61 = vpop.f32.mrf.mxu3 }
 0x4b6   : > { %3367 = vmatmul.f32.gmra.mxu2 %v3366_v48  ;;  %4069 = vmatmul.f32.gmra.mxu0 %v3363_v36  ;;  %v3986_v31 = vadd.f32 %v3985_v16, %v3662_v9  ;;  %v10094_v48 = vand.u32 4294901760, %v2901_v58  ;;  %v2716_v36 = vmax.f32 %v9616_v3, 0.0  ;;  %v3381_v9 = vsub.f32 %v3379_v22, %v3380_v59 }
 0x4b8   : > { %v10089_v50 = vadd.f32 %v4365_v21, %v3986_v31  ;;  %13500 = vst [vmem:[#allocation35_spill] sm:$0xff] %v10094_v48  ;;  %v3387_v11 = vsub.f32 %v2901_v58, %v10094_v48  ;;  %v3382_v23 = vand.u32 4294901760, %v3381_v9 }
 0x4b9   : > { %v3240_v7 = vpop.f32.mrf.mxu2 }
 0x4ba   : > { %v3241_v55 = vadd.f32 %v9985_v49, %v3240_v7  ;;  %3732 = vmatmul.f32.gmra.mxu3 %v10076_v18  ;;  %4472 = vmatmul.f32.gmra.mxu1 %v3372_v8  ;;  %v4377_v7 = vpop.f32.mrf.mxu1  ;;  %v2904_v8 = vsel %vm2737_vm2, %v2716_v36, 0 }
 0x4bb   : > { %v3995_v5 = vpop.f32.mrf.mxu0 }
 0x4bc   : > { %v3666_v35 = vadd.f32 %v3665_v61, %v3241_v55  ;;  %v3388_v55 = vand.u32 4294901760, %v3387_v11 }
 0x4bd   : > { %v3669_v16 = vpop.f32.mrf.mxu3 }
 0x4be   : > { %3375 = vmatmul.f32.gmra.mxu2 %v3374_v57  ;;  %4074 = vmatmul.f32.gmra.mxu0 %v3371_v0  ;;  %v3991_v21 = vadd.f32 %v3990_v62, %v3666_v35  ;;  %v10103_v0 = vand.u32 4294901760, %v2904_v8  ;;  %v2717_v62 = vmax.f32 %v9625_v39, 0.0  ;;  %v3389_v58 = vsub.f32 %v3387_v11, %v3388_v55 }
 0x4c0   : > { %v10098_v31 = vadd.f32 %v4371_v52, %v3991_v21  ;;  %13501 = vst [vmem:[#allocation34_spill] sm:$0xff] %v10103_v0  ;;  %v3395_v57 = vsub.f32 %v2904_v8, %v10103_v0 }
 0x4c1   : > { %v3248_v18 = vpop.f32.mrf.mxu2 }
 0x4c2   : > { %v3249_v61 = vadd.f32 %v9985_v49, %v3248_v18  ;;  %3736 = vmatmul.f32.gmra.mxu3 %v10085_v25  ;;  %4478 = vmatmul.f32.gmra.mxu1 %v3380_v59  ;;  %v2907_v59 = vsel %vm2737_vm2, %v2717_v62, 0  ;;  %v4383_v9 = vpop.f32.mrf.mxu1 }
 0x4c3   : > { %v4000_v18 = vpop.f32.mrf.mxu0 }
 0x4c4   : > { %v3670_v3 = vadd.f32 %v3669_v16, %v3249_v61  ;;  %v3390_v61 = vand.u32 4294901760, %v3389_v58 }
 0x4c5   : > { %v3673_v35 = vpop.f32.mrf.mxu3 }
 0x4c6   : > { %3383 = vmatmul.f32.gmra.mxu2 %v3382_v23  ;;  %4079 = vmatmul.f32.gmra.mxu0 %v3379_v22  ;;  %v3996_v52 = vadd.f32 %v3995_v5, %v3670_v3  ;;  %v3396_v23 = vand.u32 4294901760, %v3395_v57  ;;  %v10112_v22 = vand.u32 4294901760, %v2907_v59  ;;  %v2718_v5 = vmax.f32 %v9634_v33, 0.0 }
 0x4c8   : > { %v10107_v36 = vadd.f32 %v4377_v7, %v3996_v52  ;;  %13502 = vst [vmem:[#allocation47_spill] sm:$0xff] %v10112_v22  ;;  %v3397_v3 = vsub.f32 %v3395_v57, %v3396_v23  ;;  %v3403_v62 = vsub.f32 %v2907_v59, %v10112_v22 }
 0x4c9   : > { %v3256_v21 = vpop.f32.mrf.mxu2 }
 0x4ca   : > { %v3257_v16 = vadd.f32 %v9985_v49, %v3256_v21  ;;  %3740 = vmatmul.f32.gmra.mxu3 %v10094_v48  ;;  %4484 = vmatmul.f32.gmra.mxu1 %v3388_v55  ;;  %v2910_v55 = vsel %vm2737_vm2, %v2718_v5, 0  ;;  %v3398_v33 = vand.u32 4294901760, %v3397_v3  ;;  %v3404_v48 = vand.u32 4294901760, %v3403_v62  ;;  %v4389_v59 = vpop.f32.mrf.mxu1 }
 0x4cb   : > { %v4005_v58 = vpop.f32.mrf.mxu0 }
 0x4cc   : > { %v3674_v39 = vadd.f32 %v3673_v35, %v3257_v16 }
 0x4cd   : > { %v3677_v8 = vpop.f32.mrf.mxu3 }
 0x4ce   : > { %3391 = vmatmul.f32.gmra.mxu2 %v3390_v61  ;;  %4084 = vmatmul.f32.gmra.mxu0 %v3387_v11  ;;  %v4001_v7 = vadd.f32 %v4000_v18, %v3674_v39  ;;  %v10121_v61 = vand.u32 4294901760, %v2910_v55  ;;  %v5186_v11 = vld [vmem:[%s12408_s5 + $0x10] sm:$0xff]  ;;  %v2719_v18 = vmax.f32 %v9643_v32, 0.0 }
 0x4cf   : > { %v10127_v39 = vand.u32 4294901760, %v5186_v11 }
 0x4d0   : > { %v10116_v52 = vadd.f32 %v4383_v9, %v4001_v7  ;;  %v3411_v7 = vsub.f32 %v2910_v55, %v10121_v61 }
 0x4d1   : > { %v3264_v21 = vpop.f32.mrf.mxu2  ;;  %5407 = vmatpush.msrb.mxu0 %v10127_v39  ;;  %6610 = vmatpush.msra.mxu3 %v10127_v39 }
 0x4d2   : > { %13503 = vst [vmem:[#allocation37_spill] sm:$0xff] %v10116_v52  ;;  %v3265_v35 = vadd.f32 %v9985_v49, %v3264_v21  ;;  %3744 = vmatmul.f32.gmra.mxu3 %v10103_v0  ;;  %4490 = vmatmul.f32.gmra.mxu1 %v3396_v23  ;;  %v10131_v23 = vsub.f32 %v5186_v11, %v10127_v39  ;;  %v2913_v21 = vsel %vm2737_vm2, %v2719_v18, 0  ;;  %v2720_v18 = vmax.f32 %v9652_v40, 0.0 }
 0x4d3   : > { %v10145_v11 = vand.u32 4294901760, %v2913_v21 }
 0x4d4   : > { %v3678_v16 = vadd.f32 %v3677_v8, %v3265_v35  ;;  %v3405_v8 = vsub.f32 %v3403_v62, %v3404_v48  ;;  %v12768_v35 = vand.u32 4294901760, %v10131_v23  ;;  %6263 = vmatpush.msra.mxu2 %v10131_v23 }
 0x4d5   : > { %v3681_v9 = vpop.f32.mrf.mxu3 }
 0x4d6   : > { %3399 = vmatmul.f32.gmra.mxu2 %v3398_v33  ;;  %4089 = vmatmul.f32.gmra.mxu0 %v3395_v57  ;;  %v4006_v5 = vadd.f32 %v4005_v58, %v3678_v16  ;;  %v5966_v58 = vsub.f32 %v10131_v23, %v12768_v35  ;;  %v3406_v55 = vand.u32 4294901760, %v3405_v8  ;;  %v3412_v33 = vand.u32 4294901760, %v3411_v7 }
 0x4d7   : > { %v2916_v8 = vsel %vm2737_vm2, %v2720_v18, 0 }
 0x4d8   : > { %v10135_v3 = vadd.f32 %v4389_v59, %v4006_v5  ;;  %v4010_v59 = vpop.f32.mrf.mxu0  ;;  %v5967_v0 = vand.u32 4294901760, %v5966_v58 }
 0x4d9   : > { %v3272_v32 = vpop.f32.mrf.mxu2 }
 0x4da   : > { %13504 = vst [vmem:[#allocation36_spill] sm:$0xff] %v10135_v3  ;;  %v3273_v57 = vadd.f32 %v9985_v49, %v3272_v32  ;;  %3748 = vmatmul.f32.gmra.mxu3 %v10112_v22  ;;  %4496 = vmatmul.f32.gmra.mxu1 %v3404_v48  ;;  %v4395_v3 = vpop.f32.mrf.mxu1  ;;  %v3413_v48 = vsub.f32 %v3411_v7, %v3412_v33 }
 0x4db   : > { %5968 = vmatpush.msrb.mxu1 %v5967_v0  ;;  %v3419_v22 = vsub.f32 %v2913_v21, %v10145_v11  ;;  %v2721_v0 = vmax.f32 %v9661_v51, 0.0  ;;  %v2722_v51 = vmax.f32 %v9670_v10, 0.0  ;;  %v13508_v10 = vld [vmem:[#allocation91_spill] sm:$0xff] }
 0x4dc   : > { %v3682_v16 = vadd.f32 %v3681_v9, %v3273_v57  ;;  %v3414_v58 = vand.u32 4294901760, %v3413_v48 }
 0x4dd   : > { %v3685_v5 = vpop.f32.mrf.mxu3 }
 0x4de   : > { %3407 = vmatmul.f32.gmra.mxu2 %v3406_v55  ;;  %4094 = vmatmul.f32.gmra.mxu0 %v3403_v62  ;;  %v4011_v32 = vadd.f32 %v4010_v59, %v3682_v16  ;;  %v3420_v62 = vand.u32 4294901760, %v3419_v22  ;;  %v10156_v16 = vand.u32 4294901760, %v2916_v8  ;;  %v2919_v59 = vsel %vm2737_vm2, %v2721_v0, 0 }
 0x4df   : > { %v2922_v0 = vsel %vm2737_vm2, %v2722_v51, 0 }
 0x4e0   : > { %v10149_v52 = vadd.f32 %v4395_v3, %v4011_v32  ;;  %13505 = vst [vmem:[#allocation54_spill] sm:$0xff] %v10156_v16  ;;  %v3421_v3 = vsub.f32 %v3419_v22, %v3420_v62  ;;  %v3427_v21 = vsub.f32 %v2916_v8, %v10156_v16 }
 0x4e1   : > { %v3280_v9 = vpop.f32.mrf.mxu2 }
 0x4e2   : > { %v3281_v57 = vadd.f32 %v9985_v49, %v3280_v9  ;;  %3752 = vmatmul.f32.gmra.mxu3 %v10121_v61  ;;  %4502 = vmatmul.f32.gmra.mxu1 %v3412_v33  ;;  %v3428_v48 = vand.u32 4294901760, %v3427_v21  ;;  %v10165_v9 = vand.u32 4294901760, %v2919_v59 }
 0x4e4   : > { %v10154_v40 = vadd.f32 %v3685_v5, %v3281_v57  ;;  %v3422_v5 = vand.u32 4294901760, %v3421_v3  ;;  %13506 = vst [vmem:[#allocation41_spill] sm:$0xff] %v10165_v9  ;;  %v3429_v8 = vsub.f32 %v3427_v21, %v3428_v48  ;;  %v3435_v57 = vsub.f32 %v2919_v59, %v10165_v9 }
 0x4e5   : > { %v3689_v55 = vpop.f32.mrf.mxu3 }
 0x4e6   : > { %3415 = vmatmul.f32.gmra.mxu2 %v3414_v58  ;;  %4099 = vmatmul.f32.gmra.mxu0 %v3411_v7  ;;  %v3436_v3 = vand.u32 4294901760, %v3435_v57 }
 0x4e8   : > { %v3437_v59 = vsub.f32 %v3435_v57, %v3436_v3 }
 0x4e9   : > { %v3288_v18 = vpop.f32.mrf.mxu2 }
 0x4ea   : > { %v3289_v32 = vadd.f32 %v9985_v49, %v3288_v18  ;;  %3756 = vmatmul.f32.gmra.mxu3 %v10145_v11  ;;  %4508 = vmatmul.f32.gmra.mxu1 %v3420_v62 }
 0x4ec   : > { %v10163_v33 = vadd.f32 %v3689_v55, %v3289_v32  ;;  %v3430_v55 = vand.u32 4294901760, %v3429_v8  ;;  %v10174_v32 = vand.u32 4294901760, %v2922_v0 }
 0x4ed   : > { %v3693_v7 = vpop.f32.mrf.mxu3 }
 0x4ee   : > { %3423 = vmatmul.f32.gmra.mxu2 %v3422_v5  ;;  %4104 = vmatmul.f32.gmra.mxu0 %v3419_v22  ;;  %13507 = vst [vmem:[#allocation39_spill] sm:$0xff] %v10174_v32  ;;  %v2723_v5 = vmax.f32 %v13508_v10, 0.0  ;;  %v3443_v35 = vsub.f32 %v2922_v0, %v10174_v32 }
 0x4f0   : > { %v3444_v8 = vand.u32 4294901760, %v3443_v35 }
 0x4f1   : > { %v3296_v58 = vpop.f32.mrf.mxu2 }
 0x4f2   : > { %v3297_v18 = vadd.f32 %v9985_v49, %v3296_v58  ;;  %3760 = vmatmul.f32.gmra.mxu3 %v10156_v16  ;;  %4514 = vmatmul.f32.gmra.mxu1 %v3428_v48  ;;  %v2925_v58 = vsel %vm2737_vm2, %v2723_v5, 0  ;;  %v3445_v0 = vsub.f32 %v3443_v35, %v3444_v8 }
 0x4f4   : > { %v10172_v62 = vadd.f32 %v3693_v7, %v3297_v18  ;;  %v3438_v7 = vand.u32 4294901760, %v3437_v59  ;;  %v10183_v18 = vand.u32 4294901760, %v2925_v58 }
 0x4f5   : > { %v3697_v22 = vpop.f32.mrf.mxu3 }
 0x4f6   : > { %3431 = vmatmul.f32.gmra.mxu2 %v3430_v55  ;;  %4109 = vmatmul.f32.gmra.mxu0 %v3427_v21  ;;  %13510 = vst [vmem:[#allocation48_spill] sm:$0xff] %v10183_v18  ;;  %v2724_v55 = vmax.f32 %v9708_v53, 0.0  ;;  %v3451_v10 = vsub.f32 %v2925_v58, %v10183_v18 }
 0x4f9   : > { %v3304_v51 = vpop.f32.mrf.mxu2 }
 0x4fa   : > { %v3305_v16 = vadd.f32 %v9985_v49, %v3304_v51  ;;  %3764 = vmatmul.f32.gmra.mxu3 %v10165_v9  ;;  %4520 = vmatmul.f32.gmra.mxu1 %v3436_v3  ;;  %v2928_v51 = vsel %vm2737_vm2, %v2724_v55, 0  ;;  %v3446_v3 = vand.u32 4294901760, %v3445_v0 }
 0x4fb   : > { %v10192_v59 = vand.u32 4294901760, %v2928_v51 }
 0x4fc   : > { %v10181_v48 = vadd.f32 %v3697_v22, %v3305_v16  ;;  %v3452_v22 = vand.u32 4294901760, %v3451_v10 }
 0x4fd   : > { %v3701_v21 = vpop.f32.mrf.mxu3  ;;  %13512 = vst [vmem:[#allocation68_spill] sm:$0xff] %v10192_v59  ;;  %v3459_v58 = vsub.f32 %v2928_v51, %v10192_v59 }
 0x4fe   : > { %13509 = vst [vmem:[#allocation61_spill] sm:$0xff] %v10181_v48  ;;  %3439 = vmatmul.f32.gmra.mxu2 %v3438_v7  ;;  %4114 = vmatmul.f32.gmra.mxu0 %v3435_v57  ;;  %v3453_v57 = vsub.f32 %v3451_v10, %v3452_v22  ;;  %v13536_v48 = vand.u32 4294901760, %v9778_v2  ;;  %v13541_v2 = vand.u32 4294901760, %v10044_v60 }
 0x501   : > { %v3312_v5 = vpop.f32.mrf.mxu2 }
 0x502   : > { %v3313_v9 = vadd.f32 %v9985_v49, %v3312_v5  ;;  %3768 = vmatmul.f32.gmra.mxu3 %v10174_v32  ;;  %4526 = vmatmul.f32.gmra.mxu1 %v3444_v8  ;;  %v3460_v8 = vand.u32 4294901760, %v3459_v58 }
 0x504   : > { %v10190_v16 = vadd.f32 %v3701_v21, %v3313_v9  ;;  %v3454_v9 = vand.u32 4294901760, %v3453_v57  ;;  %v3461_v0 = vsub.f32 %v3459_v58, %v3460_v8 }
 0x505   : > { %v3705_v53 = vpop.f32.mrf.mxu3 }
 0x506   : > { %13511 = vst [vmem:[#allocation44_spill] sm:$0xff] %v10190_v16  ;;  %3447 = vmatmul.f32.gmra.mxu2 %v3446_v3  ;;  %4119 = vmatmul.f32.gmra.mxu0 %v3443_v35  ;;  %v3462_v3 = vand.u32 4294901760, %v3461_v0 }
 0x509   : > { %v3320_v7 = vpop.f32.mrf.mxu2 }
 0x50a   : > { %v3321_v55 = vadd.f32 %v9985_v49, %v3320_v7  ;;  %3772 = vmatmul.f32.gmra.mxu3 %v10183_v18  ;;  %4532 = vmatmul.f32.gmra.mxu1 %v3452_v22  ;;  %v5185_v22 = vld [vmem:[%s12408_s5 + $0x8] sm:$0xff] }
 0x50b   : > { %v10206_v57 = vand.u32 4294901760, %v5185_v22 }
 0x50c   : > { %v10197_v5 = vadd.f32 %v3705_v53, %v3321_v55 }
 0x50d   : > { %v3709_v21 = vpop.f32.mrf.mxu3  ;;  %5409 = vmatpush.msrb.mxu0 %v10206_v57  ;;  %6612 = vmatpush.msra.mxu3 %v10206_v57 }
 0x50e   : > { %13513 = vst [vmem:[#allocation55_spill] sm:$0xff] %v10197_v5  ;;  %3455 = vmatmul.f32.gmra.mxu2 %v3454_v9  ;;  %4124 = vmatmul.f32.gmra.mxu0 %v3451_v10  ;;  %v10210_v10 = vsub.f32 %v5185_v22, %v10206_v57  ;;  %v13515_v9 = vld [vmem:[#allocation53_spill] sm:$0xff]  ;;  %v13517_v22 = vld [vmem:[#allocation50_spill] sm:$0xff] }
 0x510   : > { %v12777_v7 = vand.u32 4294901760, %v10210_v10  ;;  %6266 = vmatpush.msra.mxu2 %v10210_v10  ;;  %v13545_v60 = vand.u32 4294901760, %v10210_v10 }
 0x511   : > { %v3328_v32 = vpop.f32.mrf.mxu2 }
 0x512   : > { %v3329_v35 = vadd.f32 %v9985_v49, %v3328_v32  ;;  %3776 = vmatmul.f32.gmra.mxu3 %v10192_v59  ;;  %4538 = vmatmul.f32.gmra.mxu1 %v3460_v8 }
 0x514   : > { %v10201_v51 = vadd.f32 %v3709_v21, %v3329_v35 }
 0x515   : > { %v3713_v53 = vpop.f32.mrf.mxu3 }
 0x516   : > { %13514 = vst [vmem:[#allocation51_spill] sm:$0xff] %v10201_v51  ;;  %3463 = vmatmul.f32.gmra.mxu2 %v3462_v3  ;;  %4129 = vmatmul.f32.gmra.mxu0 %v3459_v58  ;;  %v5972_v58 = vsub.f32 %v10210_v10, %v12777_v7 }
 0x518   : > { %v5973_v0 = vand.u32 4294901760, %v5972_v58 }
 0x519   : > { %v3336_v32 = vpop.f32.mrf.mxu2 }
 0x51a   : > { %v3337_v55 = vadd.f32 %v9985_v49, %v3336_v32  ;;  %4864 = vmatmul.f32.vlgmr.msrb.gmra.mxu3 %v13515_v9  ;;  %5974 = vmatpush.msrb.mxu1 %v5973_v0 }
 0x51c   : > { %v10220_v8 = vadd.f32 %v3713_v53, %v3337_v55  ;;  %v13519_v53 = vld [vmem:[#allocation63_spill] sm:$0xff] }
 0x51d   : > { %v3717_v21 = vpop.f32.mrf.mxu3 }
 0x51e   : > { %13516 = vst [vmem:[#allocation75_spill] sm:$0xff] %v10220_v8  ;;  %4583 = vmatmul.f32.vlgmr.msrb.gmra.mxu2 %v13515_v9 }
 0x521   : > { %v3344_v35 = vpop.f32.mrf.mxu2 }
 0x522   : > { %v3345_v3 = vadd.f32 %v9985_v49, %v3344_v35  ;;  %4868 = vmatmul.f32.gmra.mxu3 %v13517_v22  ;;  %v13521_v35 = vld [vmem:[#allocation57_spill] sm:$0xff] }
 0x524   : > { %v10225_v59 = vadd.f32 %v3717_v21, %v3345_v3 }
 0x525   : > { %v3721_v32 = vpop.f32.mrf.mxu3 }
 0x526   : > { %13518 = vst [vmem:[#allocation62_spill] sm:$0xff] %v10225_v59  ;;  %4587 = vmatmul.f32.gmra.mxu2 %v13517_v22  ;;  %v10238_v59 = vpop.f32.mrf.mxu1 }
 0x529   : > { %v3352_v51 = vpop.f32.mrf.mxu2 }
 0x52a   : > { %v3353_v7 = vadd.f32 %v9985_v49, %v3352_v51  ;;  %4872 = vmatmul.f32.gmra.mxu3 %v13519_v53 }
 0x52c   : > { %v10230_v55 = vadd.f32 %v3721_v32, %v3353_v7  ;;  %v13523_v7 = vld [vmem:[#allocation73_spill] sm:$0xff] }
 0x52d   : > { %v3725_v58 = vpop.f32.mrf.mxu3 }
 0x52e   : > { %13520 = vst [vmem:[#allocation58_spill] sm:$0xff] %v10230_v55  ;;  %4591 = vmatmul.f32.gmra.mxu2 %v13519_v53  ;;  %v10245_v55 = vpop.f32.mrf.mxu0 }
 0x531   : > { %v3360_v9 = vpop.f32.mrf.mxu2 }
 0x532   : > { %v3361_v0 = vadd.f32 %v9985_v49, %v3360_v9  ;;  %4876 = vmatmul.f32.gmra.mxu3 %v13521_v35 }
 0x534   : > { %v10235_v21 = vadd.f32 %v3725_v58, %v3361_v0  ;;  %v13525_v0 = vld [vmem:[#allocation70_spill] sm:$0xff] }
 0x535   : > { %v3729_v3 = vpop.f32.mrf.mxu3 }
 0x536   : > { %13522 = vst [vmem:[#allocation124_spill] sm:$0xff] %v10235_v21  ;;  %4595 = vmatmul.f32.gmra.mxu2 %v13521_v35  ;;  %v10249_v35 = vpop.f32.mrf.mxu1 }
 0x539   : > { %v3368_v22 = vpop.f32.mrf.mxu2 }
 0x53a   : > { %v3369_v51 = vadd.f32 %v9985_v49, %v3368_v22  ;;  %4880 = vmatmul.f32.gmra.mxu3 %v13523_v7 }
 0x53c   : > { %v10242_v32 = vadd.f32 %v3729_v3, %v3369_v51  ;;  %v13527_v51 = vld [vmem:[#allocation64_spill] sm:$0xff] }
 0x53d   : > { %v3733_v53 = vpop.f32.mrf.mxu3 }
 0x53e   : > { %13524 = vst [vmem:[#allocation137_spill] sm:$0xff] %v10242_v32  ;;  %4599 = vmatmul.f32.gmra.mxu2 %v13523_v7  ;;  %v10256_v7 = vpop.f32.mrf.mxu0 }
 0x541   : > { %v3376_v9 = vpop.f32.mrf.mxu2 }
 0x542   : > { %v3377_v58 = vadd.f32 %v9985_v49, %v3376_v9  ;;  %4884 = vmatmul.f32.gmra.mxu3 %v13525_v0  ;;  %v10260_v9 = vpop.f32.mrf.mxu1 }
 0x543   : > { %13529 = vst [vmem:[#allocation65_spill] sm:$0xff] %v10260_v9 }
 0x544   : > { %v10251_v21 = vadd.f32 %v3733_v53, %v3377_v58  ;;  %v13530_v58 = vld [vmem:[#allocation77_spill] sm:$0xff] }
 0x545   : > { %v3737_v8 = vpop.f32.mrf.mxu3 }
 0x546   : > { %13526 = vst [vmem:[#allocation82_spill] sm:$0xff] %v10251_v21  ;;  %4603 = vmatmul.f32.gmra.mxu2 %v13525_v0 }
 0x549   : > { %v3384_v22 = vpop.f32.mrf.mxu2 }
 0x54a   : > { %v3385_v3 = vadd.f32 %v9985_v49, %v3384_v22  ;;  %4888 = vmatmul.f32.gmra.mxu3 %v13527_v51  ;;  %v5184_v22 = vld [vmem:[%s12408_s5] sm:$0xff] }
 0x54b   : > { %v5410_v16 = vand.u32 4294901760, %v5184_v22 }
 0x54c   : > { %v10258_v32 = vadd.f32 %v3737_v8, %v3385_v3  ;;  %v10270_v8 = vpop.f32.mrf.mxu0 }
 0x54d   : > { %v3741_v18 = vpop.f32.mrf.mxu3  ;;  %13532 = vst [vmem:[#allocation49_spill] sm:$0xff] %v10270_v8  ;;  %5411 = vmatpush.msrb.mxu0 %v5410_v16  ;;  %v5976_v3 = vsub.f32 %v5184_v22, %v5410_v16  ;;  %6614 = vmatpush.msra.mxu3 %v5410_v16  ;;  %v13538_v22 = vand.u32 4294901760, %v9865_v56 }
 0x54e   : > { %13528 = vst [vmem:[#allocation69_spill] sm:$0xff] %v10258_v32  ;;  %4607 = vmatmul.f32.gmra.mxu2 %v13527_v51  ;;  %v10273_v51 = vpop.f32.mrf.mxu1  ;;  %v13535_v32 = vld [vmem:[#allocation71_spill] sm:$0xff] }
 0x54f   : > { %13533 = vst [vmem:[#allocation123_spill] sm:$0xff] %v10273_v51  ;;  %6269 = vmatpush.msra.mxu2 %v5976_v3 }
 0x551   : > { %v3392_v5 = vpop.f32.mrf.mxu2 }
 0x552   : > { %v3393_v53 = vadd.f32 %v9985_v49, %v3392_v5  ;;  %4892 = vmatmul.f32.gmra.mxu3 %v13530_v58  ;;  %v13534_v5 = vand.u32 4294901760, %v9686_v24  ;;  %v13539_v24 = vand.u32 4294901760, %v9952_v12  ;;  %v13543_v12 = vand.u32 4294901760, %v10131_v23 }
 0x554   : > { %v10265_v0 = vadd.f32 %v3741_v18, %v3393_v53  ;;  %7011 = vmatpush.msra.mxu0 %v13534_v5  ;;  %v5977_v53 = vand.u32 4294901760, %v5976_v3  ;;  %v10288_v5 = vpop.f32.mrf.mxu0 }
 0x555   : > { %v3745_v21 = vpop.f32.mrf.mxu3 }
 0x556   : > { %13531 = vst [vmem:[#allocation147_spill] sm:$0xff] %v10265_v0  ;;  %4611 = vmatmul.f32.gmra.mxu2 %v13530_v58  ;;  %7015 = vmatpush.msra.mxu0 %v13536_v48  ;;  %v5978_v9 = vsub.f32 %v5976_v3, %v5977_v53  ;;  %v13546_v3 = vld [vmem:[#allocation84_spill] sm:$0xff] }
 0x558   : > { %7019 = vmatpush.msra.mxu0 %v13538_v22  ;;  %v5979_v8 = vand.u32 4294901760, %v5978_v9 }
 0x559   : > { %v3400_v18 = vpop.f32.mrf.mxu2 }
 0x55a   : > { %v3401_v0 = vadd.f32 %v9985_v49, %v3400_v18  ;;  %4896 = vmatmul.f32.gmra.mxu3 %v13535_v32  ;;  %7023 = vmatpush.msra.mxu0 %v13539_v24  ;;  %v13540_v18 = vld [vmem:[#allocation94_spill] sm:$0xff] }
 0x55b   : > { %5980 = vmatpush.msrb.mxu1 %v5979_v8 }
 0x55c   : > { %v10281_v58 = vadd.f32 %v3745_v21, %v3401_v0  ;;  %7027 = vmatpush.msra.mxu0 %v13541_v2  ;;  %v10293_v21 = vpop.f32.mrf.mxu1  ;;  %v13542_v0 = vld [vmem:[#allocation86_spill] sm:$0xff] }
 0x55d   : > { %v3749_v51 = vpop.f32.mrf.mxu3  ;;  %7306 = vmatpush.msra.mxu1 %v13540_v18 }
 0x55e   : > { %13537 = vst [vmem:[#allocation136_spill] sm:$0xff] %v10281_v58  ;;  %4615 = vmatmul.f32.gmra.mxu2 %v13535_v32  ;;  %7031 = vmatpush.msra.mxu0 %v13543_v12  ;;  %v13565_v58 = vld [vmem:[#allocation107_spill] sm:$0xff] }
 0x55f   : > { %7308 = vmatpush.msra.mxu1 %v9774_v44  ;;  %v10308_v44 = vpop.f32.mrf.mxu0 }
 0x560   : > { %7035 = vmatpush.msra.mxu0 %v13545_v60 }
 0x561   : > { %v3408_v48 = vpop.f32.mrf.mxu2  ;;  %7310 = vmatpush.msra.mxu1 %v9861_v4 }
 0x562   : > { %v3409_v56 = vadd.f32 %v9985_v49, %v3408_v48  ;;  %4900 = vmatmul.f32.gmra.mxu3 %v13542_v0  ;;  %7039 = vmatpush.msra.mxu0 %v5977_v53  ;;  %v13548_v53 = vld [vmem:[#allocation81_spill] sm:$0xff]  ;;  %v13550_v48 = vld [vmem:[#allocation78_spill] sm:$0xff] }
 0x563   : > { %7312 = vmatpush.msra.mxu1 %v9948_v63 }
 0x564   : > { %v10300_v32 = vadd.f32 %v3749_v51, %v3409_v56  ;;  %v10313_v4 = vpop.f32.mrf.mxu1 }
 0x565   : > { %v3753_v9 = vpop.f32.mrf.mxu3  ;;  %7314 = vmatpush.msra.mxu1 %v10040_v20 }
 0x566   : > { %13544 = vst [vmem:[#allocation88_spill] sm:$0xff] %v10300_v32  ;;  %4619 = vmatmul.f32.gmra.mxu2 %v13542_v0 }
 0x567   : > { %7316 = vmatpush.msra.mxu1 %v10127_v39  ;;  %v10321_v22 = vpop.f32.mrf.mxu0 }
 0x569   : > { %v3416_v8 = vpop.f32.mrf.mxu2  ;;  %7318 = vmatpush.msra.mxu1 %v10206_v57  ;;  %v7790_v57 = vld [vmem:[%s12407_s4] ss:$0 sm:$0xff] }
 0x56a   : > { %v3417_v23 = vadd.f32 %v9985_v49, %v3416_v8  ;;  %4904 = vmatmul.f32.gmra.mxu3 %v13546_v3  ;;  %v13552_v8 = vld [vmem:[#allocation93_spill] sm:$0xff] }
 0x56b   : > { %7320 = vmatpush.msra.mxu1 %v5410_v16 }
 0x56c   : > { %v10315_v10 = vadd.f32 %v3753_v9, %v3417_v23  ;;  %v10325_v18 = vpop.f32.mrf.mxu1 }
 0x56d   : > { %v3757_v51 = vpop.f32.mrf.mxu3 }
 0x56e   : > { %13547 = vst [vmem:[#allocation76_spill] sm:$0xff] %v10315_v10  ;;  %4623 = vmatmul.f32.gmra.mxu2 %v13546_v3 }
 0x56f   : > { %v10334_v0 = vpop.f32.mrf.mxu0 }
 0x571   : > { %v3424_v63 = vpop.f32.mrf.mxu2 }
 0x572   : > { %v3425_v20 = vadd.f32 %v9985_v49, %v3424_v63  ;;  %4908 = vmatmul.f32.gmra.mxu3 %v13548_v53 }
 0x574   : > { %v10323_v24 = vadd.f32 %v3757_v51, %v3425_v20  ;;  %v10337_v12 = vpop.f32.mrf.mxu1 }
 0x575   : > { %v3761_v39 = vpop.f32.mrf.mxu3 }
 0x576   : > { %13549 = vst [vmem:[#allocation72_spill] sm:$0xff] %v10323_v24  ;;  %4627 = vmatmul.f32.gmra.mxu2 %v13548_v53 }
 0x577   : > { %v10343_v51 = vpop.f32.mrf.mxu0 }
 0x579   : > { %v3432_v2 = vpop.f32.mrf.mxu2 }
 0x57a   : > { %v3433_v16 = vadd.f32 %v7790_v57, %v3432_v2  ;;  %4912 = vmatmul.f32.gmra.mxu3 %v13550_v48 }
 0x57c   : > { %v10332_v49 = vadd.f32 %v3761_v39, %v3433_v16  ;;  %v10345_v20 = vpop.f32.mrf.mxu1  ;;  %v13554_v39 = vld [vmem:[#allocation90_spill] sm:$0xff] }
 0x57d   : > { %v3765_v56 = vpop.f32.mrf.mxu3 }
 0x57e   : > { %13551 = vst [vmem:[#allocation146_spill] sm:$0xff] %v10332_v49  ;;  %4631 = vmatmul.f32.gmra.mxu2 %v13550_v48 }
 0x581   : > { %v3440_v9 = vpop.f32.mrf.mxu2 }
 0x582   : > { %v3441_v60 = vadd.f32 %v7790_v57, %v3440_v9  ;;  %4916 = vmatmul.f32.gmra.mxu3 %v13552_v8  ;;  %v10351_v9 = vpop.f32.mrf.mxu0 }
 0x584   : > { %v10340_v23 = vadd.f32 %v3765_v56, %v3441_v60  ;;  %v13556_v60 = vld [vmem:[#allocation87_spill] sm:$0xff] }
 0x585   : > { %v3769_v3 = vpop.f32.mrf.mxu3 }
 0x586   : > { %13553 = vst [vmem:[#allocation52_spill] sm:$0xff] %v10340_v23  ;;  %4635 = vmatmul.f32.gmra.mxu2 %v13552_v8  ;;  %v10354_v8 = vpop.f32.mrf.mxu1 }
 0x589   : > { %v3448_v63 = vpop.f32.mrf.mxu2 }
 0x58a   : > { %v3449_v53 = vadd.f32 %v7790_v57, %v3448_v63  ;;  %4920 = vmatmul.f32.gmra.mxu3 %v13554_v39 }
 0x58c   : > { %v10348_v2 = vadd.f32 %v3769_v3, %v3449_v53  ;;  %v13558_v3 = vld [vmem:[#allocation100_spill] sm:$0xff]  ;;  %v10360_v53 = vpop.f32.mrf.mxu0 }
 0x58d   : > { %v3773_v16 = vpop.f32.mrf.mxu3 }
 0x58e   : > { %13555 = vst [vmem:[#allocation95_spill] sm:$0xff] %v10348_v2  ;;  %4639 = vmatmul.f32.gmra.mxu2 %v13554_v39  ;;  %v10364_v10 = vpop.f32.mrf.mxu1 }
 0x58f   : > { %13560 = vst [vmem:[#allocation103_spill] sm:$0xff] %v10364_v10 }
 0x591   : > { %v3456_v48 = vpop.f32.mrf.mxu2 }
 0x592   : > { %v3457_v56 = vadd.f32 %v7790_v57, %v3456_v48  ;;  %4924 = vmatmul.f32.gmra.mxu3 %v13556_v60 }
 0x594   : > { %v10356_v23 = vadd.f32 %v3773_v16, %v3457_v56  ;;  %v13561_v56 = vld [vmem:[#allocation97_spill] sm:$0xff]  ;;  %v10369_v32 = vpop.f32.mrf.mxu0 }
 0x595   : > { %v3777_v49 = vpop.f32.mrf.mxu3  ;;  %13562 = vst [vmem:[#allocation89_spill] sm:$0xff] %v10369_v32 }
 0x596   : > { %13557 = vst [vmem:[#allocation83_spill] sm:$0xff] %v10356_v23  ;;  %4643 = vmatmul.f32.gmra.mxu2 %v13556_v60 }
 0x599   : > { %v3464_v63 = vpop.f32.mrf.mxu2 }
 0x59a   : > { %v3465_v24 = vadd.f32 %v7790_v57, %v3464_v63  ;;  %4928 = vmatmul.f32.gmra.mxu3 %v13558_v3  ;;  %v10372_v63 = vpop.f32.mrf.mxu1 }
 0x59b   : > { %13563 = vst [vmem:[#allocation85_spill] sm:$0xff] %v10372_v63 }
 0x59c   : > { %v10362_v39 = vadd.f32 %v3777_v49, %v3465_v24 }
 0x59d   : > { %v4865_v2 = vpop.f32.mrf.mxu3 }
 0x59e   : > { %13559 = vst [vmem:[#allocation79_spill] sm:$0xff] %v10362_v39  ;;  %4647 = vmatmul.f32.gmra.mxu2 %v13558_v3 }
 0x5a1   : > { %v4584_v48 = vpop.f32.mrf.mxu2 }
 0x5a2   : > { %v4585_v16 = vadd.f32 %v4584_v48, %v9718_v47  ;;  %4932 = vmatmul.f32.gmra.mxu3 %v13561_v56 }
 0x5a4   : > { %v4866_v23 = vadd.f32 %v4865_v2, %v4585_v16 }
 0x5a5   : > { %v4869_v60 = vpop.f32.mrf.mxu3 }
 0x5a6   : > { %v5120_v57 = vmax.f32 %v4866_v23, 0.0  ;;  %4651 = vmatmul.f32.gmra.mxu2 %v13561_v56 }
 0x5a8   : > { %v5197_v24 = vsel %vm2737_vm2, %v5120_v57, 0  ;;  %v10388_v57 = vpop.f32.mrf.mxu0 }
 0x5a9   : > { %v10375_v49 = vand.u32 4294901760, %v5197_v24  ;;  %v4588_v39 = vpop.f32.mrf.mxu2  ;;  %13566 = vst [vmem:[#allocation96_spill] sm:$0xff] %v10388_v57 }
 0x5aa   : > { %v4589_v3 = vadd.f32 %v4588_v39, %v9727_v34  ;;  %4936 = vmatmul.f32.gmra.mxu3 %v13565_v58 }
 0x5ab   : > { %13564 = vst [vmem:[#allocation108_spill] sm:$0xff] %v10375_v49  ;;  %v10380_v47 = vsub.f32 %v5197_v24, %v10375_v49  ;;  %5982 = vmatmul.f32.vlgmr.msrb.gmra.mxu1 %v10375_v49  ;;  %v10393_v49 = vpop.f32.mrf.mxu1 }
 0x5ac   : > { %v4870_v2 = vadd.f32 %v4869_v60, %v4589_v3  ;;  %13568 = vst [vmem:[#allocation115_spill] sm:$0xff] %v10393_v49  ;;  %v13569_v3 = vld [vmem:[#allocation104_spill] sm:$0xff] }
 0x5ad   : > { %v12782_v23 = vand.u32 4294901760, %v10380_v47  ;;  %v4873_v48 = vpop.f32.mrf.mxu3 }
 0x5ae   : > { %v5121_v16 = vmax.f32 %v4870_v2, 0.0  ;;  %4655 = vmatmul.f32.gmra.mxu2 %v13565_v58 }
 0x5af   : > { %v5415_v56 = vsub.f32 %v10380_v47, %v12782_v23 }
 0x5b0   : > { %v5200_v34 = vsel %vm2737_vm2, %v5121_v16, 0 }
 0x5b1   : > { %v10391_v39 = vand.u32 4294901760, %v5200_v34  ;;  %v4592_v24 = vpop.f32.mrf.mxu2  ;;  %v5416_v63 = vand.u32 4294901760, %v5415_v56 }
 0x5b2   : > { %v4593_v60 = vadd.f32 %v4592_v24, %v9736_v43  ;;  %4940 = vmatmul.f32.gmra.mxu3 %v13569_v3 }
 0x5b3   : > { %13567 = vst [vmem:[#allocation92_spill] sm:$0xff] %v10391_v39  ;;  %v10398_v58 = vsub.f32 %v5200_v34, %v10391_v39  ;;  %5417 = vmatmul.f32.vlgmr.msrb.gmra.mxu0 %v5416_v63  ;;  %5986 = vmatmul.f32.gmra.mxu1 %v10391_v39  ;;  %v10409_v63 = vpop.f32.mrf.mxu0 }
 0x5b4   : > { %v4874_v2 = vadd.f32 %v4873_v48, %v4593_v60  ;;  %13571 = vst [vmem:[#allocation99_spill] sm:$0xff] %v10409_v63  ;;  %v13572_v60 = vld [vmem:[#allocation101_spill] sm:$0xff] }
 0x5b5   : > { %v4877_v23 = vpop.f32.mrf.mxu3  ;;  %v12783_v16 = vand.u32 4294901760, %v10398_v58 }
 0x5b6   : > { %v5122_v57 = vmax.f32 %v4874_v2, 0.0  ;;  %4659 = vmatmul.f32.gmra.mxu2 %v13569_v3  ;;  %v10417_v3 = vpop.f32.mrf.mxu1 }
 0x5b7   : > { %v5423_v56 = vsub.f32 %v10398_v58, %v12783_v16  ;;  %13573 = vst [vmem:[#allocation119_spill] sm:$0xff] %v10417_v3  ;;  %v13576_v3 = vld [vmem:[#allocation98_spill] sm:$0xff] }
 0x5b8   : > { %v5203_v43 = vsel %vm2737_vm2, %v5122_v57, 0 }
 0x5b9   : > { %v10407_v24 = vand.u32 4294901760, %v5203_v43  ;;  %v4596_v34 = vpop.f32.mrf.mxu2  ;;  %v5424_v49 = vand.u32 4294901760, %v5423_v56 }
 0x5ba   : > { %v4597_v48 = vadd.f32 %v4596_v34, %v9745_v6  ;;  %4944 = vmatmul.f32.gmra.mxu3 %v13572_v60 }
 0x5bb   : > { %13570 = vst [vmem:[#allocation102_spill] sm:$0xff] %v10407_v24  ;;  %v10414_v2 = vsub.f32 %v5203_v43, %v10407_v24  ;;  %5425 = vmatmul.f32.gmra.mxu0 %v5424_v49  ;;  %5990 = vmatmul.f32.gmra.mxu1 %v10407_v24  ;;  %v13575_v24 = vld [vmem:[#allocation109_spill] sm:$0xff] }
 0x5bc   : > { %v4878_v16 = vadd.f32 %v4877_v23, %v4597_v48 }
 0x5bd   : > { %v4881_v57 = vpop.f32.mrf.mxu3  ;;  %v12788_v39 = vand.u32 4294901760, %v10414_v2 }
 0x5be   : > { %v5123_v10 = vmax.f32 %v4878_v16, 0.0  ;;  %4663 = vmatmul.f32.gmra.mxu2 %v13572_v60  ;;  %v10433_v16 = vpop.f32.mrf.mxu0 }
 0x5bf   : > { %v5431_v6 = vsub.f32 %v10414_v2, %v12788_v39  ;;  %13578 = vst [vmem:[#allocation127_spill] sm:$0xff] %v10433_v16  ;;  %v10436_v39 = vpop.f32.mrf.mxu1 }
 0x5c0   : > { %v5206_v56 = vsel %vm2737_vm2, %v5123_v10, 0  ;;  %13579 = vst [vmem:[#allocation116_spill] sm:$0xff] %v10436_v39 }
 0x5c1   : > { %v10425_v43 = vand.u32 4294901760, %v5206_v56  ;;  %v4600_v49 = vpop.f32.mrf.mxu2  ;;  %v5432_v34 = vand.u32 4294901760, %v5431_v6 }
 0x5c2   : > { %v4601_v63 = vadd.f32 %v4600_v49, %v13575_v24  ;;  %4948 = vmatmul.f32.gmra.mxu3 %v13576_v3 }
 0x5c3   : > { %13574 = vst [vmem:[#allocation110_spill] sm:$0xff] %v10425_v43  ;;  %v10430_v23 = vsub.f32 %v5206_v56, %v10425_v43  ;;  %5433 = vmatmul.f32.gmra.mxu0 %v5432_v34  ;;  %5994 = vmatmul.f32.gmra.mxu1 %v10425_v43  ;;  %v13581_v43 = vld [vmem:[#allocation117_spill] sm:$0xff] }
 0x5c4   : > { %v4882_v48 = vadd.f32 %v4881_v57, %v4601_v63  ;;  %v13582_v57 = vld [vmem:[#allocation114_spill] sm:$0xff] }
 0x5c5   : > { %13577 = vst [vmem:[#allocation106_spill] sm:$0xff] %v10430_v23  ;;  %v4885_v60 = vpop.f32.mrf.mxu3  ;;  %v12791_v10 = vand.u32 4294901760, %v10430_v23 }
 0x5c6   : > { %v5124_v32 = vmax.f32 %v4882_v48, 0.0  ;;  %4667 = vmatmul.f32.gmra.mxu2 %v13576_v3  ;;  %v10452_v39 = vpop.f32.mrf.mxu0 }
 0x5c7   : > { %v5439_v24 = vsub.f32 %v10430_v23, %v12791_v10  ;;  %13583 = vst [vmem:[#allocation45_spill] sm:$0xff] %v10452_v39  ;;  %v13587_v23 = vld [vmem:[#allocation111_spill] sm:$0xff] }
 0x5c8   : > { %v5209_v6 = vsel %vm2737_vm2, %v5124_v32, 0 }
 0x5c9   : > { %v10443_v56 = vand.u32 4294901760, %v5209_v6  ;;  %v4604_v49 = vpop.f32.mrf.mxu2  ;;  %v5440_v34 = vand.u32 4294901760, %v5439_v24  ;;  %v10458_v24 = vpop.f32.mrf.mxu1 }
 0x5ca   : > { %v4605_v63 = vadd.f32 %v4604_v49, %v13581_v43  ;;  %4952 = vmatmul.f32.gmra.mxu3 %v13582_v57  ;;  %13584 = vst [vmem:[#allocation129_spill] sm:$0xff] %v10458_v24 }
 0x5cb   : > { %13580 = vst [vmem:[#allocation113_spill] sm:$0xff] %v10443_v56  ;;  %v10448_v16 = vsub.f32 %v5209_v6, %v10443_v56  ;;  %5441 = vmatmul.f32.gmra.mxu0 %v5440_v34  ;;  %5998 = vmatmul.f32.gmra.mxu1 %v10443_v56 }
 0x5cc   : > { %v4886_v3 = vadd.f32 %v4885_v60, %v4605_v63  ;;  %v13586_v63 = vld [vmem:[#allocation112_spill] sm:$0xff] }
 0x5cd   : > { %v4889_v48 = vpop.f32.mrf.mxu3  ;;  %v12796_v10 = vand.u32 4294901760, %v10448_v16 }
 0x5ce   : > { %v5125_v32 = vmax.f32 %v4886_v3, 0.0  ;;  %4671 = vmatmul.f32.gmra.mxu2 %v13582_v57 }
 0x5cf   : > { %v5447_v43 = vsub.f32 %v10448_v16, %v12796_v10 }
 0x5d0   : > { %v5212_v6 = vsel %vm2737_vm2, %v5125_v32, 0 }
 0x5d1   : > { %v10461_v49 = vand.u32 4294901760, %v5212_v6  ;;  %v4608_v34 = vpop.f32.mrf.mxu2  ;;  %v5448_v60 = vand.u32 4294901760, %v5447_v43  ;;  %v10474_v43 = vpop.f32.mrf.mxu0 }
 0x5d2   : > { %v4609_v56 = vadd.f32 %v4608_v34, %v13586_v63  ;;  %4956 = vmatmul.f32.gmra.mxu3 %v13587_v23  ;;  %13588 = vst [vmem:[#allocation118_spill] sm:$0xff] %v10474_v43 }
 0x5d3   : > { %13585 = vst [vmem:[#allocation121_spill] sm:$0xff] %v10461_v49  ;;  %v10466_v3 = vsub.f32 %v5212_v6, %v10461_v49  ;;  %5449 = vmatmul.f32.gmra.mxu0 %v5448_v60  ;;  %6002 = vmatmul.f32.gmra.mxu1 %v10461_v49  ;;  %v10479_v49 = vpop.f32.mrf.mxu1 }
 0x5d4   : > { %v4890_v57 = vadd.f32 %v4889_v48, %v4609_v56  ;;  %13590 = vst [vmem:[#allocation130_spill] sm:$0xff] %v10479_v49  ;;  %v13591_v48 = vld [vmem:[#allocation105_spill] sm:$0xff] }
 0x5d5   : > { %v4893_v10 = vpop.f32.mrf.mxu3  ;;  %v12799_v24 = vand.u32 4294901760, %v10466_v3 }
 0x5d6   : > { %v5126_v39 = vmax.f32 %v4890_v57, 0.0  ;;  %4675 = vmatmul.f32.gmra.mxu2 %v13587_v23 }
 0x5d7   : > { %v5455_v32 = vsub.f32 %v10466_v3, %v12799_v24 }
 0x5d8   : > { %v5215_v34 = vsel %vm2737_vm2, %v5126_v39, 0 }
 0x5d9   : > { %v10477_v6 = vand.u32 4294901760, %v5215_v34  ;;  %v4612_v60 = vpop.f32.mrf.mxu2  ;;  %v5456_v63 = vand.u32 4294901760, %v5455_v32 }
 0x5da   : > { %v4613_v56 = vadd.f32 %v4612_v60, %v9796_v41  ;;  %4960 = vmatmul.f32.gmra.mxu3 %v13591_v48 }
 0x5db   : > { %13589 = vst [vmem:[#allocation42_spill] sm:$0xff] %v10477_v6  ;;  %v10484_v23 = vsub.f32 %v5215_v34, %v10477_v6  ;;  %5457 = vmatmul.f32.gmra.mxu0 %v5456_v63  ;;  %6006 = vmatmul.f32.gmra.mxu1 %v10477_v6  ;;  %v10495_v63 = vpop.f32.mrf.mxu0 }
 0x5dc   : > { %v4894_v57 = vadd.f32 %v4893_v10, %v4613_v56  ;;  %13593 = vst [vmem:[#allocation125_spill] sm:$0xff] %v10495_v63 }
 0x5dd   : > { %v4897_v24 = vpop.f32.mrf.mxu3  ;;  %v12800_v39 = vand.u32 4294901760, %v10484_v23 }
 0x5de   : > { %v5127_v43 = vmax.f32 %v4894_v57, 0.0  ;;  %4679 = vmatmul.f32.gmra.mxu2 %v13591_v48  ;;  %v10503_v48 = vpop.f32.mrf.mxu1 }
 0x5df   : > { %v5463_v32 = vsub.f32 %v10484_v23, %v12800_v39  ;;  %13594 = vst [vmem:[#allocation40_spill] sm:$0xff] %v10503_v48  ;;  %v13596_v48 = vld [vmem:[#allocation126_spill] sm:$0xff] }
 0x5e0   : > { %v5218_v41 = vsel %vm2737_vm2, %v5127_v43, 0 }
 0x5e1   : > { %v10493_v60 = vand.u32 4294901760, %v5218_v41  ;;  %v4616_v34 = vpop.f32.mrf.mxu2  ;;  %v5464_v49 = vand.u32 4294901760, %v5463_v32 }
 0x5e2   : > { %v4617_v10 = vadd.f32 %v4616_v34, %v9805_v27  ;;  %4964 = vmatmul.f32.gmra.mxu3 %v9768_v37 }
 0x5e3   : > { %13592 = vst [vmem:[#allocation128_spill] sm:$0xff] %v10493_v60  ;;  %v10500_v56 = vsub.f32 %v5218_v41, %v10493_v60  ;;  %5465 = vmatmul.f32.gmra.mxu0 %v5464_v49  ;;  %6010 = vmatmul.f32.gmra.mxu1 %v10493_v60 }
 0x5e4   : > { %v4898_v57 = vadd.f32 %v4897_v24, %v4617_v10 }
 0x5e5   : > { %v4901_v43 = vpop.f32.mrf.mxu3  ;;  %v12805_v39 = vand.u32 4294901760, %v10500_v56 }
 0x5e6   : > { %v5128_v6 = vmax.f32 %v4898_v57, 0.0  ;;  %4683 = vmatmul.f32.gmra.mxu2 %v9768_v37  ;;  %v10519_v37 = vpop.f32.mrf.mxu0 }
 0x5e7   : > { %v5471_v27 = vsub.f32 %v10500_v56, %v12805_v39  ;;  %13597 = vst [vmem:[#allocation38_spill] sm:$0xff] %v10519_v37  ;;  %v10522_v39 = vpop.f32.mrf.mxu1  ;;  %v13610_v37 = vld [vmem:[#allocation3_spill] sm:$0xff] }
 0x5e8   : > { %v5221_v32 = vsel %vm2737_vm2, %v5128_v6, 0  ;;  %13598 = vst [vmem:[#allocation132_spill] sm:$0xff] %v10522_v39 }
 0x5e9   : > { %v10511_v41 = vand.u32 4294901760, %v5221_v32  ;;  %v4620_v49 = vpop.f32.mrf.mxu2  ;;  %v5472_v34 = vand.u32 4294901760, %v5471_v27 }
 0x5ea   : > { %v4621_v60 = vadd.f32 %v4620_v49, %v9814_v42  ;;  %4968 = vmatmul.f32.gmra.mxu3 %v13596_v48 }
 0x5eb   : > { %13595 = vst [vmem:[#allocation131_spill] sm:$0xff] %v10511_v41  ;;  %v10516_v24 = vsub.f32 %v5221_v32, %v10511_v41  ;;  %5473 = vmatmul.f32.gmra.mxu0 %v5472_v34  ;;  %6014 = vmatmul.f32.gmra.mxu1 %v10511_v41 }
 0x5ec   : > { %v4902_v10 = vadd.f32 %v4901_v43, %v4621_v60  ;;  %v13600_v43 = vld [vmem:[#allocation122_spill] sm:$0xff] }
 0x5ed   : > { %v4905_v57 = vpop.f32.mrf.mxu3  ;;  %v12808_v6 = vand.u32 4294901760, %v10516_v24 }
 0x5ee   : > { %v5129_v63 = vmax.f32 %v4902_v10, 0.0  ;;  %4687 = vmatmul.f32.gmra.mxu2 %v13596_v48  ;;  %v10538_v39 = vpop.f32.mrf.mxu0 }
 0x5ef   : > { %v5479_v42 = vsub.f32 %v10516_v24, %v12808_v6  ;;  %13601 = vst [vmem:[#allocation133_spill] sm:$0xff] %v10538_v39 }
 0x5f0   : > { %v5224_v27 = vsel %vm2737_vm2, %v5129_v63, 0 }
 0x5f1   : > { %v10529_v32 = vand.u32 4294901760, %v5224_v27  ;;  %v4624_v49 = vpop.f32.mrf.mxu2  ;;  %v5480_v34 = vand.u32 4294901760, %v5479_v42  ;;  %v10544_v42 = vpop.f32.mrf.mxu1 }
 0x5f2   : > { %v4625_v60 = vadd.f32 %v4624_v49, %v9823_v13  ;;  %4972 = vmatmul.f32.gmra.mxu3 %v13600_v43  ;;  %13602 = vst [vmem:[#allocation134_spill] sm:$0xff] %v10544_v42 }
 0x5f3   : > { %13599 = vst [vmem:[#allocation46_spill] sm:$0xff] %v10529_v32  ;;  %v10534_v41 = vsub.f32 %v5224_v27, %v10529_v32  ;;  %5481 = vmatmul.f32.gmra.mxu0 %v5480_v34  ;;  %6018 = vmatmul.f32.gmra.mxu1 %v10529_v32  ;;  %v13604_v32 = vld [vmem:[#allocation120_spill] sm:$0xff] }
 0x5f4   : > { %v4906_v48 = vadd.f32 %v4905_v57, %v4625_v60 }
 0x5f5   : > { %v4909_v10 = vpop.f32.mrf.mxu3  ;;  %v12811_v6 = vand.u32 4294901760, %v10534_v41 }
 0x5f6   : > { %v5130_v63 = vmax.f32 %v4906_v48, 0.0  ;;  %4691 = vmatmul.f32.gmra.mxu2 %v13600_v43 }
 0x5f7   : > { %v5487_v13 = vsub.f32 %v10534_v41, %v12811_v6 }
 0x5f8   : > { %v5227_v27 = vsel %vm2737_vm2, %v5130_v63, 0 }
 0x5f9   : > { %v10547_v49 = vand.u32 4294901760, %v5227_v27  ;;  %v4628_v34 = vpop.f32.mrf.mxu2  ;;  %v5488_v57 = vand.u32 4294901760, %v5487_v13 }
 0x5fa   : > { %v4629_v60 = vadd.f32 %v4628_v34, %v9832_v14  ;;  %4976 = vmatmul.f32.gmra.mxu3 %v13604_v32  ;;  %v10560_v14 = vpop.f32.mrf.mxu0 }
 0x5fb   : > { %13603 = vst [vmem:[#allocation135_spill] sm:$0xff] %v10547_v49  ;;  %v10552_v48 = vsub.f32 %v5227_v27, %v10547_v49  ;;  %5489 = vmatmul.f32.gmra.mxu0 %v5488_v57  ;;  %6022 = vmatmul.f32.gmra.mxu1 %v10547_v49  ;;  %v10565_v49 = vpop.f32.mrf.mxu1 }
 0x5fc   : > { %v4910_v43 = vadd.f32 %v4909_v10, %v4629_v60  ;;  %13606 = vst [vmem:[#allocation138_spill] sm:$0xff] %v10560_v14  ;;  %v13609_v10 = vld [vmem:[#allocation4_spill] sm:$0xff] }
 0x5fd   : > { %13605 = vst [vmem:[#allocation43_spill] sm:$0xff] %v10552_v48  ;;  %v4913_v6 = vpop.f32.mrf.mxu3  ;;  %v12814_v42 = vand.u32 4294901760, %v10552_v48 }
 0x5fe   : > { %v5131_v39 = vmax.f32 %v4910_v43, 0.0  ;;  %4695 = vmatmul.f32.gmra.mxu2 %v13604_v32  ;;  %13608 = vst [vmem:[#allocation139_spill] sm:$0xff] %v10565_v49 }
 0x5ff   : > { %v5495_v63 = vsub.f32 %v10552_v48, %v12814_v42 }
 0x600   : > { %v5230_v13 = vsel %vm2737_vm2, %v5131_v39, 0 }
 0x601   : > { %v10563_v27 = vand.u32 4294901760, %v5230_v13  ;;  %v4632_v34 = vpop.f32.mrf.mxu2  ;;  %v5496_v57 = vand.u32 4294901760, %v5495_v63 }
 0x602   : > { %v4633_v60 = vadd.f32 %v4632_v34, %v13609_v10  ;;  %4980 = vmatmul.f32.gmra.mxu3 %v13610_v37 }
 0x603   : > { %13607 = vst [vmem:[#allocation59_spill] sm:$0xff] %v10563_v27  ;;  %v10570_v32 = vsub.f32 %v5230_v13, %v10563_v27  ;;  %5497 = vmatmul.f32.gmra.mxu0 %v5496_v57  ;;  %6026 = vmatmul.f32.gmra.mxu1 %v10563_v27  ;;  %v10581_v57 = vpop.f32.mrf.mxu0  ;;  %v13614_v27 = vld [vmem:[#allocation6_spill] sm:$0xff] }
 0x604   : > { %v4914_v43 = vadd.f32 %v4913_v6, %v4633_v60  ;;  %13613 = vst [vmem:[#allocation141_spill] sm:$0xff] %v10581_v57  ;;  %v13615_v60 = vld [vmem:[#allocation2_spill] sm:$0xff] }
 0x605   : > { %13611 = vst [vmem:[#allocation56_spill] sm:$0xff] %v10570_v32  ;;  %v4917_v42 = vpop.f32.mrf.mxu3  ;;  %v12817_v39 = vand.u32 4294901760, %v10570_v32 }
 0x606   : > { %v5132_v14 = vmax.f32 %v4914_v43, 0.0  ;;  %4699 = vmatmul.f32.gmra.mxu2 %v13610_v37  ;;  %v10589_v37 = vpop.f32.mrf.mxu1 }
 0x607   : > { %v5503_v63 = vsub.f32 %v10570_v32, %v12817_v39  ;;  %13617 = vst [vmem:[#allocation143_spill] sm:$0xff] %v10589_v37  ;;  %v13620_v37 = vld [vmem:[#allocation5_spill] sm:$0xff] }
 0x608   : > { %v5233_v34 = vsel %vm2737_vm2, %v5132_v14, 0 }
 0x609   : > { %v10579_v10 = vand.u32 4294901760, %v5233_v34  ;;  %v4636_v13 = vpop.f32.mrf.mxu2  ;;  %v5504_v49 = vand.u32 4294901760, %v5503_v63 }
 0x60a   : > { %v4637_v6 = vadd.f32 %v4636_v13, %v13614_v27  ;;  %4984 = vmatmul.f32.gmra.mxu3 %v13615_v60 }
 0x60b   : > { %13612 = vst [vmem:[#allocation140_spill] sm:$0xff] %v10579_v10  ;;  %v10586_v43 = vsub.f32 %v5233_v34, %v10579_v10  ;;  %5505 = vmatmul.f32.gmra.mxu0 %v5504_v49  ;;  %6030 = vmatmul.f32.gmra.mxu1 %v10579_v10  ;;  %v13619_v10 = vld [vmem:[#allocation9_spill] sm:$0xff] }
 0x60c   : > { %v4918_v39 = vadd.f32 %v4917_v42, %v4637_v6 }
 0x60d   : > { %13616 = vst [vmem:[#allocation142_spill] sm:$0xff] %v10586_v43  ;;  %v4921_v14 = vpop.f32.mrf.mxu3  ;;  %v12824_v32 = vand.u32 4294901760, %v10586_v43 }
 0x60e   : > { %v5133_v48 = vmax.f32 %v4918_v39, 0.0  ;;  %4703 = vmatmul.f32.gmra.mxu2 %v13615_v60  ;;  %v10605_v39 = vpop.f32.mrf.mxu0 }
 0x60f   : > { %v5511_v27 = vsub.f32 %v10586_v43, %v12824_v32  ;;  %v10608_v32 = vpop.f32.mrf.mxu1 }
 0x610   : > { %v5236_v63 = vsel %vm2737_vm2, %v5133_v48, 0  ;;  %13621 = vst [vmem:[#allocation145_spill] sm:$0xff] %v10608_v32 }
 0x611   : > { %v10597_v34 = vand.u32 4294901760, %v5236_v63  ;;  %v4640_v49 = vpop.f32.mrf.mxu2  ;;  %v5512_v13 = vand.u32 4294901760, %v5511_v27 }
 0x612   : > { %v4641_v57 = vadd.f32 %v4640_v49, %v13619_v10  ;;  %4988 = vmatmul.f32.gmra.mxu3 %v13620_v37 }
 0x613   : > { %13618 = vst [vmem:[#allocation144_spill] sm:$0xff] %v10597_v34  ;;  %v10602_v42 = vsub.f32 %v5236_v63, %v10597_v34  ;;  %5513 = vmatmul.f32.gmra.mxu0 %v5512_v13  ;;  %6034 = vmatmul.f32.gmra.mxu1 %v10597_v34 }
 0x614   : > { %v4922_v6 = vadd.f32 %v4921_v14, %v4641_v57  ;;  %v13623_v14 = vld [vmem:[#allocation7_spill] sm:$0xff] }
 0x615   : > { %v4925_v60 = vpop.f32.mrf.mxu3  ;;  %v12829_v48 = vand.u32 4294901760, %v10602_v42 }
 0x616   : > { %v5134_v43 = vmax.f32 %v4922_v6, 0.0  ;;  %4707 = vmatmul.f32.gmra.mxu2 %v13620_v37  ;;  %v10624_v32 = vpop.f32.mrf.mxu0 }
 0x617   : > { %v5519_v10 = vsub.f32 %v10602_v42, %v12829_v48 }
 0x618   : > { %v5239_v27 = vsel %vm2737_vm2, %v5134_v43, 0 }
 0x619   : > { %v10615_v63 = vand.u32 4294901760, %v5239_v27  ;;  %v4644_v49 = vpop.f32.mrf.mxu2  ;;  %v5520_v13 = vand.u32 4294901760, %v5519_v10  ;;  %v10630_v10 = vpop.f32.mrf.mxu1 }
 0x61a   : > { %v4645_v57 = vadd.f32 %v4644_v49, %v9883_v28  ;;  %4992 = vmatmul.f32.gmra.mxu3 %v13623_v14  ;;  %13624 = vst [vmem:[#allocation149_spill] sm:$0xff] %v10630_v10 }
 0x61b   : > { %13622 = vst [vmem:[#allocation148_spill] sm:$0xff] %v10615_v63  ;;  %v10620_v34 = vsub.f32 %v5239_v27, %v10615_v63  ;;  %5521 = vmatmul.f32.gmra.mxu0 %v5520_v13  ;;  %6038 = vmatmul.f32.gmra.mxu1 %v10615_v63 }
 0x61c   : > { %v4926_v37 = vadd.f32 %v4925_v60, %v4645_v57 }
 0x61d   : > { %v4929_v6 = vpop.f32.mrf.mxu3  ;;  %v12830_v48 = vand.u32 4294901760, %v10620_v34 }
 0x61e   : > { %v5135_v43 = vmax.f32 %v4926_v37, 0.0  ;;  %4711 = vmatmul.f32.gmra.mxu2 %v13623_v14 }
 0x61f   : > { %v5527_v28 = vsub.f32 %v10620_v34, %v12830_v48 }
 0x620   : > { %v5242_v27 = vsel %vm2737_vm2, %v5135_v43, 0 }
 0x621   : > { %v10633_v49 = vand.u32 4294901760, %v5242_v27  ;;  %v4648_v13 = vpop.f32.mrf.mxu2  ;;  %v5528_v60 = vand.u32 4294901760, %v5527_v28 }
 0x622   : > { %v4649_v57 = vadd.f32 %v4648_v13, %v9892_v19  ;;  %4996 = vmatmul.f32.gmra.mxu3 %v9855_v17  ;;  %v10646_v19 = vpop.f32.mrf.mxu0 }
 0x623   : > { %13625 = vst [vmem:[#allocation152_spill] sm:$0xff] %v10633_v49  ;;  %v10638_v37 = vsub.f32 %v5242_v27, %v10633_v49  ;;  %5529 = vmatmul.f32.gmra.mxu0 %v5528_v60  ;;  %6042 = vmatmul.f32.gmra.mxu1 %v10633_v49  ;;  %v13629_v49 = vld [vmem:[#allocation8_spill] sm:$0xff] }
 0x624   : > { %v4930_v14 = vadd.f32 %v4929_v6, %v4649_v57  ;;  %13626 = vst [vmem:[#allocation153_spill] sm:$0xff] %v10646_v19 }
 0x625   : > { %v4933_v48 = vpop.f32.mrf.mxu3  ;;  %v12835_v63 = vand.u32 4294901760, %v10638_v37 }
 0x626   : > { %v5136_v10 = vmax.f32 %v4930_v14, 0.0  ;;  %4715 = vmatmul.f32.gmra.mxu2 %v9855_v17 }
 0x627   : > { %v5535_v43 = vsub.f32 %v10638_v37, %v12835_v63 }
 0x628   : > { %v5245_v28 = vsel %vm2737_vm2, %v5136_v10, 0  ;;  %v10649_v27 = vpop.f32.mrf.mxu1 }
 0x629   : > { %13627 = vst [vmem:[#allocation66_spill] sm:$0xff] %v10649_v27  ;;  %v10651_v13 = vand.u32 4294901760, %v5245_v28  ;;  %v4652_v60 = vpop.f32.mrf.mxu2  ;;  %v5536_v6 = vand.u32 4294901760, %v5535_v43  ;;  %v13633_v27 = vld [vmem:[#allocation11_spill] sm:$0xff] }
 0x62a   : > { %v4653_v57 = vadd.f32 %v4652_v60, %v9901_v54  ;;  %5000 = vmatmul.f32.gmra.mxu3 %v13629_v49 }
 0x62b   : > { %13628 = vst [vmem:[#allocation60_spill] sm:$0xff] %v10651_v13  ;;  %v10656_v17 = vsub.f32 %v5245_v28, %v10651_v13  ;;  %5537 = vmatmul.f32.gmra.mxu0 %v5536_v6  ;;  %6046 = vmatmul.f32.gmra.mxu1 %v10651_v13 }
 0x62c   : > { %v4934_v14 = vadd.f32 %v4933_v48, %v4653_v57 }
 0x62d   : > { %v4937_v63 = vpop.f32.mrf.mxu3  ;;  %v12838_v10 = vand.u32 4294901760, %v10656_v17 }
 0x62e   : > { %v5137_v19 = vmax.f32 %v4934_v14, 0.0  ;;  %4719 = vmatmul.f32.gmra.mxu2 %v13629_v49 }
 0x62f   : > { %v5543_v43 = vsub.f32 %v10656_v17, %v12838_v10 }
 0x630   : > { %v5248_v54 = vsel %vm2737_vm2, %v5137_v19, 0  ;;  %v10665_v60 = vpop.f32.mrf.mxu0  ;;  %v10667_v28 = vpop.f32.mrf.mxu1 }
 0x631   : > { %13630 = vst [vmem:[#allocation67_spill] sm:$0xff] %v10665_v60  ;;  %v10669_v6 = vand.u32 4294901760, %v5248_v54  ;;  %v4656_v13 = vpop.f32.mrf.mxu2  ;;  %v5544_v48 = vand.u32 4294901760, %v5543_v43 }
 0x632   : > { %13631 = vst [vmem:[#allocation80_spill] sm:$0xff] %v10667_v28  ;;  %v4657_v57 = vadd.f32 %v4656_v13, %v9910_v46  ;;  %5004 = vmatmul.f32.gmra.mxu3 %v13633_v27  ;;  %v13638_v28 = vld [vmem:[#allocation10_spill] sm:$0xff] }
 0x633   : > { %13632 = vst [vmem:[#allocation74_spill] sm:$0xff] %v10669_v6  ;;  %v10674_v49 = vsub.f32 %v5248_v54, %v10669_v6  ;;  %5545 = vmatmul.f32.gmra.mxu0 %v5544_v48  ;;  %6050 = vmatmul.f32.gmra.mxu1 %v10669_v6 }
 0x634   : > { %v4938_v14 = vadd.f32 %v4937_v63, %v4657_v57 }
 0x635   : > { %13634 = vst [vmem:[#allocation91_spill] sm:$0xff] %v10674_v49  ;;  %v4941_v19 = vpop.f32.mrf.mxu3  ;;  %v12841_v10 = vand.u32 4294901760, %v10674_v49 }
 0x636   : > { %v5138_v60 = vmax.f32 %v4938_v14, 0.0  ;;  %4723 = vmatmul.f32.gmra.mxu2 %v13633_v27 }
 0x637   : > { %v5551_v43 = vsub.f32 %v10674_v49, %v12841_v10  ;;  %v13644_v49 = vld [vmem:[#allocation13_spill] sm:$0xff] }
 0x638   : > { %v5251_v46 = vsel %vm2737_vm2, %v5138_v60, 0  ;;  %v10683_v13 = vpop.f32.mrf.mxu0  ;;  %v10685_v54 = vpop.f32.mrf.mxu1 }
 0x639   : > { %13635 = vst [vmem:[#allocation53_spill] sm:$0xff] %v10683_v13  ;;  %v10687_v48 = vand.u32 4294901760, %v5251_v46  ;;  %v4660_v6 = vpop.f32.mrf.mxu2  ;;  %v5552_v63 = vand.u32 4294901760, %v5551_v43 }
 0x63a   : > { %13636 = vst [vmem:[#allocation50_spill] sm:$0xff] %v10685_v54  ;;  %v4661_v57 = vadd.f32 %v4660_v6, %v9919_v45  ;;  %5008 = vmatmul.f32.gmra.mxu3 %v13638_v28 }
 0x63b   : > { %13637 = vst [vmem:[#allocation63_spill] sm:$0xff] %v10687_v48  ;;  %v10692_v27 = vsub.f32 %v5251_v46, %v10687_v48  ;;  %5553 = vmatmul.f32.gmra.mxu0 %v5552_v63  ;;  %6054 = vmatmul.f32.gmra.mxu1 %v10687_v48 }
 0x63c   : > { %v4942_v14 = vadd.f32 %v4941_v19, %v4661_v57  ;;  %v13643_v57 = vld [vmem:[#allocation14_spill] sm:$0xff] }
 0x63d   : > { %13639 = vst [vmem:[#allocation57_spill] sm:$0xff] %v10692_v27  ;;  %v4945_v60 = vpop.f32.mrf.mxu3  ;;  %v12846_v10 = vand.u32 4294901760, %v10692_v27 }
 0x63e   : > { %v5139_v13 = vmax.f32 %v4942_v14, 0.0  ;;  %4727 = vmatmul.f32.gmra.mxu2 %v13638_v28 }
 0x63f   : > { %v5559_v43 = vsub.f32 %v10692_v27, %v12846_v10  ;;  %v13650_v27 = vld [vmem:[#allocation12_spill] sm:$0xff] }
 0x640   : > { %v5254_v45 = vsel %vm2737_vm2, %v5139_v13, 0  ;;  %v10701_v6 = vpop.f32.mrf.mxu0  ;;  %v10703_v46 = vpop.f32.mrf.mxu1 }
 0x641   : > { %13640 = vst [vmem:[#allocation73_spill] sm:$0xff] %v10701_v6  ;;  %v10705_v63 = vand.u32 4294901760, %v5254_v45  ;;  %v4664_v48 = vpop.f32.mrf.mxu2  ;;  %v5560_v19 = vand.u32 4294901760, %v5559_v43 }
 0x642   : > { %13641 = vst [vmem:[#allocation70_spill] sm:$0xff] %v10703_v46  ;;  %v4665_v54 = vadd.f32 %v4664_v48, %v13643_v57  ;;  %5012 = vmatmul.f32.gmra.mxu3 %v13644_v49 }
 0x643   : > { %13642 = vst [vmem:[#allocation64_spill] sm:$0xff] %v10705_v63  ;;  %v10710_v28 = vsub.f32 %v5254_v45, %v10705_v63  ;;  %5561 = vmatmul.f32.gmra.mxu0 %v5560_v19  ;;  %6058 = vmatmul.f32.gmra.mxu1 %v10705_v63 }
 0x644   : > { %v4946_v14 = vadd.f32 %v4945_v60, %v4665_v54  ;;  %v13649_v60 = vld [vmem:[#allocation16_spill] sm:$0xff] }
 0x645   : > { %13645 = vst [vmem:[#allocation77_spill] sm:$0xff] %v10710_v28  ;;  %v4949_v13 = vpop.f32.mrf.mxu3  ;;  %v12851_v10 = vand.u32 4294901760, %v10710_v28 }
 0x646   : > { %v5140_v6 = vmax.f32 %v4946_v14, 0.0  ;;  %4731 = vmatmul.f32.gmra.mxu2 %v13644_v49 }
 0x647   : > { %v5567_v43 = vsub.f32 %v10710_v28, %v12851_v10  ;;  %v13655_v28 = vld [vmem:[#allocation15_spill] sm:$0xff] }
 0x648   : > { %v5257_v48 = vsel %vm2737_vm2, %v5140_v6, 0  ;;  %v10719_v57 = vpop.f32.mrf.mxu0  ;;  %v10721_v45 = vpop.f32.mrf.mxu1 }
 0x649   : > { %13646 = vst [vmem:[#allocation71_spill] sm:$0xff] %v10719_v57  ;;  %v10723_v19 = vand.u32 4294901760, %v5257_v48  ;;  %v4668_v63 = vpop.f32.mrf.mxu2  ;;  %v5568_v54 = vand.u32 4294901760, %v5567_v43 }
 0x64a   : > { %13647 = vst [vmem:[#allocation94_spill] sm:$0xff] %v10721_v45  ;;  %v4669_v46 = vadd.f32 %v4668_v63, %v13649_v60  ;;  %5016 = vmatmul.f32.gmra.mxu3 %v13650_v27 }
 0x64b   : > { %13648 = vst [vmem:[#allocation86_spill] sm:$0xff] %v10723_v19  ;;  %v10728_v49 = vsub.f32 %v5257_v48, %v10723_v19  ;;  %5569 = vmatmul.f32.gmra.mxu0 %v5568_v54  ;;  %6062 = vmatmul.f32.gmra.mxu1 %v10723_v19 }
 0x64c   : > { %v4950_v14 = vadd.f32 %v4949_v13, %v4669_v46  ;;  %v13654_v13 = vld [vmem:[#allocation18_spill] sm:$0xff] }
 0x64d   : > { %v4953_v6 = vpop.f32.mrf.mxu3  ;;  %v12856_v10 = vand.u32 4294901760, %v10728_v49 }
 0x64e   : > { %v5141_v57 = vmax.f32 %v4950_v14, 0.0  ;;  %4735 = vmatmul.f32.gmra.mxu2 %v13650_v27 }
 0x64f   : > { %v5575_v43 = vsub.f32 %v10728_v49, %v12856_v10 }
 0x650   : > { %v5260_v63 = vsel %vm2737_vm2, %v5141_v57, 0  ;;  %v10737_v60 = vpop.f32.mrf.mxu0  ;;  %v10739_v48 = vpop.f32.mrf.mxu1 }
 0x651   : > { %13651 = vst [vmem:[#allocation84_spill] sm:$0xff] %v10737_v60  ;;  %v10741_v54 = vand.u32 4294901760, %v5260_v63  ;;  %v4672_v19 = vpop.f32.mrf.mxu2  ;;  %v5576_v46 = vand.u32 4294901760, %v5575_v43 }
 0x652   : > { %13652 = vst [vmem:[#allocation81_spill] sm:$0xff] %v10739_v48  ;;  %v4673_v45 = vadd.f32 %v4672_v19, %v13654_v13  ;;  %5020 = vmatmul.f32.gmra.mxu3 %v13655_v28  ;;  %v13659_v48 = vld [vmem:[#allocation17_spill] sm:$0xff] }
 0x653   : > { %13653 = vst [vmem:[#allocation78_spill] sm:$0xff] %v10741_v54  ;;  %v10746_v27 = vsub.f32 %v5260_v63, %v10741_v54  ;;  %5577 = vmatmul.f32.gmra.mxu0 %v5576_v46  ;;  %6066 = vmatmul.f32.gmra.mxu1 %v10741_v54 }
 0x654   : > { %v4954_v14 = vadd.f32 %v4953_v6, %v4673_v45 }
 0x655   : > { %v4957_v57 = vpop.f32.mrf.mxu3  ;;  %v12859_v10 = vand.u32 4294901760, %v10746_v27 }
 0x656   : > { %v5142_v60 = vmax.f32 %v4954_v14, 0.0  ;;  %4739 = vmatmul.f32.gmra.mxu2 %v13655_v28 }
 0x657   : > { %v5583_v43 = vsub.f32 %v10746_v27, %v12859_v10 }
 0x658   : > { %v5263_v19 = vsel %vm2737_vm2, %v5142_v60, 0  ;;  %v10755_v13 = vpop.f32.mrf.mxu0  ;;  %v10757_v63 = vpop.f32.mrf.mxu1 }
 0x659   : > { %13656 = vst [vmem:[#allocation93_spill] sm:$0xff] %v10755_v13  ;;  %v10759_v46 = vand.u32 4294901760, %v5263_v19  ;;  %v4676_v54 = vpop.f32.mrf.mxu2  ;;  %v5584_v45 = vand.u32 4294901760, %v5583_v43 }
 0x65a   : > { %13657 = vst [vmem:[#allocation90_spill] sm:$0xff] %v10757_v63  ;;  %v4677_v6 = vadd.f32 %v4676_v54, %v9970_v38  ;;  %5024 = vmatmul.f32.gmra.mxu3 %v13659_v48  ;;  %v13664_v63 = vld [vmem:[#allocation19_spill] sm:$0xff] }
 0x65b   : > { %13658 = vst [vmem:[#allocation87_spill] sm:$0xff] %v10759_v46  ;;  %v10764_v28 = vsub.f32 %v5263_v19, %v10759_v46  ;;  %5585 = vmatmul.f32.gmra.mxu0 %v5584_v45  ;;  %6070 = vmatmul.f32.gmra.mxu1 %v10759_v46 }
 0x65c   : > { %v4958_v14 = vadd.f32 %v4957_v57, %v4677_v6 }
 0x65d   : > { %13660 = vst [vmem:[#allocation100_spill] sm:$0xff] %v10764_v28  ;;  %v4961_v60 = vpop.f32.mrf.mxu3  ;;  %v12862_v10 = vand.u32 4294901760, %v10764_v28 }
 0x65e   : > { %v5143_v13 = vmax.f32 %v4958_v14, 0.0  ;;  %4743 = vmatmul.f32.gmra.mxu2 %v13659_v48 }
 0x65f   : > { %v5591_v43 = vsub.f32 %v10764_v28, %v12862_v10  ;;  %v13670_v28 = vld [vmem:[#allocation21_spill] sm:$0xff] }
 0x660   : > { %v5266_v38 = vsel %vm2737_vm2, %v5143_v13, 0  ;;  %v10773_v54 = vpop.f32.mrf.mxu0  ;;  %v10775_v19 = vpop.f32.mrf.mxu1 }
 0x661   : > { %13661 = vst [vmem:[#allocation97_spill] sm:$0xff] %v10773_v54  ;;  %v10777_v45 = vand.u32 4294901760, %v5266_v38  ;;  %v4680_v46 = vpop.f32.mrf.mxu2  ;;  %v5592_v57 = vand.u32 4294901760, %v5591_v43 }
 0x662   : > { %13662 = vst [vmem:[#allocation107_spill] sm:$0xff] %v10775_v19  ;;  %v4681_v6 = vadd.f32 %v4680_v46, %v9979_v1  ;;  %5028 = vmatmul.f32.gmra.mxu3 %v13664_v63 }
 0x663   : > { %13663 = vst [vmem:[#allocation104_spill] sm:$0xff] %v10777_v45  ;;  %v10782_v48 = vsub.f32 %v5266_v38, %v10777_v45  ;;  %5593 = vmatmul.f32.gmra.mxu0 %v5592_v57  ;;  %6074 = vmatmul.f32.gmra.mxu1 %v10777_v45 }
 0x664   : > { %v4962_v14 = vadd.f32 %v4961_v60, %v4681_v6  ;;  %v13669_v6 = vld [vmem:[#allocation22_spill] sm:$0xff] }
 0x665   : > { %13665 = vst [vmem:[#allocation101_spill] sm:$0xff] %v10782_v48  ;;  %v4965_v13 = vpop.f32.mrf.mxu3  ;;  %v12867_v10 = vand.u32 4294901760, %v10782_v48 }
 0x666   : > { %v5144_v54 = vmax.f32 %v4962_v14, 0.0  ;;  %4747 = vmatmul.f32.gmra.mxu2 %v13664_v63 }
 0x667   : > { %v5599_v43 = vsub.f32 %v10782_v48, %v12867_v10  ;;  %v13676_v48 = vld [vmem:[#allocation20_spill] sm:$0xff] }
 0x668   : > { %v5269_v1 = vsel %vm2737_vm2, %v5144_v54, 0  ;;  %v10791_v46 = vpop.f32.mrf.mxu0  ;;  %v10793_v38 = vpop.f32.mrf.mxu1 }
 0x669   : > { %13666 = vst [vmem:[#allocation109_spill] sm:$0xff] %v10791_v46  ;;  %v10795_v57 = vand.u32 4294901760, %v5269_v1  ;;  %v4684_v45 = vpop.f32.mrf.mxu2  ;;  %v5600_v60 = vand.u32 4294901760, %v5599_v43 }
 0x66a   : > { %13667 = vst [vmem:[#allocation98_spill] sm:$0xff] %v10793_v38  ;;  %v4685_v19 = vadd.f32 %v4684_v45, %v13669_v6  ;;  %5032 = vmatmul.f32.gmra.mxu3 %v13670_v28 }
 0x66b   : > { %13668 = vst [vmem:[#allocation117_spill] sm:$0xff] %v10795_v57  ;;  %v10800_v63 = vsub.f32 %v5269_v1, %v10795_v57  ;;  %5601 = vmatmul.f32.gmra.mxu0 %v5600_v60  ;;  %6078 = vmatmul.f32.gmra.mxu1 %v10795_v57 }
 0x66c   : > { %v4966_v14 = vadd.f32 %v4965_v13, %v4685_v19  ;;  %v13675_v13 = vld [vmem:[#allocation24_spill] sm:$0xff] }
 0x66d   : > { %13671 = vst [vmem:[#allocation114_spill] sm:$0xff] %v10800_v63  ;;  %v4969_v54 = vpop.f32.mrf.mxu3  ;;  %v12872_v10 = vand.u32 4294901760, %v10800_v63 }
 0x66e   : > { %v5145_v46 = vmax.f32 %v4966_v14, 0.0  ;;  %4751 = vmatmul.f32.gmra.mxu2 %v13670_v28 }
 0x66f   : > { %v5607_v43 = vsub.f32 %v10800_v63, %v12872_v10  ;;  %v13682_v63 = vld [vmem:[#allocation23_spill] sm:$0xff] }
 0x670   : > { %v5272_v45 = vsel %vm2737_vm2, %v5145_v46, 0  ;;  %v10809_v6 = vpop.f32.mrf.mxu0  ;;  %v10811_v1 = vpop.f32.mrf.mxu1 }
 0x671   : > { %13672 = vst [vmem:[#allocation112_spill] sm:$0xff] %v10809_v6  ;;  %v10813_v60 = vand.u32 4294901760, %v5272_v45  ;;  %v4688_v57 = vpop.f32.mrf.mxu2  ;;  %v5608_v19 = vand.u32 4294901760, %v5607_v43 }
 0x672   : > { %13673 = vst [vmem:[#allocation111_spill] sm:$0xff] %v10811_v1  ;;  %v4689_v38 = vadd.f32 %v4688_v57, %v13675_v13  ;;  %5036 = vmatmul.f32.gmra.mxu3 %v13676_v48 }
 0x673   : > { %13674 = vst [vmem:[#allocation105_spill] sm:$0xff] %v10813_v60  ;;  %v10818_v28 = vsub.f32 %v5272_v45, %v10813_v60  ;;  %5609 = vmatmul.f32.gmra.mxu0 %v5608_v19  ;;  %6082 = vmatmul.f32.gmra.mxu1 %v10813_v60 }
 0x674   : > { %v4970_v14 = vadd.f32 %v4969_v54, %v4689_v38  ;;  %v13681_v54 = vld [vmem:[#allocation26_spill] sm:$0xff] }
 0x675   : > { %13677 = vst [vmem:[#allocation126_spill] sm:$0xff] %v10818_v28  ;;  %v4973_v46 = vpop.f32.mrf.mxu3  ;;  %v12877_v10 = vand.u32 4294901760, %v10818_v28 }
 0x676   : > { %v5146_v6 = vmax.f32 %v4970_v14, 0.0  ;;  %4755 = vmatmul.f32.gmra.mxu2 %v13676_v48 }
 0x677   : > { %v5615_v43 = vsub.f32 %v10818_v28, %v12877_v10  ;;  %v13688_v28 = vld [vmem:[#allocation25_spill] sm:$0xff] }
 0x678   : > { %v5275_v57 = vsel %vm2737_vm2, %v5146_v6, 0  ;;  %v10827_v13 = vpop.f32.mrf.mxu0  ;;  %v10829_v45 = vpop.f32.mrf.mxu1 }
 0x679   : > { %13678 = vst [vmem:[#allocation122_spill] sm:$0xff] %v10827_v13  ;;  %v10831_v19 = vand.u32 4294901760, %v5275_v57  ;;  %v4692_v60 = vpop.f32.mrf.mxu2  ;;  %v5616_v38 = vand.u32 4294901760, %v5615_v43 }
 0x67a   : > { %13679 = vst [vmem:[#allocation120_spill] sm:$0xff] %v10829_v45  ;;  %v4693_v1 = vadd.f32 %v4692_v60, %v13681_v54  ;;  %5040 = vmatmul.f32.gmra.mxu3 %v13682_v63 }
 0x67b   : > { %13680 = vst [vmem:[#allocation4_spill] sm:$0xff] %v10831_v19  ;;  %v10836_v48 = vsub.f32 %v5275_v57, %v10831_v19  ;;  %5617 = vmatmul.f32.gmra.mxu0 %v5616_v38  ;;  %6086 = vmatmul.f32.gmra.mxu1 %v10831_v19 }
 0x67c   : > { %v4974_v14 = vadd.f32 %v4973_v46, %v4693_v1  ;;  %v13687_v46 = vld [vmem:[#allocation28_spill] sm:$0xff] }
 0x67d   : > { %13683 = vst [vmem:[#allocation3_spill] sm:$0xff] %v10836_v48  ;;  %v4977_v6 = vpop.f32.mrf.mxu3  ;;  %v12882_v10 = vand.u32 4294901760, %v10836_v48 }
 0x67e   : > { %v5147_v13 = vmax.f32 %v4974_v14, 0.0  ;;  %4759 = vmatmul.f32.gmra.mxu2 %v13682_v63 }
 0x67f   : > { %v5623_v43 = vsub.f32 %v10836_v48, %v12882_v10  ;;  %v13694_v48 = vld [vmem:[#allocation27_spill] sm:$0xff] }
 0x680   : > { %v5278_v60 = vsel %vm2737_vm2, %v5147_v13, 0  ;;  %v10845_v54 = vpop.f32.mrf.mxu0  ;;  %v10847_v57 = vpop.f32.mrf.mxu1 }
 0x681   : > { %13684 = vst [vmem:[#allocation6_spill] sm:$0xff] %v10845_v54  ;;  %v10849_v38 = vand.u32 4294901760, %v5278_v60  ;;  %v4696_v19 = vpop.f32.mrf.mxu2  ;;  %v5624_v1 = vand.u32 4294901760, %v5623_v43 }
 0x682   : > { %13685 = vst [vmem:[#allocation2_spill] sm:$0xff] %v10847_v57  ;;  %v4697_v45 = vadd.f32 %v4696_v19, %v13687_v46  ;;  %5044 = vmatmul.f32.gmra.mxu3 %v13688_v28 }
 0x683   : > { %13686 = vst [vmem:[#allocation9_spill] sm:$0xff] %v10849_v38  ;;  %v10854_v63 = vsub.f32 %v5278_v60, %v10849_v38  ;;  %5625 = vmatmul.f32.gmra.mxu0 %v5624_v1  ;;  %6090 = vmatmul.f32.gmra.mxu1 %v10849_v38 }
 0x684   : > { %v4978_v14 = vadd.f32 %v4977_v6, %v4697_v45  ;;  %v13693_v6 = vld [vmem:[#allocation30_spill] sm:$0xff] }
 0x685   : > { %13689 = vst [vmem:[#allocation5_spill] sm:$0xff] %v10854_v63  ;;  %v4981_v13 = vpop.f32.mrf.mxu3  ;;  %v12887_v10 = vand.u32 4294901760, %v10854_v63 }
 0x686   : > { %v5148_v54 = vmax.f32 %v4978_v14, 0.0  ;;  %4763 = vmatmul.f32.gmra.mxu2 %v13688_v28 }
 0x687   : > { %v5631_v43 = vsub.f32 %v10854_v63, %v12887_v10  ;;  %v13699_v63 = vld [vmem:[#allocation29_spill] sm:$0xff] }
 0x688   : > { %v5281_v19 = vsel %vm2737_vm2, %v5148_v54, 0  ;;  %v10863_v46 = vpop.f32.mrf.mxu0  ;;  %v10865_v60 = vpop.f32.mrf.mxu1 }
 0x689   : > { %13690 = vst [vmem:[#allocation7_spill] sm:$0xff] %v10863_v46  ;;  %v10867_v1 = vand.u32 4294901760, %v5281_v19  ;;  %v4700_v38 = vpop.f32.mrf.mxu2  ;;  %v5632_v45 = vand.u32 4294901760, %v5631_v43 }
 0x68a   : > { %13691 = vst [vmem:[#allocation8_spill] sm:$0xff] %v10865_v60  ;;  %v4701_v57 = vadd.f32 %v4700_v38, %v13693_v6  ;;  %5048 = vmatmul.f32.gmra.mxu3 %v13694_v48 }
 0x68b   : > { %13692 = vst [vmem:[#allocation11_spill] sm:$0xff] %v10867_v1  ;;  %v10872_v28 = vsub.f32 %v5281_v19, %v10867_v1  ;;  %5633 = vmatmul.f32.gmra.mxu0 %v5632_v45  ;;  %6094 = vmatmul.f32.gmra.mxu1 %v10867_v1 }
 0x68c   : > { %v4982_v14 = vadd.f32 %v4981_v13, %v4701_v57  ;;  %v13698_v13 = vld [vmem:[#allocation32_spill] sm:$0xff] }
 0x68d   : > { %v4985_v54 = vpop.f32.mrf.mxu3  ;;  %v12892_v10 = vand.u32 4294901760, %v10872_v28 }
 0x68e   : > { %v5149_v46 = vmax.f32 %v4982_v14, 0.0  ;;  %4767 = vmatmul.f32.gmra.mxu2 %v13694_v48 }
 0x68f   : > { %v5639_v43 = vsub.f32 %v10872_v28, %v12892_v10 }
 0x690   : > { %v5284_v38 = vsel %vm2737_vm2, %v5149_v46, 0  ;;  %v10881_v6 = vpop.f32.mrf.mxu0  ;;  %v10883_v19 = vpop.f32.mrf.mxu1 }
 0x691   : > { %13695 = vst [vmem:[#allocation10_spill] sm:$0xff] %v10881_v6  ;;  %v10885_v45 = vand.u32 4294901760, %v5284_v38  ;;  %v4704_v1 = vpop.f32.mrf.mxu2  ;;  %v5640_v57 = vand.u32 4294901760, %v5639_v43 }
 0x692   : > { %13696 = vst [vmem:[#allocation14_spill] sm:$0xff] %v10883_v19  ;;  %v4705_v60 = vadd.f32 %v4704_v1, %v13698_v13  ;;  %5052 = vmatmul.f32.gmra.mxu3 %v13699_v63  ;;  %v13703_v19 = vld [vmem:[#allocation31_spill] sm:$0xff] }
 0x693   : > { %13697 = vst [vmem:[#allocation13_spill] sm:$0xff] %v10885_v45  ;;  %v10890_v48 = vsub.f32 %v5284_v38, %v10885_v45  ;;  %5641 = vmatmul.f32.gmra.mxu0 %v5640_v57  ;;  %6098 = vmatmul.f32.gmra.mxu1 %v10885_v45 }
 0x694   : > { %v4986_v14 = vadd.f32 %v4985_v54, %v4705_v60 }
 0x695   : > { %v4989_v46 = vpop.f32.mrf.mxu3  ;;  %v12895_v10 = vand.u32 4294901760, %v10890_v48 }
 0x696   : > { %v5150_v6 = vmax.f32 %v4986_v14, 0.0  ;;  %4771 = vmatmul.f32.gmra.mxu2 %v13699_v63 }
 0x697   : > { %v5647_v43 = vsub.f32 %v10890_v48, %v12895_v10 }
 0x698   : > { %v5287_v1 = vsel %vm2737_vm2, %v5150_v6, 0  ;;  %v10899_v13 = vpop.f32.mrf.mxu0  ;;  %v10901_v38 = vpop.f32.mrf.mxu1 }
 0x699   : > { %13700 = vst [vmem:[#allocation16_spill] sm:$0xff] %v10899_v13  ;;  %v10903_v57 = vand.u32 4294901760, %v5287_v1  ;;  %v4708_v45 = vpop.f32.mrf.mxu2  ;;  %v5648_v60 = vand.u32 4294901760, %v5647_v43 }
 0x69a   : > { %13701 = vst [vmem:[#allocation12_spill] sm:$0xff] %v10901_v38  ;;  %v4709_v54 = vadd.f32 %v4708_v45, %v10062_v15  ;;  %5056 = vmatmul.f32.gmra.mxu3 %v13703_v19  ;;  %v13707_v38 = vld [vmem:[#allocation33_spill] sm:$0xff] }
 0x69b   : > { %13702 = vst [vmem:[#allocation18_spill] sm:$0xff] %v10903_v57  ;;  %v10908_v63 = vsub.f32 %v5287_v1, %v10903_v57  ;;  %5649 = vmatmul.f32.gmra.mxu0 %v5648_v60  ;;  %6102 = vmatmul.f32.gmra.mxu1 %v10903_v57 }
 0x69c   : > { %v4990_v14 = vadd.f32 %v4989_v46, %v4709_v54 }
 0x69d   : > { %v4993_v6 = vpop.f32.mrf.mxu3  ;;  %v12898_v10 = vand.u32 4294901760, %v10908_v63 }
 0x69e   : > { %v5151_v13 = vmax.f32 %v4990_v14, 0.0  ;;  %4775 = vmatmul.f32.gmra.mxu2 %v13703_v19 }
 0x69f   : > { %v5655_v43 = vsub.f32 %v10908_v63, %v12898_v10 }
 0x6a0   : > { %v5290_v15 = vsel %vm2737_vm2, %v5151_v13, 0  ;;  %v10917_v45 = vpop.f32.mrf.mxu0  ;;  %v10919_v1 = vpop.f32.mrf.mxu1 }
 0x6a1   : > { %13704 = vst [vmem:[#allocation15_spill] sm:$0xff] %v10917_v45  ;;  %v10921_v60 = vand.u32 4294901760, %v5290_v15  ;;  %v4712_v57 = vpop.f32.mrf.mxu2  ;;  %v5656_v46 = vand.u32 4294901760, %v5655_v43 }
 0x6a2   : > { %13705 = vst [vmem:[#allocation17_spill] sm:$0xff] %v10919_v1  ;;  %v4713_v54 = vadd.f32 %v4712_v57, %v10071_v29  ;;  %5060 = vmatmul.f32.gmra.mxu3 %v13707_v38  ;;  %v13711_v1 = vld [vmem:[#allocation151_spill] sm:$0xff] }
 0x6a3   : > { %13706 = vst [vmem:[#allocation19_spill] sm:$0xff] %v10921_v60  ;;  %v10926_v19 = vsub.f32 %v5290_v15, %v10921_v60  ;;  %5657 = vmatmul.f32.gmra.mxu0 %v5656_v46  ;;  %6106 = vmatmul.f32.gmra.mxu1 %v10921_v60 }
 0x6a4   : > { %v4994_v14 = vadd.f32 %v4993_v6, %v4713_v54 }
 0x6a5   : > { %v4997_v13 = vpop.f32.mrf.mxu3  ;;  %v12901_v10 = vand.u32 4294901760, %v10926_v19 }
 0x6a6   : > { %v5152_v45 = vmax.f32 %v4994_v14, 0.0  ;;  %4779 = vmatmul.f32.gmra.mxu2 %v13707_v38 }
 0x6a7   : > { %v5663_v43 = vsub.f32 %v10926_v19, %v12901_v10 }
 0x6a8   : > { %v5293_v29 = vsel %vm2737_vm2, %v5152_v45, 0  ;;  %v10935_v57 = vpop.f32.mrf.mxu0  ;;  %v10937_v15 = vpop.f32.mrf.mxu1 }
 0x6a9   : > { %13708 = vst [vmem:[#allocation22_spill] sm:$0xff] %v10935_v57  ;;  %v10939_v46 = vand.u32 4294901760, %v5293_v29  ;;  %v4716_v60 = vpop.f32.mrf.mxu2  ;;  %v5664_v6 = vand.u32 4294901760, %v5663_v43 }
 0x6aa   : > { %13709 = vst [vmem:[#allocation21_spill] sm:$0xff] %v10937_v15  ;;  %v4717_v54 = vadd.f32 %v4716_v60, %v10080_v26  ;;  %5064 = vmatmul.f32.gmra.mxu3 %v13711_v1 }
 0x6ab   : > { %13710 = vst [vmem:[#allocation24_spill] sm:$0xff] %v10939_v46  ;;  %v10944_v38 = vsub.f32 %v5293_v29, %v10939_v46  ;;  %5665 = vmatmul.f32.gmra.mxu0 %v5664_v6  ;;  %6110 = vmatmul.f32.gmra.mxu1 %v10939_v46 }
 0x6ac   : > { %v4998_v14 = vadd.f32 %v4997_v13, %v4717_v54 }
 0x6ad   : > { %v5001_v45 = vpop.f32.mrf.mxu3  ;;  %v12904_v10 = vand.u32 4294901760, %v10944_v38 }
 0x6ae   : > { %v5153_v57 = vmax.f32 %v4998_v14, 0.0  ;;  %4783 = vmatmul.f32.gmra.mxu2 %v13711_v1 }
 0x6af   : > { %v5671_v43 = vsub.f32 %v10944_v38, %v12904_v10 }
 0x6b0   : > { %v5296_v26 = vsel %vm2737_vm2, %v5153_v57, 0  ;;  %v10953_v60 = vpop.f32.mrf.mxu0  ;;  %v10955_v29 = vpop.f32.mrf.mxu1 }
 0x6b1   : > { %13712 = vst [vmem:[#allocation20_spill] sm:$0xff] %v10955_v29  ;;  %v10957_v6 = vand.u32 4294901760, %v5296_v26  ;;  %v4720_v46 = vpop.f32.mrf.mxu2  ;;  %v5672_v13 = vand.u32 4294901760, %v5671_v43  ;;  %v13717_v29 = vld [vmem:[#allocation150_spill] sm:$0xff] }
 0x6b2   : > { %v4721_v54 = vadd.f32 %v4720_v46, %v10089_v50  ;;  %5068 = vmatmul.f32.gmra.mxu3 %v10067_v30 }
 0x6b3   : > { %13713 = vst [vmem:[#allocation26_spill] sm:$0xff] %v10957_v6  ;;  %v10962_v1 = vsub.f32 %v5296_v26, %v10957_v6  ;;  %5673 = vmatmul.f32.gmra.mxu0 %v5672_v13  ;;  %6114 = vmatmul.f32.gmra.mxu1 %v10957_v6 }
 0x6b4   : > { %v5002_v14 = vadd.f32 %v5001_v45, %v4721_v54 }
 0x6b5   : > { %v5005_v57 = vpop.f32.mrf.mxu3  ;;  %v12907_v10 = vand.u32 4294901760, %v10962_v1 }
 0x6b6   : > { %v5154_v15 = vmax.f32 %v5002_v14, 0.0  ;;  %4787 = vmatmul.f32.gmra.mxu2 %v10067_v30 }
 0x6b7   : > { %v5679_v43 = vsub.f32 %v10962_v1, %v12907_v10 }
 0x6b8   : > { %v5299_v50 = vsel %vm2737_vm2, %v5154_v15, 0  ;;  %v10971_v46 = vpop.f32.mrf.mxu0  ;;  %v10973_v26 = vpop.f32.mrf.mxu1 }
 0x6b9   : > { %13714 = vst [vmem:[#allocation23_spill] sm:$0xff] %v10971_v46  ;;  %v10975_v13 = vand.u32 4294901760, %v5299_v50  ;;  %v4724_v6 = vpop.f32.mrf.mxu2  ;;  %v5680_v45 = vand.u32 4294901760, %v5679_v43 }
 0x6ba   : > { %13715 = vst [vmem:[#allocation28_spill] sm:$0xff] %v10973_v26  ;;  %v4725_v54 = vadd.f32 %v4724_v6, %v10098_v31  ;;  %5072 = vmatmul.f32.gmra.mxu3 %v13717_v29 }
 0x6bb   : > { %13716 = vst [vmem:[#allocation25_spill] sm:$0xff] %v10975_v13  ;;  %v10980_v30 = vsub.f32 %v5299_v50, %v10975_v13  ;;  %5681 = vmatmul.f32.gmra.mxu0 %v5680_v45  ;;  %6118 = vmatmul.f32.gmra.mxu1 %v10975_v13 }
 0x6bc   : > { %v5006_v14 = vadd.f32 %v5005_v57, %v4725_v54 }
 0x6bd   : > { %v5009_v15 = vpop.f32.mrf.mxu3  ;;  %v12910_v10 = vand.u32 4294901760, %v10980_v30 }
 0x6be   : > { %v5155_v46 = vmax.f32 %v5006_v14, 0.0  ;;  %4791 = vmatmul.f32.gmra.mxu2 %v13717_v29 }
 0x6bf   : > { %v5687_v43 = vsub.f32 %v10980_v30, %v12910_v10 }
 0x6c0   : > { %v5302_v31 = vsel %vm2737_vm2, %v5155_v46, 0  ;;  %v10989_v6 = vpop.f32.mrf.mxu0  ;;  %v10991_v50 = vpop.f32.mrf.mxu1 }
 0x6c1   : > { %13718 = vst [vmem:[#allocation30_spill] sm:$0xff] %v10989_v6  ;;  %v10993_v45 = vand.u32 4294901760, %v5302_v31  ;;  %v4728_v13 = vpop.f32.mrf.mxu2  ;;  %v5688_v57 = vand.u32 4294901760, %v5687_v43  ;;  %v13726_v6 = vld [vmem:[#allocation35_spill] sm:$0xff] }
 0x6c2   : > { %13719 = vst [vmem:[#allocation27_spill] sm:$0xff] %v10991_v50  ;;  %v4729_v54 = vadd.f32 %v4728_v13, %v10107_v36  ;;  %5076 = vmatmul.f32.gmra.mxu3 %v10085_v25 }
 0x6c3   : > { %13720 = vst [vmem:[#allocation32_spill] sm:$0xff] %v10993_v45  ;;  %v10998_v29 = vsub.f32 %v5302_v31, %v10993_v45  ;;  %5689 = vmatmul.f32.gmra.mxu0 %v5688_v57  ;;  %6122 = vmatmul.f32.gmra.mxu1 %v10993_v45 }
 0x6c4   : > { %v5010_v14 = vadd.f32 %v5009_v15, %v4729_v54  ;;  %v13725_v54 = vld [vmem:[#allocation37_spill] sm:$0xff] }
 0x6c5   : > { %13721 = vst [vmem:[#allocation29_spill] sm:$0xff] %v10998_v29  ;;  %v5013_v46 = vpop.f32.mrf.mxu3  ;;  %v12913_v10 = vand.u32 4294901760, %v10998_v29 }
 0x6c6   : > { %v5156_v26 = vmax.f32 %v5010_v14, 0.0  ;;  %4795 = vmatmul.f32.gmra.mxu2 %v10085_v25 }
 0x6c7   : > { %v5695_v43 = vsub.f32 %v10998_v29, %v12913_v10  ;;  %v13731_v29 = vld [vmem:[#allocation34_spill] sm:$0xff] }
 0x6c8   : > { %v5305_v36 = vsel %vm2737_vm2, %v5156_v26, 0  ;;  %v11007_v13 = vpop.f32.mrf.mxu0  ;;  %v11009_v31 = vpop.f32.mrf.mxu1 }
 0x6c9   : > { %13722 = vst [vmem:[#allocation31_spill] sm:$0xff] %v11007_v13  ;;  %v11011_v57 = vand.u32 4294901760, %v5305_v36  ;;  %v4732_v45 = vpop.f32.mrf.mxu2  ;;  %v5696_v15 = vand.u32 4294901760, %v5695_v43 }
 0x6ca   : > { %13723 = vst [vmem:[#allocation33_spill] sm:$0xff] %v11009_v31  ;;  %v4733_v50 = vadd.f32 %v4732_v45, %v13725_v54  ;;  %5080 = vmatmul.f32.gmra.mxu3 %v13726_v6 }
 0x6cb   : > { %13724 = vst [vmem:[#allocation151_spill] sm:$0xff] %v11011_v57  ;;  %v11016_v25 = vsub.f32 %v5305_v36, %v11011_v57  ;;  %5697 = vmatmul.f32.gmra.mxu0 %v5696_v15  ;;  %6126 = vmatmul.f32.gmra.mxu1 %v11011_v57 }
 0x6cc   : > { %v5014_v14 = vadd.f32 %v5013_v46, %v4733_v50  ;;  %v13730_v46 = vld [vmem:[#allocation36_spill] sm:$0xff] }
 0x6cd   : > { %v5017_v26 = vpop.f32.mrf.mxu3  ;;  %v12918_v10 = vand.u32 4294901760, %v11016_v25 }
 0x6ce   : > { %v5157_v13 = vmax.f32 %v5014_v14, 0.0  ;;  %4799 = vmatmul.f32.gmra.mxu2 %v13726_v6 }
 0x6cf   : > { %v5703_v43 = vsub.f32 %v11016_v25, %v12918_v10 }
 0x6d0   : > { %v5308_v45 = vsel %vm2737_vm2, %v5157_v13, 0  ;;  %v11025_v54 = vpop.f32.mrf.mxu0  ;;  %v11027_v36 = vpop.f32.mrf.mxu1 }
 0x6d1   : > { %13727 = vst [vmem:[#allocation150_spill] sm:$0xff] %v11025_v54  ;;  %v11029_v15 = vand.u32 4294901760, %v5308_v45  ;;  %v4736_v57 = vpop.f32.mrf.mxu2  ;;  %v5704_v50 = vand.u32 4294901760, %v5703_v43 }
 0x6d2   : > { %13728 = vst [vmem:[#allocation37_spill] sm:$0xff] %v11027_v36  ;;  %v4737_v31 = vadd.f32 %v4736_v57, %v13730_v46  ;;  %5084 = vmatmul.f32.gmra.mxu3 %v13731_v29  ;;  %v13735_v36 = vld [vmem:[#allocation47_spill] sm:$0xff] }
 0x6d3   : > { %13729 = vst [vmem:[#allocation35_spill] sm:$0xff] %v11029_v15  ;;  %v11034_v6 = vsub.f32 %v5308_v45, %v11029_v15  ;;  %5705 = vmatmul.f32.gmra.mxu0 %v5704_v50  ;;  %6130 = vmatmul.f32.gmra.mxu1 %v11029_v15 }
 0x6d4   : > { %v5018_v14 = vadd.f32 %v5017_v26, %v4737_v31 }
 0x6d5   : > { %v5021_v13 = vpop.f32.mrf.mxu3  ;;  %v12921_v10 = vand.u32 4294901760, %v11034_v6 }
 0x6d6   : > { %v5158_v54 = vmax.f32 %v5018_v14, 0.0  ;;  %4803 = vmatmul.f32.gmra.mxu2 %v13731_v29 }
 0x6d7   : > { %v5711_v43 = vsub.f32 %v11034_v6, %v12921_v10 }
 0x6d8   : > { %v5311_v57 = vsel %vm2737_vm2, %v5158_v54, 0  ;;  %v11043_v46 = vpop.f32.mrf.mxu0  ;;  %v11045_v45 = vpop.f32.mrf.mxu1  ;;  %v4016_v54 = vadd.f32 %v10245_v55, %v10154_v40 }
 0x6d9   : > { %13732 = vst [vmem:[#allocation36_spill] sm:$0xff] %v11043_v46  ;;  %v11047_v50 = vand.u32 4294901760, %v5311_v57  ;;  %v4740_v15 = vpop.f32.mrf.mxu2  ;;  %v5712_v31 = vand.u32 4294901760, %v5711_v43 }
 0x6da   : > { %13733 = vst [vmem:[#allocation34_spill] sm:$0xff] %v11045_v45  ;;  %v4741_v26 = vadd.f32 %v4740_v15, %v10149_v52  ;;  %5088 = vmatmul.f32.gmra.mxu3 %v13735_v36 }
 0x6db   : > { %13734 = vst [vmem:[#allocation154_spill] sm:$0xff] %v11047_v50  ;;  %v11052_v29 = vsub.f32 %v5311_v57, %v11047_v50  ;;  %5713 = vmatmul.f32.gmra.mxu0 %v5712_v31  ;;  %6134 = vmatmul.f32.gmra.mxu1 %v11047_v50 }
 0x6dc   : > { %v5022_v14 = vadd.f32 %v5021_v13, %v4741_v26  ;;  %v4402_v13 = vadd.f32 %v10238_v59, %v4016_v54 }
 0x6dd   : > { %v5025_v10 = vpop.f32.mrf.mxu3  ;;  %v12922_v45 = vand.u32 4294901760, %v11052_v29 }
 0x6de   : > { %v5159_v46 = vmax.f32 %v5022_v14, 0.0  ;;  %4807 = vmatmul.f32.gmra.mxu2 %v13735_v36  ;;  %v4021_v14 = vadd.f32 %v10256_v7, %v10163_v33 }
 0x6df   : > { %v5719_v52 = vsub.f32 %v11052_v29, %v12922_v45 }
 0x6e0   : > { %v5314_v15 = vsel %vm2737_vm2, %v5159_v46, 0  ;;  %v11063_v43 = vpop.f32.mrf.mxu0  ;;  %v11065_v57 = vpop.f32.mrf.mxu1 }
 0x6e1   : > { %v11068_v31 = vand.u32 4294901760, %v5314_v15  ;;  %v4744_v40 = vpop.f32.mrf.mxu2  ;;  %v5720_v55 = vand.u32 4294901760, %v5719_v52 }
 0x6e2   : > { %v4745_v26 = vadd.f32 %v4744_v40, %v4402_v13  ;;  %5092 = vmatmul.f32.gmra.mxu3 %v10121_v61 }
 0x6e3   : > { %13736 = vst [vmem:[#allocation47_spill] sm:$0xff] %v11068_v31  ;;  %v11072_v36 = vsub.f32 %v5314_v15, %v11068_v31  ;;  %5721 = vmatmul.f32.gmra.mxu0 %v5720_v55  ;;  %6138 = vmatmul.f32.gmra.mxu1 %v11068_v31 }
 0x6e4   : > { %v5026_v46 = vadd.f32 %v5025_v10, %v4745_v26  ;;  %v4408_v10 = vadd.f32 %v10249_v35, %v4021_v14 }
 0x6e5   : > { %v5029_v45 = vpop.f32.mrf.mxu3  ;;  %v12923_v59 = vand.u32 4294901760, %v11072_v36 }
 0x6e6   : > { %v5160_v54 = vmax.f32 %v5026_v46, 0.0  ;;  %4811 = vmatmul.f32.gmra.mxu2 %v10121_v61 }
 0x6e7   : > { %v5727_v52 = vsub.f32 %v11072_v36, %v12923_v59 }
 0x6e8   : > { %v5317_v15 = vsel %vm2737_vm2, %v5160_v54, 0  ;;  %v11083_v13 = vpop.f32.mrf.mxu0  ;;  %v11085_v40 = vpop.f32.mrf.mxu1  ;;  %v13738_v54 = vld [vmem:[#allocation49_spill] sm:$0xff] }
 0x6e9   : > { %v11088_v55 = vand.u32 4294901760, %v5317_v15  ;;  %v4748_v33 = vpop.f32.mrf.mxu2  ;;  %v5728_v7 = vand.u32 4294901760, %v5727_v52  ;;  %v4026_v59 = vadd.f32 %v13738_v54, %v10172_v62 }
 0x6ea   : > { %v4749_v26 = vadd.f32 %v4748_v33, %v4408_v10  ;;  %5096 = vmatmul.f32.gmra.mxu3 %v10145_v11 }
 0x6eb   : > { %13737 = vst [vmem:[#allocation155_spill] sm:$0xff] %v11088_v55  ;;  %v11092_v61 = vsub.f32 %v5317_v15, %v11088_v55  ;;  %5729 = vmatmul.f32.gmra.mxu0 %v5728_v7  ;;  %6142 = vmatmul.f32.gmra.mxu1 %v11088_v55 }
 0x6ec   : > { %v5030_v46 = vadd.f32 %v5029_v45, %v4749_v26  ;;  %v13740_v45 = vld [vmem:[#allocation65_spill] sm:$0xff] }
 0x6ed   : > { %v5033_v31 = vpop.f32.mrf.mxu3  ;;  %v12928_v35 = vand.u32 4294901760, %v11092_v61  ;;  %v4414_v7 = vadd.f32 %v13740_v45, %v4026_v59 }
 0x6ee   : > { %v5161_v14 = vmax.f32 %v5030_v46, 0.0  ;;  %4815 = vmatmul.f32.gmra.mxu2 %v10145_v11  ;;  %v13742_v46 = vld [vmem:[#allocation54_spill] sm:$0xff] }
 0x6ef   : > { %v5735_v52 = vsub.f32 %v11092_v61, %v12928_v35  ;;  %v13743_v35 = vld [vmem:[#allocation61_spill] sm:$0xff] }
 0x6f0   : > { %v5320_v15 = vsel %vm2737_vm2, %v5161_v14, 0  ;;  %v11103_v10 = vpop.f32.mrf.mxu0  ;;  %v11105_v33 = vpop.f32.mrf.mxu1  ;;  %v4031_v50 = vadd.f32 %v10288_v5, %v13743_v35 }
 0x6f1   : > { %13739 = vst [vmem:[#allocation49_spill] sm:$0xff] %v11105_v33  ;;  %v11108_v26 = vand.u32 4294901760, %v5320_v15  ;;  %v4752_v62 = vpop.f32.mrf.mxu2  ;;  %v5736_v54 = vand.u32 4294901760, %v5735_v52 }
 0x6f2   : > { %v4753_v55 = vadd.f32 %v4752_v62, %v4414_v7  ;;  %5100 = vmatmul.f32.gmra.mxu3 %v13742_v46 }
 0x6f3   : > { %13741 = vst [vmem:[#allocation65_spill] sm:$0xff] %v11108_v26  ;;  %v11112_v11 = vsub.f32 %v5320_v15, %v11108_v26  ;;  %5737 = vmatmul.f32.gmra.mxu0 %v5736_v54  ;;  %6146 = vmatmul.f32.gmra.mxu1 %v11108_v26 }
 0x6f4   : > { %v5034_v14 = vadd.f32 %v5033_v31, %v4753_v55  ;;  %v13746_v31 = vld [vmem:[#allocation123_spill] sm:$0xff] }
 0x6f5   : > { %v5037_v33 = vpop.f32.mrf.mxu3  ;;  %v12933_v59 = vand.u32 4294901760, %v11112_v11  ;;  %v4420_v55 = vadd.f32 %v13746_v31, %v4031_v50 }
 0x6f6   : > { %v5162_v45 = vmax.f32 %v5034_v14, 0.0  ;;  %4819 = vmatmul.f32.gmra.mxu2 %v13742_v46  ;;  %v13748_v14 = vld [vmem:[#allocation41_spill] sm:$0xff] }
 0x6f7   : > { %v5743_v52 = vsub.f32 %v11112_v11, %v12933_v59  ;;  %v13749_v59 = vld [vmem:[#allocation44_spill] sm:$0xff] }
 0x6f8   : > { %v5323_v15 = vsel %vm2737_vm2, %v5162_v45, 0  ;;  %v11123_v7 = vpop.f32.mrf.mxu0  ;;  %v11125_v62 = vpop.f32.mrf.mxu1 }
 0x6f9   : > { %13744 = vst [vmem:[#allocation54_spill] sm:$0xff] %v11123_v7  ;;  %v11128_v54 = vand.u32 4294901760, %v5323_v15  ;;  %v4756_v5 = vpop.f32.mrf.mxu2  ;;  %v5744_v35 = vand.u32 4294901760, %v5743_v52  ;;  %v4036_v7 = vadd.f32 %v10308_v44, %v13749_v59 }
 0x6fa   : > { %13745 = vst [vmem:[#allocation61_spill] sm:$0xff] %v11125_v62  ;;  %v4757_v26 = vadd.f32 %v4756_v5, %v4420_v55  ;;  %5104 = vmatmul.f32.gmra.mxu3 %v13748_v14 }
 0x6fb   : > { %13747 = vst [vmem:[#allocation123_spill] sm:$0xff] %v11128_v54  ;;  %v11132_v46 = vsub.f32 %v5323_v15, %v11128_v54  ;;  %5745 = vmatmul.f32.gmra.mxu0 %v5744_v35  ;;  %6150 = vmatmul.f32.gmra.mxu1 %v11128_v54 }
 0x6fc   : > { %v5038_v45 = vadd.f32 %v5037_v33, %v4757_v26  ;;  %v4426_v33 = vadd.f32 %v10293_v21, %v4036_v7 }
 0x6fd   : > { %v5041_v62 = vpop.f32.mrf.mxu3  ;;  %v12934_v50 = vand.u32 4294901760, %v11132_v46 }
 0x6fe   : > { %v5163_v31 = vmax.f32 %v5038_v45, 0.0  ;;  %4823 = vmatmul.f32.gmra.mxu2 %v13748_v14  ;;  %v13752_v45 = vld [vmem:[#allocation39_spill] sm:$0xff] }
 0x6ff   : > { %v5751_v52 = vsub.f32 %v11132_v46, %v12934_v50  ;;  %v13753_v50 = vld [vmem:[#allocation55_spill] sm:$0xff] }
 0x700   : > { %v5326_v15 = vsel %vm2737_vm2, %v5163_v31, 0  ;;  %v11143_v55 = vpop.f32.mrf.mxu0  ;;  %v11145_v5 = vpop.f32.mrf.mxu1  ;;  %v4041_v54 = vadd.f32 %v10321_v22, %v13753_v50 }
 0x701   : > { %13750 = vst [vmem:[#allocation41_spill] sm:$0xff] %v11145_v5  ;;  %v11148_v26 = vand.u32 4294901760, %v5326_v15  ;;  %v4760_v44 = vpop.f32.mrf.mxu2  ;;  %v5752_v59 = vand.u32 4294901760, %v5751_v52 }
 0x702   : > { %v4761_v35 = vadd.f32 %v4760_v44, %v4426_v33  ;;  %5108 = vmatmul.f32.gmra.mxu3 %v13752_v45 }
 0x703   : > { %13751 = vst [vmem:[#allocation44_spill] sm:$0xff] %v11148_v26  ;;  %v11152_v14 = vsub.f32 %v5326_v15, %v11148_v26  ;;  %5753 = vmatmul.f32.gmra.mxu0 %v5752_v59  ;;  %6154 = vmatmul.f32.gmra.mxu1 %v11148_v26 }
 0x704   : > { %v5042_v31 = vadd.f32 %v5041_v62, %v4761_v35  ;;  %v4432_v62 = vadd.f32 %v10313_v4, %v4041_v54 }
 0x705   : > { %v5045_v5 = vpop.f32.mrf.mxu3  ;;  %v12937_v21 = vand.u32 4294901760, %v11152_v14 }
 0x706   : > { %v5164_v7 = vmax.f32 %v5042_v31, 0.0  ;;  %4827 = vmatmul.f32.gmra.mxu2 %v13752_v45  ;;  %v13756_v31 = vld [vmem:[#allocation48_spill] sm:$0xff] }
 0x707   : > { %v5759_v52 = vsub.f32 %v11152_v14, %v12937_v21  ;;  %v13757_v21 = vld [vmem:[#allocation51_spill] sm:$0xff] }
 0x708   : > { %v5329_v15 = vsel %vm2737_vm2, %v5164_v7, 0  ;;  %v11163_v33 = vpop.f32.mrf.mxu0  ;;  %v11165_v44 = vpop.f32.mrf.mxu1  ;;  %v4046_v26 = vadd.f32 %v10334_v0, %v13757_v21 }
 0x709   : > { %13754 = vst [vmem:[#allocation39_spill] sm:$0xff] %v11165_v44  ;;  %v11168_v59 = vand.u32 4294901760, %v5329_v15  ;;  %v4764_v22 = vpop.f32.mrf.mxu2  ;;  %v5760_v50 = vand.u32 4294901760, %v5759_v52 }
 0x70a   : > { %v4765_v35 = vadd.f32 %v4764_v22, %v4432_v62  ;;  %5112 = vmatmul.f32.gmra.mxu3 %v13756_v31 }
 0x70b   : > { %13755 = vst [vmem:[#allocation55_spill] sm:$0xff] %v11168_v59  ;;  %v11172_v45 = vsub.f32 %v5329_v15, %v11168_v59  ;;  %5761 = vmatmul.f32.gmra.mxu0 %v5760_v50  ;;  %6158 = vmatmul.f32.gmra.mxu1 %v11168_v59 }
 0x70c   : > { %v5046_v7 = vadd.f32 %v5045_v5, %v4765_v35  ;;  %v4438_v5 = vadd.f32 %v10325_v18, %v4046_v26 }
 0x70d   : > { %v5049_v44 = vpop.f32.mrf.mxu3  ;;  %v12940_v4 = vand.u32 4294901760, %v11172_v45 }
 0x70e   : > { %v5165_v54 = vmax.f32 %v5046_v7, 0.0  ;;  %4831 = vmatmul.f32.gmra.mxu2 %v13756_v31  ;;  %v13760_v7 = vld [vmem:[#allocation68_spill] sm:$0xff] }
 0x70f   : > { %v5767_v52 = vsub.f32 %v11172_v45, %v12940_v4  ;;  %v13761_v4 = vld [vmem:[#allocation75_spill] sm:$0xff] }
 0x710   : > { %v5332_v15 = vsel %vm2737_vm2, %v5165_v54, 0  ;;  %v11183_v62 = vpop.f32.mrf.mxu0  ;;  %v11185_v22 = vpop.f32.mrf.mxu1  ;;  %v4051_v59 = vadd.f32 %v10343_v51, %v13761_v4 }
 0x711   : > { %13758 = vst [vmem:[#allocation48_spill] sm:$0xff] %v11185_v22  ;;  %v11188_v50 = vand.u32 4294901760, %v5332_v15  ;;  %v4768_v0 = vpop.f32.mrf.mxu2  ;;  %v5768_v21 = vand.u32 4294901760, %v5767_v52 }
 0x712   : > { %v4769_v35 = vadd.f32 %v4768_v0, %v4438_v5  ;;  %5116 = vmatmul.f32.gmra.mxu3 %v13760_v7 }
 0x713   : > { %13759 = vst [vmem:[#allocation51_spill] sm:$0xff] %v11188_v50  ;;  %v11192_v31 = vsub.f32 %v5332_v15, %v11188_v50  ;;  %5769 = vmatmul.f32.gmra.mxu0 %v5768_v21  ;;  %6162 = vmatmul.f32.gmra.mxu1 %v11188_v50 }
 0x714   : > { %v5050_v54 = vadd.f32 %v5049_v44, %v4769_v35  ;;  %v4444_v44 = vadd.f32 %v10337_v12, %v4051_v59 }
 0x715   : > { %v5053_v22 = vpop.f32.mrf.mxu3  ;;  %v12943_v18 = vand.u32 4294901760, %v11192_v31 }
 0x716   : > { %v5166_v26 = vmax.f32 %v5050_v54, 0.0  ;;  %4835 = vmatmul.f32.gmra.mxu2 %v13760_v7  ;;  %v13764_v54 = vand.u32 4294901760, %v10380_v47 }
 0x717   : > { %v5775_v52 = vsub.f32 %v11192_v31, %v12943_v18  ;;  %v13765_v18 = vld [vmem:[#allocation62_spill] sm:$0xff] }
 0x718   : > { %v5335_v15 = vsel %vm2737_vm2, %v5166_v26, 0  ;;  %v11203_v5 = vpop.f32.mrf.mxu0  ;;  %v11205_v0 = vpop.f32.mrf.mxu1  ;;  %v4056_v50 = vadd.f32 %v10351_v9, %v13765_v18 }
 0x719   : > { %13762 = vst [vmem:[#allocation68_spill] sm:$0xff] %v11205_v0  ;;  %v11208_v21 = vand.u32 4294901760, %v5335_v15  ;;  %v4772_v51 = vpop.f32.mrf.mxu2  ;;  %v5776_v4 = vand.u32 4294901760, %v5775_v52 }
 0x71a   : > { %v4773_v35 = vadd.f32 %v4772_v51, %v4444_v44  ;;  %6618 = vmatmul.f32.vlgmr.msra.gmra.mxu3 %v13764_v54  ;;  %v13767_v54 = vand.u32 4294901760, %v10398_v58 }
 0x71b   : > { %13763 = vst [vmem:[#allocation75_spill] sm:$0xff] %v11208_v21  ;;  %v11213_v7 = vsub.f32 %v5335_v15, %v11208_v21  ;;  %5777 = vmatmul.f32.gmra.mxu0 %v5776_v4  ;;  %6166 = vmatmul.f32.gmra.mxu1 %v11208_v21 }
 0x71c   : > { %v5054_v26 = vadd.f32 %v5053_v22, %v4773_v35  ;;  %v4450_v22 = vadd.f32 %v10345_v20, %v4056_v50 }
 0x71d   : > { %v5057_v0 = vpop.f32.mrf.mxu3  ;;  %v12946_v12 = vand.u32 4294901760, %v11213_v7 }
 0x71e   : > { %v5167_v59 = vmax.f32 %v5054_v26, 0.0  ;;  %6272 = vmatmul.f32.vlgmr.msra.gmra.mxu2 %v10380_v47 }
 0x71f   : > { %v5783_v52 = vsub.f32 %v11213_v7, %v12946_v12 }
 0x720   : > { %v5338_v15 = vsel %vm2737_vm2, %v5167_v59, 0  ;;  %v11224_v44 = vpop.f32.mrf.mxu0  ;;  %v11226_v51 = vpop.f32.mrf.mxu1  ;;  %v13768_v59 = vld [vmem:[#allocation58_spill] sm:$0xff] }
 0x721   : > { %v11229_v4 = vand.u32 4294901760, %v5338_v15  ;;  %v4776_v9 = vpop.f32.mrf.mxu2  ;;  %v5784_v18 = vand.u32 4294901760, %v5783_v52  ;;  %v4061_v12 = vadd.f32 %v10360_v53, %v13768_v59 }
 0x722   : > { %v4777_v35 = vadd.f32 %v4776_v9, %v4450_v22  ;;  %6624 = vmatmul.f32.gmra.mxu3 %v13767_v54 }
 0x723   : > { %13766 = vst [vmem:[#allocation62_spill] sm:$0xff] %v11229_v4  ;;  %v11234_v47 = vsub.f32 %v5338_v15, %v11229_v4  ;;  %5785 = vmatmul.f32.gmra.mxu0 %v5784_v18  ;;  %6170 = vmatmul.f32.gmra.mxu1 %v11229_v4 }
 0x724   : > { %v5058_v26 = vadd.f32 %v5057_v0, %v4777_v35  ;;  %v4456_v0 = vadd.f32 %v10354_v8, %v4061_v12 }
 0x725   : > { %v5061_v21 = vpop.f32.mrf.mxu3  ;;  %v12949_v20 = vand.u32 4294901760, %v11234_v47 }
 0x726   : > { %v5168_v50 = vmax.f32 %v5058_v26, 0.0  ;;  %6277 = vmatmul.f32.gmra.mxu2 %v10398_v58  ;;  %v13771_v26 = vand.u32 4294901760, %v10414_v2 }
 0x727   : > { %v5791_v52 = vsub.f32 %v11234_v47, %v12949_v20  ;;  %v13774_v20 = vld [vmem:[#allocation89_spill] sm:$0xff] }
 0x728   : > { %v5341_v15 = vsel %vm2737_vm2, %v5168_v50, 0  ;;  %v11245_v22 = vpop.f32.mrf.mxu0  ;;  %v11247_v9 = vpop.f32.mrf.mxu1  ;;  %v13773_v50 = vld [vmem:[#allocation124_spill] sm:$0xff] }
 0x729   : > { %13769 = vst [vmem:[#allocation58_spill] sm:$0xff] %v11247_v9  ;;  %v11250_v18 = vand.u32 4294901760, %v5341_v15  ;;  %v4780_v53 = vpop.f32.mrf.mxu2  ;;  %v5792_v35 = vand.u32 4294901760, %v5791_v52  ;;  %v4066_v4 = vadd.f32 %v13774_v20, %v13773_v50 }
 0x72a   : > { %v4781_v54 = vadd.f32 %v4780_v53, %v4456_v0  ;;  %6630 = vmatmul.f32.gmra.mxu3 %v13771_v26 }
 0x72b   : > { %13770 = vst [vmem:[#allocation156_spill] sm:$0xff] %v11250_v18  ;;  %v11255_v58 = vsub.f32 %v5341_v15, %v11250_v18  ;;  %5793 = vmatmul.f32.gmra.mxu0 %v5792_v35  ;;  %6174 = vmatmul.f32.gmra.mxu1 %v11250_v18 }
 0x72c   : > { %v5062_v59 = vadd.f32 %v5061_v21, %v4781_v54  ;;  %v13777_v21 = vld [vmem:[#allocation103_spill] sm:$0xff] }
 0x72d   : > { %13772 = vst [vmem:[#allocation157_spill] sm:$0xff] %v11255_v58  ;;  %v5065_v9 = vpop.f32.mrf.mxu3  ;;  %v12954_v8 = vand.u32 4294901760, %v11255_v58  ;;  %v4462_v35 = vadd.f32 %v13777_v21, %v4066_v4 }
 0x72e   : > { %v5169_v12 = vmax.f32 %v5062_v59, 0.0  ;;  %6282 = vmatmul.f32.gmra.mxu2 %v10414_v2  ;;  %v13779_v59 = vld [vmem:[#allocation106_spill] sm:$0xff] }
 0x72f   : > { %v5799_v52 = vsub.f32 %v11255_v58, %v12954_v8  ;;  %v13780_v18 = vand.u32 4294901760, %v13779_v59  ;;  %v13781_v8 = vld [vmem:[#allocation137_spill] sm:$0xff] }
 0x730   : > { %v5344_v15 = vsel %vm2737_vm2, %v5169_v12, 0  ;;  %v11266_v0 = vpop.f32.mrf.mxu0  ;;  %v11268_v53 = vpop.f32.mrf.mxu1 }
 0x731   : > { %13775 = vst [vmem:[#allocation124_spill] sm:$0xff] %v11266_v0  ;;  %v11271_v54 = vand.u32 4294901760, %v5344_v15  ;;  %v4784_v20 = vpop.f32.mrf.mxu2  ;;  %v5800_v26 = vand.u32 4294901760, %v5799_v52  ;;  %v13782_v0 = vld [vmem:[#allocation96_spill] sm:$0xff] }
 0x732   : > { %13776 = vst [vmem:[#allocation89_spill] sm:$0xff] %v11268_v53  ;;  %v4785_v50 = vadd.f32 %v4784_v20, %v4462_v35  ;;  %6636 = vmatmul.f32.gmra.mxu3 %v13780_v18  ;;  %v4071_v53 = vadd.f32 %v13782_v0, %v13781_v8 }
 0x733   : > { %13778 = vst [vmem:[#allocation103_spill] sm:$0xff] %v11271_v54  ;;  %v11276_v2 = vsub.f32 %v5344_v15, %v11271_v54  ;;  %5801 = vmatmul.f32.gmra.mxu0 %v5800_v26  ;;  %6178 = vmatmul.f32.gmra.mxu1 %v11271_v54  ;;  %v13789_v54 = vld [vmem:[#allocation99_spill] sm:$0xff] }
 0x734   : > { %v5066_v12 = vadd.f32 %v5065_v9, %v4785_v50  ;;  %v13785_v9 = vld [vmem:[#allocation85_spill] sm:$0xff] }
 0x735   : > { %v5069_v58 = vpop.f32.mrf.mxu3  ;;  %v12957_v4 = vand.u32 4294901760, %v11276_v2  ;;  %v4468_v20 = vadd.f32 %v13785_v9, %v4071_v53 }
 0x736   : > { %v5170_v21 = vmax.f32 %v5066_v12, 0.0  ;;  %6287 = vmatmul.f32.gmra.mxu2 %v13779_v59  ;;  %v13787_v12 = vand.u32 4294901760, %v10448_v16 }
 0x737   : > { %v5807_v18 = vsub.f32 %v11276_v2, %v12957_v4  ;;  %v13788_v4 = vld [vmem:[#allocation82_spill] sm:$0xff] }
 0x738   : > { %v5347_v52 = vsel %vm2737_vm2, %v5170_v21, 0  ;;  %v11287_v15 = vpop.f32.mrf.mxu0  ;;  %v11289_v35 = vpop.f32.mrf.mxu1 }
 0x739   : > { %13783 = vst [vmem:[#allocation106_spill] sm:$0xff] %v11287_v15  ;;  %v11292_v26 = vand.u32 4294901760, %v5347_v52  ;;  %v4788_v8 = vpop.f32.mrf.mxu2  ;;  %v5808_v0 = vand.u32 4294901760, %v5807_v18 }
 0x73a   : > { %13784 = vst [vmem:[#allocation137_spill] sm:$0xff] %v11289_v35  ;;  %v4789_v50 = vadd.f32 %v4788_v8, %v4468_v20  ;;  %6642 = vmatmul.f32.gmra.mxu3 %v13787_v12  ;;  %v4076_v35 = vadd.f32 %v13789_v54, %v13788_v4 }
 0x73b   : > { %13786 = vst [vmem:[#allocation96_spill] sm:$0xff] %v11292_v26  ;;  %v11297_v59 = vsub.f32 %v5347_v52, %v11292_v26  ;;  %5809 = vmatmul.f32.gmra.mxu0 %v5808_v0  ;;  %6182 = vmatmul.f32.gmra.mxu1 %v11292_v26  ;;  %v13796_v26 = vld [vmem:[#allocation127_spill] sm:$0xff] }
 0x73c   : > { %v5070_v21 = vadd.f32 %v5069_v58, %v4789_v50  ;;  %v13792_v58 = vld [vmem:[#allocation115_spill] sm:$0xff] }
 0x73d   : > { %v5073_v15 = vpop.f32.mrf.mxu3  ;;  %v12960_v53 = vand.u32 4294901760, %v11297_v59  ;;  %v4474_v0 = vadd.f32 %v13792_v58, %v4076_v35 }
 0x73e   : > { %v5171_v9 = vmax.f32 %v5070_v21, 0.0  ;;  %6292 = vmatmul.f32.gmra.mxu2 %v10448_v16  ;;  %v13794_v21 = vand.u32 4294901760, %v10466_v3 }
 0x73f   : > { %v5815_v18 = vsub.f32 %v11297_v59, %v12960_v53  ;;  %v13795_v53 = vld [vmem:[#allocation69_spill] sm:$0xff] }
 0x740   : > { %v5350_v52 = vsel %vm2737_vm2, %v5171_v9, 0  ;;  %v11308_v20 = vpop.f32.mrf.mxu0  ;;  %v11310_v8 = vpop.f32.mrf.mxu1 }
 0x741   : > { %13790 = vst [vmem:[#allocation85_spill] sm:$0xff] %v11308_v20  ;;  %v11313_v50 = vand.u32 4294901760, %v5350_v52  ;;  %v4792_v54 = vpop.f32.mrf.mxu2  ;;  %v5816_v4 = vand.u32 4294901760, %v5815_v18 }
 0x742   : > { %13791 = vst [vmem:[#allocation82_spill] sm:$0xff] %v11310_v8  ;;  %v4793_v12 = vadd.f32 %v4792_v54, %v4474_v0  ;;  %6648 = vmatmul.f32.gmra.mxu3 %v13794_v21  ;;  %v4081_v8 = vadd.f32 %v13796_v26, %v13795_v53 }
 0x743   : > { %13793 = vst [vmem:[#allocation99_spill] sm:$0xff] %v11313_v50  ;;  %v11318_v16 = vsub.f32 %v5350_v52, %v11313_v50  ;;  %5817 = vmatmul.f32.gmra.mxu0 %v5816_v4  ;;  %6186 = vmatmul.f32.gmra.mxu1 %v11313_v50  ;;  %v13804_v50 = vld [vmem:[#allocation45_spill] sm:$0xff] }
 0x744   : > { %v5074_v9 = vadd.f32 %v5073_v15, %v4793_v12  ;;  %v13799_v15 = vld [vmem:[#allocation119_spill] sm:$0xff] }
 0x745   : > { %v5077_v20 = vpop.f32.mrf.mxu3  ;;  %v12963_v35 = vand.u32 4294901760, %v11318_v16  ;;  %v4480_v4 = vadd.f32 %v13799_v15, %v4081_v8 }
 0x746   : > { %v5172_v58 = vmax.f32 %v5074_v9, 0.0  ;;  %6297 = vmatmul.f32.gmra.mxu2 %v10466_v3  ;;  %v13801_v9 = vand.u32 4294901760, %v10484_v23 }
 0x747   : > { %v5823_v18 = vsub.f32 %v11318_v16, %v12963_v35  ;;  %v13803_v35 = vld [vmem:[#allocation147_spill] sm:$0xff] }
 0x748   : > { %v5353_v52 = vsel %vm2737_vm2, %v5172_v58, 0  ;;  %v11329_v0 = vpop.f32.mrf.mxu0  ;;  %v11331_v54 = vpop.f32.mrf.mxu1 }
 0x749   : > { %13797 = vst [vmem:[#allocation115_spill] sm:$0xff] %v11329_v0  ;;  %v11334_v12 = vand.u32 4294901760, %v5353_v52  ;;  %v4796_v26 = vpop.f32.mrf.mxu2  ;;  %v5824_v53 = vand.u32 4294901760, %v5823_v18 }
 0x74a   : > { %13798 = vst [vmem:[#allocation69_spill] sm:$0xff] %v11331_v54  ;;  %v4797_v21 = vadd.f32 %v4796_v26, %v4480_v4  ;;  %6654 = vmatmul.f32.gmra.mxu3 %v13801_v9  ;;  %v4086_v54 = vadd.f32 %v13804_v50, %v13803_v35 }
 0x74b   : > { %13800 = vst [vmem:[#allocation127_spill] sm:$0xff] %v11334_v12  ;;  %v11339_v3 = vsub.f32 %v5353_v52, %v11334_v12  ;;  %5825 = vmatmul.f32.gmra.mxu0 %v5824_v53  ;;  %6190 = vmatmul.f32.gmra.mxu1 %v11334_v12  ;;  %v13812_v12 = vld [vmem:[#allocation118_spill] sm:$0xff] }
 0x74c   : > { %v5078_v58 = vadd.f32 %v5077_v20, %v4797_v21  ;;  %v13807_v20 = vld [vmem:[#allocation116_spill] sm:$0xff] }
 0x74d   : > { %13802 = vst [vmem:[#allocation119_spill] sm:$0xff] %v11339_v3  ;;  %v5081_v0 = vpop.f32.mrf.mxu3  ;;  %v12966_v8 = vand.u32 4294901760, %v11339_v3  ;;  %v4486_v53 = vadd.f32 %v13807_v20, %v4086_v54 }
 0x74e   : > { %v5173_v15 = vmax.f32 %v5078_v58, 0.0  ;;  %6302 = vmatmul.f32.gmra.mxu2 %v10484_v23  ;;  %v13809_v58 = vand.u32 4294901760, %v10500_v56 }
 0x74f   : > { %v5831_v18 = vsub.f32 %v11339_v3, %v12966_v8  ;;  %v13811_v8 = vld [vmem:[#allocation136_spill] sm:$0xff] }
 0x750   : > { %v5356_v52 = vsel %vm2737_vm2, %v5173_v15, 0  ;;  %v11350_v4 = vpop.f32.mrf.mxu0  ;;  %v11352_v26 = vpop.f32.mrf.mxu1 }
 0x751   : > { %13805 = vst [vmem:[#allocation147_spill] sm:$0xff] %v11350_v4  ;;  %v11355_v21 = vand.u32 4294901760, %v5356_v52  ;;  %v4800_v50 = vpop.f32.mrf.mxu2  ;;  %v5832_v35 = vand.u32 4294901760, %v5831_v18 }
 0x752   : > { %13806 = vst [vmem:[#allocation45_spill] sm:$0xff] %v11352_v26  ;;  %v4801_v9 = vadd.f32 %v4800_v50, %v4486_v53  ;;  %6660 = vmatmul.f32.gmra.mxu3 %v13809_v58  ;;  %v4091_v26 = vadd.f32 %v13812_v12, %v13811_v8 }
 0x753   : > { %13808 = vst [vmem:[#allocation116_spill] sm:$0xff] %v11355_v21  ;;  %v11360_v23 = vsub.f32 %v5356_v52, %v11355_v21  ;;  %5833 = vmatmul.f32.gmra.mxu0 %v5832_v35  ;;  %6194 = vmatmul.f32.gmra.mxu1 %v11355_v21  ;;  %v13820_v21 = vld [vmem:[#allocation125_spill] sm:$0xff] }
 0x754   : > { %v5082_v15 = vadd.f32 %v5081_v0, %v4801_v9  ;;  %v13815_v0 = vld [vmem:[#allocation129_spill] sm:$0xff] }
 0x755   : > { %13810 = vst [vmem:[#allocation158_spill] sm:$0xff] %v11360_v23  ;;  %v5085_v4 = vpop.f32.mrf.mxu3  ;;  %v12969_v54 = vand.u32 4294901760, %v11360_v23  ;;  %v4492_v35 = vadd.f32 %v13815_v0, %v4091_v26 }
 0x756   : > { %v5174_v20 = vmax.f32 %v5082_v15, 0.0  ;;  %6307 = vmatmul.f32.gmra.mxu2 %v10500_v56  ;;  %v13817_v15 = vand.u32 4294901760, %v10516_v24 }
 0x757   : > { %v5839_v18 = vsub.f32 %v11360_v23, %v12969_v54  ;;  %v13819_v54 = vld [vmem:[#allocation88_spill] sm:$0xff] }
 0x758   : > { %v5359_v52 = vsel %vm2737_vm2, %v5174_v20, 0  ;;  %v11371_v53 = vpop.f32.mrf.mxu0  ;;  %v11373_v50 = vpop.f32.mrf.mxu1 }
 0x759   : > { %13813 = vst [vmem:[#allocation136_spill] sm:$0xff] %v11371_v53  ;;  %v11376_v9 = vand.u32 4294901760, %v5359_v52  ;;  %v4804_v12 = vpop.f32.mrf.mxu2  ;;  %v5840_v8 = vand.u32 4294901760, %v5839_v18 }
 0x75a   : > { %13814 = vst [vmem:[#allocation118_spill] sm:$0xff] %v11373_v50  ;;  %v4805_v58 = vadd.f32 %v4804_v12, %v4492_v35  ;;  %6666 = vmatmul.f32.gmra.mxu3 %v13817_v15  ;;  %v4096_v50 = vadd.f32 %v13820_v21, %v13819_v54 }
 0x75b   : > { %13816 = vst [vmem:[#allocation129_spill] sm:$0xff] %v11376_v9  ;;  %v11381_v56 = vsub.f32 %v5359_v52, %v11376_v9  ;;  %5841 = vmatmul.f32.gmra.mxu0 %v5840_v8  ;;  %6198 = vmatmul.f32.gmra.mxu1 %v11376_v9  ;;  %v13828_v9 = vld [vmem:[#allocation38_spill] sm:$0xff] }
 0x75c   : > { %v5086_v20 = vadd.f32 %v5085_v4, %v4805_v58  ;;  %v13823_v4 = vld [vmem:[#allocation130_spill] sm:$0xff] }
 0x75d   : > { %13818 = vst [vmem:[#allocation159_spill] sm:$0xff] %v11381_v56  ;;  %v5089_v53 = vpop.f32.mrf.mxu3  ;;  %v12972_v26 = vand.u32 4294901760, %v11381_v56  ;;  %v4498_v8 = vadd.f32 %v13823_v4, %v4096_v50 }
 0x75e   : > { %v5175_v0 = vmax.f32 %v5086_v20, 0.0  ;;  %6312 = vmatmul.f32.gmra.mxu2 %v10516_v24  ;;  %v13825_v20 = vand.u32 4294901760, %v10534_v41 }
 0x75f   : > { %v5847_v18 = vsub.f32 %v11381_v56, %v12972_v26  ;;  %v13827_v26 = vld [vmem:[#allocation76_spill] sm:$0xff]  ;;  %v13959_v56 = vld [vmem:[#allocation46_spill] sm:$0xff] }
 0x760   : > { %v5362_v52 = vsel %vm2737_vm2, %v5175_v0, 0  ;;  %v11392_v35 = vpop.f32.mrf.mxu0  ;;  %v11394_v12 = vpop.f32.mrf.mxu1 }
 0x761   : > { %13821 = vst [vmem:[#allocation88_spill] sm:$0xff] %v11392_v35  ;;  %v11397_v58 = vand.u32 4294901760, %v5362_v52  ;;  %v4808_v21 = vpop.f32.mrf.mxu2  ;;  %v5848_v54 = vand.u32 4294901760, %v5847_v18 }
 0x762   : > { %13822 = vst [vmem:[#allocation125_spill] sm:$0xff] %v11394_v12  ;;  %v4809_v15 = vadd.f32 %v4808_v21, %v4498_v8  ;;  %6672 = vmatmul.f32.gmra.mxu3 %v13825_v20  ;;  %v4101_v12 = vadd.f32 %v13828_v9, %v13827_v26 }
 0x763   : > { %13824 = vst [vmem:[#allocation130_spill] sm:$0xff] %v11397_v58  ;;  %v11402_v24 = vsub.f32 %v5362_v52, %v11397_v58  ;;  %5849 = vmatmul.f32.gmra.mxu0 %v5848_v54  ;;  %6202 = vmatmul.f32.gmra.mxu1 %v11397_v58 }
 0x764   : > { %v5090_v0 = vadd.f32 %v5089_v53, %v4809_v15  ;;  %v13831_v53 = vld [vmem:[#allocation40_spill] sm:$0xff] }
 0x765   : > { %13826 = vst [vmem:[#allocation160_spill] sm:$0xff] %v11402_v24  ;;  %v5093_v35 = vpop.f32.mrf.mxu3  ;;  %v12977_v50 = vand.u32 4294901760, %v11402_v24  ;;  %v4504_v54 = vadd.f32 %v13831_v53, %v4101_v12 }
 0x766   : > { %v5176_v4 = vmax.f32 %v5090_v0, 0.0  ;;  %6317 = vmatmul.f32.gmra.mxu2 %v10534_v41  ;;  %v13833_v0 = vld [vmem:[#allocation43_spill] sm:$0xff] }
 0x767   : > { %v5855_v18 = vsub.f32 %v11402_v24, %v12977_v50  ;;  %v13834_v58 = vand.u32 4294901760, %v13833_v0  ;;  %v13836_v50 = vld [vmem:[#allocation72_spill] sm:$0xff] }
 0x768   : > { %v5365_v52 = vsel %vm2737_vm2, %v5176_v4, 0  ;;  %v11413_v8 = vpop.f32.mrf.mxu0  ;;  %v11415_v21 = vpop.f32.mrf.mxu1 }
 0x769   : > { %13829 = vst [vmem:[#allocation76_spill] sm:$0xff] %v11413_v8  ;;  %v11418_v15 = vand.u32 4294901760, %v5365_v52  ;;  %v4812_v9 = vpop.f32.mrf.mxu2  ;;  %v5856_v26 = vand.u32 4294901760, %v5855_v18  ;;  %v13837_v8 = vld [vmem:[#allocation133_spill] sm:$0xff] }
 0x76a   : > { %13830 = vst [vmem:[#allocation38_spill] sm:$0xff] %v11415_v21  ;;  %v4813_v20 = vadd.f32 %v4812_v9, %v4504_v54  ;;  %6678 = vmatmul.f32.gmra.mxu3 %v13834_v58  ;;  %v4106_v21 = vadd.f32 %v13837_v8, %v13836_v50 }
 0x76b   : > { %13832 = vst [vmem:[#allocation40_spill] sm:$0xff] %v11418_v15  ;;  %v11423_v41 = vsub.f32 %v5365_v52, %v11418_v15  ;;  %5857 = vmatmul.f32.gmra.mxu0 %v5856_v26  ;;  %6206 = vmatmul.f32.gmra.mxu1 %v11418_v15 }
 0x76c   : > { %v5094_v4 = vadd.f32 %v5093_v35, %v4813_v20  ;;  %v13840_v35 = vld [vmem:[#allocation132_spill] sm:$0xff] }
 0x76d   : > { %13835 = vst [vmem:[#allocation43_spill] sm:$0xff] %v11423_v41  ;;  %v5097_v24 = vpop.f32.mrf.mxu3  ;;  %v12982_v12 = vand.u32 4294901760, %v11423_v41  ;;  %v4510_v9 = vadd.f32 %v13840_v35, %v4106_v21 }
 0x76e   : > { %v5177_v53 = vmax.f32 %v5094_v4, 0.0  ;;  %6322 = vmatmul.f32.gmra.mxu2 %v13833_v0  ;;  %v13842_v4 = vld [vmem:[#allocation56_spill] sm:$0xff] }
 0x76f   : > { %v5863_v58 = vsub.f32 %v11423_v41, %v12982_v12  ;;  %v13843_v15 = vand.u32 4294901760, %v13842_v4  ;;  %v13845_v12 = vld [vmem:[#allocation146_spill] sm:$0xff] }
 0x770   : > { %v5368_v18 = vsel %vm2737_vm2, %v5177_v53, 0  ;;  %v11434_v52 = vpop.f32.mrf.mxu0  ;;  %v11436_v54 = vpop.f32.mrf.mxu1 }
 0x771   : > { %13838 = vst [vmem:[#allocation72_spill] sm:$0xff] %v11434_v52  ;;  %v11439_v26 = vand.u32 4294901760, %v5368_v18  ;;  %v4816_v50 = vpop.f32.mrf.mxu2  ;;  %v5864_v8 = vand.u32 4294901760, %v5863_v58  ;;  %v13846_v52 = vld [vmem:[#allocation138_spill] sm:$0xff] }
 0x772   : > { %13839 = vst [vmem:[#allocation133_spill] sm:$0xff] %v11436_v54  ;;  %v4817_v20 = vadd.f32 %v4816_v50, %v4510_v9  ;;  %6684 = vmatmul.f32.gmra.mxu3 %v13843_v15  ;;  %v4111_v54 = vadd.f32 %v13846_v52, %v13845_v12 }
 0x773   : > { %13841 = vst [vmem:[#allocation132_spill] sm:$0xff] %v11439_v26  ;;  %v11444_v0 = vsub.f32 %v5368_v18, %v11439_v26  ;;  %5865 = vmatmul.f32.gmra.mxu0 %v5864_v8  ;;  %6210 = vmatmul.f32.gmra.mxu1 %v11439_v26 }
 0x774   : > { %v5098_v53 = vadd.f32 %v5097_v24, %v4817_v20  ;;  %v13849_v24 = vld [vmem:[#allocation134_spill] sm:$0xff] }
 0x775   : > { %13844 = vst [vmem:[#allocation56_spill] sm:$0xff] %v11444_v0  ;;  %v5101_v41 = vpop.f32.mrf.mxu3  ;;  %v12987_v21 = vand.u32 4294901760, %v11444_v0  ;;  %v4516_v50 = vadd.f32 %v13849_v24, %v4111_v54 }
 0x776   : > { %v5178_v35 = vmax.f32 %v5098_v53, 0.0  ;;  %6327 = vmatmul.f32.gmra.mxu2 %v13842_v4  ;;  %v13851_v53 = vld [vmem:[#allocation142_spill] sm:$0xff] }
 0x777   : > { %v5871_v15 = vsub.f32 %v11444_v0, %v12987_v21  ;;  %v13852_v26 = vand.u32 4294901760, %v13851_v53  ;;  %v13854_v21 = vld [vmem:[#allocation52_spill] sm:$0xff] }
 0x778   : > { %v5371_v58 = vsel %vm2737_vm2, %v5178_v35, 0  ;;  %v11455_v18 = vpop.f32.mrf.mxu0  ;;  %v11457_v9 = vpop.f32.mrf.mxu1 }
 0x779   : > { %13847 = vst [vmem:[#allocation146_spill] sm:$0xff] %v11455_v18  ;;  %v11460_v8 = vand.u32 4294901760, %v5371_v58  ;;  %v4820_v12 = vpop.f32.mrf.mxu2  ;;  %v5872_v52 = vand.u32 4294901760, %v5871_v15  ;;  %v13855_v18 = vld [vmem:[#allocation141_spill] sm:$0xff] }
 0x77a   : > { %13848 = vst [vmem:[#allocation138_spill] sm:$0xff] %v11457_v9  ;;  %v4821_v20 = vadd.f32 %v4820_v12, %v4516_v50  ;;  %6690 = vmatmul.f32.gmra.mxu3 %v13852_v26  ;;  %v4116_v9 = vadd.f32 %v13855_v18, %v13854_v21 }
 0x77b   : > { %13850 = vst [vmem:[#allocation134_spill] sm:$0xff] %v11460_v8  ;;  %v11465_v4 = vsub.f32 %v5371_v58, %v11460_v8  ;;  %5873 = vmatmul.f32.gmra.mxu0 %v5872_v52  ;;  %6214 = vmatmul.f32.gmra.mxu1 %v11460_v8 }
 0x77c   : > { %v5102_v35 = vadd.f32 %v5101_v41, %v4821_v20  ;;  %v13858_v41 = vld [vmem:[#allocation139_spill] sm:$0xff] }
 0x77d   : > { %13853 = vst [vmem:[#allocation142_spill] sm:$0xff] %v11465_v4  ;;  %v5105_v0 = vpop.f32.mrf.mxu3  ;;  %v12990_v54 = vand.u32 4294901760, %v11465_v4  ;;  %v4522_v12 = vadd.f32 %v13858_v41, %v4116_v9 }
 0x77e   : > { %v5179_v24 = vmax.f32 %v5102_v35, 0.0  ;;  %6332 = vmatmul.f32.gmra.mxu2 %v13851_v53  ;;  %v13860_v35 = vand.u32 4294901760, %v10602_v42 }
 0x77f   : > { %v5879_v26 = vsub.f32 %v11465_v4, %v12990_v54  ;;  %v13862_v54 = vld [vmem:[#allocation95_spill] sm:$0xff] }
 0x780   : > { %v5374_v15 = vsel %vm2737_vm2, %v5179_v24, 0  ;;  %v11476_v58 = vpop.f32.mrf.mxu0  ;;  %v11478_v50 = vpop.f32.mrf.mxu1  ;;  %v13952_v4 = vld [vmem:[#allocation131_spill] sm:$0xff] }
 0x781   : > { %13856 = vst [vmem:[#allocation52_spill] sm:$0xff] %v11476_v58  ;;  %v11481_v52 = vand.u32 4294901760, %v5374_v15  ;;  %v4824_v21 = vpop.f32.mrf.mxu2  ;;  %v5880_v18 = vand.u32 4294901760, %v5879_v26 }
 0x782   : > { %13857 = vst [vmem:[#allocation141_spill] sm:$0xff] %v11478_v50  ;;  %v4825_v20 = vadd.f32 %v4824_v21, %v4522_v12  ;;  %6696 = vmatmul.f32.gmra.mxu3 %v13860_v35  ;;  %v4121_v50 = vadd.f32 %v10605_v39, %v13862_v54 }
 0x783   : > { %13859 = vst [vmem:[#allocation139_spill] sm:$0xff] %v11481_v52  ;;  %v11486_v53 = vsub.f32 %v5374_v15, %v11481_v52  ;;  %5881 = vmatmul.f32.gmra.mxu0 %v5880_v18  ;;  %6218 = vmatmul.f32.gmra.mxu1 %v11481_v52 }
 0x784   : > { %v5106_v24 = vadd.f32 %v5105_v0, %v4825_v20  ;;  %v13865_v0 = vld [vmem:[#allocation143_spill] sm:$0xff] }
 0x785   : > { %13861 = vst [vmem:[#allocation161_spill] sm:$0xff] %v11486_v53  ;;  %v5109_v8 = vpop.f32.mrf.mxu3  ;;  %v12993_v9 = vand.u32 4294901760, %v11486_v53  ;;  %v4528_v18 = vadd.f32 %v13865_v0, %v4121_v50 }
 0x786   : > { %v5180_v41 = vmax.f32 %v5106_v24, 0.0  ;;  %6337 = vmatmul.f32.gmra.mxu2 %v10602_v42  ;;  %v13867_v24 = vand.u32 4294901760, %v10620_v34 }
 0x787   : > { %v5887_v26 = vsub.f32 %v11486_v53, %v12993_v9  ;;  %v13869_v9 = vld [vmem:[#allocation83_spill] sm:$0xff]  ;;  %v13945_v53 = vld [vmem:[#allocation128_spill] sm:$0xff] }
 0x788   : > { %v5377_v15 = vsel %vm2737_vm2, %v5180_v41, 0  ;;  %v11497_v12 = vpop.f32.mrf.mxu0  ;;  %v11499_v21 = vpop.f32.mrf.mxu1 }
 0x789   : > { %13863 = vst [vmem:[#allocation95_spill] sm:$0xff] %v11497_v12  ;;  %v11502_v20 = vand.u32 4294901760, %v5377_v15  ;;  %v4828_v39 = vpop.f32.mrf.mxu2  ;;  %v5888_v54 = vand.u32 4294901760, %v5887_v26 }
 0x78a   : > { %13864 = vst [vmem:[#allocation162_spill] sm:$0xff] %v11499_v21  ;;  %v4829_v35 = vadd.f32 %v4828_v39, %v4528_v18  ;;  %6702 = vmatmul.f32.gmra.mxu3 %v13867_v24  ;;  %v4126_v21 = vadd.f32 %v10624_v32, %v13869_v9 }
 0x78b   : > { %13866 = vst [vmem:[#allocation143_spill] sm:$0xff] %v11502_v20  ;;  %v11507_v42 = vsub.f32 %v5377_v15, %v11502_v20  ;;  %5889 = vmatmul.f32.gmra.mxu0 %v5888_v54  ;;  %6222 = vmatmul.f32.gmra.mxu1 %v11502_v20  ;;  %v13877_v20 = vld [vmem:[#allocation153_spill] sm:$0xff] }
 0x78c   : > { %v5110_v41 = vadd.f32 %v5109_v8, %v4829_v35  ;;  %v13872_v8 = vld [vmem:[#allocation145_spill] sm:$0xff] }
 0x78d   : > { %13868 = vst [vmem:[#allocation163_spill] sm:$0xff] %v11507_v42  ;;  %v5113_v52 = vpop.f32.mrf.mxu3  ;;  %v12996_v50 = vand.u32 4294901760, %v11507_v42  ;;  %v4534_v54 = vadd.f32 %v13872_v8, %v4126_v21 }
 0x78e   : > { %v5181_v0 = vmax.f32 %v5110_v41, 0.0  ;;  %6342 = vmatmul.f32.gmra.mxu2 %v10620_v34  ;;  %v13874_v41 = vand.u32 4294901760, %v10638_v37 }
 0x78f   : > { %v5895_v26 = vsub.f32 %v11507_v42, %v12996_v50  ;;  %v13876_v50 = vld [vmem:[#allocation79_spill] sm:$0xff]  ;;  %v13938_v42 = vld [vmem:[#allocation42_spill] sm:$0xff] }
 0x790   : > { %v5380_v15 = vsel %vm2737_vm2, %v5181_v0, 0  ;;  %v11518_v18 = vpop.f32.mrf.mxu0  ;;  %v11520_v39 = vpop.f32.mrf.mxu1 }
 0x791   : > { %13870 = vst [vmem:[#allocation83_spill] sm:$0xff] %v11518_v18  ;;  %v11523_v35 = vand.u32 4294901760, %v5380_v15  ;;  %v4832_v32 = vpop.f32.mrf.mxu2  ;;  %v5896_v9 = vand.u32 4294901760, %v5895_v26 }
 0x792   : > { %13871 = vst [vmem:[#allocation164_spill] sm:$0xff] %v11520_v39  ;;  %v4833_v24 = vadd.f32 %v4832_v32, %v4534_v54  ;;  %6708 = vmatmul.f32.gmra.mxu3 %v13874_v41  ;;  %v4131_v39 = vadd.f32 %v13877_v20, %v13876_v50  ;;  %v13880_v50 = vld [vmem:[#allocation149_spill] sm:$0xff] }
 0x793   : > { %13873 = vst [vmem:[#allocation145_spill] sm:$0xff] %v11523_v35  ;;  %v11528_v34 = vsub.f32 %v5380_v15, %v11523_v35  ;;  %5897 = vmatmul.f32.gmra.mxu0 %v5896_v9  ;;  %6226 = vmatmul.f32.gmra.mxu1 %v11523_v35  ;;  %v11541_v15 = vld [vmem:[%s12409_s6] ss:$0 sm:$0xff] }
 0x794   : > { %v5114_v0 = vadd.f32 %v5113_v52, %v4833_v24  ;;  %v4540_v32 = vadd.f32 %v13880_v50, %v4131_v39 }
 0x795   : > { %13875 = vst [vmem:[#allocation165_spill] sm:$0xff] %v11528_v34  ;;  %v5117_v18 = vpop.f32.mrf.mxu3  ;;  %v12999_v21 = vand.u32 4294901760, %v11528_v34 }
 0x796   : > { %v5182_v8 = vmax.f32 %v5114_v0, 0.0  ;;  %6347 = vmatmul.f32.gmra.mxu2 %v10638_v37  ;;  %v13882_v0 = vand.u32 4294901760, %v10656_v17 }
 0x797   : > { %v5903_v26 = vsub.f32 %v11528_v34, %v12999_v21  ;;  %v13931_v34 = vld [vmem:[#allocation121_spill] sm:$0xff] }
 0x798   : > { %v5383_v52 = vsel %vm2737_vm2, %v5182_v8, 0  ;;  %v11544_v54 = vpop.f32.mrf.mxu0  ;;  %v11546_v20 = vpop.f32.mrf.mxu1  ;;  %v13884_v8 = vld [vmem:[#allocation67_spill] sm:$0xff] }
 0x799   : > { %13878 = vst [vmem:[#allocation79_spill] sm:$0xff] %v11544_v54  ;;  %v11549_v9 = vand.u32 4294901760, %v5383_v52  ;;  %v4836_v37 = vpop.f32.mrf.mxu2  ;;  %v5904_v24 = vand.u32 4294901760, %v5903_v26  ;;  %v5419_v35 = vadd.f32 %v11541_v15, %v13884_v8 }
 0x79a   : > { %13879 = vst [vmem:[#allocation153_spill] sm:$0xff] %v11546_v20  ;;  %v4837_v41 = vadd.f32 %v4836_v37, %v4540_v32  ;;  %6714 = vmatmul.f32.gmra.mxu3 %v13882_v0 }
 0x79b   : > { %13881 = vst [vmem:[#allocation149_spill] sm:$0xff] %v11549_v9  ;;  %v11554_v21 = vsub.f32 %v5383_v52, %v11549_v9  ;;  %5905 = vmatmul.f32.gmra.mxu0 %v5904_v24  ;;  %6230 = vmatmul.f32.gmra.mxu1 %v11549_v9  ;;  %v13887_v24 = vld [vmem:[#allocation66_spill] sm:$0xff] }
 0x79c   : > { %v5118_v20 = vadd.f32 %v5117_v18, %v4837_v41  ;;  %v5984_v0 = vadd.f32 %v13887_v24, %v5419_v35 }
 0x79d   : > { %13883 = vst [vmem:[#allocation166_spill] sm:$0xff] %v11554_v21  ;;  %v6619_v54 = vpop.f32.mrf.mxu3  ;;  %v13004_v39 = vand.u32 4294901760, %v11554_v21 }
 0x79e   : > { %v5183_v50 = vmax.f32 %v5118_v20, 0.0  ;;  %6352 = vmatmul.f32.gmra.mxu2 %v10656_v17  ;;  %v13889_v20 = vld [vmem:[#allocation91_spill] sm:$0xff] }
 0x79f   : > { %v5911_v26 = vsub.f32 %v11554_v21, %v13004_v39  ;;  %v13890_v12 = vand.u32 4294901760, %v13889_v20 }
 0x7a0   : > { %v5386_v52 = vsel %vm2737_vm2, %v5183_v50, 0  ;;  %v11565_v32 = vpop.f32.mrf.mxu0  ;;  %v11567_v37 = vpop.f32.mrf.mxu1  ;;  %v13892_v50 = vld [vmem:[#allocation53_spill] sm:$0xff] }
 0x7a1   : > { %13885 = vst [vmem:[#allocation67_spill] sm:$0xff] %v11565_v32  ;;  %v11570_v8 = vand.u32 4294901760, %v5386_v52  ;;  %v6273_v18 = vpop.f32.mrf.mxu2  ;;  %v5912_v41 = vand.u32 4294901760, %v5911_v26  ;;  %v5427_v39 = vadd.f32 %v11541_v15, %v13892_v50  ;;  %v13898_v32 = vld [vmem:[#allocation108_spill] sm:$0xff] }
 0x7a2   : > { %13886 = vst [vmem:[#allocation167_spill] sm:$0xff] %v11567_v37  ;;  %v6274_v9 = vadd.f32 %v6273_v18, %v5984_v0  ;;  %6720 = vmatmul.f32.gmra.mxu3 %v13890_v12  ;;  %v13895_v0 = vld [vmem:[#allocation80_spill] sm:$0xff] }
 0x7a3   : > { %13888 = vst [vmem:[#allocation66_spill] sm:$0xff] %v11570_v8  ;;  %v11575_v17 = vsub.f32 %v5386_v52, %v11570_v8  ;;  %5913 = vmatmul.f32.gmra.mxu0 %v5912_v41  ;;  %6234 = vmatmul.f32.gmra.mxu1 %v11570_v8  ;;  %v5988_v18 = vadd.f32 %v13895_v0, %v5427_v39 }
 0x7a4   : > { %v11580_v37 = vadd.f32 %v6619_v54, %v6274_v9  ;;  %v13896_v54 = vld [vmem:[#allocation57_spill] sm:$0xff] }
 0x7a5   : > { %13891 = vst [vmem:[#allocation91_spill] sm:$0xff] %v11575_v17  ;;  %v6625_v35 = vpop.f32.mrf.mxu3  ;;  %v13009_v24 = vand.u32 4294901760, %v11575_v17  ;;  %v13897_v9 = vand.u32 4294901760, %v13896_v54 }
 0x7a6   : > { %6357 = vmatmul.f32.gmra.mxu2 %v13889_v20  ;;  %v13899_v20 = vld [vmem:[#allocation73_spill] sm:$0xff] }
 0x7a7   : > { %v5919_v12 = vsub.f32 %v11575_v17, %v13009_v24  ;;  %v5435_v58 = vadd.f32 %v11541_v15, %v13899_v20  ;;  %v13924_v17 = vld [vmem:[#allocation113_spill] sm:$0xff] }
 0x7a8   : > { %v11587_v26 = vpop.f32.mrf.mxu0  ;;  %v11589_v52 = vpop.f32.mrf.mxu1 }
 0x7a9   : > { %13893 = vst [vmem:[#allocation53_spill] sm:$0xff] %v11587_v26  ;;  %v6278_v41 = vpop.f32.mrf.mxu2  ;;  %v5920_v8 = vand.u32 4294901760, %v5919_v12  ;;  %v13902_v12 = vld [vmem:[#allocation50_spill] sm:$0xff]  ;;  %v13905_v26 = vld [vmem:[#allocation92_spill] sm:$0xff] }
 0x7aa   : > { %13894 = vst [vmem:[#allocation168_spill] sm:$0xff] %v11589_v52  ;;  %v6279_v50 = vadd.f32 %v6278_v41, %v5988_v18  ;;  %6726 = vmatmul.f32.gmra.mxu3 %v13897_v9  ;;  %v5992_v0 = vadd.f32 %v13902_v12, %v5435_v58  ;;  %v13903_v9 = vld [vmem:[#allocation77_spill] sm:$0xff]  ;;  %v13909_v12 = vld [vmem:[#allocation70_spill] sm:$0xff] }
 0x7ab   : > { %5921 = vmatmul.f32.gmra.mxu0 %v5920_v8  ;;  %7322 = vmatmul.f32.vlgmr.msra.gmra.mxu1 %v13898_v32  ;;  %v13904_v8 = vand.u32 4294901760, %v13903_v9 }
 0x7ac   : > { %v11597_v21 = vadd.f32 %v6625_v35, %v6279_v50  ;;  %v13906_v35 = vld [vmem:[#allocation71_spill] sm:$0xff] }
 0x7ad   : > { %v6631_v24 = vpop.f32.mrf.mxu3  ;;  %v5443_v50 = vadd.f32 %v11541_v15, %v13906_v35 }
 0x7ae   : > { %6362 = vmatmul.f32.gmra.mxu2 %v13896_v54 }
 0x7b0   : > { %v11600_v52 = vpop.f32.mrf.mxu0  ;;  %v11602_v39 = vpop.f32.mrf.mxu1 }
 0x7b1   : > { %13900 = vst [vmem:[#allocation80_spill] sm:$0xff] %v11600_v52  ;;  %v6283_v18 = vpop.f32.mrf.mxu2  ;;  %v13911_v52 = vld [vmem:[#allocation102_spill] sm:$0xff] }
 0x7b2   : > { %13901 = vst [vmem:[#allocation57_spill] sm:$0xff] %v11602_v39  ;;  %v6284_v41 = vadd.f32 %v6283_v18, %v5992_v0  ;;  %6732 = vmatmul.f32.gmra.mxu3 %v13904_v8  ;;  %v5996_v0 = vadd.f32 %v13909_v12, %v5443_v50  ;;  %v13915_v12 = vld [vmem:[#allocation94_spill] sm:$0xff] }
 0x7b3   : > { %7041 = vmatmul.f32.vlgmr.msra.gmra.mxu0 %v13898_v32  ;;  %7326 = vmatmul.f32.gmra.mxu1 %v13905_v26  ;;  %v13910_v32 = vand.u32 4294901760, %v10728_v49 }
 0x7b4   : > { %v11611_v20 = vadd.f32 %v6631_v24, %v6284_v41  ;;  %v13912_v24 = vld [vmem:[#allocation84_spill] sm:$0xff] }
 0x7b5   : > { %v6637_v54 = vpop.f32.mrf.mxu3  ;;  %v5451_v41 = vadd.f32 %v11541_v15, %v13912_v24 }
 0x7b6   : > { %6367 = vmatmul.f32.gmra.mxu2 %v13903_v9 }
 0x7b8   : > { %v11614_v39 = vpop.f32.mrf.mxu0  ;;  %v11616_v58 = vpop.f32.mrf.mxu1 }
 0x7b9   : > { %13907 = vst [vmem:[#allocation108_spill] sm:$0xff] %v11614_v39  ;;  %v6288_v18 = vpop.f32.mrf.mxu2  ;;  %v13917_v39 = vld [vmem:[#allocation110_spill] sm:$0xff] }
 0x7ba   : > { %13908 = vst [vmem:[#allocation73_spill] sm:$0xff] %v11616_v58  ;;  %v6289_v8 = vadd.f32 %v6288_v18, %v5996_v0  ;;  %6738 = vmatmul.f32.gmra.mxu3 %v13910_v32  ;;  %v6000_v0 = vadd.f32 %v13915_v12, %v5451_v41  ;;  %v13921_v12 = vld [vmem:[#allocation81_spill] sm:$0xff] }
 0x7bb   : > { %7045 = vmatmul.f32.gmra.mxu0 %v13905_v26  ;;  %7330 = vmatmul.f32.gmra.mxu1 %v13911_v52  ;;  %v13916_v26 = vand.u32 4294901760, %v10746_v27 }
 0x7bc   : > { %v11625_v35 = vadd.f32 %v6637_v54, %v6289_v8  ;;  %v13918_v54 = vld [vmem:[#allocation93_spill] sm:$0xff] }
 0x7bd   : > { %v6643_v9 = vpop.f32.mrf.mxu3  ;;  %v5459_v8 = vadd.f32 %v11541_v15, %v13918_v54 }
 0x7be   : > { %6372 = vmatmul.f32.gmra.mxu2 %v10728_v49 }
 0x7c0   : > { %v11628_v58 = vpop.f32.mrf.mxu0  ;;  %v11630_v50 = vpop.f32.mrf.mxu1 }
 0x7c1   : > { %13913 = vst [vmem:[#allocation50_spill] sm:$0xff] %v11628_v58  ;;  %v6293_v18 = vpop.f32.mrf.mxu2  ;;  %v13922_v58 = vld [vmem:[#allocation100_spill] sm:$0xff] }
 0x7c2   : > { %13914 = vst [vmem:[#allocation77_spill] sm:$0xff] %v11630_v50  ;;  %v6294_v32 = vadd.f32 %v6293_v18, %v6000_v0  ;;  %6744 = vmatmul.f32.gmra.mxu3 %v13916_v26  ;;  %v6004_v0 = vadd.f32 %v13921_v12, %v5459_v8  ;;  %v13928_v12 = vld [vmem:[#allocation90_spill] sm:$0xff] }
 0x7c3   : > { %7049 = vmatmul.f32.gmra.mxu0 %v13911_v52  ;;  %7334 = vmatmul.f32.gmra.mxu1 %v13917_v39  ;;  %v13923_v52 = vand.u32 4294901760, %v13922_v58 }
 0x7c4   : > { %v11639_v24 = vadd.f32 %v6643_v9, %v6294_v32  ;;  %v13925_v9 = vld [vmem:[#allocation97_spill] sm:$0xff] }
 0x7c5   : > { %v6649_v49 = vpop.f32.mrf.mxu3  ;;  %v5467_v32 = vadd.f32 %v11541_v15, %v13925_v9 }
 0x7c6   : > { %6377 = vmatmul.f32.gmra.mxu2 %v10746_v27 }
 0x7c8   : > { %v11642_v50 = vpop.f32.mrf.mxu0  ;;  %v11644_v41 = vpop.f32.mrf.mxu1 }
 0x7c9   : > { %13919 = vst [vmem:[#allocation92_spill] sm:$0xff] %v11642_v50  ;;  %v6298_v18 = vpop.f32.mrf.mxu2  ;;  %v13929_v50 = vld [vmem:[#allocation101_spill] sm:$0xff] }
 0x7ca   : > { %13920 = vst [vmem:[#allocation71_spill] sm:$0xff] %v11644_v41  ;;  %v6299_v26 = vadd.f32 %v6298_v18, %v6004_v0  ;;  %6750 = vmatmul.f32.gmra.mxu3 %v13923_v52  ;;  %v6008_v0 = vadd.f32 %v13928_v12, %v5467_v32  ;;  %v13935_v12 = vld [vmem:[#allocation107_spill] sm:$0xff] }
 0x7cb   : > { %7053 = vmatmul.f32.gmra.mxu0 %v13917_v39  ;;  %7338 = vmatmul.f32.gmra.mxu1 %v13924_v17  ;;  %v13930_v39 = vand.u32 4294901760, %v13929_v50 }
 0x7cc   : > { %v11653_v54 = vadd.f32 %v6649_v49, %v6299_v26  ;;  %v13932_v49 = vld [vmem:[#allocation109_spill] sm:$0xff] }
 0x7cd   : > { %v6655_v27 = vpop.f32.mrf.mxu3  ;;  %v5475_v26 = vadd.f32 %v11541_v15, %v13932_v49 }
 0x7ce   : > { %6382 = vmatmul.f32.gmra.mxu2 %v13922_v58 }
 0x7d0   : > { %v11656_v41 = vpop.f32.mrf.mxu0  ;;  %v11658_v8 = vpop.f32.mrf.mxu1 }
 0x7d1   : > { %13926 = vst [vmem:[#allocation70_spill] sm:$0xff] %v11656_v41  ;;  %v6303_v18 = vpop.f32.mrf.mxu2  ;;  %v13936_v41 = vld [vmem:[#allocation114_spill] sm:$0xff] }
 0x7d2   : > { %13927 = vst [vmem:[#allocation102_spill] sm:$0xff] %v11658_v8  ;;  %v6304_v52 = vadd.f32 %v6303_v18, %v6008_v0  ;;  %6756 = vmatmul.f32.gmra.mxu3 %v13930_v39  ;;  %v6012_v0 = vadd.f32 %v13935_v12, %v5475_v26  ;;  %v13942_v12 = vld [vmem:[#allocation98_spill] sm:$0xff] }
 0x7d3   : > { %7057 = vmatmul.f32.gmra.mxu0 %v13924_v17  ;;  %7342 = vmatmul.f32.gmra.mxu1 %v13931_v34  ;;  %v13937_v17 = vand.u32 4294901760, %v13936_v41 }
 0x7d4   : > { %v11667_v9 = vadd.f32 %v6655_v27, %v6304_v52  ;;  %v13939_v27 = vld [vmem:[#allocation112_spill] sm:$0xff] }
 0x7d5   : > { %v6661_v58 = vpop.f32.mrf.mxu3  ;;  %v5483_v52 = vadd.f32 %v11541_v15, %v13939_v27 }
 0x7d6   : > { %6387 = vmatmul.f32.gmra.mxu2 %v13929_v50 }
 0x7d8   : > { %v11670_v8 = vpop.f32.mrf.mxu0  ;;  %v11672_v32 = vpop.f32.mrf.mxu1 }
 0x7d9   : > { %13933 = vst [vmem:[#allocation84_spill] sm:$0xff] %v11670_v8  ;;  %v6308_v18 = vpop.f32.mrf.mxu2  ;;  %v13943_v8 = vld [vmem:[#allocation126_spill] sm:$0xff] }
 0x7da   : > { %13934 = vst [vmem:[#allocation94_spill] sm:$0xff] %v11672_v32  ;;  %v6309_v39 = vadd.f32 %v6308_v18, %v6012_v0  ;;  %6762 = vmatmul.f32.gmra.mxu3 %v13937_v17  ;;  %v6016_v0 = vadd.f32 %v13942_v12, %v5483_v52  ;;  %v13949_v12 = vld [vmem:[#allocation111_spill] sm:$0xff] }
 0x7db   : > { %7061 = vmatmul.f32.gmra.mxu0 %v13931_v34  ;;  %7346 = vmatmul.f32.gmra.mxu1 %v13938_v42  ;;  %v13944_v34 = vand.u32 4294901760, %v13943_v8 }
 0x7dc   : > { %v11681_v49 = vadd.f32 %v6661_v58, %v6309_v39  ;;  %v13946_v58 = vld [vmem:[#allocation122_spill] sm:$0xff] }
 0x7dd   : > { %v6667_v50 = vpop.f32.mrf.mxu3  ;;  %v5491_v39 = vadd.f32 %v11541_v15, %v13946_v58 }
 0x7de   : > { %6392 = vmatmul.f32.gmra.mxu2 %v13936_v41 }
 0x7e0   : > { %v11684_v32 = vpop.f32.mrf.mxu0  ;;  %v11686_v26 = vpop.f32.mrf.mxu1 }
 0x7e1   : > { %13940 = vst [vmem:[#allocation110_spill] sm:$0xff] %v11684_v32  ;;  %v6313_v18 = vpop.f32.mrf.mxu2  ;;  %v13950_v32 = vld [vmem:[#allocation3_spill] sm:$0xff] }
 0x7e2   : > { %13941 = vst [vmem:[#allocation93_spill] sm:$0xff] %v11686_v26  ;;  %v6314_v17 = vadd.f32 %v6313_v18, %v6016_v0  ;;  %6768 = vmatmul.f32.gmra.mxu3 %v13944_v34  ;;  %v6020_v0 = vadd.f32 %v13949_v12, %v5491_v39  ;;  %v13956_v12 = vld [vmem:[#allocation120_spill] sm:$0xff] }
 0x7e3   : > { %7065 = vmatmul.f32.gmra.mxu0 %v13938_v42  ;;  %7350 = vmatmul.f32.gmra.mxu1 %v13945_v53  ;;  %v13951_v42 = vand.u32 4294901760, %v13950_v32 }
 0x7e4   : > { %v11695_v27 = vadd.f32 %v6667_v50, %v6314_v17  ;;  %v13953_v50 = vld [vmem:[#allocation6_spill] sm:$0xff] }
 0x7e5   : > { %v6673_v41 = vpop.f32.mrf.mxu3  ;;  %v5499_v17 = vadd.f32 %v11541_v15, %v13953_v50 }
 0x7e6   : > { %6397 = vmatmul.f32.gmra.mxu2 %v13943_v8 }
 0x7e8   : > { %v11698_v26 = vpop.f32.mrf.mxu0  ;;  %v11700_v52 = vpop.f32.mrf.mxu1 }
 0x7e9   : > { %13947 = vst [vmem:[#allocation81_spill] sm:$0xff] %v11698_v26  ;;  %v6318_v18 = vpop.f32.mrf.mxu2  ;;  %v13957_v26 = vld [vmem:[#allocation5_spill] sm:$0xff] }
 0x7ea   : > { %13948 = vst [vmem:[#allocation100_spill] sm:$0xff] %v11700_v52  ;;  %v6319_v34 = vadd.f32 %v6318_v18, %v6020_v0  ;;  %6774 = vmatmul.f32.gmra.mxu3 %v13951_v42  ;;  %v6024_v0 = vadd.f32 %v13956_v12, %v5499_v17  ;;  %v13963_v12 = vld [vmem:[#allocation2_spill] sm:$0xff] }
 0x7eb   : > { %7069 = vmatmul.f32.gmra.mxu0 %v13945_v53  ;;  %7354 = vmatmul.f32.gmra.mxu1 %v13952_v4  ;;  %v13958_v53 = vand.u32 4294901760, %v13957_v26 }
 0x7ec   : > { %v11709_v58 = vadd.f32 %v6673_v41, %v6319_v34  ;;  %v13960_v41 = vld [vmem:[#allocation7_spill] sm:$0xff] }
 0x7ed   : > { %v6679_v8 = vpop.f32.mrf.mxu3  ;;  %v5507_v34 = vadd.f32 %v11541_v15, %v13960_v41 }
 0x7ee   : > { %6402 = vmatmul.f32.gmra.mxu2 %v13950_v32 }
 0x7f0   : > { %v11712_v52 = vpop.f32.mrf.mxu0  ;;  %v11714_v39 = vpop.f32.mrf.mxu1 }
 0x7f1   : > { %13954 = vst [vmem:[#allocation113_spill] sm:$0xff] %v11712_v52  ;;  %v6323_v18 = vpop.f32.mrf.mxu2  ;;  %v13965_v52 = vld [vmem:[#allocation135_spill] sm:$0xff] }
 0x7f2   : > { %13955 = vst [vmem:[#allocation97_spill] sm:$0xff] %v11714_v39  ;;  %v6324_v42 = vadd.f32 %v6323_v18, %v6024_v0  ;;  %6780 = vmatmul.f32.gmra.mxu3 %v13958_v53  ;;  %v6028_v0 = vadd.f32 %v13963_v12, %v5507_v34  ;;  %v13969_v12 = vld [vmem:[#allocation8_spill] sm:$0xff] }
 0x7f3   : > { %7073 = vmatmul.f32.gmra.mxu0 %v13952_v4  ;;  %7358 = vmatmul.f32.gmra.mxu1 %v13959_v56  ;;  %v13964_v4 = vand.u32 4294901760, %v10872_v28 }
 0x7f4   : > { %v11723_v50 = vadd.f32 %v6679_v8, %v6324_v42  ;;  %v13966_v8 = vld [vmem:[#allocation10_spill] sm:$0xff] }
 0x7f5   : > { %v6685_v32 = vpop.f32.mrf.mxu3  ;;  %v5515_v42 = vadd.f32 %v11541_v15, %v13966_v8 }
 0x7f6   : > { %6407 = vmatmul.f32.gmra.mxu2 %v13957_v26 }
 0x7f8   : > { %v11726_v39 = vpop.f32.mrf.mxu0  ;;  %v11728_v17 = vpop.f32.mrf.mxu1 }
 0x7f9   : > { %13961 = vst [vmem:[#allocation90_spill] sm:$0xff] %v11726_v39  ;;  %v6328_v18 = vpop.f32.mrf.mxu2  ;;  %v13971_v39 = vld [vmem:[#allocation59_spill] sm:$0xff] }
 0x7fa   : > { %13962 = vst [vmem:[#allocation101_spill] sm:$0xff] %v11728_v17  ;;  %v6329_v53 = vadd.f32 %v6328_v18, %v6028_v0  ;;  %6786 = vmatmul.f32.gmra.mxu3 %v13964_v4  ;;  %v6032_v0 = vadd.f32 %v13969_v12, %v5515_v42  ;;  %v13975_v12 = vld [vmem:[#allocation14_spill] sm:$0xff] }
 0x7fb   : > { %7077 = vmatmul.f32.gmra.mxu0 %v13959_v56  ;;  %7362 = vmatmul.f32.gmra.mxu1 %v13965_v52  ;;  %v13970_v56 = vand.u32 4294901760, %v10890_v48 }
 0x7fc   : > { %v11737_v41 = vadd.f32 %v6685_v32, %v6329_v53  ;;  %v13972_v32 = vld [vmem:[#allocation16_spill] sm:$0xff] }
 0x7fd   : > { %v6691_v26 = vpop.f32.mrf.mxu3  ;;  %v5523_v53 = vadd.f32 %v11541_v15, %v13972_v32 }
 0x7fe   : > { %6412 = vmatmul.f32.gmra.mxu2 %v10872_v28 }
 0x800   : > { %v11740_v17 = vpop.f32.mrf.mxu0  ;;  %v11742_v34 = vpop.f32.mrf.mxu1 }
 0x801   : > { %13967 = vst [vmem:[#allocation121_spill] sm:$0xff] %v11740_v17  ;;  %v6333_v18 = vpop.f32.mrf.mxu2  ;;  %v13977_v17 = vld [vmem:[#allocation140_spill] sm:$0xff] }
 0x802   : > { %13968 = vst [vmem:[#allocation109_spill] sm:$0xff] %v11742_v34  ;;  %v6334_v4 = vadd.f32 %v6333_v18, %v6032_v0  ;;  %6792 = vmatmul.f32.gmra.mxu3 %v13970_v56  ;;  %v6036_v0 = vadd.f32 %v13975_v12, %v5523_v53  ;;  %v13981_v12 = vld [vmem:[#allocation12_spill] sm:$0xff] }
 0x803   : > { %7081 = vmatmul.f32.gmra.mxu0 %v13965_v52  ;;  %7366 = vmatmul.f32.gmra.mxu1 %v13971_v39  ;;  %v13976_v52 = vand.u32 4294901760, %v10908_v63 }
 0x804   : > { %v11751_v8 = vadd.f32 %v6691_v26, %v6334_v4  ;;  %v13978_v26 = vld [vmem:[#allocation15_spill] sm:$0xff] }
 0x805   : > { %v6697_v28 = vpop.f32.mrf.mxu3  ;;  %v5531_v4 = vadd.f32 %v11541_v15, %v13978_v26 }
 0x806   : > { %6417 = vmatmul.f32.gmra.mxu2 %v10890_v48 }
 0x808   : > { %v11754_v34 = vpop.f32.mrf.mxu0  ;;  %v11756_v42 = vpop.f32.mrf.mxu1 }
 0x809   : > { %13973 = vst [vmem:[#allocation107_spill] sm:$0xff] %v11754_v34  ;;  %v6338_v18 = vpop.f32.mrf.mxu2  ;;  %v13983_v34 = vld [vmem:[#allocation144_spill] sm:$0xff] }
 0x80a   : > { %13974 = vst [vmem:[#allocation114_spill] sm:$0xff] %v11756_v42  ;;  %v6339_v56 = vadd.f32 %v6338_v18, %v6036_v0  ;;  %6798 = vmatmul.f32.gmra.mxu3 %v13976_v52  ;;  %v6040_v0 = vadd.f32 %v13981_v12, %v5531_v4  ;;  %v13987_v12 = vld [vmem:[#allocation17_spill] sm:$0xff] }
 0x80b   : > { %7085 = vmatmul.f32.gmra.mxu0 %v13971_v39  ;;  %7370 = vmatmul.f32.gmra.mxu1 %v13977_v17  ;;  %v13982_v39 = vand.u32 4294901760, %v10926_v19 }
 0x80c   : > { %v11765_v32 = vadd.f32 %v6697_v28, %v6339_v56  ;;  %v13984_v28 = vld [vmem:[#allocation22_spill] sm:$0xff] }
 0x80d   : > { %v6703_v48 = vpop.f32.mrf.mxu3  ;;  %v5539_v56 = vadd.f32 %v11541_v15, %v13984_v28 }
 0x80e   : > { %6422 = vmatmul.f32.gmra.mxu2 %v10908_v63 }
 0x810   : > { %v11768_v42 = vpop.f32.mrf.mxu0  ;;  %v11770_v53 = vpop.f32.mrf.mxu1 }
 0x811   : > { %13979 = vst [vmem:[#allocation42_spill] sm:$0xff] %v11768_v42  ;;  %v6343_v18 = vpop.f32.mrf.mxu2  ;;  %v13989_v42 = vld [vmem:[#allocation148_spill] sm:$0xff] }
 0x812   : > { %13980 = vst [vmem:[#allocation112_spill] sm:$0xff] %v11770_v53  ;;  %v6344_v52 = vadd.f32 %v6343_v18, %v6040_v0  ;;  %6804 = vmatmul.f32.gmra.mxu3 %v13982_v39  ;;  %v6044_v0 = vadd.f32 %v13987_v12, %v5539_v56  ;;  %v13992_v12 = vld [vmem:[#allocation21_spill] sm:$0xff] }
 0x813   : > { %7089 = vmatmul.f32.gmra.mxu0 %v13977_v17  ;;  %7374 = vmatmul.f32.gmra.mxu1 %v13983_v34  ;;  %v13988_v17 = vand.u32 4294901760, %v10944_v38 }
 0x814   : > { %v11779_v26 = vadd.f32 %v6703_v48, %v6344_v52  ;;  %v5547_v48 = vadd.f32 %v11541_v15, %v10953_v60  ;;  %v13995_v60 = vld [vmem:[#allocation23_spill] sm:$0xff] }
 0x815   : > { %v6709_v63 = vpop.f32.mrf.mxu3 }
 0x816   : > { %6427 = vmatmul.f32.gmra.mxu2 %v10926_v19 }
 0x818   : > { %v11782_v53 = vpop.f32.mrf.mxu0  ;;  %v11784_v4 = vpop.f32.mrf.mxu1 }
 0x819   : > { %13985 = vst [vmem:[#allocation98_spill] sm:$0xff] %v11782_v53  ;;  %v6348_v18 = vpop.f32.mrf.mxu2 }
 0x81a   : > { %13986 = vst [vmem:[#allocation126_spill] sm:$0xff] %v11784_v4  ;;  %v6349_v39 = vadd.f32 %v6348_v18, %v6044_v0  ;;  %6810 = vmatmul.f32.gmra.mxu3 %v13988_v17  ;;  %v6048_v0 = vadd.f32 %v13992_v12, %v5547_v48  ;;  %v13994_v4 = vld [vmem:[#allocation152_spill] sm:$0xff] }
 0x81b   : > { %7093 = vmatmul.f32.gmra.mxu0 %v13983_v34  ;;  %7378 = vmatmul.f32.gmra.mxu1 %v13989_v42  ;;  %v13993_v34 = vand.u32 4294901760, %v10962_v1  ;;  %v13997_v12 = vld [vmem:[#allocation20_spill] sm:$0xff] }
 0x81c   : > { %v11793_v52 = vadd.f32 %v6709_v63, %v6349_v39  ;;  %v5555_v63 = vadd.f32 %v11541_v15, %v13995_v60  ;;  %v14000_v60 = vld [vmem:[#allocation30_spill] sm:$0xff] }
 0x81d   : > { %v6715_v19 = vpop.f32.mrf.mxu3 }
 0x81e   : > { %6432 = vmatmul.f32.gmra.mxu2 %v10944_v38 }
 0x820   : > { %v11796_v28 = vpop.f32.mrf.mxu0  ;;  %v11798_v56 = vpop.f32.mrf.mxu1 }
 0x821   : > { %13990 = vst [vmem:[#allocation128_spill] sm:$0xff] %v11796_v28  ;;  %v6353_v18 = vpop.f32.mrf.mxu2 }
 0x822   : > { %13991 = vst [vmem:[#allocation122_spill] sm:$0xff] %v11798_v56  ;;  %v6354_v17 = vadd.f32 %v6353_v18, %v6048_v0  ;;  %6816 = vmatmul.f32.gmra.mxu3 %v13993_v34  ;;  %v6052_v0 = vadd.f32 %v13997_v12, %v5555_v63  ;;  %v13998_v34 = vand.u32 4294901760, %v10980_v30  ;;  %v14001_v12 = vld [vmem:[#allocation28_spill] sm:$0xff] }
 0x823   : > { %7097 = vmatmul.f32.gmra.mxu0 %v13989_v42  ;;  %7382 = vmatmul.f32.gmra.mxu1 %v13994_v4  ;;  %v13999_v42 = vld [vmem:[#allocation60_spill] sm:$0xff] }
 0x824   : > { %v11807_v39 = vadd.f32 %v6715_v19, %v6354_v17  ;;  %v5563_v19 = vadd.f32 %v11541_v15, %v14000_v60  ;;  %v14004_v60 = vld [vmem:[#allocation74_spill] sm:$0xff] }
 0x825   : > { %v6721_v38 = vpop.f32.mrf.mxu3 }
 0x826   : > { %6437 = vmatmul.f32.gmra.mxu2 %v10962_v1 }
 0x828   : > { %v11810_v56 = vpop.f32.mrf.mxu0  ;;  %v7323_v48 = vpop.f32.mrf.mxu1 }
 0x829   : > { %13996 = vst [vmem:[#allocation111_spill] sm:$0xff] %v11810_v56  ;;  %v6358_v18 = vpop.f32.mrf.mxu2 }
 0x82a   : > { %v6359_v28 = vadd.f32 %v6358_v18, %v6052_v0  ;;  %6822 = vmatmul.f32.gmra.mxu3 %v13998_v34  ;;  %v6056_v0 = vadd.f32 %v14001_v12, %v5563_v19 }
 0x82b   : > { %7101 = vmatmul.f32.gmra.mxu0 %v13994_v4  ;;  %7386 = vmatmul.f32.gmra.mxu1 %v13999_v42  ;;  %v14002_v4 = vld [vmem:[#allocation29_spill] sm:$0xff] }
 0x82c   : > { %v11819_v17 = vadd.f32 %v6721_v38, %v6359_v28  ;;  %v14003_v23 = vand.u32 4294901760, %v14002_v4  ;;  %v14005_v28 = vld [vmem:[#allocation31_spill] sm:$0xff] }
 0x82d   : > { %v6727_v1 = vpop.f32.mrf.mxu3  ;;  %v5571_v38 = vadd.f32 %v11541_v15, %v14005_v28 }
 0x82e   : > { %6442 = vmatmul.f32.gmra.mxu2 %v10980_v30 }
 0x830   : > { %v7042_v56 = vpop.f32.mrf.mxu0  ;;  %v7327_v63 = vpop.f32.mrf.mxu1 }
 0x831   : > { %v7043_v18 = vadd.f32 %v7042_v56, %v11580_v37  ;;  %v6363_v34 = vpop.f32.mrf.mxu2 }
 0x832   : > { %v6364_v53 = vadd.f32 %v6363_v34, %v6056_v0  ;;  %6828 = vmatmul.f32.gmra.mxu3 %v14003_v23  ;;  %v14008_v34 = vand.u32 4294901760, %v11016_v25 }
 0x833   : > { %v7324_v3 = vadd.f32 %v7323_v48, %v7043_v18  ;;  %7105 = vmatmul.f32.gmra.mxu0 %v13999_v42  ;;  %7390 = vmatmul.f32.gmra.mxu1 %v14004_v60  ;;  %v14007_v42 = vld [vmem:[#allocation27_spill] sm:$0xff] }
 0x834   : > { %v11837_v30 = vadd.f32 %v6727_v1, %v6364_v53  ;;  %v6060_v19 = vadd.f32 %v14007_v42, %v5571_v38  ;;  %v14010_v1 = vld [vmem:[#allocation150_spill] sm:$0xff] }
 0x835   : > { %v7578_v37 = vmax.f32 %v7324_v3, 0.0  ;;  %v6733_v56 = vpop.f32.mrf.mxu3  ;;  %v14009_v3 = vld [vmem:[#allocation63_spill] sm:$0xff] }
 0x836   : > { %14006 = vst [vmem:[#allocation3_spill] sm:$0xff] %v11837_v30  ;;  %6447 = vmatmul.f32.gmra.mxu2 %v14002_v4  ;;  %v5579_v4 = vadd.f32 %v11541_v15, %v14010_v1 }
 0x837   : > { %7642 = vst.msk [vmem:[%s11835_s18] sm:$0xff] %vm2737_vm2, %v7578_v37 }
 0x838   : > { %v7046_v23 = vpop.f32.mrf.mxu0  ;;  %v7331_v48 = vpop.f32.mrf.mxu1 }
 0x839   : > { %v7047_v12 = vadd.f32 %v7046_v23, %v11597_v21  ;;  %v6368_v0 = vpop.f32.mrf.mxu2  ;;  %v14011_v23 = vld [vmem:[#allocation33_spill] sm:$0xff] }
 0x83a   : > { %v6369_v18 = vadd.f32 %v6368_v0, %v6060_v19  ;;  %6834 = vmatmul.f32.gmra.mxu3 %v14008_v34  ;;  %v14013_v0 = vld [vmem:[#allocation64_spill] sm:$0xff] }
 0x83b   : > { %v7328_v53 = vadd.f32 %v7327_v63, %v7047_v12  ;;  %7109 = vmatmul.f32.gmra.mxu0 %v14004_v60  ;;  %7394 = vmatmul.f32.gmra.mxu1 %v14009_v3  ;;  %v6064_v63 = vadd.f32 %v14011_v23, %v5579_v4  ;;  %v14012_v12 = vand.u32 4294901760, %v11034_v6 }
 0x83c   : > { %v11850_v28 = vadd.f32 %v6733_v56, %v6369_v18 }
 0x83d   : > { %v7579_v37 = vmax.f32 %v7328_v53, 0.0  ;;  %v6739_v30 = vpop.f32.mrf.mxu3 }
 0x83e   : > { %6452 = vmatmul.f32.gmra.mxu2 %v11016_v25  ;;  %v14014_v25 = vld [vmem:[#allocation36_spill] sm:$0xff] }
 0x83f   : > { %7643 = vst.msk [vmem:[%s11835_s18 + $0x8] sm:$0xff] %vm2737_vm2, %v7579_v37  ;;  %v5587_v18 = vadd.f32 %v11541_v15, %v14014_v25  ;;  %v14015_v37 = vld [vmem:[#allocation37_spill] sm:$0xff]  ;;  %v14018_v25 = vld [vmem:[#allocation34_spill] sm:$0xff] }
 0x840   : > { %v7050_v21 = vpop.f32.mrf.mxu0  ;;  %v7335_v38 = vpop.f32.mrf.mxu1 }
 0x841   : > { %v7051_v60 = vadd.f32 %v7050_v21, %v11611_v20  ;;  %v6373_v42 = vpop.f32.mrf.mxu2 }
 0x842   : > { %v6374_v19 = vadd.f32 %v6373_v42, %v6064_v63  ;;  %6840 = vmatmul.f32.gmra.mxu3 %v14012_v12  ;;  %v14016_v63 = vand.u32 4294901760, %v11052_v29 }
 0x843   : > { %v7332_v56 = vadd.f32 %v7331_v48, %v7051_v60  ;;  %7113 = vmatmul.f32.gmra.mxu0 %v14009_v3  ;;  %7398 = vmatmul.f32.gmra.mxu1 %v14013_v0  ;;  %v6068_v48 = vadd.f32 %v14015_v37, %v5587_v18  ;;  %v14017_v60 = vld [vmem:[#allocation86_spill] sm:$0xff] }
 0x844   : > { %v11863_v34 = vadd.f32 %v6739_v30, %v6374_v19 }
 0x845   : > { %v7580_v53 = vmax.f32 %v7332_v56, 0.0  ;;  %v6745_v1 = vpop.f32.mrf.mxu3 }
 0x846   : > { %6457 = vmatmul.f32.gmra.mxu2 %v11034_v6  ;;  %v5595_v6 = vadd.f32 %v11541_v15, %v11063_v43 }
 0x847   : > { %7644 = vst.msk [vmem:[%s11835_s18 + $0x10] sm:$0xff] %vm2737_vm2, %v7580_v53 }
 0x848   : > { %v7054_v20 = vpop.f32.mrf.mxu0  ;;  %v7339_v4 = vpop.f32.mrf.mxu1 }
 0x849   : > { %v7055_v3 = vadd.f32 %v7054_v20, %v11625_v35  ;;  %v6378_v21 = vpop.f32.mrf.mxu2  ;;  %v14019_v20 = vand.u32 4294901760, %v11072_v36 }
 0x84a   : > { %v6379_v23 = vadd.f32 %v6378_v21, %v6068_v48  ;;  %6846 = vmatmul.f32.gmra.mxu3 %v14016_v63 }
 0x84b   : > { %v7336_v30 = vadd.f32 %v7335_v38, %v7055_v3  ;;  %7117 = vmatmul.f32.gmra.mxu0 %v14013_v0  ;;  %7402 = vmatmul.f32.gmra.mxu1 %v14017_v60  ;;  %v6072_v38 = vadd.f32 %v14018_v25, %v5595_v6  ;;  %v14022_v6 = vld [vmem:[#allocation87_spill] sm:$0xff] }
 0x84c   : > { %v11876_v42 = vadd.f32 %v6745_v1, %v6379_v23  ;;  %v14020_v1 = vld [vmem:[#allocation78_spill] sm:$0xff] }
 0x84d   : > { %v7581_v19 = vmax.f32 %v7336_v30, 0.0  ;;  %v6751_v12 = vpop.f32.mrf.mxu3 }
 0x84e   : > { %6462 = vmatmul.f32.gmra.mxu2 %v11052_v29  ;;  %v5603_v29 = vadd.f32 %v11541_v15, %v11083_v13 }
 0x84f   : > { %7645 = vst.msk [vmem:[%s11835_s18 + $0x18] sm:$0xff] %vm2737_vm2, %v7581_v19 }
 0x850   : > { %v7058_v35 = vpop.f32.mrf.mxu0  ;;  %v7343_v56 = vpop.f32.mrf.mxu1 }
 0x851   : > { %v7059_v0 = vadd.f32 %v7058_v35, %v11639_v24  ;;  %v6383_v18 = vpop.f32.mrf.mxu2 }
 0x852   : > { %v6384_v53 = vadd.f32 %v6383_v18, %v6072_v38  ;;  %6852 = vmatmul.f32.gmra.mxu3 %v14019_v20  ;;  %v14023_v18 = vand.u32 4294901760, %v11112_v11 }
 0x853   : > { %v7340_v43 = vadd.f32 %v7339_v4, %v7059_v0  ;;  %7121 = vmatmul.f32.gmra.mxu0 %v14017_v60  ;;  %7406 = vmatmul.f32.gmra.mxu1 %v14020_v1  ;;  %v6076_v4 = vadd.f32 %v11065_v57, %v5603_v29  ;;  %v14021_v60 = vand.u32 4294901760, %v11092_v61 }
 0x854   : > { %v11889_v37 = vadd.f32 %v6751_v12, %v6384_v53  ;;  %v14024_v53 = vld [vmem:[#allocation104_spill] sm:$0xff] }
 0x855   : > { %v7582_v48 = vmax.f32 %v7340_v43, 0.0  ;;  %v6757_v3 = vpop.f32.mrf.mxu3 }
 0x856   : > { %6467 = vmatmul.f32.gmra.mxu2 %v11072_v36  ;;  %v5611_v36 = vadd.f32 %v11541_v15, %v11103_v10 }
 0x857   : > { %7646 = vst.msk [vmem:[%s11835_s18 + $0x20] sm:$0xff] %vm2737_vm2, %v7582_v48  ;;  %v14026_v48 = vld [vmem:[#allocation49_spill] sm:$0xff] }
 0x858   : > { %v7062_v24 = vpop.f32.mrf.mxu0  ;;  %v7347_v21 = vpop.f32.mrf.mxu1 }
 0x859   : > { %v7063_v23 = vadd.f32 %v7062_v24, %v11653_v54  ;;  %v6388_v63 = vpop.f32.mrf.mxu2 }
 0x85a   : > { %v6389_v30 = vadd.f32 %v6388_v63, %v6076_v4  ;;  %6858 = vmatmul.f32.gmra.mxu3 %v14021_v60 }
 0x85b   : > { %v7344_v13 = vadd.f32 %v7343_v56, %v7063_v23  ;;  %7125 = vmatmul.f32.gmra.mxu0 %v14020_v1  ;;  %7410 = vmatmul.f32.gmra.mxu1 %v14022_v6  ;;  %v6080_v56 = vadd.f32 %v11085_v40, %v5611_v36  ;;  %v14027_v23 = vand.u32 4294901760, %v11132_v46 }
 0x85c   : > { %v11902_v19 = vadd.f32 %v6757_v3, %v6389_v30  ;;  %v14028_v30 = vld [vmem:[#allocation117_spill] sm:$0xff] }
 0x85d   : > { %v7583_v12 = vmax.f32 %v7344_v13, 0.0  ;;  %v6763_v35 = vpop.f32.mrf.mxu3 }
 0x85e   : > { %6472 = vmatmul.f32.gmra.mxu2 %v11092_v61  ;;  %v14025_v61 = vld [vmem:[#allocation54_spill] sm:$0xff] }
 0x85f   : > { %7647 = vst.msk [vmem:[%s11835_s18 + $0x28] sm:$0xff] %vm2737_vm2, %v7583_v12  ;;  %v5619_v20 = vadd.f32 %v11541_v15, %v14025_v61  ;;  %v14029_v12 = vld [vmem:[#allocation61_spill] sm:$0xff] }
 0x860   : > { %v7066_v57 = vpop.f32.mrf.mxu0  ;;  %v7351_v54 = vpop.f32.mrf.mxu1  ;;  %v14032_v61 = vld [vmem:[#allocation41_spill] sm:$0xff] }
 0x861   : > { %v7067_v25 = vadd.f32 %v7066_v57, %v11667_v9  ;;  %v6393_v38 = vpop.f32.mrf.mxu2  ;;  %v6084_v3 = vadd.f32 %v14026_v48, %v5619_v20  ;;  %v14034_v48 = vld [vmem:[#allocation4_spill] sm:$0xff] }
 0x862   : > { %v6394_v0 = vadd.f32 %v6393_v38, %v6080_v56  ;;  %6864 = vmatmul.f32.gmra.mxu3 %v14023_v18  ;;  %v14031_v38 = vld [vmem:[#allocation105_spill] sm:$0xff] }
 0x863   : > { %v7348_v10 = vadd.f32 %v7347_v21, %v7067_v25  ;;  %7129 = vmatmul.f32.gmra.mxu0 %v14022_v6  ;;  %7414 = vmatmul.f32.gmra.mxu1 %v14024_v53  ;;  %v14030_v25 = vand.u32 4294901760, %v11152_v14 }
 0x864   : > { %v11915_v43 = vadd.f32 %v6763_v35, %v6394_v0 }
 0x865   : > { %v7584_v1 = vmax.f32 %v7348_v10, 0.0  ;;  %v6769_v29 = vpop.f32.mrf.mxu3 }
 0x866   : > { %6477 = vmatmul.f32.gmra.mxu2 %v11112_v11  ;;  %v5627_v11 = vadd.f32 %v11541_v15, %v11143_v55 }
 0x867   : > { %7648 = vst.msk [vmem:[%s11835_s18 + $0x30] sm:$0xff] %vm2737_vm2, %v7584_v1 }
 0x868   : > { %v7070_v40 = vpop.f32.mrf.mxu0  ;;  %v7355_v9 = vpop.f32.mrf.mxu1  ;;  %v6088_v35 = vadd.f32 %v14029_v12, %v5627_v11 }
 0x869   : > { %v7071_v24 = vadd.f32 %v7070_v40, %v11681_v49  ;;  %v6398_v21 = vpop.f32.mrf.mxu2 }
 0x86a   : > { %v6399_v4 = vadd.f32 %v6398_v21, %v6084_v3  ;;  %6870 = vmatmul.f32.gmra.mxu3 %v14027_v23  ;;  %v14035_v23 = vld [vmem:[#allocation39_spill] sm:$0xff] }
 0x86b   : > { %v7352_v63 = vadd.f32 %v7351_v54, %v7071_v24  ;;  %7133 = vmatmul.f32.gmra.mxu0 %v14024_v53  ;;  %7418 = vmatmul.f32.gmra.mxu1 %v14028_v30 }
 0x86c   : > { %v11928_v60 = vadd.f32 %v6769_v29, %v6399_v4 }
 0x86d   : > { %v7585_v13 = vmax.f32 %v7352_v63, 0.0  ;;  %v6775_v6 = vpop.f32.mrf.mxu3 }
 0x86e   : > { %6482 = vmatmul.f32.gmra.mxu2 %v11132_v46  ;;  %v5635_v46 = vadd.f32 %v11541_v15, %v11163_v33 }
 0x86f   : > { %7649 = vst.msk [vmem:[%s11835_s18 + $0x38] sm:$0xff] %vm2737_vm2, %v7585_v13 }
 0x870   : > { %v7074_v49 = vpop.f32.mrf.mxu0  ;;  %v7359_v36 = vpop.f32.mrf.mxu1  ;;  %v6092_v20 = vadd.f32 %v14032_v61, %v5635_v46  ;;  %v14039_v46 = vand.u32 4294901760, %v11213_v7 }
 0x871   : > { %v7075_v57 = vadd.f32 %v7074_v49, %v11695_v27  ;;  %v6403_v54 = vpop.f32.mrf.mxu2  ;;  %v14037_v49 = vld [vmem:[#allocation9_spill] sm:$0xff] }
 0x872   : > { %v6404_v56 = vadd.f32 %v6403_v54, %v6088_v35  ;;  %6876 = vmatmul.f32.gmra.mxu3 %v14030_v25  ;;  %v14038_v54 = vld [vmem:[#allocation48_spill] sm:$0xff] }
 0x873   : > { %v7356_v55 = vadd.f32 %v7355_v9, %v7075_v57  ;;  %7137 = vmatmul.f32.gmra.mxu0 %v14028_v30  ;;  %7422 = vmatmul.f32.gmra.mxu1 %v14031_v38  ;;  %v14033_v9 = vand.u32 4294901760, %v11172_v45 }
 0x874   : > { %v11941_v0 = vadd.f32 %v6775_v6, %v6404_v56  ;;  %v14036_v6 = vand.u32 4294901760, %v11192_v31 }
 0x875   : > { %v7586_v18 = vmax.f32 %v7356_v55, 0.0  ;;  %v6781_v10 = vpop.f32.mrf.mxu3 }
 0x876   : > { %6487 = vmatmul.f32.gmra.mxu2 %v11152_v14  ;;  %v5643_v14 = vadd.f32 %v11541_v15, %v11183_v62 }
 0x877   : > { %7650 = vst.msk [vmem:[%s11835_s18 + $0x40] sm:$0xff] %vm2737_vm2, %v7586_v18  ;;  %v14040_v18 = vld [vmem:[#allocation11_spill] sm:$0xff] }
 0x878   : > { %v7078_v27 = vpop.f32.mrf.mxu0  ;;  %v7363_v53 = vpop.f32.mrf.mxu1  ;;  %v6096_v63 = vadd.f32 %v14035_v23, %v5643_v14 }
 0x879   : > { %v7079_v1 = vadd.f32 %v7078_v27, %v11709_v58  ;;  %v6408_v29 = vpop.f32.mrf.mxu2 }
 0x87a   : > { %v6409_v40 = vadd.f32 %v6408_v29, %v6092_v20  ;;  %6882 = vmatmul.f32.gmra.mxu3 %v14033_v9  ;;  %v14041_v20 = vld [vmem:[#allocation68_spill] sm:$0xff] }
 0x87b   : > { %v7360_v33 = vadd.f32 %v7359_v36, %v7079_v1  ;;  %7141 = vmatmul.f32.gmra.mxu0 %v14031_v38  ;;  %7426 = vmatmul.f32.gmra.mxu1 %v14034_v48 }
 0x87c   : > { %v11954_v3 = vadd.f32 %v6781_v10, %v6409_v40 }
 0x87d   : > { %v7587_v24 = vmax.f32 %v7360_v33, 0.0  ;;  %v6787_v21 = vpop.f32.mrf.mxu3  ;;  %v14042_v33 = vand.u32 4294901760, %v11234_v47 }
 0x87e   : > { %6492 = vmatmul.f32.gmra.mxu2 %v11172_v45  ;;  %v5651_v45 = vadd.f32 %v11541_v15, %v11203_v5 }
 0x87f   : > { %7651 = vst.msk [vmem:[%s11835_s18 + $0x48] sm:$0xff] %vm2737_vm2, %v7587_v24 }
 0x880   : > { %v7082_v58 = vpop.f32.mrf.mxu0  ;;  %v7367_v4 = vpop.f32.mrf.mxu1  ;;  %v6100_v56 = vadd.f32 %v14038_v54, %v5651_v45 }
 0x881   : > { %v7083_v30 = vadd.f32 %v7082_v58, %v11723_v50  ;;  %v6413_v11 = vpop.f32.mrf.mxu2 }
 0x882   : > { %v6414_v13 = vadd.f32 %v6413_v11, %v6096_v63  ;;  %6888 = vmatmul.f32.gmra.mxu3 %v14036_v6  ;;  %v14044_v11 = vld [vmem:[#allocation157_spill] sm:$0xff]  ;;  %v14046_v6 = vld [vmem:[#allocation18_spill] sm:$0xff] }
 0x883   : > { %v7364_v62 = vadd.f32 %v7363_v53, %v7083_v30  ;;  %7145 = vmatmul.f32.gmra.mxu0 %v14034_v48  ;;  %7430 = vmatmul.f32.gmra.mxu1 %v14037_v49  ;;  %v14043_v48 = vld [vmem:[#allocation13_spill] sm:$0xff] }
 0x884   : > { %v11967_v36 = vadd.f32 %v6787_v21, %v6414_v13  ;;  %v14045_v13 = vand.u32 4294901760, %v14044_v11 }
 0x885   : > { %v7588_v12 = vmax.f32 %v7364_v62, 0.0  ;;  %v6793_v35 = vpop.f32.mrf.mxu3 }
 0x886   : > { %6497 = vmatmul.f32.gmra.mxu2 %v11192_v31  ;;  %v5659_v31 = vadd.f32 %v11541_v15, %v11224_v44 }
 0x887   : > { %7652 = vst.msk [vmem:[%s11835_s18 + $0x50] sm:$0xff] %vm2737_vm2, %v7588_v12 }
 0x888   : > { %v7086_v50 = vpop.f32.mrf.mxu0  ;;  %v7371_v57 = vpop.f32.mrf.mxu1  ;;  %v6104_v1 = vadd.f32 %v14041_v20, %v5659_v31 }
 0x889   : > { %v7087_v25 = vadd.f32 %v7086_v50, %v11737_v41  ;;  %v6418_v55 = vpop.f32.mrf.mxu2 }
 0x88a   : > { %v6419_v38 = vadd.f32 %v6418_v55, %v6100_v56  ;;  %6894 = vmatmul.f32.gmra.mxu3 %v14039_v46  ;;  %v14051_v46 = vld [vmem:[#allocation106_spill] sm:$0xff] }
 0x88b   : > { %v7368_v5 = vadd.f32 %v7367_v4, %v7087_v25  ;;  %7149 = vmatmul.f32.gmra.mxu0 %v14037_v49  ;;  %7434 = vmatmul.f32.gmra.mxu1 %v14040_v18  ;;  %v14049_v25 = vand.u32 4294901760, %v11276_v2 }
 0x88c   : > { %v11980_v10 = vadd.f32 %v6793_v35, %v6419_v38  ;;  %v14048_v35 = vld [vmem:[#allocation58_spill] sm:$0xff]  ;;  %v14050_v38 = vld [vmem:[#allocation19_spill] sm:$0xff] }
 0x88d   : > { %v7589_v27 = vmax.f32 %v7368_v5, 0.0  ;;  %v6799_v53 = vpop.f32.mrf.mxu3  ;;  %v5683_v5 = vadd.f32 %v11541_v15, %v14051_v46 }
 0x88e   : > { %6502 = vmatmul.f32.gmra.mxu2 %v11213_v7  ;;  %v5667_v7 = vadd.f32 %v11541_v15, %v11245_v22 }
 0x88f   : > { %7653 = vst.msk [vmem:[%s11835_s18 + $0x58] sm:$0xff] %vm2737_vm2, %v7589_v27 }
 0x890   : > { %v7090_v41 = vpop.f32.mrf.mxu0  ;;  %v7375_v61 = vpop.f32.mrf.mxu1  ;;  %v6108_v4 = vadd.f32 %v11226_v51, %v5667_v7 }
 0x891   : > { %v7091_v29 = vadd.f32 %v7090_v41, %v11751_v8  ;;  %v6423_v40 = vpop.f32.mrf.mxu2  ;;  %v14052_v41 = vld [vmem:[#allocation89_spill] sm:$0xff] }
 0x892   : > { %v6424_v9 = vadd.f32 %v6423_v40, %v6104_v1  ;;  %6900 = vmatmul.f32.gmra.mxu3 %v14042_v33  ;;  %v14053_v40 = vand.u32 4294901760, %v11297_v59  ;;  %v14054_v33 = vld [vmem:[#allocation24_spill] sm:$0xff] }
 0x893   : > { %v7372_v44 = vadd.f32 %v7371_v57, %v7091_v29  ;;  %7153 = vmatmul.f32.gmra.mxu0 %v14040_v18  ;;  %7438 = vmatmul.f32.gmra.mxu1 %v14043_v48 }
 0x894   : > { %v11993_v14 = vadd.f32 %v6799_v53, %v6424_v9 }
 0x895   : > { %v7590_v24 = vmax.f32 %v7372_v44, 0.0  ;;  %v6805_v21 = vpop.f32.mrf.mxu3 }
 0x896   : > { %6507 = vmatmul.f32.gmra.mxu2 %v11234_v47  ;;  %v14047_v47 = vld [vmem:[#allocation124_spill] sm:$0xff] }
 0x897   : > { %7654 = vst.msk [vmem:[%s11835_s18 + $0x60] sm:$0xff] %vm2737_vm2, %v7590_v24  ;;  %v5675_v62 = vadd.f32 %v11541_v15, %v14047_v47 }
 0x898   : > { %v7094_v8 = vpop.f32.mrf.mxu0  ;;  %v7379_v58 = vpop.f32.mrf.mxu1 }
 0x899   : > { %v7095_v23 = vadd.f32 %v7094_v8, %v11765_v32  ;;  %v6428_v63 = vpop.f32.mrf.mxu2  ;;  %v6112_v50 = vadd.f32 %v14048_v35, %v5675_v62  ;;  %v14056_v8 = vld [vmem:[#allocation137_spill] sm:$0xff] }
 0x89a   : > { %v6429_v30 = vadd.f32 %v6428_v63, %v6108_v4  ;;  %6906 = vmatmul.f32.gmra.mxu3 %v14045_v13  ;;  %v14058_v13 = vld [vmem:[#allocation26_spill] sm:$0xff] }
 0x89b   : > { %v7376_v22 = vadd.f32 %v7375_v61, %v7095_v23  ;;  %7157 = vmatmul.f32.gmra.mxu0 %v14043_v48  ;;  %7442 = vmatmul.f32.gmra.mxu1 %v14046_v6  ;;  %v6116_v61 = vadd.f32 %v14052_v41, %v5683_v5 }
 0x89c   : > { %v12006_v49 = vadd.f32 %v6805_v21, %v6429_v30  ;;  %v14057_v30 = vand.u32 4294901760, %v11318_v16 }
 0x89d   : > { %v7591_v45 = vmax.f32 %v7376_v22, 0.0  ;;  %v6811_v12 = vpop.f32.mrf.mxu3 }
 0x89e   : > { %6512 = vmatmul.f32.gmra.mxu2 %v14044_v11 }
 0x89f   : > { %7655 = vst.msk [vmem:[%s11835_s18 + $0x68] sm:$0xff] %vm2737_vm2, %v7591_v45 }
 0x8a0   : > { %v7098_v51 = vpop.f32.mrf.mxu0  ;;  %v7383_v32 = vpop.f32.mrf.mxu1 }
 0x8a1   : > { %v7099_v57 = vadd.f32 %v7098_v51, %v11779_v26  ;;  %v6433_v54 = vpop.f32.mrf.mxu2 }
 0x8a2   : > { %v6434_v56 = vadd.f32 %v6433_v54, %v6112_v50  ;;  %6912 = vmatmul.f32.gmra.mxu3 %v14049_v25  ;;  %v14064_v25 = vld [vmem:[#allocation147_spill] sm:$0xff] }
 0x8a3   : > { %v7380_v55 = vadd.f32 %v7379_v58, %v7099_v57  ;;  %7161 = vmatmul.f32.gmra.mxu0 %v14046_v6  ;;  %7446 = vmatmul.f32.gmra.mxu1 %v14050_v38  ;;  %v14061_v57 = vld [vmem:[#allocation119_spill] sm:$0xff] }
 0x8a4   : > { %v12019_v18 = vadd.f32 %v6811_v12, %v6434_v56  ;;  %v14060_v12 = vld [vmem:[#allocation82_spill] sm:$0xff]  ;;  %v14062_v54 = vand.u32 4294901760, %v14061_v57  ;;  %v14063_v56 = vld [vmem:[#allocation25_spill] sm:$0xff] }
 0x8a5   : > { %v7592_v31 = vmax.f32 %v7380_v55, 0.0  ;;  %v6817_v27 = vpop.f32.mrf.mxu3 }
 0x8a6   : > { %6517 = vmatmul.f32.gmra.mxu2 %v11276_v2  ;;  %v14055_v2 = vld [vmem:[#allocation85_spill] sm:$0xff] }
 0x8a7   : > { %7656 = vst.msk [vmem:[%s11835_s18 + $0x70] sm:$0xff] %vm2737_vm2, %v7592_v31  ;;  %v5691_v44 = vadd.f32 %v11541_v15, %v14055_v2 }
 0x8a8   : > { %v7102_v26 = vpop.f32.mrf.mxu0  ;;  %v7387_v53 = vpop.f32.mrf.mxu1 }
 0x8a9   : > { %v7103_v20 = vadd.f32 %v7102_v26, %v11793_v52  ;;  %v6438_v1 = vpop.f32.mrf.mxu2  ;;  %v6120_v58 = vadd.f32 %v14056_v8, %v5691_v44  ;;  %v14071_v8 = vld [vmem:[#allocation45_spill] sm:$0xff] }
 0x8aa   : > { %v6439_v29 = vadd.f32 %v6438_v1, %v6116_v61  ;;  %6918 = vmatmul.f32.gmra.mxu3 %v14053_v40  ;;  %v14067_v1 = vld [vmem:[#allocation158_spill] sm:$0xff] }
 0x8ab   : > { %v7384_v9 = vadd.f32 %v7383_v32, %v7103_v20  ;;  %7165 = vmatmul.f32.gmra.mxu0 %v14050_v38  ;;  %7450 = vmatmul.f32.gmra.mxu1 %v14054_v33 }
 0x8ac   : > { %v12032_v48 = vadd.f32 %v6817_v27, %v6439_v29  ;;  %v14065_v27 = vld [vmem:[#allocation69_spill] sm:$0xff]  ;;  %v14068_v29 = vand.u32 4294901760, %v14067_v1 }
 0x8ad   : > { %v7593_v7 = vmax.f32 %v7384_v9, 0.0  ;;  %v6823_v24 = vpop.f32.mrf.mxu3  ;;  %v14069_v9 = vld [vmem:[#allocation32_spill] sm:$0xff] }
 0x8ae   : > { %6522 = vmatmul.f32.gmra.mxu2 %v11297_v59  ;;  %v14059_v59 = vld [vmem:[#allocation115_spill] sm:$0xff] }
 0x8af   : > { %7657 = vst.msk [vmem:[%s11835_s18 + $0x78] sm:$0xff] %vm2737_vm2, %v7593_v7  ;;  %v5699_v22 = vadd.f32 %v11541_v15, %v14059_v59  ;;  %v14074_v59 = vld [vmem:[#allocation151_spill] sm:$0xff] }
 0x8b0   : > { %v7106_v52 = vpop.f32.mrf.mxu0  ;;  %v7391_v21 = vpop.f32.mrf.mxu1 }
 0x8b1   : > { %v7107_v4 = vadd.f32 %v7106_v52, %v11807_v39  ;;  %v6443_v23 = vpop.f32.mrf.mxu2  ;;  %v6124_v51 = vadd.f32 %v14060_v12, %v5699_v22  ;;  %v14075_v22 = vld [vmem:[#allocation88_spill] sm:$0xff]  ;;  %v14076_v12 = vld [vmem:[#allocation118_spill] sm:$0xff] }
 0x8b2   : > { %v6444_v63 = vadd.f32 %v6443_v23, %v6120_v58  ;;  %6924 = vmatmul.f32.gmra.mxu3 %v14057_v30  ;;  %v14072_v30 = vld [vmem:[#allocation159_spill] sm:$0xff] }
 0x8b3   : > { %v7388_v11 = vadd.f32 %v7387_v53, %v7107_v4  ;;  %7169 = vmatmul.f32.gmra.mxu0 %v14054_v33  ;;  %7454 = vmatmul.f32.gmra.mxu1 %v14058_v13  ;;  %v14066_v53 = vld [vmem:[#allocation3_spill] sm:$0xff]  ;;  %v14070_v33 = vld [vmem:[#allocation136_spill] sm:$0xff] }
 0x8b4   : > { %v12045_v6 = vadd.f32 %v6823_v24, %v6444_v63 }
 0x8b5   : > { %v7594_v47 = vmax.f32 %v7388_v11, 0.0  ;;  %v6829_v62 = vpop.f32.mrf.mxu3  ;;  %v14073_v11 = vand.u32 4294901760, %v14072_v30 }
 0x8b6   : > { %6527 = vmatmul.f32.gmra.mxu2 %v11318_v16  ;;  %v12059_v16 = vld [vmem:[%s12409_s6] ss:$0 sm:$0xff] }
 0x8b7   : > { %7658 = vst.msk [vmem:[%s11835_s18 + $0x80] sm:$0xff] %vm2737_vm2, %v7594_v47  ;;  %v5707_v55 = vadd.f32 %v12059_v16, %v14064_v25  ;;  %v5715_v2 = vadd.f32 %v12059_v16, %v14070_v33  ;;  %v5723_v47 = vadd.f32 %v12059_v16, %v14075_v22  ;;  %v14079_v25 = vld [vmem:[#allocation35_spill] sm:$0xff] }
 0x8b8   : > { %v7110_v39 = vpop.f32.mrf.mxu0  ;;  %v7395_v45 = vpop.f32.mrf.mxu1 }
 0x8b9   : > { %v7111_v32 = vadd.f32 %v7110_v39, %v11819_v17  ;;  %v6448_v35 = vpop.f32.mrf.mxu2  ;;  %v6128_v26 = vadd.f32 %v14065_v27, %v5707_v55  ;;  %v6132_v58 = vadd.f32 %v14071_v8, %v5715_v2  ;;  %v14080_v55 = vld [vmem:[#allocation76_spill] sm:$0xff]  ;;  %v14081_v27 = vld [vmem:[#allocation125_spill] sm:$0xff] }
 0x8ba   : > { %v6449_v50 = vadd.f32 %v6448_v35, %v6124_v51  ;;  %6930 = vmatmul.f32.gmra.mxu3 %v14062_v54  ;;  %v6136_v51 = vadd.f32 %v14076_v12, %v5723_v47  ;;  %v14077_v54 = vld [vmem:[#allocation160_spill] sm:$0xff] }
 0x8bb   : > { %v7392_v15 = vadd.f32 %v7391_v21, %v7111_v32  ;;  %7173 = vmatmul.f32.gmra.mxu0 %v14058_v13  ;;  %7458 = vmatmul.f32.gmra.mxu1 %v14063_v56 }
 0x8bc   : > { %v12063_v38 = vadd.f32 %v6829_v62, %v6449_v50 }
 0x8bd   : > { %v7595_v17 = vmax.f32 %v7392_v15, 0.0  ;;  %v6835_v46 = vpop.f32.mrf.mxu3  ;;  %v14078_v15 = vand.u32 4294901760, %v14077_v54 }
 0x8be   : > { %6532 = vmatmul.f32.gmra.mxu2 %v14061_v57 }
 0x8bf   : > { %7659 = vst.msk [vmem:[%s11835_s18 + $0x88] sm:$0xff] %vm2737_vm2, %v7595_v17  ;;  %v5731_v17 = vadd.f32 %v12059_v16, %v14080_v55 }
 0x8c0   : > { %v7114_v5 = vpop.f32.mrf.mxu0  ;;  %v7399_v31 = vpop.f32.mrf.mxu1 }
 0x8c1   : > { %v7115_v41 = vadd.f32 %v7114_v5, %v14066_v53  ;;  %v6453_v61 = vpop.f32.mrf.mxu2 }
 0x8c2   : > { %v6454_v20 = vadd.f32 %v6453_v61, %v6128_v26  ;;  %6936 = vmatmul.f32.gmra.mxu3 %v14068_v29  ;;  %v6140_v26 = vadd.f32 %v14081_v27, %v5731_v17  ;;  %v14099_v27 = vld [vmem:[#allocation44_spill] sm:$0xff] }
 0x8c3   : > { %v7396_v40 = vadd.f32 %v7395_v45, %v7115_v41  ;;  %7177 = vmatmul.f32.gmra.mxu0 %v14063_v56  ;;  %7462 = vmatmul.f32.gmra.mxu1 %v14069_v9 }
 0x8c4   : > { %v12076_v44 = vadd.f32 %v6835_v46, %v6454_v20  ;;  %v14082_v20 = vld [vmem:[#allocation43_spill] sm:$0xff] }
 0x8c5   : > { %v7596_v7 = vmax.f32 %v7396_v40, 0.0  ;;  %v6841_v24 = vpop.f32.mrf.mxu3 }
 0x8c6   : > { %6537 = vmatmul.f32.gmra.mxu2 %v14067_v1  ;;  %v14083_v1 = vand.u32 4294901760, %v14082_v20 }
 0x8c7   : > { %7660 = vst.msk [vmem:[%s11835_s18 + $0x90] sm:$0xff] %vm2737_vm2, %v7596_v7 }
 0x8c8   : > { %v7118_v52 = vpop.f32.mrf.mxu0  ;;  %v7403_v21 = vpop.f32.mrf.mxu1 }
 0x8c9   : > { %v7119_v4 = vadd.f32 %v7118_v52, %v11850_v28  ;;  %v6458_v23 = vpop.f32.mrf.mxu2  ;;  %v14085_v52 = vld [vmem:[#allocation56_spill] sm:$0xff] }
 0x8ca   : > { %v6459_v63 = vadd.f32 %v6458_v23, %v6132_v58  ;;  %6942 = vmatmul.f32.gmra.mxu3 %v14073_v11  ;;  %v14087_v58 = vld [vmem:[#allocation47_spill] sm:$0xff]  ;;  %v14088_v11 = vld [vmem:[#allocation142_spill] sm:$0xff] }
 0x8cb   : > { %v7400_v13 = vadd.f32 %v7399_v31, %v7119_v4  ;;  %7181 = vmatmul.f32.gmra.mxu0 %v14069_v9  ;;  %7466 = vmatmul.f32.gmra.mxu1 %v14074_v59  ;;  %v14084_v9 = vld [vmem:[#allocation154_spill] sm:$0xff] }
 0x8cc   : > { %v12089_v62 = vadd.f32 %v6841_v24, %v6459_v63 }
 0x8cd   : > { %v7597_v39 = vmax.f32 %v7400_v13, 0.0  ;;  %v6847_v32 = vpop.f32.mrf.mxu3 }
 0x8ce   : > { %6542 = vmatmul.f32.gmra.mxu2 %v14072_v30 }
 0x8cf   : > { %7661 = vst.msk [vmem:[%s11835_s18 + $0x98] sm:$0xff] %vm2737_vm2, %v7597_v39 }
 0x8d0   : > { %v7122_v28 = vpop.f32.mrf.mxu0  ;;  %v7407_v45 = vpop.f32.mrf.mxu1 }
 0x8d1   : > { %v7123_v35 = vadd.f32 %v7122_v28, %v11863_v34  ;;  %v6463_v50 = vpop.f32.mrf.mxu2 }
 0x8d2   : > { %v6464_v57 = vadd.f32 %v6463_v50, %v6136_v51  ;;  %6948 = vmatmul.f32.gmra.mxu3 %v14078_v15  ;;  %v14093_v51 = vld [vmem:[#allocation65_spill] sm:$0xff] }
 0x8d3   : > { %v7404_v56 = vadd.f32 %v7403_v21, %v7123_v35  ;;  %7185 = vmatmul.f32.gmra.mxu0 %v14074_v59  ;;  %7470 = vmatmul.f32.gmra.mxu1 %v14079_v25  ;;  %v14086_v21 = vand.u32 4294901760, %v14085_v52  ;;  %v14090_v59 = vld [vmem:[#allocation155_spill] sm:$0xff] }
 0x8d4   : > { %v12102_v46 = vadd.f32 %v6847_v32, %v6464_v57 }
 0x8d5   : > { %v7598_v5 = vmax.f32 %v7404_v56, 0.0  ;;  %v6853_v29 = vpop.f32.mrf.mxu3  ;;  %v14096_v56 = vld [vmem:[#allocation123_spill] sm:$0xff] }
 0x8d6   : > { %6547 = vmatmul.f32.gmra.mxu2 %v14077_v54  ;;  %v14094_v54 = vld [vmem:[#allocation163_spill] sm:$0xff] }
 0x8d7   : > { %7662 = vst.msk [vmem:[%s11835_s18 + $0xa0] sm:$0xff] %vm2737_vm2, %v7598_v5 }
 0x8d8   : > { %v7126_v34 = vpop.f32.mrf.mxu0  ;;  %v7411_v31 = vpop.f32.mrf.mxu1 }
 0x8d9   : > { %v7127_v53 = vadd.f32 %v7126_v34, %v11876_v42  ;;  %v6468_v41 = vpop.f32.mrf.mxu2  ;;  %v14097_v34 = vld [vmem:[#allocation165_spill] sm:$0xff] }
 0x8da   : > { %v6469_v61 = vadd.f32 %v6468_v41, %v6140_v26  ;;  %6954 = vmatmul.f32.gmra.mxu3 %v14083_v1 }
 0x8db   : > { %v7408_v40 = vadd.f32 %v7407_v45, %v7127_v53  ;;  %7189 = vmatmul.f32.gmra.mxu0 %v14079_v25  ;;  %7474 = vmatmul.f32.gmra.mxu1 %v14084_v9  ;;  %v14091_v45 = vld [vmem:[#allocation161_spill] sm:$0xff] }
 0x8dc   : > { %v12113_v33 = vadd.f32 %v6853_v29, %v6469_v61  ;;  %v14102_v29 = vld [vmem:[#allocation55_spill] sm:$0xff] }
 0x8dd   : > { %v7599_v2 = vmax.f32 %v7408_v40, 0.0 }
 0x8de   : > { %6552 = vmatmul.f32.gmra.mxu2 %v14082_v20  ;;  %v14100_v20 = vld [vmem:[#allocation166_spill] sm:$0xff] }
 0x8df   : > { %7663 = vst.msk [vmem:[%s11835_s18 + $0xa8] sm:$0xff] %vm2737_vm2, %v7599_v2 }
 0x8e0   : > { %v7130_v42 = vpop.f32.mrf.mxu0  ;;  %v7415_v7 = vpop.f32.mrf.mxu1 }
 0x8e1   : > { %v7131_v24 = vadd.f32 %v7130_v42, %v11889_v37  ;;  %v14089_v37 = vand.u32 4294901760, %v14088_v11 }
 0x8e2   : > { %6960 = vmatmul.f32.gmra.mxu3 %v14086_v21 }
 0x8e3   : > { %v7412_v8 = vadd.f32 %v7411_v31, %v7131_v24  ;;  %7193 = vmatmul.f32.gmra.mxu0 %v14084_v9  ;;  %7478 = vmatmul.f32.gmra.mxu1 %v14087_v58 }
 0x8e5   : > { %v7600_v4 = vmax.f32 %v7412_v8, 0.0 }
 0x8e6   : > { %6557 = vmatmul.f32.gmra.mxu2 %v14085_v52  ;;  %v14105_v52 = vld [vmem:[#allocation51_spill] sm:$0xff] }
 0x8e7   : > { %7664 = vst.msk [vmem:[%s11835_s18 + $0xb0] sm:$0xff] %vm2737_vm2, %v7600_v4 }
 0x8e8   : > { %v7134_v23 = vpop.f32.mrf.mxu0  ;;  %v7419_v63 = vpop.f32.mrf.mxu1 }
 0x8e9   : > { %v7135_v30 = vadd.f32 %v7134_v23, %v11902_v19  ;;  %v14092_v19 = vand.u32 4294901760, %v14091_v45 }
 0x8ea   : > { %6966 = vmatmul.f32.gmra.mxu3 %v14089_v37 }
 0x8eb   : > { %v7416_v13 = vadd.f32 %v7415_v7, %v7135_v30  ;;  %7197 = vmatmul.f32.gmra.mxu0 %v14087_v58  ;;  %7482 = vmatmul.f32.gmra.mxu1 %v14090_v59 }
 0x8ed   : > { %v7601_v22 = vmax.f32 %v7416_v13, 0.0 }
 0x8ee   : > { %6562 = vmatmul.f32.gmra.mxu2 %v14088_v11 }
 0x8ef   : > { %7665 = vst.msk [vmem:[%s11835_s18 + $0xb8] sm:$0xff] %vm2737_vm2, %v7601_v22 }
 0x8f0   : > { %v7138_v47 = vpop.f32.mrf.mxu0  ;;  %v7423_v39 = vpop.f32.mrf.mxu1 }
 0x8f1   : > { %v7139_v28 = vadd.f32 %v7138_v47, %v11915_v43  ;;  %v14095_v43 = vand.u32 4294901760, %v14094_v54 }
 0x8f2   : > { %6972 = vmatmul.f32.gmra.mxu3 %v14092_v19 }
 0x8f3   : > { %v7420_v12 = vadd.f32 %v7419_v63, %v7139_v28  ;;  %7201 = vmatmul.f32.gmra.mxu0 %v14090_v59  ;;  %7486 = vmatmul.f32.gmra.mxu1 %v14093_v51  ;;  %v14107_v59 = vld [vmem:[#allocation62_spill] sm:$0xff] }
 0x8f5   : > { %v7602_v32 = vmax.f32 %v7420_v12, 0.0 }
 0x8f6   : > { %6567 = vmatmul.f32.gmra.mxu2 %v14091_v45  ;;  %v14108_v45 = vld [vmem:[#allocation156_spill] sm:$0xff] }
 0x8f7   : > { %7666 = vst.msk [vmem:[%s11835_s18 + $0xc0] sm:$0xff] %vm2737_vm2, %v7602_v32 }
 0x8f8   : > { %v7142_v35 = vpop.f32.mrf.mxu0  ;;  %v7427_v50 = vpop.f32.mrf.mxu1 }
 0x8f9   : > { %v7143_v57 = vadd.f32 %v7142_v35, %v11928_v60  ;;  %v14098_v60 = vand.u32 4294901760, %v14097_v34  ;;  %v14109_v35 = vld [vmem:[#allocation103_spill] sm:$0xff] }
 0x8fa   : > { %6978 = vmatmul.f32.gmra.mxu3 %v14095_v43 }
 0x8fb   : > { %v7424_v15 = vadd.f32 %v7423_v39, %v7143_v57  ;;  %7205 = vmatmul.f32.gmra.mxu0 %v14093_v51  ;;  %7490 = vmatmul.f32.gmra.mxu1 %v14096_v56 }
 0x8fd   : > { %v7603_v25 = vmax.f32 %v7424_v15, 0.0 }
 0x8fe   : > { %6572 = vmatmul.f32.gmra.mxu2 %v14094_v54  ;;  %v6473_v54 = vpop.f32.mrf.mxu2 }
 0x8ff   : > { %7667 = vst.msk [vmem:[%s11835_s18 + $0xc8] sm:$0xff] %vm2737_vm2, %v7603_v25  ;;  %v12197_v25 = vpop.f32.mrf.mxu3 }
 0x900   : > { %v7146_v55 = vpop.f32.mrf.mxu0  ;;  %v7431_v17 = vpop.f32.mrf.mxu1 }
 0x901   : > { %v7147_v5 = vadd.f32 %v7146_v55, %v11941_v0  ;;  %v14101_v0 = vand.u32 4294901760, %v14100_v20 }
 0x902   : > { %6984 = vmatmul.f32.gmra.mxu3 %v14098_v60 }
 0x903   : > { %v7428_v31 = vadd.f32 %v7427_v50, %v7147_v5  ;;  %7209 = vmatmul.f32.gmra.mxu0 %v14096_v56  ;;  %7494 = vmatmul.f32.gmra.mxu1 %v14099_v27  ;;  %v14110_v56 = vld [vmem:[#allocation96_spill] sm:$0xff] }
 0x905   : > { %v7604_v26 = vmax.f32 %v7428_v31, 0.0 }
 0x906   : > { %6577 = vmatmul.f32.gmra.mxu2 %v14097_v34  ;;  %v12202_v34 = vpop.f32.mrf.mxu2 }
 0x907   : > { %7668 = vst.msk [vmem:[%s11835_s18 + $0xd0] sm:$0xff] %vm2737_vm2, %v7604_v26 }
 0x908   : > { %v7150_v53 = vpop.f32.mrf.mxu0  ;;  %v7435_v41 = vpop.f32.mrf.mxu1 }
 0x909   : > { %v7151_v61 = vadd.f32 %v7150_v53, %v11954_v3  ;;  %v14103_v3 = vld [vmem:[#allocation91_spill] sm:$0xff]  ;;  %v12208_v53 = vpop.f32.mrf.mxu3 }
 0x90a   : > { %6990 = vmatmul.f32.gmra.mxu3 %v14101_v0  ;;  %v14104_v7 = vand.u32 4294901760, %v14103_v3 }
 0x90b   : > { %v7432_v1 = vadd.f32 %v7431_v17, %v7151_v61  ;;  %7213 = vmatmul.f32.gmra.mxu0 %v14099_v27  ;;  %7498 = vmatmul.f32.gmra.mxu1 %v14102_v29 }
 0x90d   : > { %v7605_v40 = vmax.f32 %v7432_v1, 0.0 }
 0x90e   : > { %6582 = vmatmul.f32.gmra.mxu2 %v14100_v20  ;;  %v12213_v20 = vpop.f32.mrf.mxu2 }
 0x90f   : > { %7669 = vst.msk [vmem:[%s11835_s18 + $0xd8] sm:$0xff] %vm2737_vm2, %v7605_v40 }
 0x910   : > { %v7154_v9 = vpop.f32.mrf.mxu0  ;;  %v7439_v2 = vpop.f32.mrf.mxu1 }
 0x911   : > { %v7155_v42 = vadd.f32 %v7154_v9, %v11967_v36  ;;  %v14106_v36 = vld [vmem:[#allocation75_spill] sm:$0xff]  ;;  %v12218_v9 = vpop.f32.mrf.mxu3 }
 0x912   : > { %6996 = vmatmul.f32.gmra.mxu3 %v14104_v7 }
 0x913   : > { %v7436_v24 = vadd.f32 %v7435_v41, %v7155_v42  ;;  %7217 = vmatmul.f32.gmra.mxu0 %v14102_v29  ;;  %7502 = vmatmul.f32.gmra.mxu1 %v14105_v52 }
 0x915   : > { %v7606_v21 = vmax.f32 %v7436_v24, 0.0 }
 0x916   : > { %6587 = vmatmul.f32.gmra.mxu2 %v14103_v3  ;;  %v12222_v3 = vpop.f32.mrf.mxu2 }
 0x917   : > { %7670 = vst.msk [vmem:[%s11835_s18 + $0xe0] sm:$0xff] %vm2737_vm2, %v7606_v21 }
 0x918   : > { %v7158_v8 = vpop.f32.mrf.mxu0  ;;  %v7443_v58 = vpop.f32.mrf.mxu1 }
 0x919   : > { %v7159_v4 = vadd.f32 %v7158_v8, %v11980_v10  ;;  %v12229_v8 = vpop.f32.mrf.mxu3 }
 0x91b   : > { %v7440_v23 = vadd.f32 %v7439_v2, %v7159_v4  ;;  %7221 = vmatmul.f32.gmra.mxu0 %v14105_v52  ;;  %7506 = vmatmul.f32.gmra.mxu1 %v14106_v36 }
 0x91d   : > { %v7607_v63 = vmax.f32 %v7440_v23, 0.0 }
 0x91f   : > { %7671 = vst.msk [vmem:[%s11835_s18 + $0xe8] sm:$0xff] %vm2737_vm2, %v7607_v63 }
 0x920   : > { %v7162_v30 = vpop.f32.mrf.mxu0  ;;  %v7447_v11 = vpop.f32.mrf.mxu1 }
 0x921   : > { %v7163_v37 = vadd.f32 %v7162_v30, %v11993_v14 }
 0x923   : > { %v7444_v13 = vadd.f32 %v7443_v58, %v7163_v37  ;;  %7225 = vmatmul.f32.gmra.mxu0 %v14106_v36  ;;  %7510 = vmatmul.f32.gmra.mxu1 %v14107_v59  ;;  %v12233_v36 = vpop.f32.mrf.mxu2 }
 0x925   : > { %v7608_v22 = vmax.f32 %v7444_v13, 0.0 }
 0x927   : > { %7672 = vst.msk [vmem:[%s11835_s18 + $0xf0] sm:$0xff] %vm2737_vm2, %v7608_v22 }
 0x928   : > { %v7166_v10 = vpop.f32.mrf.mxu0  ;;  %v7451_v47 = vpop.f32.mrf.mxu1 }
 0x929   : > { %v7167_v39 = vadd.f32 %v7166_v10, %v12006_v49 }
 0x92b   : > { %v7448_v28 = vadd.f32 %v7447_v11, %v7167_v39  ;;  %7229 = vmatmul.f32.gmra.mxu0 %v14107_v59  ;;  %7514 = vmatmul.f32.gmra.mxu1 %v14108_v45  ;;  %v14116_v11 = vld [vmem:[#allocation72_spill] sm:$0xff]  ;;  %v12240_v59 = vpop.f32.mrf.mxu3 }
 0x92c   : > { %v5739_v37 = vadd.f32 %v12059_v16, %v14116_v11  ;;  %v14129_v11 = vld [vmem:[#allocation162_spill] sm:$0xff] }
 0x92d   : > { %v7609_v19 = vmax.f32 %v7448_v28, 0.0 }
 0x92f   : > { %7673 = vst.msk [vmem:[%s11835_s18 + $0xf8] sm:$0xff] %vm2737_vm2, %v7609_v19 }
 0x930   : > { %v7170_v14 = vpop.f32.mrf.mxu0  ;;  %v7455_v12 = vpop.f32.mrf.mxu1 }
 0x931   : > { %v7171_v51 = vadd.f32 %v7170_v14, %v12019_v18  ;;  %v14118_v14 = vld [vmem:[#allocation40_spill] sm:$0xff] }
 0x933   : > { %v7452_v32 = vadd.f32 %v7451_v47, %v7171_v51  ;;  %7233 = vmatmul.f32.gmra.mxu0 %v14108_v45  ;;  %7518 = vmatmul.f32.gmra.mxu1 %v14109_v35  ;;  %v14117_v47 = vld [vmem:[#allocation38_spill] sm:$0xff]  ;;  %v12246_v45 = vpop.f32.mrf.mxu2 }
 0x934   : > { %v6144_v39 = vadd.f32 %v14117_v47, %v5739_v37  ;;  %v14130_v47 = vld [vmem:[#allocation143_spill] sm:$0xff] }
 0x935   : > { %v7610_v50 = vmax.f32 %v7452_v32, 0.0 }
 0x936   : > { %v6474_v28 = vadd.f32 %v6473_v54, %v6144_v39  ;;  %v12256_v54 = vpop.f32.mrf.mxu3  ;;  %v14131_v39 = vld [vmem:[#allocation79_spill] sm:$0xff] }
 0x937   : > { %7674 = vst.msk [vmem:[%s11835_s18 + $0x100] sm:$0xff] %vm2737_vm2, %v7610_v50 }
 0x938   : > { %v7174_v49 = vpop.f32.mrf.mxu0  ;;  %v7459_v57 = vpop.f32.mrf.mxu1 }
 0x939   : > { %v7175_v43 = vadd.f32 %v7174_v49, %v12032_v48  ;;  %v14111_v48 = vld [vmem:[#allocation99_spill] sm:$0xff] }
 0x93b   : > { %v7456_v15 = vadd.f32 %v7455_v12, %v7175_v43  ;;  %7237 = vmatmul.f32.gmra.mxu0 %v14109_v35  ;;  %7522 = vmatmul.f32.gmra.mxu1 %v14110_v56  ;;  %v14119_v12 = vld [vmem:[#allocation146_spill] sm:$0xff]  ;;  %v6860_v35 = vadd.f32 %v12197_v25, %v6474_v28 }
 0x93c   : > { %v5747_v51 = vadd.f32 %v12059_v16, %v14119_v12 }
 0x93d   : > { %v7611_v18 = vmax.f32 %v7456_v15, 0.0 }
 0x93f   : > { %7675 = vst.msk [vmem:[%s11835_s18 + $0x108] sm:$0xff] %vm2737_vm2, %v7611_v18  ;;  %v14121_v18 = vld [vmem:[#allocation132_spill] sm:$0xff] }
 0x940   : > { %v7178_v55 = vpop.f32.mrf.mxu0  ;;  %v7463_v17 = vpop.f32.mrf.mxu1 }
 0x941   : > { %v7179_v5 = vadd.f32 %v7178_v55, %v12045_v6  ;;  %v14112_v6 = vld [vmem:[#allocation127_spill] sm:$0xff]  ;;  %v14122_v55 = vld [vmem:[#allocation52_spill] sm:$0xff] }
 0x943   : > { %v7460_v60 = vadd.f32 %v7459_v57, %v7179_v5  ;;  %7241 = vmatmul.f32.gmra.mxu0 %v14110_v56  ;;  %7526 = vmatmul.f32.gmra.mxu1 %v14111_v48  ;;  %v12263_v5 = vpop.f32.mrf.mxu2 }
 0x945   : > { %v7612_v31 = vmax.f32 %v7460_v60, 0.0 }
 0x947   : > { %7676 = vst.msk [vmem:[%s11835_s18 + $0x110] sm:$0xff] %vm2737_vm2, %v7612_v31 }
 0x948   : > { %v7182_v27 = vpop.f32.mrf.mxu0  ;;  %v7467_v26 = vpop.f32.mrf.mxu1 }
 0x949   : > { %v7183_v41 = vadd.f32 %v7182_v27, %v12063_v38  ;;  %v14113_v38 = vld [vmem:[#allocation116_spill] sm:$0xff]  ;;  %v14123_v27 = vld [vmem:[#allocation138_spill] sm:$0xff] }
 0x94b   : > { %v7464_v61 = vadd.f32 %v7463_v17, %v7183_v41  ;;  %7245 = vmatmul.f32.gmra.mxu0 %v14111_v48  ;;  %7530 = vmatmul.f32.gmra.mxu1 %v14112_v6  ;;  %v5755_v17 = vadd.f32 %v12059_v16, %v14122_v55  ;;  %v14135_v55 = vld [vmem:[#allocation153_spill] sm:$0xff] }
 0x94d   : > { %v7613_v0 = vmax.f32 %v7464_v61, 0.0  ;;  %v6895_v61 = vpop.f32.mrf.mxu3 }
 0x94f   : > { %7677 = vst.msk [vmem:[%s11835_s18 + $0x118] sm:$0xff] %vm2737_vm2, %v7613_v0  ;;  %v14124_v0 = vld [vmem:[#allocation134_spill] sm:$0xff] }
 0x950   : > { %v7186_v1 = vpop.f32.mrf.mxu0  ;;  %v7471_v29 = vpop.f32.mrf.mxu1 }
 0x951   : > { %v7187_v40 = vadd.f32 %v7186_v1, %v12076_v44  ;;  %v14114_v44 = vld [vmem:[#allocation129_spill] sm:$0xff]  ;;  %v14125_v1 = vld [vmem:[#allocation95_spill] sm:$0xff] }
 0x953   : > { %v7468_v2 = vadd.f32 %v7467_v26, %v7187_v40  ;;  %7249 = vmatmul.f32.gmra.mxu0 %v14112_v6  ;;  %7534 = vmatmul.f32.gmra.mxu1 %v14113_v38 }
 0x955   : > { %v7614_v42 = vmax.f32 %v7468_v2, 0.0  ;;  %v6508_v2 = vpop.f32.mrf.mxu2 }
 0x957   : > { %7678 = vst.msk [vmem:[%s11835_s18 + $0x120] sm:$0xff] %vm2737_vm2, %v7614_v42 }
 0x958   : > { %v7190_v7 = vpop.f32.mrf.mxu0  ;;  %v7475_v24 = vpop.f32.mrf.mxu1 }
 0x959   : > { %v7191_v52 = vadd.f32 %v7190_v7, %v12089_v62  ;;  %v14115_v62 = vld [vmem:[#allocation130_spill] sm:$0xff]  ;;  %v14126_v7 = vld [vmem:[#allocation141_spill] sm:$0xff] }
 0x95b   : > { %v7472_v21 = vadd.f32 %v7471_v29, %v7191_v52  ;;  %7253 = vmatmul.f32.gmra.mxu0 %v14113_v38  ;;  %7538 = vmatmul.f32.gmra.mxu1 %v14114_v44  ;;  %v5763_v29 = vadd.f32 %v12059_v16, %v14125_v1  ;;  %v14138_v1 = vld [vmem:[#allocation167_spill] sm:$0xff] }
 0x95d   : > { %v7615_v58 = vmax.f32 %v7472_v21, 0.0 }
 0x95f   : > { %7679 = vst.msk [vmem:[%s11835_s18 + $0x128] sm:$0xff] %vm2737_vm2, %v7615_v58  ;;  %v14128_v58 = vld [vmem:[#allocation83_spill] sm:$0xff] }
 0x960   : > { %v7194_v4 = vpop.f32.mrf.mxu0  ;;  %v7479_v23 = vpop.f32.mrf.mxu1 }
 0x961   : > { %v7195_v63 = vadd.f32 %v7194_v4, %v12102_v46  ;;  %v5771_v4 = vadd.f32 %v12059_v16, %v14128_v58  ;;  %v14141_v58 = vld [vmem:[#allocation168_spill] sm:$0xff] }
 0x963   : > { %v7476_v30 = vadd.f32 %v7475_v24, %v7195_v63  ;;  %7257 = vmatmul.f32.gmra.mxu0 %v14114_v44  ;;  %7542 = vmatmul.f32.gmra.mxu1 %v14115_v62  ;;  %v14127_v44 = vld [vmem:[#allocation139_spill] sm:$0xff]  ;;  %v6160_v37 = vadd.f32 %v14129_v11, %v5771_v4 }
 0x965   : > { %v7616_v13 = vmax.f32 %v7476_v30, 0.0 }
 0x967   : > { %7680 = vst.msk [vmem:[%s11835_s18 + $0x130] sm:$0xff] %vm2737_vm2, %v7616_v13 }
 0x968   : > { %v7198_v22 = vpop.f32.mrf.mxu0  ;;  %v7483_v10 = vpop.f32.mrf.mxu1 }
 0x969   : > { %v7199_v46 = vadd.f32 %v7198_v22, %v12113_v33  ;;  %v14120_v33 = vld [vmem:[#allocation133_spill] sm:$0xff]  ;;  %v6494_v22 = vadd.f32 %v12233_v36, %v6160_v37 }
 0x96a   : > { %v6148_v57 = vadd.f32 %v14120_v33, %v5747_v51  ;;  %v14132_v51 = vld [vmem:[#allocation164_spill] sm:$0xff]  ;;  %v14133_v33 = vld [vmem:[#allocation145_spill] sm:$0xff] }
 0x96b   : > { %v7480_v19 = vadd.f32 %v7479_v23, %v7199_v46  ;;  %7261 = vmatmul.f32.gmra.mxu0 %v14115_v62  ;;  %7546 = vmatmul.f32.gmra.mxu1 %v14118_v14  ;;  %v6901_v23 = vpop.f32.mrf.mxu3  ;;  %v5779_v46 = vadd.f32 %v12059_v16, %v14131_v39 }
 0x96c   : > { %v6479_v15 = vadd.f32 %v12202_v34, %v6148_v57  ;;  %v6152_v34 = vadd.f32 %v14123_v27, %v5755_v17  ;;  %v14134_v57 = vld [vmem:[#allocation67_spill] sm:$0xff]  ;;  %v14137_v27 = vld [vmem:[#allocation53_spill] sm:$0xff] }
 0x96d   : > { %v7617_v32 = vmax.f32 %v7480_v19, 0.0 }
 0x96e   : > { %v6866_v60 = vadd.f32 %v12208_v53, %v6479_v15  ;;  %v6484_v41 = vadd.f32 %v12213_v20, %v6152_v34  ;;  %v6156_v20 = vadd.f32 %v14126_v7, %v5763_v29  ;;  %v5795_v34 = vadd.f32 %v12059_v16, %v14137_v27  ;;  %v14140_v7 = vld [vmem:[#allocation80_spill] sm:$0xff] }
 0x96f   : > { %7681 = vst.msk [vmem:[%s11835_s18 + $0x138] sm:$0xff] %vm2737_vm2, %v7617_v32  ;;  %v6164_v32 = vadd.f32 %v14132_v51, %v5779_v46 }
 0x970   : > { %v7202_v50 = vpop.f32.mrf.mxu0  ;;  %v7487_v49 = vpop.f32.mrf.mxu1  ;;  %v6872_v53 = vadd.f32 %v12218_v9, %v6484_v41  ;;  %v6489_v52 = vadd.f32 %v12222_v3, %v6156_v20  ;;  %v6172_v29 = vadd.f32 %v14138_v1, %v5795_v34  ;;  %v5803_v20 = vadd.f32 %v12059_v16, %v14140_v7  ;;  %v14148_v34 = vld [vmem:[#allocation70_spill] sm:$0xff]  ;;  %v14150_v7 = vld [vmem:[#allocation84_spill] sm:$0xff] }
 0x971   : > { %v7203_v43 = vadd.f32 %v7202_v50, %v6860_v35  ;;  %v6513_v3 = vpop.f32.mrf.mxu2  ;;  %v6499_v35 = vadd.f32 %v12246_v45, %v6164_v32 }
 0x972   : > { %v6878_v9 = vadd.f32 %v12229_v8, %v6489_v52  ;;  %v6884_v8 = vadd.f32 %v12240_v59, %v6494_v22  ;;  %v6176_v4 = vadd.f32 %v14141_v58, %v5803_v20  ;;  %v5843_v20 = vadd.f32 %v12059_v16, %v14150_v7  ;;  %v14151_v58 = vld [vmem:[#allocation102_spill] sm:$0xff]  ;;  %v14160_v7 = vld [vmem:[#allocation121_spill] sm:$0xff] }
 0x973   : > { %v7484_v56 = vadd.f32 %v7483_v10, %v7203_v43  ;;  %7265 = vmatmul.f32.gmra.mxu0 %v14118_v14  ;;  %7550 = vmatmul.f32.gmra.mxu1 %v14121_v18  ;;  %v6907_v19 = vpop.f32.mrf.mxu3  ;;  %v5787_v43 = vadd.f32 %v12059_v16, %v14134_v57  ;;  %v6890_v59 = vadd.f32 %v12256_v54, %v6499_v35 }
 0x975   : > { %v7618_v25 = vmax.f32 %v7484_v56, 0.0  ;;  %v6168_v17 = vadd.f32 %v14135_v55, %v5787_v43 }
 0x977   : > { %7682 = vst.msk [vmem:[%s11835_s18 + $0x140] sm:$0xff] %vm2737_vm2, %v7618_v25 }
 0x978   : > { %v7206_v48 = vpop.f32.mrf.mxu0  ;;  %v7491_v31 = vpop.f32.mrf.mxu1 }
 0x979   : > { %v7207_v26 = vadd.f32 %v7206_v48, %v6866_v60  ;;  %v6518_v50 = vpop.f32.mrf.mxu2  ;;  %v6504_v60 = vadd.f32 %v12263_v5, %v6168_v17  ;;  %v6509_v5 = vadd.f32 %v6508_v2, %v6172_v29  ;;  %v14149_v29 = vld [vmem:[#allocation71_spill] sm:$0xff] }
 0x97b   : > { %v7488_v6 = vadd.f32 %v7487_v49, %v7207_v26  ;;  %7269 = vmatmul.f32.gmra.mxu0 %v14121_v18  ;;  %7554 = vmatmul.f32.gmra.mxu1 %v14124_v0  ;;  %v6913_v45 = vpop.f32.mrf.mxu3  ;;  %v6896_v54 = vadd.f32 %v6895_v61, %v6504_v60  ;;  %v6902_v61 = vadd.f32 %v6901_v23, %v6509_v5 }
 0x97d   : > { %v7619_v40 = vmax.f32 %v7488_v6, 0.0 }
 0x97f   : > { %7683 = vst.msk [vmem:[%s11835_s18 + $0x148] sm:$0xff] %vm2737_vm2, %v7619_v40 }
 0x980   : > { %v7210_v38 = vpop.f32.mrf.mxu0  ;;  %v7495_v42 = vpop.f32.mrf.mxu1 }
 0x981   : > { %v7211_v24 = vadd.f32 %v7210_v38, %v6872_v53  ;;  %v6523_v26 = vpop.f32.mrf.mxu2 }
 0x983   : > { %v7492_v21 = vadd.f32 %v7491_v31, %v7211_v24  ;;  %7273 = vmatmul.f32.gmra.mxu0 %v14124_v0  ;;  %7558 = vmatmul.f32.gmra.mxu1 %v14127_v44  ;;  %v14136_v31 = vld [vmem:[#allocation149_spill] sm:$0xff]  ;;  %v6919_v53 = vpop.f32.mrf.mxu3 }
 0x985   : > { %v7620_v63 = vmax.f32 %v7492_v21, 0.0 }
 0x987   : > { %7684 = vst.msk [vmem:[%s11835_s18 + $0x150] sm:$0xff] %vm2737_vm2, %v7620_v63  ;;  %v6514_v63 = vadd.f32 %v6513_v3, %v6176_v4  ;;  %v6196_v4 = vadd.f32 %v14151_v58, %v5843_v20  ;;  %v5883_v20 = vadd.f32 %v12059_v16, %v14160_v7  ;;  %v14161_v58 = vld [vmem:[#allocation101_spill] sm:$0xff] }
 0x988   : > { %v7214_v30 = vpop.f32.mrf.mxu0  ;;  %v7499_v62 = vpop.f32.mrf.mxu1 }
 0x989   : > { %v7215_v13 = vadd.f32 %v7214_v30, %v6878_v9  ;;  %v6528_v52 = vpop.f32.mrf.mxu2  ;;  %v14142_v30 = vld [vmem:[#allocation108_spill] sm:$0xff] }
 0x98b   : > { %v7496_v10 = vadd.f32 %v7495_v42, %v7215_v13  ;;  %7277 = vmatmul.f32.gmra.mxu0 %v14127_v44  ;;  %7562 = vmatmul.f32.gmra.mxu1 %v14130_v47  ;;  %v14139_v42 = vld [vmem:[#allocation66_spill] sm:$0xff]  ;;  %v6925_v11 = vpop.f32.mrf.mxu3  ;;  %v6908_v13 = vadd.f32 %v6907_v19, %v6514_v63  ;;  %v14145_v19 = vld [vmem:[#allocation73_spill] sm:$0xff] }
 0x98d   : > { %v7621_v28 = vmax.f32 %v7496_v10, 0.0  ;;  %v14143_v10 = vld [vmem:[#allocation57_spill] sm:$0xff] }
 0x98f   : > { %7685 = vst.msk [vmem:[%s11835_s18 + $0x158] sm:$0xff] %vm2737_vm2, %v7621_v28 }
 0x990   : > { %v7218_v14 = vpop.f32.mrf.mxu0  ;;  %v7503_v12 = vpop.f32.mrf.mxu1 }
 0x991   : > { %v7219_v36 = vadd.f32 %v7218_v14, %v6884_v8  ;;  %v6533_v39 = vpop.f32.mrf.mxu2  ;;  %v14144_v8 = vld [vmem:[#allocation50_spill] sm:$0xff] }
 0x992   : > { %v5819_v14 = vadd.f32 %v12059_v16, %v14144_v8  ;;  %v14154_v8 = vld [vmem:[#allocation81_spill] sm:$0xff] }
 0x993   : > { %v7500_v49 = vadd.f32 %v7499_v62, %v7219_v36  ;;  %7281 = vmatmul.f32.gmra.mxu0 %v14130_v47  ;;  %7566 = vmatmul.f32.gmra.mxu1 %v14133_v33  ;;  %v5811_v62 = vadd.f32 %v12059_v16, %v14142_v30  ;;  %v6931_v51 = vpop.f32.mrf.mxu3  ;;  %v14152_v30 = vld [vmem:[#allocation110_spill] sm:$0xff] }
 0x995   : > { %v7622_v15 = vmax.f32 %v7500_v49, 0.0  ;;  %v6180_v47 = vadd.f32 %v14143_v10, %v5811_v62  ;;  %v6184_v49 = vadd.f32 %v14145_v19, %v5819_v14  ;;  %v5851_v62 = vadd.f32 %v12059_v16, %v14152_v30  ;;  %v14153_v10 = vld [vmem:[#allocation94_spill] sm:$0xff]  ;;  %v14155_v19 = vld [vmem:[#allocation93_spill] sm:$0xff]  ;;  %v14162_v30 = vld [vmem:[#allocation107_spill] sm:$0xff] }
 0x996   : > { %v5859_v14 = vadd.f32 %v12059_v16, %v14154_v8  ;;  %v14164_v8 = vld [vmem:[#allocation42_spill] sm:$0xff] }
 0x997   : > { %7686 = vst.msk [vmem:[%s11835_s18 + $0x160] sm:$0xff] %vm2737_vm2, %v7622_v15  ;;  %v6519_v28 = vadd.f32 %v6518_v50, %v6180_v47  ;;  %v6524_v57 = vadd.f32 %v6523_v26, %v6184_v49  ;;  %v14146_v50 = vld [vmem:[#allocation92_spill] sm:$0xff]  ;;  %v5835_v26 = vadd.f32 %v12059_v16, %v14148_v34  ;;  %v6200_v47 = vadd.f32 %v14153_v10, %v5851_v62  ;;  %v14158_v34 = vld [vmem:[#allocation90_spill] sm:$0xff] }
 0x998   : > { %v7222_v56 = vpop.f32.mrf.mxu0  ;;  %v7507_v18 = vpop.f32.mrf.mxu1  ;;  %v6204_v49 = vadd.f32 %v14155_v19, %v5859_v14  ;;  %v5891_v62 = vadd.f32 %v12059_v16, %v14162_v30  ;;  %v5899_v14 = vadd.f32 %v12059_v16, %v14164_v8 }
 0x999   : > { %v7223_v25 = vadd.f32 %v7222_v56, %v6890_v59  ;;  %v6914_v32 = vadd.f32 %v6913_v45, %v6519_v28  ;;  %v6538_v43 = vpop.f32.mrf.mxu2  ;;  %v5827_v59 = vadd.f32 %v12059_v16, %v14146_v50  ;;  %v14156_v50 = vld [vmem:[#allocation113_spill] sm:$0xff] }
 0x99a   : > { %v6539_v63 = vadd.f32 %v6538_v43, %v6196_v4  ;;  %v6216_v4 = vadd.f32 %v14161_v58, %v5883_v20 }
 0x99b   : > { %v7504_v48 = vadd.f32 %v7503_v12, %v7223_v25  ;;  %7285 = vmatmul.f32.gmra.mxu0 %v14133_v33  ;;  %7570 = vmatmul.f32.gmra.mxu1 %v14136_v31  ;;  %v14147_v25 = vld [vmem:[#allocation77_spill] sm:$0xff]  ;;  %v6937_v60 = vpop.f32.mrf.mxu3 }
 0x99c   : > { %v6188_v45 = vadd.f32 %v14147_v25, %v5827_v59  ;;  %v5867_v59 = vadd.f32 %v12059_v16, %v14156_v50  ;;  %v14157_v25 = vld [vmem:[#allocation100_spill] sm:$0xff]  ;;  %v14166_v50 = vld [vmem:[#allocation98_spill] sm:$0xff] }
 0x99d   : > { %v7623_v41 = vmax.f32 %v7504_v48, 0.0 }
 0x99f   : > { %7687 = vst.msk [vmem:[%s11835_s18 + $0x168] sm:$0xff] %vm2737_vm2, %v7623_v41 }
 0x9a0   : > { %v7226_v6 = vpop.f32.mrf.mxu0  ;;  %v7511_v0 = vpop.f32.mrf.mxu1 }
 0x9a1   : > { %v7227_v40 = vadd.f32 %v7226_v6, %v6896_v54  ;;  %v6543_v41 = vpop.f32.mrf.mxu2 }
 0x9a2   : > { %v6544_v28 = vadd.f32 %v6543_v41, %v6200_v47 }
 0x9a3   : > { %v7508_v38 = vadd.f32 %v7507_v18, %v7227_v40  ;;  %7289 = vmatmul.f32.gmra.mxu0 %v14136_v31  ;;  %7574 = vmatmul.f32.gmra.mxu1 %v14139_v42  ;;  %v6920_v18 = vadd.f32 %v6919_v53, %v6524_v57  ;;  %v6529_v31 = vadd.f32 %v6528_v52, %v6188_v45 }
 0x9a4   : > { %v6192_v40 = vadd.f32 %v14149_v29, %v5835_v26  ;;  %v6208_v45 = vadd.f32 %v14157_v25, %v5867_v59  ;;  %v5875_v26 = vadd.f32 %v12059_v16, %v14158_v34  ;;  %v14159_v29 = vld [vmem:[#allocation97_spill] sm:$0xff]  ;;  %v5907_v59 = vadd.f32 %v12059_v16, %v14166_v50 }
 0x9a5   : > { %v7624_v24 = vmax.f32 %v7508_v38, 0.0  ;;  %v6926_v6 = vadd.f32 %v6925_v11, %v6529_v31  ;;  %v6943_v38 = vpop.f32.mrf.mxu3 }
 0x9a6   : > { %v6534_v53 = vadd.f32 %v6533_v39, %v6192_v40  ;;  %v6212_v40 = vadd.f32 %v14159_v29, %v5875_v26 }
 0x9a7   : > { %7688 = vst.msk [vmem:[%s11835_s18 + $0x170] sm:$0xff] %vm2737_vm2, %v7624_v24 }
 0x9a8   : > { %v7230_v21 = vpop.f32.mrf.mxu0  ;;  %v7515_v44 = vpop.f32.mrf.mxu1 }
 0x9a9   : > { %v7231_v2 = vadd.f32 %v7230_v21, %v6902_v61  ;;  %v6548_v52 = vpop.f32.mrf.mxu2  ;;  %v6932_v61 = vadd.f32 %v6931_v51, %v6534_v53 }
 0x9aa   : > { %v6549_v57 = vadd.f32 %v6548_v52, %v6204_v49 }
 0x9ab   : > { %v7512_v9 = vadd.f32 %v7511_v0, %v7231_v2  ;;  %7293 = vmatmul.f32.gmra.mxu0 %v14139_v42 }
 0x9ad   : > { %v7625_v37 = vmax.f32 %v7512_v9, 0.0  ;;  %v6949_v11 = vpop.f32.mrf.mxu3 }
 0x9af   : > { %7689 = vst.msk [vmem:[%s11835_s18 + $0x178] sm:$0xff] %vm2737_vm2, %v7625_v37 }
 0x9b0   : > { %v7234_v22 = vpop.f32.mrf.mxu0  ;;  %v7519_v23 = vpop.f32.mrf.mxu1 }
 0x9b1   : > { %v7235_v46 = vadd.f32 %v7234_v22, %v6908_v13  ;;  %v6938_v13 = vadd.f32 %v6937_v60, %v6539_v63  ;;  %v6553_v39 = vpop.f32.mrf.mxu2 }
 0x9b2   : > { %v6554_v31 = vadd.f32 %v6553_v39, %v6208_v45 }
 0x9b3   : > { %v7516_v3 = vadd.f32 %v7515_v44, %v7235_v46 }
 0x9b5   : > { %v7626_v12 = vmax.f32 %v7516_v3, 0.0  ;;  %v6955_v51 = vpop.f32.mrf.mxu3 }
 0x9b7   : > { %7690 = vst.msk [vmem:[%s11835_s18 + $0x180] sm:$0xff] %vm2737_vm2, %v7626_v12 }
 0x9b8   : > { %v7238_v36 = vpop.f32.mrf.mxu0  ;;  %v7523_v35 = vpop.f32.mrf.mxu1 }
 0x9b9   : > { %v7239_v33 = vadd.f32 %v7238_v36, %v6914_v32  ;;  %v6944_v32 = vadd.f32 %v6943_v38, %v6544_v28  ;;  %v6558_v43 = vpop.f32.mrf.mxu2 }
 0x9ba   : > { %v6559_v53 = vadd.f32 %v6558_v43, %v6212_v40 }
 0x9bb   : > { %v7520_v15 = vadd.f32 %v7519_v23, %v7239_v33 }
 0x9bd   : > { %v7627_v56 = vmax.f32 %v7520_v15, 0.0 }
 0x9bf   : > { %7691 = vst.msk [vmem:[%s11835_s18 + $0x188] sm:$0xff] %vm2737_vm2, %v7627_v56 }
 0x9c0   : > { %v7242_v55 = vpop.f32.mrf.mxu0  ;;  %v7527_v17 = vpop.f32.mrf.mxu1 }
 0x9c1   : > { %v7243_v48 = vadd.f32 %v7242_v55, %v6920_v18  ;;  %v6950_v18 = vadd.f32 %v6949_v11, %v6549_v57  ;;  %v6563_v41 = vpop.f32.mrf.mxu2 }
 0x9c2   : > { %v6564_v63 = vadd.f32 %v6563_v41, %v6216_v4 }
 0x9c3   : > { %v7524_v27 = vadd.f32 %v7523_v35, %v7243_v48  ;;  %v6961_v48 = vpop.f32.mrf.mxu3 }
 0x9c5   : > { %v7628_v54 = vmax.f32 %v7524_v27, 0.0 }
 0x9c7   : > { %7692 = vst.msk [vmem:[%s11835_s18 + $0x190] sm:$0xff] %vm2737_vm2, %v7628_v54 }
 0x9c8   : > { %v7246_v0 = vpop.f32.mrf.mxu0  ;;  %v7531_v1 = vpop.f32.mrf.mxu1 }
 0x9c9   : > { %v7247_v5 = vadd.f32 %v7246_v0, %v6926_v6  ;;  %v6956_v6 = vadd.f32 %v6955_v51, %v6554_v31  ;;  %v6568_v52 = vpop.f32.mrf.mxu2 }
 0x9cb   : > { %v7528_v42 = vadd.f32 %v7527_v17, %v7247_v5 }
 0x9cd   : > { %v7629_v24 = vmax.f32 %v7528_v42, 0.0  ;;  %v6967_v42 = vpop.f32.mrf.mxu3 }
 0x9cf   : > { %7693 = vst.msk [vmem:[%s11835_s18 + $0x198] sm:$0xff] %vm2737_vm2, %v7629_v24 }
 0x9d0   : > { %v7250_v21 = vpop.f32.mrf.mxu0  ;;  %v7535_v44 = vpop.f32.mrf.mxu1 }
 0x9d1   : > { %v7251_v2 = vadd.f32 %v7250_v21, %v6932_v61  ;;  %v6962_v61 = vadd.f32 %v6961_v48, %v6559_v53  ;;  %v6573_v47 = vpop.f32.mrf.mxu2 }
 0x9d3   : > { %v7532_v9 = vadd.f32 %v7531_v1, %v7251_v2 }
 0x9d5   : > { %v7630_v37 = vmax.f32 %v7532_v9, 0.0 }
 0x9d7   : > { %7694 = vst.msk [vmem:[%s11835_s18 + $0x1a0] sm:$0xff] %vm2737_vm2, %v7630_v37  ;;  %v6973_v37 = vpop.f32.mrf.mxu3 }
 0x9d8   : > { %v7254_v22 = vpop.f32.mrf.mxu0  ;;  %v7539_v23 = vpop.f32.mrf.mxu1 }
 0x9d9   : > { %v7255_v46 = vadd.f32 %v7254_v22, %v6938_v13  ;;  %v6968_v13 = vadd.f32 %v6967_v42, %v6564_v63  ;;  %v6578_v57 = vpop.f32.mrf.mxu2  ;;  %v14170_v42 = vld [vmem:[#allocation111_spill] sm:$0xff] }
 0x9da   : > { %v5923_v7 = vadd.f32 %v12059_v16, %v14170_v42 }
 0x9db   : > { %v7536_v3 = vadd.f32 %v7535_v44, %v7255_v46 }
 0x9dd   : > { %v7631_v12 = vmax.f32 %v7536_v3, 0.0 }
 0x9df   : > { %7695 = vst.msk [vmem:[%s11835_s18 + $0x1a8] sm:$0xff] %vm2737_vm2, %v7631_v12 }
 0x9e0   : > { %v7258_v36 = vpop.f32.mrf.mxu0  ;;  %v7543_v35 = vpop.f32.mrf.mxu1 }
 0x9e1   : > { %v7259_v33 = vadd.f32 %v7258_v36, %v6944_v32  ;;  %v6979_v32 = vpop.f32.mrf.mxu3  ;;  %v6583_v26 = vpop.f32.mrf.mxu2 }
 0x9e3   : > { %v7540_v15 = vadd.f32 %v7539_v23, %v7259_v33  ;;  %v14163_v23 = vld [vmem:[#allocation109_spill] sm:$0xff] }
 0x9e4   : > { %v6220_v10 = vadd.f32 %v14163_v23, %v5891_v62 }
 0x9e5   : > { %v7632_v56 = vmax.f32 %v7540_v15, 0.0 }
 0x9e6   : > { %v6569_v28 = vadd.f32 %v6568_v52, %v6220_v10 }
 0x9e7   : > { %7696 = vst.msk [vmem:[%s11835_s18 + $0x1b0] sm:$0xff] %vm2737_vm2, %v7632_v56 }
 0x9e8   : > { %v7262_v55 = vpop.f32.mrf.mxu0  ;;  %v7547_v17 = vpop.f32.mrf.mxu1  ;;  %v6974_v51 = vadd.f32 %v6973_v37, %v6569_v28 }
 0x9e9   : > { %v7263_v60 = vadd.f32 %v7262_v55, %v6950_v18 }
 0x9eb   : > { %v7544_v27 = vadd.f32 %v7543_v35, %v7263_v60  ;;  %v14165_v35 = vld [vmem:[#allocation114_spill] sm:$0xff]  ;;  %v6985_v60 = vpop.f32.mrf.mxu3 }
 0x9ec   : > { %v6224_v19 = vadd.f32 %v14165_v35, %v5899_v14 }
 0x9ed   : > { %v7633_v54 = vmax.f32 %v7544_v27, 0.0  ;;  %v14168_v27 = vld [vmem:[#allocation128_spill] sm:$0xff] }
 0x9ee   : > { %v6574_v33 = vadd.f32 %v6573_v47, %v6224_v19  ;;  %v5915_v34 = vadd.f32 %v12059_v16, %v14168_v27 }
 0x9ef   : > { %7697 = vst.msk [vmem:[%s11835_s18 + $0x1b8] sm:$0xff] %vm2737_vm2, %v7633_v54 }
 0x9f0   : > { %v7266_v0 = vpop.f32.mrf.mxu0  ;;  %v7551_v1 = vpop.f32.mrf.mxu1  ;;  %v6980_v18 = vadd.f32 %v6979_v32, %v6574_v33 }
 0x9f1   : > { %v7267_v5 = vadd.f32 %v7266_v0, %v6956_v6 }
 0x9f3   : > { %v7548_v38 = vadd.f32 %v7547_v17, %v7267_v5  ;;  %v14167_v17 = vld [vmem:[#allocation112_spill] sm:$0xff] }
 0x9f4   : > { %v6228_v25 = vadd.f32 %v14167_v17, %v5907_v59 }
 0x9f5   : > { %v7634_v24 = vmax.f32 %v7548_v38, 0.0  ;;  %v6991_v38 = vpop.f32.mrf.mxu3 }
 0x9f6   : > { %v6579_v48 = vadd.f32 %v6578_v57, %v6228_v25 }
 0x9f7   : > { %7698 = vst.msk [vmem:[%s11835_s18 + $0x1c0] sm:$0xff] %vm2737_vm2, %v7634_v24  ;;  %v6588_v24 = vpop.f32.mrf.mxu2 }
 0x9f8   : > { %v7270_v21 = vpop.f32.mrf.mxu0  ;;  %v7555_v44 = vpop.f32.mrf.mxu1  ;;  %v6986_v6 = vadd.f32 %v6985_v60, %v6579_v48 }
 0x9f9   : > { %v7271_v2 = vadd.f32 %v7270_v21, %v6962_v61 }
 0x9fb   : > { %v7552_v9 = vadd.f32 %v7551_v1, %v7271_v2  ;;  %v14169_v1 = vld [vmem:[#allocation126_spill] sm:$0xff] }
 0x9fc   : > { %v6232_v29 = vadd.f32 %v14169_v1, %v5915_v34 }
 0x9fd   : > { %v7635_v11 = vmax.f32 %v7552_v9, 0.0  ;;  %v6997_v30 = vpop.f32.mrf.mxu3 }
 0x9fe   : > { %v6584_v5 = vadd.f32 %v6583_v26, %v6232_v29 }
 0x9ff   : > { %7699 = vst.msk [vmem:[%s11835_s18 + $0x1c8] sm:$0xff] %vm2737_vm2, %v7635_v11 }
 0xa00   : > { %v7274_v22 = vpop.f32.mrf.mxu0  ;;  %v7559_v46 = vpop.f32.mrf.mxu1  ;;  %v6992_v52 = vadd.f32 %v6991_v38, %v6584_v5 }
 0xa01   : > { %v7275_v39 = vadd.f32 %v7274_v22, %v6968_v13 }
 0xa03   : > { %v7556_v3 = vadd.f32 %v7555_v44, %v7275_v39  ;;  %v14171_v44 = vld [vmem:[#allocation122_spill] sm:$0xff] }
 0xa04   : > { %v6236_v58 = vadd.f32 %v14171_v44, %v5923_v7 }
 0xa05   : > { %v7636_v12 = vmax.f32 %v7556_v3, 0.0 }
 0xa06   : > { %v6589_v2 = vadd.f32 %v6588_v24, %v6236_v58 }
 0xa07   : > { %7700 = vst.msk [vmem:[%s11835_s18 + $0x1d0] sm:$0xff] %vm2737_vm2, %v7636_v12 }
 0xa08   : > { %v7278_v36 = vpop.f32.mrf.mxu0  ;;  %v7563_v15 = vpop.f32.mrf.mxu1  ;;  %v6998_v62 = vadd.f32 %v6997_v30, %v6589_v2 }
 0xa09   : > { %v7279_v49 = vadd.f32 %v7278_v36, %v6974_v51 }
 0xa0b   : > { %v7560_v43 = vadd.f32 %v7559_v46, %v7279_v49 }
 0xa0d   : > { %v7637_v56 = vmax.f32 %v7560_v43, 0.0 }
 0xa0f   : > { %7701 = vst.msk [vmem:[%s11835_s18 + $0x1d8] sm:$0xff] %vm2737_vm2, %v7637_v56 }
 0xa10   : > { %v7282_v55 = vpop.f32.mrf.mxu0  ;;  %v7567_v54 = vpop.f32.mrf.mxu1 }
 0xa11   : > { %v7283_v45 = vadd.f32 %v7282_v55, %v6980_v18 }
 0xa13   : > { %v7564_v31 = vadd.f32 %v7563_v15, %v7283_v45 }
 0xa15   : > { %v7638_v41 = vmax.f32 %v7564_v31, 0.0 }
 0xa17   : > { %7702 = vst.msk [vmem:[%s11835_s18 + $0x1e0] sm:$0xff] %vm2737_vm2, %v7638_v41 }
 0xa18   : > { %v7286_v0 = vpop.f32.mrf.mxu0  ;;  %v7571_v61 = vpop.f32.mrf.mxu1 }
 0xa19   : > { %v7287_v40 = vadd.f32 %v7286_v0, %v6986_v6 }
 0xa1b   : > { %v7568_v53 = vadd.f32 %v7567_v54, %v7287_v40 }
 0xa1d   : > { %v7639_v20 = vmax.f32 %v7568_v53, 0.0 }
 0xa1f   : > { %7703 = vst.msk [vmem:[%s11835_s18 + $0x1e8] sm:$0xff] %vm2737_vm2, %v7639_v20 }
 0xa20   : > { %v7290_v21 = vpop.f32.mrf.mxu0  ;;  %v7575_v37 = vpop.f32.mrf.mxu1 }
 0xa21   : > { %v7291_v4 = vadd.f32 %v7290_v21, %v6992_v52 }
 0xa23   : > { %v7572_v63 = vadd.f32 %v7571_v61, %v7291_v4 }
 0xa25   : > { %v7640_v9 = vmax.f32 %v7572_v63, 0.0 }
 0xa27   : > { %7704 = vst.msk [vmem:[%s11835_s18 + $0x1f0] sm:$0xff] %vm2737_vm2, %v7640_v9 }
 0xa28   : > { %v7294_v11 = vpop.f32.mrf.mxu0 }
 0xa29   : > { %v7295_v16 = vadd.f32 %v7294_v11, %v6998_v62 }
 0xa2b   : > { %v7576_v13 = vadd.f32 %v7575_v37, %v7295_v16 }
 0xa2d   : > { %v7641_v22 = vmax.f32 %v7576_v13, 0.0 }
 0xa2f   : > { %7705 = vst.msk [vmem:[%s11835_s18 + $0x1f8] sm:$0xff] %vm2737_vm2, %v7641_v22 }
 0xa30 PF: > { %s17_s24 = sadd.s32 1, %s7798_s24  }
 0xa31   : > { %p14_p4 = scmp.ge.s32.totalorder %s17_s24, 4  }
 0xa33   :  { %16 = sbr.rel (!%p14_p4) target bundleno = 1 (0x1), region = 78 }

</bundles_post_ra>
